<compile_context>
chip_gen: v7x
topology: tpu7x:2x2x1
jax: 0.10.0
libtpu: 0.0.40
codegen_flags: <defaults>
</compile_context>

<pallas_src>
import functools

import jax
import jax.numpy as jnp
from jax.experimental import pallas as pl
from jax.experimental.pallas import tpu as pltpu  # noqa: F401 (memory spaces, if needed)


def atgru_cell_kernel(x_ref, state_ref, emb_ref, nv1_ref, nv2_ref,
                      wg_ref, bg_ref, wu_ref, bu_ref, h_ref,
                      *, batch, cheb_k, hidden_dim):
    f32 = jnp.float32
    B, K, H = batch, cheb_k, hidden_dim
    mxu_dt = wg_ref.dtype            # bf16 (or f32) MXU operands, f32 accumulation

    x = x_ref[...]                   # (R, dim_in)  rows are (b, n), b-major
    state = state_ref[...]           # (R, H)
    emb = emb_ref[...]               # (R, D)       node embeddings, tiled over batch
    R = x.shape[0]
    N = R // B
    D = emb.shape[1]

    # ---- adaptive adjacency, built once: softmax(relu(nv1 @ nv2), axis=1) ----
    a = jnp.dot(nv1_ref[...], nv2_ref[...], preferred_element_type=f32)
    a = jnp.maximum(a, 0.0)
    a = a - jnp.max(a, axis=1, keepdims=True)
    ea = jnp.exp(a)
    supports = ea / jnp.sum(ea, axis=1, keepdims=True)           # (N, N)

    def s_apply(v):
        # Apply S to every batch block of the row-stacked (R, C) tensor.
        return jnp.concatenate(
            [jnp.dot(supports, v[b * N:(b + 1) * N, :],
                     preferred_element_type=f32) for b in range(B)], axis=0)

    def cheb_apply(v):
        # [T_0 v, ..., T_{K-1} v] via the Chebyshev recurrence applied directly to v.
        # T_0 v = v (no identity matmul); T_k never materialized.
        outs = [v]
        if K >= 2:
            outs.append(s_apply(v))
        for _ in range(2, K):
            outs.append(2.0 * s_apply(outs[-1]) - outs[-2])
        return outs

    def agcn(sx_list, ss_list, w_ref, bpool_ref):
        # xg columns: [T_0 x .. T_{K-1} x | T_0 s .. T_{K-1} s]            (R, K*Ci)
        xg = jnp.concatenate(sx_list + ss_list, axis=-1)
        # Fold the embed dim into the contraction:
        #   xge[:, d*K*Ci + f] = emb[:, d] * xg[:, f]                      (R, D*K*Ci)
        xge = jnp.concatenate([emb[:, d:d + 1] * xg for d in range(D)], axis=-1)
        out = jnp.dot(xge.astype(mxu_dt), w_ref[...],
                      preferred_element_type=f32)                         # (R, O) MXU
        bias = jnp.dot(emb, bpool_ref[...], preferred_element_type=f32)   # (R, O)
        return out + bias

    sx = cheb_apply(x)               # S_k @ x, shared between gate and update
    ss = cheb_apply(state)

    zr = jax.nn.sigmoid(agcn(sx, ss, wg_ref, bg_ref))                     # (R, 2H)
    z = zr[:, :H]
    r = zr[:, H:]

    szs = cheb_apply(z * state)
    hc = jnp.tanh(agcn(sx, szs, wu_ref, bu_ref))                          # (R, H)

    h_ref[...] = (r * state + (1.0 - r) * hc).astype(h_ref.dtype)


def atgru_cell(x, state, node_embeddings, nodevec1, nodevec2, params, *,
               cheb_k, hidden_dim, embed_dim, matmul_dtype=jnp.bfloat16):
    del embed_dim  # derived from node_embeddings inside the kernel
    B, N, dim_in = x.shape
    H = hidden_dim
    f32 = jnp.float32

    def prep_w(wpool):
        # (D, K, Ci, O) -> rows ordered d-major, then [x-part (k,i_x) | state-part (k,i_s)]
        # to match the in-kernel xge column layout (x columns shared across gate/update).
        D, K, Ci, O = wpool.shape
        w_x = wpool[:, :, :dim_in, :].reshape(D, K * dim_in, O)
        w_s = wpool[:, :, dim_in:, :].reshape(D, K * (Ci - dim_in), O)
        w = jnp.concatenate([w_x, w_s], axis=1)          # (D, K*Ci, O)
        return w.reshape(D * K * Ci, O).astype(matmul_dtype)

    wg = prep_w(params["gate_w"])                        # (D*K*Ci, 2H)
    wu = prep_w(params["update_w"])                      # (D*K*Ci, H)
    bg = params["gate_b"].astype(f32)                    # (D, 2H)
    bu = params["update_b"].astype(f32)                  # (D, H)

    x_flat = x.reshape(B * N, dim_in).astype(f32)        # rows (b, n), b-major
    state_flat = state.reshape(B * N, H).astype(f32)
    emb_rep = jnp.tile(node_embeddings.astype(f32), (B, 1))    # (B*N, D)

    kernel = functools.partial(atgru_cell_kernel, batch=B,
                               cheb_k=cheb_k, hidden_dim=H)

    inputs = (x_flat, state_flat, emb_rep,
              nodevec1.astype(f32), nodevec2.astype(f32), wg, bg, wu, bu)

    def full_spec(a):
        # full-array block, everything resident in VMEM (single grid step)
        return pl.BlockSpec(a.shape, lambda i: (0, 0))

    h_flat = pl.pallas_call(
        kernel,
        out_shape=jax.ShapeDtypeStruct((B * N, H), f32),
        grid=(1,),
        in_specs=[full_spec(a) for a in inputs],
        out_specs=pl.BlockSpec((B * N, H), lambda i: (0, 0)),
    )(*inputs)
    return h_flat.reshape(B, N, H)


# ----------------------- pure-JAX reference (for checking) -----------------------
def _agcn_ref(x, emb, nv1, nv2, wpool, bpool, cheb_k):
    N = emb.shape[0]
    supports = jax.nn.softmax(jax.nn.relu(nv1 @ nv2), axis=1)
    s = [jnp.eye(N, dtype=x.dtype), supports]
    for _ in range(2, cheb_k):
        s.append(2.0 * supports @ s[-1] - s[-2])
    supports = jnp.stack(s, 0)
    weights = jnp.einsum('nd,dkio->nkio', emb, wpool)
    bias = emb @ bpool
    x_g = jnp.einsum('knm,bmc->bknc', supports, x)
    x_g = jnp.transpose(x_g, (0, 2, 1, 3))
    return jnp.einsum('bnki,nkio->bno', x_g, weights) + bias


def _atgru_ref(x, state, emb, nv1, nv2, params, cheb_k, H):
    xs = jnp.concatenate([x, state], axis=-1)
    zr = jax.nn.sigmoid(
        _agcn_ref(xs, emb, nv1, nv2, params["gate_w"], params["gate_b"], cheb_k))
    z, r = zr[..., :H], zr[..., H:]
    cand = jnp.concatenate([x, z * state], axis=-1)
    hc = jnp.tanh(
        _agcn_ref(cand, emb, nv1, nv2, params["update_w"], params["update_b"], cheb_k))
    return r * state + (1.0 - r) * hc


if __name__ == "__main__":
    jax.config.update("jax_default_matmul_precision", "highest")

    # small, module-consistent shapes
    B, N, dim_in, H = 2, 16, 4, 32          # batch, nodes, input dim, hidden dim
    cheb_k, D, D_adapt = 3, 8, 10           # Chebyshev order, embed dim, adaptive-adj dim
    Ci = dim_in + H

    key = jax.random.PRNGKey(0)
    ks = jax.random.split(key, 9)
    x = jax.random.normal(ks[0], (B, N, dim_in), jnp.float32)
    state = jax.random.normal(ks[1], (B, N, H), jnp.float32)
    emb = jax.random.normal(ks[2], (N, D), jnp.float32)
    nv1 = jax.random.normal(ks[3], (N, D_adapt), jnp.float32)
    nv2 = jax.random.normal(ks[4], (D_adapt, N), jnp.float32)

    params = {
        "gate_w":   0.1 * jax.random.normal(ks[5], (D, cheb_k, Ci, 2 * H), jnp.float32),
        "gate_b":   0.1 * jax.random.normal(ks[6], (D, 2 * H), jnp.float32),
        "update_w": 0.1 * jax.random.normal(ks[7], (D, cheb_k, Ci, H), jnp.float32),
        "update_b": 0.1 * jax.random.normal(ks[8], (D, H), jnp.float32),
    }

    h_ref = _atgru_ref(x, state, emb, nv1, nv2, params, cheb_k, H)

    # 1) f32 MXU path: tight structural check.
    h32 = jax.block_until_ready(
        atgru_cell(x, state, emb, nv1, nv2, params, cheb_k=cheb_k,
                   hidden_dim=H, embed_dim=D, matmul_dtype=jnp.float32))
    assert h32.shape == (B, N, H)
    err32 = float(jnp.max(jnp.abs(h32 - h_ref)))
    assert jnp.allclose(h32, h_ref, rtol=1e-3, atol=1e-3), f"f32 max abs err {err32}"

    # 2) default path: bf16 MXU operands / f32 accumulation (looser tolerance).
    h = jax.block_until_ready(
        atgru_cell(x, state, emb, nv1, nv2, params, cheb_k=cheb_k,
                   hidden_dim=H, embed_dim=D))
    assert h.shape == (B, N, H)
    err16 = float(jnp.max(jnp.abs(h - h_ref)))
    assert jnp.allclose(h, h_ref, rtol=2e-2, atol=3e-2), f"bf16 max abs err {err16}"

    print("KERNEL_OK")
</pallas_src>

<mosaic_0001>
module attributes {stable_mosaic.version = 11 : i64} {
  func.func @atgru_cell_kernel(%arg0: i32, %arg1: memref<32x4xf32, #tpu.memory_space<vmem>>, %arg2: memref<32x32xf32, #tpu.memory_space<vmem>>, %arg3: memref<32x8xf32, #tpu.memory_space<vmem>>, %arg4: memref<16x10xf32, #tpu.memory_space<vmem>>, %arg5: memref<10x16xf32, #tpu.memory_space<vmem>>, %arg6: memref<864x64xf32, #tpu.memory_space<vmem>>, %arg7: memref<8x64xf32, #tpu.memory_space<vmem>>, %arg8: memref<864x32xf32, #tpu.memory_space<vmem>>, %arg9: memref<8x32xf32, #tpu.memory_space<vmem>>, %arg10: memref<32x32xf32, #tpu.memory_space<vmem>>) attributes {dimension_semantics = [#tpu.dimension_semantics<arbitrary>], iteration_bounds = array<i64: 1>, scalar_prefetch = 0 : i64, scratch_operands = 0 : i64, tpu.core_type = #tpu.core_type<tc>, window_params = [{pipeline_mode = #tpu.pipeline_mode<synchronous>, transform_indices = @transform_0, window_bounds = array<i64: 32, 4>}, {pipeline_mode = #tpu.pipeline_mode<synchronous>, transform_indices = @transform_1, window_bounds = array<i64: 32, 32>}, {pipeline_mode = #tpu.pipeline_mode<synchronous>, transform_indices = @transform_2, window_bounds = array<i64: 32, 8>}, {pipeline_mode = #tpu.pipeline_mode<synchronous>, transform_indices = @transform_3, window_bounds = array<i64: 16, 10>}, {pipeline_mode = #tpu.pipeline_mode<synchronous>, transform_indices = @transform_4, window_bounds = array<i64: 10, 16>}, {pipeline_mode = #tpu.pipeline_mode<synchronous>, transform_indices = @transform_5, window_bounds = array<i64: 864, 64>}, {pipeline_mode = #tpu.pipeline_mode<synchronous>, transform_indices = @transform_6, window_bounds = array<i64: 8, 64>}, {pipeline_mode = #tpu.pipeline_mode<synchronous>, transform_indices = @transform_7, window_bounds = array<i64: 864, 32>}, {pipeline_mode = #tpu.pipeline_mode<synchronous>, transform_indices = @transform_8, window_bounds = array<i64: 8, 32>}, {pipeline_mode = #tpu.pipeline_mode<synchronous>, transform_indices = @transform_9, window_bounds = array<i64: 32, 32>}]} {
    %c0 = arith.constant 0 : index
    %c0_0 = arith.constant 0 : index
    %0 = vector.load %arg1[%c0, %c0_0] : memref<32x4xf32, #tpu.memory_space<vmem>>, vector<32x4xf32>
    %c0_1 = arith.constant 0 : index
    %c0_2 = arith.constant 0 : index
    %1 = vector.load %arg2[%c0_1, %c0_2] : memref<32x32xf32, #tpu.memory_space<vmem>>, vector<32x32xf32>
    %c0_3 = arith.constant 0 : index
    %c0_4 = arith.constant 0 : index
    %2 = vector.load %arg3[%c0_3, %c0_4] : memref<32x8xf32, #tpu.memory_space<vmem>>, vector<32x8xf32>
    %c0_5 = arith.constant 0 : index
    %c0_6 = arith.constant 0 : index
    %3 = vector.load %arg4[%c0_5, %c0_6] : memref<16x10xf32, #tpu.memory_space<vmem>>, vector<16x10xf32>
    %c0_7 = arith.constant 0 : index
    %c0_8 = arith.constant 0 : index
    %4 = vector.load %arg5[%c0_7, %c0_8] : memref<10x16xf32, #tpu.memory_space<vmem>>, vector<10x16xf32>
    %cst = arith.constant dense<0.000000e+00> : vector<16x16xf32>
    %5 = tpu.matmul %3, %4, %cst {dimension_numbers = #tpu.dot_dimension_numbers<[1], [0], [0], [1], [0, 0, 1, 1], [], []>, precision = #tpu.contract_precision<fp32>} : vector<16x10xf32>, vector<10x16xf32>, vector<16x16xf32> -> vector<16x16xf32>
    %cst_9 = arith.constant 0.000000e+00 : f32
    %6 = vector.broadcast %cst_9 : f32 to vector<16x16xf32>
    %7 = arith.maximumf %5, %6 : vector<16x16xf32>
    %cst_10 = arith.constant dense<0xFF800000> : vector<16xf32>
    %8 = vector.multi_reduction <maximumf>, %7, %cst_10 [1] : vector<16x16xf32> to vector<16xf32>
    %9 = vector.shape_cast %8 : vector<16xf32> to vector<16x1xf32>
    %10 = vector.broadcast %9 : vector<16x1xf32> to vector<16x16xf32>
    %11 = arith.subf %7, %10 : vector<16x16xf32>
    %12 = math.exp %11 : vector<16x16xf32>
    %cst_11 = arith.constant dense<0.000000e+00> : vector<16xf32>
    %13 = vector.multi_reduction <add>, %12, %cst_11 [1] : vector<16x16xf32> to vector<16xf32>
    %14 = vector.shape_cast %13 : vector<16xf32> to vector<16x1xf32>
    %15 = vector.broadcast %14 : vector<16x1xf32> to vector<16x16xf32>
    %16 = arith.divf %12, %15 : vector<16x16xf32>
    %17 = vector.extract_strided_slice %0 {offsets = [0, 0], sizes = [16, 4], strides = [1, 1]} : vector<32x4xf32> to vector<16x4xf32>
    %cst_12 = arith.constant dense<0.000000e+00> : vector<16x4xf32>
    %18 = tpu.matmul %16, %17, %cst_12 {dimension_numbers = #tpu.dot_dimension_numbers<[1], [0], [0], [1], [0, 0, 1, 1], [], []>, precision = #tpu.contract_precision<fp32>} : vector<16x16xf32>, vector<16x4xf32>, vector<16x4xf32> -> vector<16x4xf32>
    %19 = vector.extract_strided_slice %0 {offsets = [16, 0], sizes = [16, 4], strides = [1, 1]} : vector<32x4xf32> to vector<16x4xf32>
    %cst_13 = arith.constant dense<0.000000e+00> : vector<16x4xf32>
    %20 = tpu.matmul %16, %19, %cst_13 {dimension_numbers = #tpu.dot_dimension_numbers<[1], [0], [0], [1], [0, 0, 1, 1], [], []>, precision = #tpu.contract_precision<fp32>} : vector<16x16xf32>, vector<16x4xf32>, vector<16x4xf32> -> vector<16x4xf32>
    %21 = tpu.concatenate %18, %20 in 0 : vector<16x4xf32>, vector<16x4xf32> -> vector<32x4xf32>
    %22 = vector.extract_strided_slice %21 {offsets = [0, 0], sizes = [16, 4], strides = [1, 1]} : vector<32x4xf32> to vector<16x4xf32>
    %cst_14 = arith.constant dense<0.000000e+00> : vector<16x4xf32>
    %23 = tpu.matmul %16, %22, %cst_14 {dimension_numbers = #tpu.dot_dimension_numbers<[1], [0], [0], [1], [0, 0, 1, 1], [], []>, precision = #tpu.contract_precision<fp32>} : vector<16x16xf32>, vector<16x4xf32>, vector<16x4xf32> -> vector<16x4xf32>
    %24 = vector.extract_strided_slice %21 {offsets = [16, 0], sizes = [16, 4], strides = [1, 1]} : vector<32x4xf32> to vector<16x4xf32>
    %cst_15 = arith.constant dense<0.000000e+00> : vector<16x4xf32>
    %25 = tpu.matmul %16, %24, %cst_15 {dimension_numbers = #tpu.dot_dimension_numbers<[1], [0], [0], [1], [0, 0, 1, 1], [], []>, precision = #tpu.contract_precision<fp32>} : vector<16x16xf32>, vector<16x4xf32>, vector<16x4xf32> -> vector<16x4xf32>
    %26 = tpu.concatenate %23, %25 in 0 : vector<16x4xf32>, vector<16x4xf32> -> vector<32x4xf32>
    %cst_16 = arith.constant 2.000000e+00 : f32
    %27 = vector.broadcast %cst_16 : f32 to vector<32x4xf32>
    %28 = arith.mulf %27, %26 : vector<32x4xf32>
    %29 = arith.subf %28, %0 : vector<32x4xf32>
    %30 = vector.extract_strided_slice %1 {offsets = [0, 0], sizes = [16, 32], strides = [1, 1]} : vector<32x32xf32> to vector<16x32xf32>
    %cst_17 = arith.constant dense<0.000000e+00> : vector<16x32xf32>
    %31 = tpu.matmul %16, %30, %cst_17 {dimension_numbers = #tpu.dot_dimension_numbers<[1], [0], [0], [1], [0, 0, 1, 1], [], []>, precision = #tpu.contract_precision<fp32>} : vector<16x16xf32>, vector<16x32xf32>, vector<16x32xf32> -> vector<16x32xf32>
    %32 = vector.extract_strided_slice %1 {offsets = [16, 0], sizes = [16, 32], strides = [1, 1]} : vector<32x32xf32> to vector<16x32xf32>
    %cst_18 = arith.constant dense<0.000000e+00> : vector<16x32xf32>
    %33 = tpu.matmul %16, %32, %cst_18 {dimension_numbers = #tpu.dot_dimension_numbers<[1], [0], [0], [1], [0, 0, 1, 1], [], []>, precision = #tpu.contract_precision<fp32>} : vector<16x16xf32>, vector<16x32xf32>, vector<16x32xf32> -> vector<16x32xf32>
    %34 = tpu.concatenate %31, %33 in 0 : vector<16x32xf32>, vector<16x32xf32> -> vector<32x32xf32>
    %35 = vector.extract_strided_slice %34 {offsets = [0, 0], sizes = [16, 32], strides = [1, 1]} : vector<32x32xf32> to vector<16x32xf32>
    %cst_19 = arith.constant dense<0.000000e+00> : vector<16x32xf32>
    %36 = tpu.matmul %16, %35, %cst_19 {dimension_numbers = #tpu.dot_dimension_numbers<[1], [0], [0], [1], [0, 0, 1, 1], [], []>, precision = #tpu.contract_precision<fp32>} : vector<16x16xf32>, vector<16x32xf32>, vector<16x32xf32> -> vector<16x32xf32>
    %37 = vector.extract_strided_slice %34 {offsets = [16, 0], sizes = [16, 32], strides = [1, 1]} : vector<32x32xf32> to vector<16x32xf32>
    %cst_20 = arith.constant dense<0.000000e+00> : vector<16x32xf32>
    %38 = tpu.matmul %16, %37, %cst_20 {dimension_numbers = #tpu.dot_dimension_numbers<[1], [0], [0], [1], [0, 0, 1, 1], [], []>, precision = #tpu.contract_precision<fp32>} : vector<16x16xf32>, vector<16x32xf32>, vector<16x32xf32> -> vector<16x32xf32>
    %39 = tpu.concatenate %36, %38 in 0 : vector<16x32xf32>, vector<16x32xf32> -> vector<32x32xf32>
    %cst_21 = arith.constant 2.000000e+00 : f32
    %40 = vector.broadcast %cst_21 : f32 to vector<32x32xf32>
    %41 = arith.mulf %40, %39 : vector<32x32xf32>
    %42 = arith.subf %41, %1 : vector<32x32xf32>
    %43 = tpu.concatenate %0, %21, %29, %1, %34, %42 in 1 : vector<32x4xf32>, vector<32x4xf32>, vector<32x4xf32>, vector<32x32xf32>, vector<32x32xf32>, vector<32x32xf32> -> vector<32x108xf32>
    %44 = vector.extract_strided_slice %2 {offsets = [0, 0], sizes = [32, 1], strides = [1, 1]} : vector<32x8xf32> to vector<32x1xf32>
    %45 = vector.broadcast %44 : vector<32x1xf32> to vector<32x108xf32>
    %46 = arith.mulf %45, %43 : vector<32x108xf32>
    %47 = vector.extract_strided_slice %2 {offsets = [0, 1], sizes = [32, 1], strides = [1, 1]} : vector<32x8xf32> to vector<32x1xf32>
    %48 = vector.broadcast %47 : vector<32x1xf32> to vector<32x108xf32>
    %49 = arith.mulf %48, %43 : vector<32x108xf32>
    %50 = vector.extract_strided_slice %2 {offsets = [0, 2], sizes = [32, 1], strides = [1, 1]} : vector<32x8xf32> to vector<32x1xf32>
    %51 = vector.broadcast %50 : vector<32x1xf32> to vector<32x108xf32>
    %52 = arith.mulf %51, %43 : vector<32x108xf32>
    %53 = vector.extract_strided_slice %2 {offsets = [0, 3], sizes = [32, 1], strides = [1, 1]} : vector<32x8xf32> to vector<32x1xf32>
    %54 = vector.broadcast %53 : vector<32x1xf32> to vector<32x108xf32>
    %55 = arith.mulf %54, %43 : vector<32x108xf32>
    %56 = vector.extract_strided_slice %2 {offsets = [0, 4], sizes = [32, 1], strides = [1, 1]} : vector<32x8xf32> to vector<32x1xf32>
    %57 = vector.broadcast %56 : vector<32x1xf32> to vector<32x108xf32>
    %58 = arith.mulf %57, %43 : vector<32x108xf32>
    %59 = vector.extract_strided_slice %2 {offsets = [0, 5], sizes = [32, 1], strides = [1, 1]} : vector<32x8xf32> to vector<32x1xf32>
    %60 = vector.broadcast %59 : vector<32x1xf32> to vector<32x108xf32>
    %61 = arith.mulf %60, %43 : vector<32x108xf32>
    %62 = vector.extract_strided_slice %2 {offsets = [0, 6], sizes = [32, 1], strides = [1, 1]} : vector<32x8xf32> to vector<32x1xf32>
    %63 = vector.broadcast %62 : vector<32x1xf32> to vector<32x108xf32>
    %64 = arith.mulf %63, %43 : vector<32x108xf32>
    %65 = vector.extract_strided_slice %2 {offsets = [0, 7], sizes = [32, 1], strides = [1, 1]} : vector<32x8xf32> to vector<32x1xf32>
    %66 = vector.broadcast %65 : vector<32x1xf32> to vector<32x108xf32>
    %67 = arith.mulf %66, %43 : vector<32x108xf32>
    %68 = tpu.concatenate %46, %49, %52, %55, %58, %61, %64, %67 in 1 : vector<32x108xf32>, vector<32x108xf32>, vector<32x108xf32>, vector<32x108xf32>, vector<32x108xf32>, vector<32x108xf32>, vector<32x108xf32>, vector<32x108xf32> -> vector<32x864xf32>
    %c0_22 = arith.constant 0 : index
    %c0_23 = arith.constant 0 : index
    %69 = vector.load %arg6[%c0_22, %c0_23] : memref<864x64xf32, #tpu.memory_space<vmem>>, vector<864x64xf32>
    %cst_24 = arith.constant dense<0.000000e+00> : vector<32x64xf32>
    %70 = tpu.matmul %68, %69, %cst_24 {dimension_numbers = #tpu.dot_dimension_numbers<[1], [0], [0], [1], [0, 0, 1, 1], [], []>, precision = #tpu.contract_precision<fp32>} : vector<32x864xf32>, vector<864x64xf32>, vector<32x64xf32> -> vector<32x64xf32>
    %c0_25 = arith.constant 0 : index
    %c0_26 = arith.constant 0 : index
    %71 = vector.load %arg7[%c0_25, %c0_26] : memref<8x64xf32, #tpu.memory_space<vmem>>, vector<8x64xf32>
    %cst_27 = arith.constant dense<0.000000e+00> : vector<32x64xf32>
    %72 = tpu.matmul %2, %71, %cst_27 {dimension_numbers = #tpu.dot_dimension_numbers<[1], [0], [0], [1], [0, 0, 1, 1], [], []>, precision = #tpu.contract_precision<fp32>} : vector<32x8xf32>, vector<8x64xf32>, vector<32x64xf32> -> vector<32x64xf32>
    %73 = arith.addf %70, %72 : vector<32x64xf32>
    %74 = arith.negf %73 : vector<32x64xf32>
    %75 = math.exp %74 : vector<32x64xf32>
    %cst_28 = arith.constant 1.000000e+00 : f32
    %76 = vector.broadcast %cst_28 : f32 to vector<32x64xf32>
    %77 = arith.addf %76, %75 : vector<32x64xf32>
    %78 = arith.divf %76, %77 : vector<32x64xf32>
    %79 = vector.extract_strided_slice %78 {offsets = [0, 0], sizes = [32, 32], strides = [1, 1]} : vector<32x64xf32> to vector<32x32xf32>
    %80 = vector.extract_strided_slice %78 {offsets = [0, 32], sizes = [32, 32], strides = [1, 1]} : vector<32x64xf32> to vector<32x32xf32>
    %81 = arith.mulf %79, %1 : vector<32x32xf32>
    %82 = vector.extract_strided_slice %81 {offsets = [0, 0], sizes = [16, 32], strides = [1, 1]} : vector<32x32xf32> to vector<16x32xf32>
    %cst_29 = arith.constant dense<0.000000e+00> : vector<16x32xf32>
    %83 = tpu.matmul %16, %82, %cst_29 {dimension_numbers = #tpu.dot_dimension_numbers<[1], [0], [0], [1], [0, 0, 1, 1], [], []>, precision = #tpu.contract_precision<fp32>} : vector<16x16xf32>, vector<16x32xf32>, vector<16x32xf32> -> vector<16x32xf32>
    %84 = vector.extract_strided_slice %81 {offsets = [16, 0], sizes = [16, 32], strides = [1, 1]} : vector<32x32xf32> to vector<16x32xf32>
    %cst_30 = arith.constant dense<0.000000e+00> : vector<16x32xf32>
    %85 = tpu.matmul %16, %84, %cst_30 {dimension_numbers = #tpu.dot_dimension_numbers<[1], [0], [0], [1], [0, 0, 1, 1], [], []>, precision = #tpu.contract_precision<fp32>} : vector<16x16xf32>, vector<16x32xf32>, vector<16x32xf32> -> vector<16x32xf32>
    %86 = tpu.concatenate %83, %85 in 0 : vector<16x32xf32>, vector<16x32xf32> -> vector<32x32xf32>
    %87 = vector.extract_strided_slice %86 {offsets = [0, 0], sizes = [16, 32], strides = [1, 1]} : vector<32x32xf32> to vector<16x32xf32>
    %cst_31 = arith.constant dense<0.000000e+00> : vector<16x32xf32>
    %88 = tpu.matmul %16, %87, %cst_31 {dimension_numbers = #tpu.dot_dimension_numbers<[1], [0], [0], [1], [0, 0, 1, 1], [], []>, precision = #tpu.contract_precision<fp32>} : vector<16x16xf32>, vector<16x32xf32>, vector<16x32xf32> -> vector<16x32xf32>
    %89 = vector.extract_strided_slice %86 {offsets = [16, 0], sizes = [16, 32], strides = [1, 1]} : vector<32x32xf32> to vector<16x32xf32>
    %cst_32 = arith.constant dense<0.000000e+00> : vector<16x32xf32>
    %90 = tpu.matmul %16, %89, %cst_32 {dimension_numbers = #tpu.dot_dimension_numbers<[1], [0], [0], [1], [0, 0, 1, 1], [], []>, precision = #tpu.contract_precision<fp32>} : vector<16x16xf32>, vector<16x32xf32>, vector<16x32xf32> -> vector<16x32xf32>
    %91 = tpu.concatenate %88, %90 in 0 : vector<16x32xf32>, vector<16x32xf32> -> vector<32x32xf32>
    %cst_33 = arith.constant 2.000000e+00 : f32
    %92 = vector.broadcast %cst_33 : f32 to vector<32x32xf32>
    %93 = arith.mulf %92, %91 : vector<32x32xf32>
    %94 = arith.subf %93, %81 : vector<32x32xf32>
    %95 = tpu.concatenate %0, %21, %29, %81, %86, %94 in 1 : vector<32x4xf32>, vector<32x4xf32>, vector<32x4xf32>, vector<32x32xf32>, vector<32x32xf32>, vector<32x32xf32> -> vector<32x108xf32>
    %96 = vector.extract_strided_slice %2 {offsets = [0, 0], sizes = [32, 1], strides = [1, 1]} : vector<32x8xf32> to vector<32x1xf32>
    %97 = vector.broadcast %96 : vector<32x1xf32> to vector<32x108xf32>
    %98 = arith.mulf %97, %95 : vector<32x108xf32>
    %99 = vector.extract_strided_slice %2 {offsets = [0, 1], sizes = [32, 1], strides = [1, 1]} : vector<32x8xf32> to vector<32x1xf32>
    %100 = vector.broadcast %99 : vector<32x1xf32> to vector<32x108xf32>
    %101 = arith.mulf %100, %95 : vector<32x108xf32>
    %102 = vector.extract_strided_slice %2 {offsets = [0, 2], sizes = [32, 1], strides = [1, 1]} : vector<32x8xf32> to vector<32x1xf32>
    %103 = vector.broadcast %102 : vector<32x1xf32> to vector<32x108xf32>
    %104 = arith.mulf %103, %95 : vector<32x108xf32>
    %105 = vector.extract_strided_slice %2 {offsets = [0, 3], sizes = [32, 1], strides = [1, 1]} : vector<32x8xf32> to vector<32x1xf32>
    %106 = vector.broadcast %105 : vector<32x1xf32> to vector<32x108xf32>
    %107 = arith.mulf %106, %95 : vector<32x108xf32>
    %108 = vector.extract_strided_slice %2 {offsets = [0, 4], sizes = [32, 1], strides = [1, 1]} : vector<32x8xf32> to vector<32x1xf32>
    %109 = vector.broadcast %108 : vector<32x1xf32> to vector<32x108xf32>
    %110 = arith.mulf %109, %95 : vector<32x108xf32>
    %111 = vector.extract_strided_slice %2 {offsets = [0, 5], sizes = [32, 1], strides = [1, 1]} : vector<32x8xf32> to vector<32x1xf32>
    %112 = vector.broadcast %111 : vector<32x1xf32> to vector<32x108xf32>
    %113 = arith.mulf %112, %95 : vector<32x108xf32>
    %114 = vector.extract_strided_slice %2 {offsets = [0, 6], sizes = [32, 1], strides = [1, 1]} : vector<32x8xf32> to vector<32x1xf32>
    %115 = vector.broadcast %114 : vector<32x1xf32> to vector<32x108xf32>
    %116 = arith.mulf %115, %95 : vector<32x108xf32>
    %117 = vector.extract_strided_slice %2 {offsets = [0, 7], sizes = [32, 1], strides = [1, 1]} : vector<32x8xf32> to vector<32x1xf32>
    %118 = vector.broadcast %117 : vector<32x1xf32> to vector<32x108xf32>
    %119 = arith.mulf %118, %95 : vector<32x108xf32>
    %120 = tpu.concatenate %98, %101, %104, %107, %110, %113, %116, %119 in 1 : vector<32x108xf32>, vector<32x108xf32>, vector<32x108xf32>, vector<32x108xf32>, vector<32x108xf32>, vector<32x108xf32>, vector<32x108xf32>, vector<32x108xf32> -> vector<32x864xf32>
    %c0_34 = arith.constant 0 : index
    %c0_35 = arith.constant 0 : index
    %121 = vector.load %arg8[%c0_34, %c0_35] : memref<864x32xf32, #tpu.memory_space<vmem>>, vector<864x32xf32>
    %cst_36 = arith.constant dense<0.000000e+00> : vector<32x32xf32>
    %122 = tpu.matmul %120, %121, %cst_36 {dimension_numbers = #tpu.dot_dimension_numbers<[1], [0], [0], [1], [0, 0, 1, 1], [], []>, precision = #tpu.contract_precision<fp32>} : vector<32x864xf32>, vector<864x32xf32>, vector<32x32xf32> -> vector<32x32xf32>
    %c0_37 = arith.constant 0 : index
    %c0_38 = arith.constant 0 : index
    %123 = vector.load %arg9[%c0_37, %c0_38] : memref<8x32xf32, #tpu.memory_space<vmem>>, vector<8x32xf32>
    %cst_39 = arith.constant dense<0.000000e+00> : vector<32x32xf32>
    %124 = tpu.matmul %2, %123, %cst_39 {dimension_numbers = #tpu.dot_dimension_numbers<[1], [0], [0], [1], [0, 0, 1, 1], [], []>, precision = #tpu.contract_precision<fp32>} : vector<32x8xf32>, vector<8x32xf32>, vector<32x32xf32> -> vector<32x32xf32>
    %125 = arith.addf %122, %124 : vector<32x32xf32>
    %126 = math.tanh %125 : vector<32x32xf32>
    %127 = arith.mulf %80, %1 : vector<32x32xf32>
    %cst_40 = arith.constant 1.000000e+00 : f32
    %128 = vector.broadcast %cst_40 : f32 to vector<32x32xf32>
    %129 = arith.subf %128, %80 : vector<32x32xf32>
    %130 = arith.mulf %129, %126 : vector<32x32xf32>
    %131 = arith.addf %127, %130 : vector<32x32xf32>
    %c0_41 = arith.constant 0 : index
    %c0_42 = arith.constant 0 : index
    %132 = vector.load %arg10[%c0_41, %c0_42] : memref<32x32xf32, #tpu.memory_space<vmem>>, vector<32x32xf32>
    tpu.vector_store %arg10[%c0_41, %c0_42], %131 {strides = array<i32>} : memref<32x32xf32, #tpu.memory_space<vmem>>, vector<32x32xf32>,
    return
  }
  func.func @transform_0(%arg0: i32) -> (i32, i32) {
    %c0_i32 = arith.constant 0 : i32
    %c0_i32_0 = arith.constant 0 : i32
    %c0_i32_1 = arith.constant 0 : i32
    return %c0_i32, %c0_i32_0 : i32, i32
  }
  func.func @transform_1(%arg0: i32) -> (i32, i32) {
    %c0_i32 = arith.constant 0 : i32
    %c0_i32_0 = arith.constant 0 : i32
    %c0_i32_1 = arith.constant 0 : i32
    return %c0_i32, %c0_i32_0 : i32, i32
  }
  func.func @transform_2(%arg0: i32) -> (i32, i32) {
    %c0_i32 = arith.constant 0 : i32
    %c0_i32_0 = arith.constant 0 : i32
    %c0_i32_1 = arith.constant 0 : i32
    return %c0_i32, %c0_i32_0 : i32, i32
  }
  func.func @transform_3(%arg0: i32) -> (i32, i32) {
    %c0_i32 = arith.constant 0 : i32
    %c0_i32_0 = arith.constant 0 : i32
    %c0_i32_1 = arith.constant 0 : i32
    return %c0_i32, %c0_i32_0 : i32, i32
  }
  func.func @transform_4(%arg0: i32) -> (i32, i32) {
    %c0_i32 = arith.constant 0 : i32
    %c0_i32_0 = arith.constant 0 : i32
    %c0_i32_1 = arith.constant 0 : i32
    return %c0_i32, %c0_i32_0 : i32, i32
  }
  func.func @transform_5(%arg0: i32) -> (i32, i32) {
    %c0_i32 = arith.constant 0 : i32
    %c0_i32_0 = arith.constant 0 : i32
    %c0_i32_1 = arith.constant 0 : i32
    return %c0_i32, %c0_i32_0 : i32, i32
  }
  func.func @transform_6(%arg0: i32) -> (i32, i32) {
    %c0_i32 = arith.constant 0 : i32
    %c0_i32_0 = arith.constant 0 : i32
    %c0_i32_1 = arith.constant 0 : i32
    return %c0_i32, %c0_i32_0 : i32, i32
  }
  func.func @transform_7(%arg0: i32) -> (i32, i32) {
    %c0_i32 = arith.constant 0 : i32
    %c0_i32_0 = arith.constant 0 : i32
    %c0_i32_1 = arith.constant 0 : i32
    return %c0_i32, %c0_i32_0 : i32, i32
  }
  func.func @transform_8(%arg0: i32) -> (i32, i32) {
    %c0_i32 = arith.constant 0 : i32
    %c0_i32_0 = arith.constant 0 : i32
    %c0_i32_1 = arith.constant 0 : i32
    return %c0_i32, %c0_i32_0 : i32, i32
  }
  func.func @transform_9(%arg0: i32) -> (i32, i32) {
    %c0_i32 = arith.constant 0 : i32
    %c0_i32_0 = arith.constant 0 : i32
    %c0_i32_1 = arith.constant 0 : i32
    return %c0_i32, %c0_i32_0 : i32, i32
  }
}

</mosaic_0001>

<bundles_post_ra>
// kernel: tpu_custom_call.1
= control target key start
LH: loop header
LB: loop body
LE: loop exit
PB: predicated region body
PF: predicated region fallthrough
CT: control target
= control target key end

     0   :  { %vm56_vm0 = vcmask 1041408   ;;  %vm49_vm1 = vcmask 80896   ;;  %s29099_s0 = inlined_call_operand.vmem [shape: f32[32,4], index: 0, kind: input, shape index: {}]   ;;  %s29100_s1 = inlined_call_operand.vmem [shape: f32[32,32], index: 1, kind: input, shape index: {}]   ;;  %s29101_s2 = inlined_call_operand.vmem [shape: f32[32,8], index: 2, kind: input, shape index: {}]   ;;  %s29102_s3 = inlined_call_operand.vmem [shape: f32[16,10], index: 3, kind: input, shape index: {}]   ;;  %s29103_s4 = inlined_call_operand.vmem [shape: f32[10,16], index: 4, kind: input, shape index: {}]   ;;  %s29104_s5 = inlined_call_operand.vmem [shape: f32[864,64], index: 5, kind: input, shape index: {}]   ;;  %s29105_s6 = inlined_call_operand.vmem [shape: f32[8,64], index: 6, kind: input, shape index: {}]   ;;  %s29106_s7 = inlined_call_operand.vmem [shape: f32[864,32], index: 7, kind: input, shape index: {}]   ;;  %s29107_s8 = inlined_call_operand.vmem [shape: f32[8,32], index: 8, kind: input, shape index: {}]   ;;  %s29108_s9 = inlined_call_operand.hbm [shape: f32[32,32], index: 9, kind: output, shape index: {}]  }
   0x1   :  { %v47_v0 = vld [vmem:[%s29103_s4] sm:$0xff]  ;;  %v48_v1 = vld [vmem:[%s29103_s4 + $0x8] sm:$0x3] }
   0x2   :  { %v45_v2 = vld [vmem:[%s29102_s3] sm:$0xff]  ;;  %v58_v3 = vsel %vm56_vm0, %v48_v1, 0  ;;  %v61_v4 = vand.u32 4294901760, %v47_v0  ;;  %v46_v5 = vld [vmem:[%s29102_s3 + $0x8] sm:$0xff] }
   0x3   :  { %v51_v6 = vsel %vm49_vm1, %v45_v2, 0 }
   0x4   :  { %14 = vsyncpa [#allocation3], 0  ;;  %v64_v7 = vand.u32 4294901760, %v58_v3  ;;  %v54_v8 = vsel %vm49_vm1, %v46_v5, 0  ;;  %v127_v9 = vand.u32 4294901760, %v51_v6  ;;  %v149_v11 = vsub.f32 %v47_v0, %v61_v4  ;;  %v21897_v47 = vld [vmem:[%s29099_s0] sm:$0xff] }
   0x5   :  { %v137_v10 = vand.u32 4294901760, %v54_v8  ;;  %vm564_vm2 = vcmask 130048   ;;  %v21902_v48 = vld [vmem:[%s29099_s0 + $0x8] sm:$0xff]  ;;  %v21907_v49 = vld [vmem:[%s29099_s0 + $0x10] sm:$0xff]  ;;  %v594_v50 = vand.u32 4294901760, %v21897_v47  ;;  %v21914_v52 = vld [vmem:[%s29099_s0 + $0x18] sm:$0xff] }
   0x6   :  { %v19564_v12 = vpack.c.bf16 %v64_v7, %v61_v4  ;;  %v128_v13 = vsub.f32 %v51_v6, %v127_v9  ;;  %v156_v14 = vsub.f32 %v58_v3, %v64_v7  ;;  %v150_v16 = vand.u32 4294901760, %v149_v11  ;;  %s21801_s29 = smov 12   ;;  %s21802_s13 = smov 4  }
   0x7   :  { %v138_v15 = vsub.f32 %v54_v8, %v137_v10  ;;  %v597_v51 = vand.u32 4294901760, %v21902_v48  ;;  %v1096_v53 = vand.u32 4294901760, %v21907_v49  ;;  %v1099_v54 = vand.u32 4294901760, %v21914_v52  ;;  %s21803_s4 = smov 8   ;;  %s21804_s17 = smov 44  }
   0x8   :  { %19565 = vmatprep.subr.bf16.mxu0 %v19564_v12  ;;  %v129_v17 = vand.u32 4294901760, %v128_v13  ;;  %v157_v18 = vand.u32 4294901760, %v156_v14  ;;  %v151_v20 = vsub.f32 %v149_v11, %v150_v16  ;;  %v19572_v29 = vpack.c.bf16 %v156_v14, %v149_v11  ;;  %s21805_s18 = smov 76   ;;  %s21808_s10 = smov 88  }
   0x9   :  { %19567 = vmatpush3.bf16.msra.mxu0 %v19564_v12  ;;  %v139_v19 = vand.u32 4294901760, %v138_v15  ;;  %v21918_v55 = vpack.c.bf16 %v597_v51, %v594_v50  ;;  %v682_v56 = vsub.f32 %v21897_v47, %v594_v50  ;;  %v689_v57 = vsub.f32 %v21902_v48, %v597_v51  ;;  %s21809_s11 = smov 108   ;;  %s21813_s19 = smov 68  }
   0xa   :  { %v130_v21 = vsub.f32 %v128_v13, %v129_v17  ;;  %v158_v22 = vsub.f32 %v156_v14, %v157_v18  ;;  %v152_v24 = vand.u32 4294901760, %v151_v20  ;;  %v19580_v30 = vpack.c.bf16 %v157_v18, %v150_v16  ;;  %v21944_v18 = vld [vmem:[%s29100_s1] sm:$0xff]  ;;  %v21958_v20 = vld [vmem:[%s29101_s2 + $0x8] sm:$0xff]  ;;  %s21814_s23 = smov 48  }
   0xb   :  { %v140_v23 = vsub.f32 %v138_v15, %v139_v19  ;;  %v1184_v58 = vsub.f32 %v21907_v49, %v1096_v53  ;;  %v21923_v59 = vpack.c.bf16 %v1099_v54, %v1096_v53  ;;  %v1191_v60 = vsub.f32 %v21914_v52, %v1099_v54  ;;  %19589 = vmatprep.subr.bf16.mxu1 %v21918_v55 }
   0xc   :  { %v131_v25 = vand.u32 4294901760, %v130_v21  ;;  %v159_v26 = vand.u32 4294901760, %v158_v22  ;;  %v683_v61 = vand.u32 4294901760, %v682_v56  ;;  %v690_v62 = vand.u32 4294901760, %v689_v57  ;;  %19591 = vmatpush3.bf16.msra.mxu1 %v21918_v55  ;;  %v21963_v21 = vld [vmem:[%s29101_s2 + $0x10] sm:$0xff] }
   0xd   :  { %v141_v27 = vand.u32 4294901760, %v140_v23  ;;  %v1185_v63 = vand.u32 4294901760, %v1184_v58  ;;  %v1192_v0 = vand.u32 4294901760, %v1191_v60  ;;  %v19596_v11 = vpack.c.bf16 %v689_v57, %v682_v56 }
   0xe   :  { %18566 = vmatprep.mubr.f32.mxu0 %v131_v25  ;;  %v19568_v28 = vpack.c.bf16 %v159_v26, %v152_v24  ;;  %v684_v1 = vsub.f32 %v682_v56, %v683_v61  ;;  %v691_v2 = vsub.f32 %v689_v57, %v690_v62  ;;  %v21799_v16 = vmov 2  }
   0xf   :  { %18567 = vmatmul.mubr.f32.vlgmr.msra.gmra.mrb[0].mxu0 %v141_v27  ;;  %v1186_v3 = vsub.f32 %v1184_v58, %v1185_v63  ;;  %v1193_v4 = vsub.f32 %v1191_v60, %v1192_v0  ;;  %v21932_v14 = vpack.c.bf16 %v1192_v0, %v1185_v63  ;;  %21702 = vset.pattern.permute.xlu1 %v21799_v16  ;;  %vm4710_vm3 = vcmask 64512  }
  0x10   :  { %19569 = vmatprep.subr.bf16.mxu0 %v19568_v28  ;;  %18573 = vmatprep.mubr.f32.mxu0 %v127_v9  ;;  %v685_v5 = vand.u32 4294901760, %v684_v1  ;;  %v692_v6 = vand.u32 4294901760, %v691_v2  ;;  %vm4705_vm4 = vcmask 31744   ;;  %vm4715_vm5 = vcmask 97280  }
  0x11   :  { %19571 = vmatpush3.bf16.msra.mxu0 %v19568_v28  ;;  %v1187_v7 = vand.u32 4294901760, %v1186_v3  ;;  %v1194_v8 = vand.u32 4294901760, %v1193_v4  ;;  %vm4720_vm6 = vcmask 359424   ;;  %vm4725_vm7 = vcmask 621568  }
  0x12   :  { %19573 = vmatprep.subr.bf16.mxu0 %v19572_v29  ;;  %vm5006_vm8 = vcmask 883712   ;;  %vm5011_vm9 = vcmask 719872   ;;  %vm5016_vm10 = vcmask 556032   ;;  %vm5021_vm11 = vcmask 392192  }
  0x13   :  { %vm5026_vm12 = vcmask 228352   ;;  %vm5035_vm13 = vcmask 949248   ;;  %vm5732_vm14 = vcmask 785408   ;;  %vm16389_vm15 = vcmask 261120  }
  0x17   :  { %18574 = vmatmul.mubr.f32.vlgmr.msra.gmra.mrb[0].mxu0 %v137_v10 }
  0x18   :  { %19575 = vmatpush3.bf16.msra.mxu0 %v19572_v29  ;;  %18580 = vmatprep.mubr.f32.mxu0 %v128_v13  ;;  %v21930_v13 = vpack.c.bf16 %v690_v62, %v683_v61 }
  0x19   :  { %19577 = vmatprep.subr.bf16.mxu0 %v19564_v12 }
  0x1f   :  { %18581 = vmatmul.mubr.f32.vlgmr.msra.gmra.mrb[0].mxu0 %v138_v15  ;;  %v21937_v15 = vld [vmem:[%s29101_s2] sm:$0xff] }
  0x20   :  { %19579 = vmatpush3.bf16.msra.mxu0 %v19564_v12  ;;  %18587 = vmatprep.mubr.f32.mxu0 %v129_v17  ;;  %v21800_v17 = vmov 1  }
  0x21   :  { %19581 = vmatprep.subr.bf16.mxu0 %v19580_v30  ;;  %21701 = vset.pattern.permute.xlu0 %v21800_v17 }
  0x27   :  { %18588 = vmatmul.mubr.f32.vlgmr.msra.gmra.mrb[0].mxu0 %v139_v19  ;;  %v21949_v19 = vld [vmem:[%s29100_s1 + $0x8] sm:$0xff] }
  0x28   :  { %19583 = vmatpush3.bf16.msra.mxu0 %v19580_v30  ;;  %18594 = vmatprep.mubr.f32.mxu0 %v127_v9 }
  0x29   :  { %19585 = vmatprep.subr.bf16.mxu0 %v19564_v12 }
  0x2f   :  { %18595 = vmatmul.mubr.f32.vlgmr.msra.gmra.mrb[0].mxu0 %v137_v10 }
  0x30   :  { %19587 = vmatpush3.bf16.msra.mxu0 %v19564_v12  ;;  %18601 = vmatprep.mubr.f32.mxu0 %v127_v9  ;;  %v19592_v9 = vpack.c.bf16 %v692_v6, %v685_v5  ;;  %v19620_v12 = vpack.c.bf16 %v1191_v60, %v1184_v58 }
  0x31   :  { %19613 = vmatprep.subr.bf16.mxu0 %v21923_v59 }
  0x32   :  { %19593 = vmatprep.subr.bf16.mxu1 %v19592_v9 }
  0x37   :  { %18602 = vmatmul.mubr.f32.vlgmr.msra.gmra.mrb[0].mxu0 %v137_v10  ;;  %v19616_v10 = vpack.c.bf16 %v1194_v8, %v1187_v7 }
  0x38   :  { %19615 = vmatpush3.bf16.msra.mxu0 %v21923_v59 }
  0x39   :  { %19617 = vmatprep.subr.bf16.mxu0 %v19616_v10 }
 0x10a   :  { %v18603_v31 = vpop.f32.mrb[0].mxu0 }
 0x10b   :  { %v552_v32 = vpop.f32.mrb[1].mxu0  ;;  %v563_v34 = vmax.f32 %v18603_v31, 0.0 }
 0x10c   :  { %v562_v33 = vmax.f32 %v552_v32, 0.0 }
 0x10d   :  { %v568_v36 = vsel %vm564_vm2, %v563_v34, -inf }
 0x10e   :  { %v565_v35 = vsel %vm564_vm2, %v562_v33, -inf }
 0x10f   :  { %566 = vmax.xlane.f32.xlu0 %v565_v35 }
 0x113   :  { %569 = vmax.xlane.f32.xlu0 %v568_v36 }
 0x129   :  { %4755 = vperm.xlu0 %21701, %v21937_v15  }
 0x12d   :  { %4663 = vrot.lane.b32.xlu0 %v21949_v19, %s21801_s29 }
 0x12e   :  { %21706 = vset.pattern.permute.xlu0 %v21799_v16 }
 0x131   :  { %4783 = vperm.xlu0 %21706, %v21963_v21  }
 0x19c   :  { %v567_v37 = vpop.xlane.xlu0 %566 }
 0x19d   :  { %v571_v38 = vsub.f32 %v562_v33, %v567_v37 }
 0x19f   :  { %v573_v39 = vmul.f32 1.442695, %v571_v38 }
 0x1a0   :  { %v570_v40 = vpop.xlane.xlu0 %569 }
 0x1a1   :  { %21726 = vpow2.f32 %v573_v39  ;;  %v572_v41 = vsub.f32 %v563_v34, %v570_v40 }
 0x1a3   :  { %v575_v42 = vmul.f32 1.442695, %v572_v41 }
 0x1a5   :  { %21728 = vpow2.f32 %v575_v42 }
 0x1ab   :  { %v21886_v43 = vpop.eup %21726 }
 0x1ac   :  { %v577_v44 = vsel %vm564_vm2, %v21886_v43, 0.0 }
 0x1ad   :  { %578 = vadd.xlane.f32.xlu1 %v577_v44 }
 0x1af   :  { %v21890_v45 = vpop.eup %21728 }
 0x1b0   :  { %v580_v46 = vsel %vm564_vm2, %v21890_v45, 0.0 }
 0x1b1   :  { %581 = vadd.xlane.f32.xlu1 %v580_v46 }
 0x1c2   :  { %4775 = vperm.xlu1 %21702, %v21937_v15  }
 0x1c6   :  { %4661 = vrot.lane.b32.xlu1 %v21944_v18, %s21801_s29 }
 0x1c7   :  { %21703 = vset.pattern.permute.xlu1 %v21800_v17 }
 0x1ca   :  { %4759 = vperm.xlu1 %21703, %v21958_v20  }
 0x1ce   :  { %21704 = vset.pattern.permute.xlu1 %v21799_v16  ;;  %v2613_v16 = vand.u32 4294901760, %v21949_v19 }
 0x1cf   :  { %4779 = vperm.xlu1 %21704, %v21958_v20  }
 0x1d3   :  { %21705 = vset.pattern.permute.xlu1 %v21800_v17 }
 0x1d4   :  { %4763 = vperm.xlu1 %21705, %v21963_v21  }
 0x23a   :  { %v579_v22 = vpop.xlane.xlu1 %578 }
 0x23b   :  { %21730 = vrcp.f32 %v579_v22 }
 0x23e   :  { %v582_v23 = vpop.xlane.xlu1 %581 }
 0x23f   :  { %21732 = vrcp.f32 %v582_v23 }
 0x245   :  { %v21731_v24 = vpop.eup %21730 }
 0x246   :  { %v584_v25 = vmul.f32 %v21731_v24, %v21886_v43  ;;  %v2705_v24 = vsub.f32 %v21949_v19, %v2613_v16 }
 0x248   :  { %v588_v26 = vsel %vm564_vm2, %v584_v25, 0 }
 0x249   :  { %v21733_v27 = vpop.eup %21732  ;;  %v21971_v28 = vand.u32 4294901760, %v588_v26 }
 0x24a   :  { %v586_v29 = vmul.f32 %v21733_v27, %v21890_v45 }
 0x24b   :  { %29824 = vst [vmem:[#allocation5_spill] sm:$0xff] %v21971_v28  ;;  %v21975_v30 = vsub.f32 %v588_v26, %v21971_v28 }
 0x24c   :  { %v591_v31 = vsel %vm564_vm2, %v586_v29, 0  ;;  %v2706_v29 = vand.u32 4294901760, %v2705_v24 }
 0x24d   :  { %29825 = vst [vmem:[#allocation6_spill] sm:$0xff] %v21975_v30  ;;  %v21979_v32 = vand.u32 4294901760, %v21975_v30  ;;  %v21981_v33 = vand.u32 4294901760, %v591_v31 }
 0x24f   :  { %29826 = vst [vmem:[#allocation7_spill] sm:$0xff] %v21979_v32  ;;  %29827 = vst [vmem:[#allocation8_spill] sm:$0xff] %v21981_v33  ;;  %v21984_v34 = vsub.f32 %v591_v31, %v21981_v33  ;;  %v663_v35 = vsub.f32 %v21975_v30, %v21979_v32 }
 0x251   :  { %29828 = vst [vmem:[#allocation9_spill] sm:$0xff] %v21984_v34  ;;  %v21989_v36 = vand.u32 4294901760, %v21984_v34  ;;  %v21991_v37 = vand.u32 4294901760, %v663_v35 }
 0x253   :  { %29829 = vst [vmem:[#allocation10_spill] sm:$0xff] %v21989_v36  ;;  %29830 = vst [vmem:[#allocation11_spill] sm:$0xff] %v21991_v37  ;;  %18608 = vmatprep.mubr.f32.mxu1 %v21991_v37  ;;  %18650 = vmatprep.mubr.f32.mxu0 %v21991_v37  ;;  %v673_v38 = vsub.f32 %v21984_v34, %v21989_v36 }
 0x255   :  { %v21997_v39 = vand.u32 4294901760, %v673_v38 }
 0x257   :  { %29831 = vst [vmem:[#allocation12_spill] sm:$0xff] %v21997_v39  ;;  %18609 = vmatmul.mubr.f32.vlgmr.msra.gmra.mrb[0].mxu1 %v21997_v39  ;;  %18651 = vmatmul.mubr.f32.vlgmr.msra.gmra.mrb[2].mxu0 %v21997_v39 }
 0x258   :  { %18615 = vmatprep.mubr.f32.mxu1 %v21971_v28  ;;  %18657 = vmatprep.mubr.f32.mxu0 %v21971_v28 }
 0x259   :  { %19595 = vmatpush3.bf16.msra.mxu1 %v19592_v9  ;;  %19619 = vmatpush3.bf16.msra.mxu0 %v19616_v10 }
 0x25a   :  { %19597 = vmatprep.subr.bf16.mxu1 %v19596_v11  ;;  %19621 = vmatprep.subr.bf16.mxu0 %v19620_v12 }
 0x25f   :  { %18616 = vmatmul.mubr.f32.vlgmr.msra.gmra.mrb[0].mxu1 %v21981_v33  ;;  %18658 = vmatmul.mubr.f32.vlgmr.msra.gmra.mrb[2].mxu0 %v21981_v33 }
 0x260   :  { %18622 = vmatprep.mubr.f32.mxu1 %v21975_v30  ;;  %18664 = vmatprep.mubr.f32.mxu0 %v21975_v30 }
 0x261   :  { %19599 = vmatpush3.bf16.msra.mxu1 %v19596_v11  ;;  %19623 = vmatpush3.bf16.msra.mxu0 %v19620_v12  ;;  %v22068_v12 = vld [vmem:[%s29100_s1 + $0x10] sm:$0xff] }
 0x262   :  { %19601 = vmatprep.subr.bf16.mxu1 %v21918_v55  ;;  %19625 = vmatprep.subr.bf16.mxu0 %v21923_v59  ;;  %v3112_v17 = vand.u32 4294901760, %v22068_v12 }
 0x264   :  { %v22088_v25 = vsub.f32 %v22068_v12, %v3112_v17 }
 0x266   :  { %v3201_v31 = vand.u32 4294901760, %v22088_v25 }
 0x267   :  { %18623 = vmatmul.mubr.f32.vlgmr.msra.gmra.mrb[0].mxu1 %v21984_v34  ;;  %18665 = vmatmul.mubr.f32.vlgmr.msra.gmra.mrb[2].mxu0 %v21984_v34 }
 0x268   :  { %18629 = vmatprep.mubr.f32.mxu1 %v21979_v32  ;;  %18671 = vmatprep.mubr.f32.mxu0 %v21979_v32 }
 0x269   :  { %19603 = vmatpush3.bf16.msra.mxu1 %v21918_v55  ;;  %19627 = vmatpush3.bf16.msra.mxu0 %v21923_v59 }
 0x26a   :  { %19605 = vmatprep.subr.bf16.mxu1 %v21930_v13  ;;  %19629 = vmatprep.subr.bf16.mxu0 %v21932_v14 }
 0x26f   :  { %18630 = vmatmul.mubr.f32.vlgmr.msra.gmra.mrb[0].mxu1 %v21989_v36  ;;  %18672 = vmatmul.mubr.f32.vlgmr.msra.gmra.mrb[2].mxu0 %v21989_v36 }
 0x270   :  { %18636 = vmatprep.mubr.f32.mxu1 %v21971_v28  ;;  %18678 = vmatprep.mubr.f32.mxu0 %v21971_v28 }
 0x271   :  { %19607 = vmatpush3.bf16.msra.mxu1 %v21930_v13  ;;  %19631 = vmatpush3.bf16.msra.mxu0 %v21932_v14  ;;  %v22073_v13 = vld [vmem:[%s29100_s1 + $0x18] sm:$0xff]  ;;  %v2610_v14 = vand.u32 4294901760, %v21944_v18 }
 0x272   :  { %19609 = vmatprep.subr.bf16.mxu1 %v21918_v55  ;;  %19633 = vmatprep.subr.bf16.mxu0 %v21923_v59  ;;  %v3115_v22 = vand.u32 4294901760, %v22073_v13 }
 0x273   :  { %v22084_v23 = vsub.f32 %v21944_v18, %v2610_v14  ;;  %v22099_v38 = vpack.c.bf16 %v2613_v16, %v2610_v14 }
 0x274   :  { %v3207_v26 = vsub.f32 %v22073_v13, %v3115_v22 }
 0x275   :  { %v2699_v27 = vand.u32 4294901760, %v22084_v23 }
 0x276   :  { %v3208_v35 = vand.u32 4294901760, %v3207_v26 }
 0x277   :  { %18637 = vmatmul.mubr.f32.vlgmr.msra.gmra.mrb[0].mxu1 %v21981_v33  ;;  %18679 = vmatmul.mubr.f32.vlgmr.msra.gmra.mrb[2].mxu0 %v21981_v33 }
 0x278   :  { %18643 = vmatprep.mubr.f32.mxu1 %v21971_v28  ;;  %18685 = vmatprep.mubr.f32.mxu0 %v21971_v28 }
 0x279   :  { %19611 = vmatpush3.bf16.msra.mxu1 %v21918_v55  ;;  %19635 = vmatpush3.bf16.msra.mxu0 %v21923_v59 }
 0x27f   :  { %18644 = vmatmul.mubr.f32.vlgmr.msra.gmra.mrb[0].mxu1 %v21981_v33  ;;  %18686 = vmatmul.mubr.f32.vlgmr.msra.gmra.mrb[2].mxu0 %v21981_v33 }
 0x280   :  { %18692 = vmatprep.mubr.f32.mxu1 %v21991_v37  ;;  %18734 = vmatprep.mubr.f32.mxu0 %v21991_v37 }
 0x352   :  { %v18645_v40 = vpop.f32.mrb[0].mxu1  ;;  %v22035_v41 = vpop.f32.mrb[2].mxu0 }
 0x353   :  { %v1601_v42 = vand.u32 4294901760, %v18645_v40  ;;  %v2103_v43 = vand.u32 4294901760, %v22035_v41  ;;  %v22038_v44 = vpop.f32.mrb[3].mxu0  ;;  %4631 = vrot.lane.b32.xlu0 %v18645_v40, %s21802_s13  ;;  %v1085_v45 = vpop.f32.mrb[1].mxu1 }
 0x354   :  { %v2100_v46 = vand.u32 4294901760, %v22038_v44  ;;  %v1598_v50 = vand.u32 4294901760, %v1085_v45  ;;  %4629 = vrot.lane.b32.xlu1 %v1085_v45, %s21802_s13 }
 0x355   :  { %v1693_v51 = vsub.f32 %v18645_v40, %v1601_v42  ;;  %v2195_v53 = vsub.f32 %v22035_v41, %v2103_v43  ;;  %v22101_v40 = vpack.c.bf16 %v3115_v22, %v3112_v17 }
 0x356   :  { %v22044_v54 = vpack.c.bf16 %v2103_v43, %v2100_v46  ;;  %v2188_v55 = vsub.f32 %v22038_v44, %v2100_v46  ;;  %v22047_v56 = vpack.c.bf16 %v1601_v42, %v1598_v50  ;;  %v1686_v57 = vsub.f32 %v1085_v45, %v1598_v50 }
 0x357   :  { %v1694_v58 = vand.u32 4294901760, %v1693_v51  ;;  %v2196_v59 = vand.u32 4294901760, %v2195_v53  ;;  %v2700_v42 = vsub.f32 %v22084_v23, %v2699_v27  ;;  %v2707_v43 = vsub.f32 %v2705_v24, %v2706_v29 }
 0x358   :  { %v2189_v60 = vand.u32 4294901760, %v2188_v55  ;;  %v1687_v61 = vand.u32 4294901760, %v1686_v57  ;;  %19637 = vmatprep.subr.bf16.mxu1 %v22047_v56  ;;  %19661 = vmatprep.subr.bf16.mxu0 %v22044_v54  ;;  %v19644_v62 = vpack.c.bf16 %v1693_v51, %v1686_v57  ;;  %v19668_v63 = vpack.c.bf16 %v2195_v53, %v2188_v55 }
 0x359   :  { %19639 = vmatpush3.bf16.msra.mxu1 %v22047_v56  ;;  %19663 = vmatpush3.bf16.msra.mxu0 %v22044_v54  ;;  %v1695_v0 = vsub.f32 %v1693_v51, %v1694_v58  ;;  %v2197_v1 = vsub.f32 %v2195_v53, %v2196_v59  ;;  %v3202_v45 = vsub.f32 %v22088_v25, %v3201_v31  ;;  %v2701_v50 = vand.u32 4294901760, %v2700_v42 }
 0x35a   :  { %v1688_v2 = vsub.f32 %v1686_v57, %v1687_v61  ;;  %v2190_v3 = vsub.f32 %v2188_v55, %v2189_v60  ;;  %v19652_v4 = vpack.c.bf16 %v1694_v58, %v1687_v61  ;;  %v19676_v5 = vpack.c.bf16 %v2196_v59, %v2189_v60 }
 0x35b   :  { %v1696_v6 = vand.u32 4294901760, %v1695_v0  ;;  %v2198_v7 = vand.u32 4294901760, %v2197_v1  ;;  %v3209_v46 = vsub.f32 %v3207_v26, %v3208_v35  ;;  %v2708_v51 = vand.u32 4294901760, %v2707_v43 }
 0x35c   :  { %18693 = vmatmul.mubr.f32.vlgmr.msra.gmra.mrb[2].mxu1 %v21997_v39  ;;  %18735 = vmatmul.mubr.f32.vlgmr.msra.gmra.mrb[4].mxu0 %v21997_v39  ;;  %v1689_v8 = vand.u32 4294901760, %v1688_v2  ;;  %v2191_v9 = vand.u32 4294901760, %v2190_v3  ;;  %v3203_v53 = vand.u32 4294901760, %v3202_v45  ;;  %v19700_v59 = vpack.c.bf16 %v2706_v29, %v2699_v27 }
 0x35d   :  { %18699 = vmatprep.mubr.f32.mxu1 %v21971_v28  ;;  %18741 = vmatprep.mubr.f32.mxu0 %v21971_v28  ;;  %v3210_v55 = vand.u32 4294901760, %v3209_v46  ;;  %v19688_v57 = vpack.c.bf16 %v2708_v51, %v2701_v50  ;;  %v19724_v60 = vpack.c.bf16 %v3208_v35, %v3201_v31 }
 0x35e   :  { %v19640_v10 = vpack.c.bf16 %v1696_v6, %v1689_v8  ;;  %v19664_v11 = vpack.c.bf16 %v2198_v7, %v2191_v9 }
 0x35f   :  { %v19712_v58 = vpack.c.bf16 %v3210_v55, %v3203_v53 }
 0x360   :  { %19641 = vmatprep.subr.bf16.mxu1 %v19640_v10  ;;  %19665 = vmatprep.subr.bf16.mxu0 %v19664_v11 }
 0x361   :  { %19643 = vmatpush3.bf16.msra.mxu1 %v19640_v10  ;;  %19667 = vmatpush3.bf16.msra.mxu0 %v19664_v11 }
 0x362   :  { %19645 = vmatprep.subr.bf16.mxu1 %v19644_v62  ;;  %19669 = vmatprep.subr.bf16.mxu0 %v19668_v63 }
 0x364   :  { %18700 = vmatmul.mubr.f32.vlgmr.msra.gmra.mrb[2].mxu1 %v21981_v33  ;;  %18742 = vmatmul.mubr.f32.vlgmr.msra.gmra.mrb[4].mxu0 %v21981_v33 }
 0x365   :  { %19647 = vmatpush3.bf16.msra.mxu1 %v19644_v62  ;;  %18706 = vmatprep.mubr.f32.mxu1 %v21975_v30 }
 0x366   :  { %19671 = vmatpush3.bf16.msra.mxu0 %v19668_v63  ;;  %18748 = vmatprep.mubr.f32.mxu0 %v21975_v30 }
 0x367   :  { %19649 = vmatprep.subr.bf16.mxu1 %v22047_v56  ;;  %19673 = vmatprep.subr.bf16.mxu0 %v22044_v54 }
 0x36c   :  { %18707 = vmatmul.mubr.f32.vlgmr.msra.gmra.mrb[2].mxu1 %v21984_v34  ;;  %18749 = vmatmul.mubr.f32.vlgmr.msra.gmra.mrb[4].mxu0 %v21984_v34 }
 0x36d   :  { %19651 = vmatpush3.bf16.msra.mxu1 %v22047_v56  ;;  %19675 = vmatpush3.bf16.msra.mxu0 %v22044_v54 }
 0x36e   :  { %18713 = vmatprep.mubr.f32.mxu1 %v21979_v32  ;;  %19653 = vmatprep.subr.bf16.mxu1 %v19652_v4 }
 0x36f   :  { %18755 = vmatprep.mubr.f32.mxu0 %v21979_v32  ;;  %19677 = vmatprep.subr.bf16.mxu0 %v19676_v5 }
 0x374   :  { %18714 = vmatmul.mubr.f32.vlgmr.msra.gmra.mrb[2].mxu1 %v21989_v36  ;;  %18756 = vmatmul.mubr.f32.vlgmr.msra.gmra.mrb[4].mxu0 %v21989_v36 }
 0x375   :  { %19655 = vmatpush3.bf16.msra.mxu1 %v19652_v4  ;;  %19679 = vmatpush3.bf16.msra.mxu0 %v19676_v5 }
 0x376   :  { %18720 = vmatprep.mubr.f32.mxu1 %v21971_v28  ;;  %19657 = vmatprep.subr.bf16.mxu1 %v22047_v56 }
 0x377   :  { %18762 = vmatprep.mubr.f32.mxu0 %v21971_v28  ;;  %19681 = vmatprep.subr.bf16.mxu0 %v22044_v54 }
 0x37c   :  { %18721 = vmatmul.mubr.f32.vlgmr.msra.gmra.mrb[2].mxu1 %v21981_v33  ;;  %18763 = vmatmul.mubr.f32.vlgmr.msra.gmra.mrb[4].mxu0 %v21981_v33 }
 0x37d   :  { %19659 = vmatpush3.bf16.msra.mxu1 %v22047_v56  ;;  %19683 = vmatpush3.bf16.msra.mxu0 %v22044_v54  ;;  %v19692_v54 = vpack.c.bf16 %v2705_v24, %v22084_v23  ;;  %v19716_v56 = vpack.c.bf16 %v3207_v26, %v22088_v25 }
 0x37e   :  { %18727 = vmatprep.mubr.f32.mxu1 %v21971_v28  ;;  %18769 = vmatprep.mubr.f32.mxu0 %v21971_v28 }
 0x37f   :  { %19685 = vmatprep.subr.bf16.mxu1 %v22099_v38  ;;  %19709 = vmatprep.subr.bf16.mxu0 %v22101_v40 }
 0x384   :  { %18728 = vmatmul.mubr.f32.vlgmr.msra.gmra.mrb[2].mxu1 %v21981_v33  ;;  %18770 = vmatmul.mubr.f32.vlgmr.msra.gmra.mrb[4].mxu0 %v21981_v33 }
 0x385   :  { %19687 = vmatpush3.bf16.msra.mxu1 %v22099_v38  ;;  %18776 = vmatprep.mubr.f32.mxu1 %v21991_v37 }
 0x386   :  { %19711 = vmatpush3.bf16.msra.mxu0 %v22101_v40  ;;  %18818 = vmatprep.mubr.f32.mxu0 %v21991_v37 }
 0x387   :  { %19689 = vmatprep.subr.bf16.mxu1 %v19688_v57  ;;  %19713 = vmatprep.subr.bf16.mxu0 %v19712_v58 }
 0x388   :  { %18777 = vmatmul.mubr.f32.vlgmr.msra.gmra.mrb[4].mxu1 %v21997_v39 }
 0x389   :  { %18819 = vmatmul.mubr.f32.vlgmr.msra.gmra.mrb[6].mxu0 %v21997_v39  ;;  %18783 = vmatprep.mubr.f32.mxu1 %v21971_v28 }
 0x38a   :  { %18825 = vmatprep.mubr.f32.mxu0 %v21971_v28  ;;  %19691 = vmatpush3.bf16.msra.mxu1 %v19688_v57 }
 0x38b   :  { %19715 = vmatpush3.bf16.msra.mxu0 %v19712_v58  ;;  %19693 = vmatprep.subr.bf16.mxu1 %v19692_v54 }
 0x38c   :  { %19717 = vmatprep.subr.bf16.mxu0 %v19716_v56 }
 0x390   :  { %18784 = vmatmul.mubr.f32.vlgmr.msra.gmra.mrb[4].mxu1 %v21981_v33 }
 0x391   :  { %18826 = vmatmul.mubr.f32.vlgmr.msra.gmra.mrb[6].mxu0 %v21981_v33  ;;  %18790 = vmatprep.mubr.f32.mxu1 %v21975_v30 }
 0x392   :  { %18832 = vmatprep.mubr.f32.mxu0 %v21975_v30  ;;  %19695 = vmatpush3.bf16.msra.mxu1 %v19692_v54 }
 0x393   :  { %19719 = vmatpush3.bf16.msra.mxu0 %v19716_v56  ;;  %19697 = vmatprep.subr.bf16.mxu1 %v22099_v38 }
 0x394   :  { %19721 = vmatprep.subr.bf16.mxu0 %v22101_v40 }
 0x398   :  { %18791 = vmatmul.mubr.f32.vlgmr.msra.gmra.mrb[4].mxu1 %v21984_v34 }
 0x399   :  { %18833 = vmatmul.mubr.f32.vlgmr.msra.gmra.mrb[6].mxu0 %v21984_v34  ;;  %18797 = vmatprep.mubr.f32.mxu1 %v21979_v32 }
 0x39a   :  { %18839 = vmatprep.mubr.f32.mxu0 %v21979_v32  ;;  %19699 = vmatpush3.bf16.msra.mxu1 %v22099_v38 }
 0x39b   :  { %19723 = vmatpush3.bf16.msra.mxu0 %v22101_v40  ;;  %19701 = vmatprep.subr.bf16.mxu1 %v19700_v59 }
 0x39c   :  { %19725 = vmatprep.subr.bf16.mxu0 %v19724_v60 }
 0x3a0   :  { %18798 = vmatmul.mubr.f32.vlgmr.msra.gmra.mrb[4].mxu1 %v21989_v36 }
 0x3a1   :  { %18840 = vmatmul.mubr.f32.vlgmr.msra.gmra.mrb[6].mxu0 %v21989_v36  ;;  %18804 = vmatprep.mubr.f32.mxu1 %v21971_v28 }
 0x3a2   :  { %18846 = vmatprep.mubr.f32.mxu0 %v21971_v28  ;;  %19703 = vmatpush3.bf16.msra.mxu1 %v19700_v59 }
 0x3a3   :  { %19727 = vmatpush3.bf16.msra.mxu0 %v19724_v60  ;;  %19705 = vmatprep.subr.bf16.mxu1 %v22099_v38 }
 0x3a4   :  { %19729 = vmatprep.subr.bf16.mxu0 %v22101_v40 }
 0x3a8   :  { %18805 = vmatmul.mubr.f32.vlgmr.msra.gmra.mrb[4].mxu1 %v21981_v33 }
 0x3a9   :  { %18847 = vmatmul.mubr.f32.vlgmr.msra.gmra.mrb[6].mxu0 %v21981_v33  ;;  %18811 = vmatprep.mubr.f32.mxu1 %v21971_v28 }
 0x3aa   :  { %18853 = vmatprep.mubr.f32.mxu0 %v21971_v28  ;;  %19707 = vmatpush3.bf16.msra.mxu1 %v22099_v38 }
 0x3ab   :  { %19731 = vmatpush3.bf16.msra.mxu0 %v22101_v40 }
 0x3b0   :  { %18812 = vmatmul.mubr.f32.vlgmr.msra.gmra.mrb[4].mxu1 %v21981_v33 }
 0x3b1   :  { %18854 = vmatmul.mubr.f32.vlgmr.msra.gmra.mrb[6].mxu0 %v21981_v33  ;;  %18860 = vmatprep.mubr.f32.mxu1 %v21991_v37 }
 0x3b2   :  { %18902 = vmatprep.mubr.f32.mxu0 %v21991_v37 }
 0x457   :  { %v18729_v61 = vpop.f32.mrb[2].mxu1  ;;  %v22153_v62 = vpop.f32.mrb[4].mxu0 }
 0x458   :  { %v2602_v63 = vmul.f32 2.0, %v18729_v61  ;;  %v2089_v0 = vpop.f32.mrb[3].mxu1  ;;  %v22155_v1 = vpop.f32.mrb[5].mxu0 }
 0x459   :  { %v2601_v3 = vmul.f32 2.0, %v2089_v0 }
 0x45a   :  { %v2606_v2 = vsub.f32 %v2602_v63, %v21902_v48 }
 0x45b   :  { %v2605_v4 = vsub.f32 %v2601_v3, %v21897_v47  ;;  %v22205_v3 = vld [vmem:[%s29101_s2 + $0x18] sm:$0xff] }
 0x45c   :  { %4647 = vrot.lane.b32.xlu1 %v2606_v2, %s21803_s4  ;;  %v2603_v2 = vmul.f32 2.0, %v22155_v1  ;;  %v21806_v1 = vmov 0  }
 0x460   :  { %4645 = vrot.lane.b32.xlu1 %v2605_v4, %s21803_s4  ;;  %v29109_v4 = vmov 4  }
 0x483   :  { %v18813_v5 = vpop.f32.mrb[4].mxu1 }
 0x484   :  { %v3617_v6 = vand.u32 4294901760, %v18813_v5  ;;  %v22161_v7 = vpop.f32.mrb[6].mxu0  ;;  %v3101_v8 = vpop.f32.mrb[5].mxu1  ;;  %4679 = vrot.lane.b32.xlu1 %v18813_v5, %s21804_s17 }
 0x485   :  { %v4119_v9 = vand.u32 4294901760, %v22161_v7  ;;  %v3614_v10 = vand.u32 4294901760, %v3101_v8  ;;  %v22165_v48 = vpop.f32.mrb[7].mxu0 }
 0x486   :  { %v3709_v11 = vsub.f32 %v18813_v5, %v3617_v6  ;;  %v4116_v14 = vand.u32 4294901760, %v22165_v48  ;;  %v5149_v5 = vsel %vm4710_vm3, %v21937_v15, 0 }
 0x487   :  { %v4211_v47 = vsub.f32 %v22161_v7, %v4119_v9  ;;  %v19732_v16 = vpack.c.bf16 %v3617_v6, %v3614_v10  ;;  %v3702_v17 = vsub.f32 %v3101_v8, %v3614_v10  ;;  %v5151_v6 = vsel %vm4710_vm3, %v21958_v20, 0 }
 0x488   :  { %v3710_v22 = vand.u32 4294901760, %v3709_v11  ;;  %v19756_v23 = vpack.c.bf16 %v4119_v9, %v4116_v14  ;;  %v4204_v24 = vsub.f32 %v22165_v48, %v4116_v14  ;;  %4677 = vrot.lane.b32.xlu1 %v3101_v8, %s21804_s17  ;;  %v5148_v8 = vld [vmem:[%s29105_s6] sm:$0xff] }
 0x489   :  { %v4212_v25 = vand.u32 4294901760, %v4211_v47  ;;  %v3703_v26 = vand.u32 4294901760, %v3702_v17  ;;  %19733 = vmatprep.subr.bf16.mxu1 %v19732_v16  ;;  %v19740_v27 = vpack.c.bf16 %v3709_v11, %v3702_v17  ;;  %v22249_v10 = vand.u32 4294901760, %v5148_v8 }
 0x48a   :  { %v4205_v29 = vand.u32 4294901760, %v4204_v24  ;;  %19757 = vmatprep.subr.bf16.mxu0 %v19756_v23  ;;  %19735 = vmatpush3.bf16.msra.mxu1 %v19732_v16  ;;  %v3711_v31 = vsub.f32 %v3709_v11, %v3710_v22  ;;  %v19764_v35 = vpack.c.bf16 %v4211_v47, %v4204_v24  ;;  %v5155_v11 = vsel %vm4710_vm3, %v22205_v3, 0 }
 0x48b   :  { %19759 = vmatpush3.bf16.msra.mxu0 %v19756_v23  ;;  %v3704_v38 = vsub.f32 %v3702_v17, %v3703_v26  ;;  %v4213_v40 = vsub.f32 %v4211_v47, %v4212_v25  ;;  %v19748_v42 = vpack.c.bf16 %v3710_v22, %v3703_v26  ;;  %v22261_v47 = vand.u32 4294901760, %v5155_v11 }
 0x48c   :  { %v3712_v43 = vand.u32 4294901760, %v3711_v31  ;;  %v4206_v45 = vsub.f32 %v4204_v24, %v4205_v29  ;;  %v19772_v46 = vpack.c.bf16 %v4212_v25, %v4205_v29 }
 0x48d   :  { %18861 = vmatmul.mubr.f32.vlgmr.msra.gmra.mrb[6].mxu1 %v21997_v39  ;;  %v3705_v50 = vand.u32 4294901760, %v3704_v38  ;;  %v4214_v51 = vand.u32 4294901760, %v4213_v40  ;;  %29839 = vst [vmem:[#allocation20_spill] sm:$0xff] %v22261_v47  ;;  %v22273_v22 = vsub.f32 %v5155_v11, %v22261_v47  ;;  %v22297_v38 = vld [vmem:[%s29104_s5 + $0x80] sm:$0xff]  ;;  %v22302_v40 = vld [vmem:[%s29104_s5 + $0x88] sm:$0xff] }
 0x48e   :  { %18903 = vmatmul.mubr.f32.vlgmr.msra.gmra.mrb[8].mxu0 %v21997_v39  ;;  %18867 = vmatprep.mubr.f32.mxu1 %v21971_v28  ;;  %v4207_v53 = vand.u32 4294901760, %v4206_v45  ;;  %v29126_v45 = vand.u32 4294901760, %v22297_v38 }
 0x48f   :  { %18909 = vmatprep.mubr.f32.mxu0 %v21971_v28  ;;  %v19736_v55 = vpack.c.bf16 %v3712_v43, %v3705_v50  ;;  %29841 = vst [vmem:[#allocation22_spill] sm:$0xff] %v22273_v22  ;;  %v22283_v26 = vand.u32 4294901760, %v22273_v22  ;;  %v22316_v50 = vld [vmem:[%s29104_s5 + $0x8] sm:$0xff] }
 0x490   :  { %v19760_v57 = vpack.c.bf16 %v4214_v51, %v4207_v53  ;;  %v22322_v53 = vld [vmem:[%s29104_s5 + $0x90] sm:$0xff] }
 0x491   :  { %19737 = vmatprep.subr.bf16.mxu1 %v19736_v55  ;;  %29845 = vst [vmem:[#allocation26_spill] sm:$0xff] %v22283_v26  ;;  %v5256_v31 = vsub.f32 %v22273_v22, %v22283_v26 }
 0x492   :  { %19761 = vmatprep.subr.bf16.mxu0 %v19760_v57  ;;  %19739 = vmatpush3.bf16.msra.mxu1 %v19736_v55 }
 0x493   :  { %19763 = vmatpush3.bf16.msra.mxu0 %v19760_v57  ;;  %19741 = vmatprep.subr.bf16.mxu1 %v19740_v27  ;;  %v22324_v55 = vand.u32 4294901760, %v5256_v31 }
 0x494   :  { %19765 = vmatprep.subr.bf16.mxu0 %v19764_v35 }
 0x495   :  { %18868 = vmatmul.mubr.f32.vlgmr.msra.gmra.mrb[6].mxu1 %v21981_v33  ;;  %29847 = vst [vmem:[#allocation28_spill] sm:$0xff] %v22324_v55 }
 0x496   :  { %18910 = vmatmul.mubr.f32.vlgmr.msra.gmra.mrb[8].mxu0 %v21981_v33  ;;  %19743 = vmatpush3.bf16.msra.mxu1 %v19740_v27  ;;  %v5265_v27 = vsub.f32 %v5148_v8, %v22249_v10 }
 0x497   :  { %18874 = vmatprep.mubr.f32.mxu1 %v21975_v30  ;;  %19767 = vmatpush3.bf16.msra.mxu0 %v19764_v35 }
 0x498   :  { %18916 = vmatprep.mubr.f32.mxu0 %v21975_v30  ;;  %19745 = vmatprep.subr.bf16.mxu1 %v19732_v16  ;;  %v22292_v35 = vand.u32 4294901760, %v5265_v27 }
 0x499   :  { %19769 = vmatprep.subr.bf16.mxu0 %v19756_v23 }
 0x49a   :  { %v5267_v57 = vsub.f32 %v5265_v27, %v22292_v35 }
 0x49d   :  { %18875 = vmatmul.mubr.f32.vlgmr.msra.gmra.mrb[6].mxu1 %v21984_v34 }
 0x49e   :  { %19747 = vmatpush3.bf16.msra.mxu1 %v19732_v16  ;;  %18917 = vmatmul.mubr.f32.vlgmr.msra.gmra.mrb[8].mxu0 %v21984_v34 }
 0x49f   :  { %19771 = vmatpush3.bf16.msra.mxu0 %v19756_v23  ;;  %18881 = vmatprep.mubr.f32.mxu1 %v21979_v32 }
 0x4a0   :  { %19749 = vmatprep.subr.bf16.mxu1 %v19748_v42  ;;  %18923 = vmatprep.mubr.f32.mxu0 %v21979_v32 }
 0x4a1   :  { %19773 = vmatprep.subr.bf16.mxu0 %v19772_v46 }
 0x4a5   :  { %18882 = vmatmul.mubr.f32.vlgmr.msra.gmra.mrb[6].mxu1 %v21989_v36 }
 0x4a6   :  { %19751 = vmatpush3.bf16.msra.mxu1 %v19748_v42  ;;  %18924 = vmatmul.mubr.f32.vlgmr.msra.gmra.mrb[8].mxu0 %v21989_v36  ;;  %v22307_v42 = vld [vmem:[%s29104_s5] sm:$0xff] }
 0x4a7   :  { %19775 = vmatpush3.bf16.msra.mxu0 %v19772_v46  ;;  %18888 = vmatprep.mubr.f32.mxu1 %v21971_v28  ;;  %v29121_v46 = vand.u32 4294901760, %v22302_v40  ;;  %v29120_v51 = vand.u32 4294901760, %v22307_v42 }
 0x4a8   :  { %19753 = vmatprep.subr.bf16.mxu1 %v19732_v16  ;;  %18930 = vmatprep.mubr.f32.mxu0 %v21971_v28 }
 0x4a9   :  { %19777 = vmatprep.subr.bf16.mxu0 %v19756_v23 }
 0x4ad   :  { %18889 = vmatmul.mubr.f32.vlgmr.msra.gmra.mrb[6].mxu1 %v21981_v33 }
 0x4ae   :  { %19755 = vmatpush3.bf16.msra.mxu1 %v19732_v16  ;;  %18931 = vmatmul.mubr.f32.vlgmr.msra.gmra.mrb[8].mxu0 %v21981_v33 }
 0x4af   :  { %19779 = vmatpush3.bf16.msra.mxu0 %v19756_v23  ;;  %18895 = vmatprep.mubr.f32.mxu1 %v21971_v28 }
 0x4b0   :  { %18937 = vmatprep.mubr.f32.mxu0 %v21971_v28  ;;  %18940 = vmatprep.subr.mxu1 %v22249_v10 }
 0x4b5   :  { %18896 = vmatmul.mubr.f32.vlgmr.msra.gmra.mrb[6].mxu1 %v21981_v33 }
 0x4b6   :  { %18938 = vmatmul.mubr.f32.vlgmr.msra.gmra.mrb[8].mxu0 %v21981_v33  ;;  %18941 = vmatpush3.msra.mxu1 %v22249_v10 }
 0x588   :  { %v18897_v58 = vpop.f32.mrb[6].mxu1 }
 0x589   :  { %v4618_v54 = vmul.f32 2.0, %v18897_v58  ;;  %v18939_v56 = vpop.f32.mrb[8].mxu0  ;;  %v4105_v59 = vpop.f32.mrb[7].mxu1  ;;  %v29116_v58 = vand.u32 4294901760, %v22316_v50 }
 0x58a   :  { %v4617_v60 = vmul.f32 2.0, %v4105_v59  ;;  %v4607_v61 = vpop.f32.mrb[9].mxu0  ;;  %v22337_v59 = vld [vmem:[%s29104_s5 + $0x10] sm:$0xff] }
 0x58b   :  { %v4622_v63 = vsub.f32 %v4618_v54, %v21949_v19  ;;  %v2604_v19 = vmul.f32 2.0, %v22153_v62  ;;  %v22331_v54 = vld [vmem:[%s29104_s5 + $0x98] sm:$0xff] }
 0x58c   :  { %v4621_v0 = vsub.f32 %v4617_v60, %v21944_v18  ;;  %v2607_v18 = vsub.f32 %v2603_v2, %v21907_v49  ;;  %v4619_v49 = vmul.f32 2.0, %v4607_v61  ;;  %v22343_v60 = vsub.f32 %v22297_v38, %v29126_v45  ;;  %v22359_v2 = vld [vmem:[%s29104_s5 + $0x18] sm:$0xff] }
 0x58d   :  { %4695 = vrot.lane.b32.xlu0 %v4622_v63, %s21805_s18  ;;  %v22348_v61 = vsub.f32 %v22302_v40, %v29121_v46  ;;  %v22353_v63 = vsub.f32 %v22307_v42, %v29120_v51  ;;  %v29119_v11 = vand.u32 4294901760, %v22359_v2  ;;  %v22475_v45 = vld [vmem:[%s29104_s5 + $0x38] sm:$0xff] }
 0x58e   :  { %4693 = vrot.lane.b32.xlu1 %v4621_v0, %s21805_s18  ;;  %v4623_v62 = vsub.f32 %v4619_v49, %v22068_v12  ;;  %v29112_v0 = vand.u32 4294901760, %v22331_v54  ;;  %v22376_v49 = vld [vmem:[%s29104_s5 + $0xa0] sm:$0xff] }
 0x591   :  { %4665 = vrot.lane.b32.xlu0 %v22068_v12, %s21801_s29  ;;  %v22232_v12 = vand.u32 4294901760, %v5149_v5 }
 0x592   :  { %4633 = vrot.lane.b32.xlu1 %v22038_v44, %s21802_s13  ;;  %v2608_v44 = vsub.f32 %v2604_v19, %v21914_v52  ;;  %v22365_v19 = vsub.f32 %v22316_v50, %v29116_v58  ;;  %v22438_v58 = vld [vmem:[%s29104_s5 + $0xb8] sm:$0xff] }
 0x593   :  { %29832 = vst [vmem:[#allocation13_spill] sm:$0xff] %v22232_v12 }
 0x594   :  { %v29117_v8 = vand.u32 4294901760, %v22365_v19 }
 0x595   :  { %4787 = vperm.xlu0 %21706, %v22205_v3  }
 0x596   :  { %4649 = vrot.lane.b32.xlu1 %v2607_v18, %s21803_s4  ;;  %v5268_v18 = vand.u32 4294901760, %v5267_v57 }
 0x598   :  { %18948 = vmatprep.subr.mxu1 %v5268_v18 }
 0x599   :  { %4635 = vrot.lane.b32.xlu0 %v22035_v41, %s21802_s13  ;;  %v4620_v41 = vmul.f32 2.0, %v18939_v56  ;;  %v29115_v56 = vand.u32 4294901760, %v22322_v53  ;;  %s21817_s13 = smov 116  }
 0x59a   :  { %4767 = vperm.xlu1 %21705, %v22205_v3   ;;  %21707 = vset.pattern.permute.xlu0 %v21806_v1 }
 0x59b   :  { %v4624_v52 = vsub.f32 %v4620_v41, %v22073_v13  ;;  %v29114_v41 = vand.u32 4294901760, %v22343_v60 }
 0x59d   :  { %4651 = vrot.lane.b32.xlu0 %v2608_v44, %s21803_s4  ;;  %v29111_v44 = vand.u32 4294901760, %v22337_v59 }
 0x59e   :  { %4681 = vrot.lane.b32.xlu1 %v22165_v48, %s21804_s17 }
 0x59f   :  { %21708 = vset.pattern.permute.xlu1 %v21806_v1  ;;  %v22370_v1 = vsub.f32 %v22322_v53, %v29115_v56  ;;  %v22433_v56 = vld [vmem:[%s29104_s5 + $0xb0] sm:$0xff] }
 0x5a1   :  { %4683 = vrot.lane.b32.xlu0 %v22161_v7, %s21804_s17  ;;  %v22236_v7 = vand.u32 4294901760, %v5151_v6 }
 0x5a2   :  { %4667 = vrot.lane.b32.xlu1 %v22073_v13, %s21801_s29  ;;  %v22239_v13 = vsub.f32 %v5149_v5, %v22232_v12  ;;  %v22385_v5 = vsub.f32 %v22331_v54, %v29112_v0 }
 0x5a3   :  { %29833 = vst [vmem:[#allocation14_spill] sm:$0xff] %v22236_v7  ;;  %v22245_v9 = vsub.f32 %v5151_v6, %v22236_v7  ;;  %v22390_v6 = vld [vmem:[%s29104_s5 + $0xa8] sm:$0xff] }
 0x5a4   :  { %29834 = vst [vmem:[#allocation15_spill] sm:$0xff] %v22239_v13  ;;  %v22252_v48 = vand.u32 4294901760, %v22239_v13  ;;  %v29122_v57 = vand.u32 4294901760, %v22385_v5 }
 0x5a5   :  { %4732 = vperm.xlu0 %21707, %v21937_v15   ;;  %29835 = vst [vmem:[#allocation16_spill] sm:$0xff] %v22245_v9  ;;  %v5153_v15 = vsel %vm4710_vm3, %v21963_v21, 0  ;;  %v22259_v14 = vand.u32 4294901760, %v22245_v9 }
 0x5a6   :  { %4697 = vrot.lane.b32.xlu1 %v4623_v62, %s21805_s18  ;;  %29836 = vst [vmem:[#allocation17_spill] sm:$0xff] %v22252_v48  ;;  %v5226_v21 = vsub.f32 %v22239_v13, %v22252_v48  ;;  %v29113_v62 = vand.u32 4294901760, %v22348_v61 }
 0x5a7   :  { %29838 = vst [vmem:[#allocation19_spill] sm:$0xff] %v22259_v14  ;;  %v5236_v17 = vsub.f32 %v22245_v9, %v22259_v14 }
 0x5a8   :  { %v22275_v23 = vand.u32 4294901760, %v5226_v21  ;;  %v22398_v21 = vsub.f32 %v22337_v59, %v29111_v44  ;;  %v19908_v31 = vpack.c.bf16 %v29113_v62, %v29114_v41  ;;  %v22416_v44 = vld [vmem:[%s29104_s5 + $0x28] sm:$0xff]  ;;  %v22427_v62 = vsub.f32 %v22359_v2, %v29119_v11 }
 0x5a9   :  { %4737 = vperm.xlu0 %21707, %v21958_v20   ;;  %v22254_v20 = vand.u32 4294901760, %v5153_v15  ;;  %v22280_v25 = vand.u32 4294901760, %v5236_v17  ;;  %v22403_v17 = vld [vmem:[%s29104_s5 + $0x20] sm:$0xff]  ;;  %v29125_v41 = vand.u32 4294901760, %v22390_v6  ;;  %v29130_v46 = vand.u32 4294901760, %v22416_v44 }
 0x5aa   :  { %4699 = vrot.lane.b32.xlu1 %v4624_v52, %s21805_s18  ;;  %29842 = vst [vmem:[#allocation23_spill] sm:$0xff] %v22275_v23  ;;  %18942 = vmatprep.mubr.f32.mxu1 %v22275_v23  ;;  %v29118_v52 = vand.u32 4294901760, %v22353_v63  ;;  %v29129_v0 = vand.u32 4294901760, %v22398_v21  ;;  %v29127_v11 = vand.u32 4294901760, %v22403_v17  ;;  %v29128_v51 = vand.u32 4294901760, %v22427_v62 }
 0x5ab   :  { %29837 = vst [vmem:[#allocation18_spill] sm:$0xff] %v22254_v20  ;;  %v22267_v16 = vsub.f32 %v5153_v15, %v22254_v20  ;;  %29844 = vst [vmem:[#allocation25_spill] sm:$0xff] %v22280_v25  ;;  %18943 = vmatmul.mubr.f32.vlgmr.msra.gmra.mrb[8].mxu1 %v22280_v25  ;;  %v29123_v15 = vand.u32 4294901760, %v22370_v1  ;;  %19909 = vmatprep.subr.bf16.mxu0 %v19908_v31  ;;  %v29143_v23 = vand.u32 4294901760, %v22475_v45 }
 0x5ac   :  { %18949 = vmatpush3.msra.mxu1 %v5268_v18  ;;  %v19910_v18 = vpack.c.bf16 %v29117_v8, %v29118_v52  ;;  %v22468_v31 = vsub.f32 %v22403_v17, %v29127_v11  ;;  %v29852_v11 = vand.u32 4294901760, %v22438_v58 }
 0x5ad   :  { %4747 = vperm.xlu0 %21707, %v22205_v3   ;;  %29840 = vst [vmem:[#allocation21_spill] sm:$0xff] %v22267_v16  ;;  %v22278_v24 = vand.u32 4294901760, %v22267_v16  ;;  %18956 = vmatprep.subr.mxu1 %v5265_v27  ;;  %v19912_v8 = vpack.c.bf16 %v29122_v57, %v29123_v15  ;;  %v22462_v57 = vld [vmem:[%s29104_s5 + $0x30] sm:$0xff]  ;;  %v22486_v15 = vsub.f32 %v22416_v44, %v29130_v46 }
 0x5ae   :  { %19911 = vmatpush3.bf16.msra.mxu0 %v19910_v18  ;;  %v19914_v18 = vpack.c.bf16 %v29128_v51, %v29129_v0  ;;  %v29850_v51 = vand.u32 4294901760, %v22433_v56  ;;  %v22505_v46 = vsub.f32 %v22438_v58, %v29852_v11  ;;  %v22522_v11 = vld [vmem:[%s29104_s5 + $0x40] sm:$0xff]  ;;  %v29856_v32 = vand.u32 4294901760, %v22462_v57 }
 0x5af   :  { %29843 = vst [vmem:[#allocation24_spill] sm:$0xff] %v22278_v24  ;;  %v5246_v29 = vsub.f32 %v22267_v16, %v22278_v24  ;;  %19913 = vmatprep.subr.bf16.mxu0 %v19912_v8  ;;  %29849 = vst [vmem:[#allocation30_spill] sm:$0xff] %v22486_v15  ;;  %v29158_v33 = vand.u32 4294901760, %v22522_v11 }
 0x5b0   :  { %v22500_v0 = vsub.f32 %v22433_v56, %v29850_v51  ;;  %29853 = vst [vmem:[#allocation32_spill] sm:$0xff] %v22505_v46  ;;  %v29142_v51 = vand.u32 4294901760, %v22486_v15  ;;  %v22529_v34 = vsub.f32 %v22462_v57, %v29856_v32  ;;  %v22545_v32 = vsub.f32 %v22475_v45, %v29143_v23 }
 0x5b1   :  { %21710 = vset.pattern.permute.xlu0 %v29109_v4  ;;  %v22309_v43 = vand.u32 4294901760, %v5246_v29  ;;  %v22405_v29 = vpop.permute.xlu1 %4775  ;;  %v29124_v4 = vand.u32 4294901760, %v22376_v49 }
 0x5b2   :  { %29848 = vst [vmem:[#allocation29_spill] sm:$0xff] %v22405_v29  ;;  %29851 = vst [vmem:[#allocation31_spill] sm:$0xff] %v22500_v0  ;;  %19915 = vmatpush3.bf16.msra.mxu0 %v19914_v18  ;;  %v29858_v18 = vand.u32 4294901760, %v22468_v31 }
 0x5b3   :  { %29846 = vst [vmem:[#allocation27_spill] sm:$0xff] %v22309_v43  ;;  %18945 = vmatprep.mubr.f32.mxu1 %v22309_v43  ;;  %v22448_v52 = vsub.f32 %v22376_v49, %v29124_v4  ;;  %v22511_v43 = vld [vmem:[%s29104_s5 + $0xc8] sm:$0xff]  ;;  %29857 = vst [vmem:[#allocation33_spill] sm:$0xff] %v22529_v34 }
 0x5b4   :  { %18946 = vmatmul.mubr.f32.gmra.mrb[10].mxu1 %v22324_v55  ;;  %v19918_v36 = vpack.c.bf16 %v29142_v51, %v29858_v18  ;;  %29859 = vst [vmem:[#allocation34_spill] sm:$0xff] %v22545_v32  ;;  %v22551_v55 = vld [vmem:[%s29104_s5 + $0xd0] sm:$0xff]  ;;  %v29860_v18 = vand.u32 4294901760, %v22500_v0  ;;  %v29861_v51 = vand.u32 4294901760, %v22505_v46  ;;  %v29863_v28 = vand.u32 4294901760, %v22511_v43 }
 0x5b5   :  { %18950 = vmatprep.mubr.f32.mxu1 %v22232_v12  ;;  %v22493_v4 = vpop.permute.xlu1 %4661  ;;  %v29869_v15 = vand.u32 4294901760, %v22551_v55 }
 0x5b6   :  { %v19920_v23 = vpack.c.bf16 %v29861_v51, %v29860_v18  ;;  %v22576_v39 = vsub.f32 %v22511_v43, %v29863_v28  ;;  %v22582_v18 = vld [vmem:[%s29104_s5 + $0x50] sm:$0xff]  ;;  %v22597_v51 = vld [vmem:[%s29104_s5 + $0x58] sm:$0xff] }
 0x5b7   :  { %v29175_v37 = vand.u32 4294901760, %v22597_v51 }
 0x5b8   :  { %18951 = vmatmul.mubr.f32.vlgmr.msra.gmra.mrb[8].mxu1 %v22236_v7  ;;  %29864 = vst [vmem:[#allocation35_spill] sm:$0xff] %v22576_v39 }
 0x5b9   :  { %18953 = vmatprep.mubr.f32.mxu1 %v22254_v20  ;;  %18957 = vmatpush3.msra.mxu1 %v5265_v27  ;;  %v22456_v27 = vsub.f32 %v22390_v6, %v29125_v41  ;;  %v22491_v41 = vld [vmem:[%s29104_s5 + $0xc0] sm:$0xff] }
 0x5ba   :  { %18964 = vmatprep.subr.mxu1 %v22249_v10 }
 0x5bb   :  { %v29855_v8 = vand.u32 4294901760, %v22456_v27 }
 0x5bc   :  { %18954 = vmatmul.mubr.f32.gmra.mrb[10].mxu1 %v22261_v47 }
 0x5bd   :  { %18958 = vmatprep.mubr.f32.mxu1 %v22239_v13  ;;  %v29854_v13 = vand.u32 4294901760, %v22448_v52 }
 0x5bf   :  { %v19916_v25 = vpack.c.bf16 %v29855_v8, %v29854_v13  ;;  %v22535_v8 = vld [vmem:[%s29104_s5 + $0x48] sm:$0xff]  ;;  %v29867_v13 = vand.u32 4294901760, %v22545_v32 }
 0x5c0   :  { %18959 = vmatmul.mubr.f32.vlgmr.msra.gmra.mrb[8].mxu1 %v22245_v9  ;;  %v29862_v9 = vand.u32 4294901760, %v22491_v41  ;;  %v29868_v0 = vand.u32 4294901760, %v22535_v8 }
 0x5c1   :  { %19917 = vmatprep.subr.bf16.mxu0 %v19916_v25  ;;  %v22556_v25 = vld [vmem:[%s29104_s5 + $0xd8] sm:$0xff]  ;;  %18961 = vmatprep.mubr.f32.mxu1 %v22267_v16  ;;  %v22590_v16 = vsub.f32 %v22522_v11, %v29158_v33 }
 0x5c2   :  { %18965 = vmatpush3.msra.mxu1 %v22249_v10  ;;  %v22568_v30 = vsub.f32 %v22491_v41, %v29862_v9  ;;  %v22584_v9 = vpop.permute.xlu1 %4759  ;;  %19919 = vmatpush3.bf16.msra.mxu0 %v19918_v36  ;;  %v29866_v36 = vand.u32 4294901760, %v22529_v34  ;;  %v22608_v28 = vsub.f32 %v22535_v8, %v29868_v0  ;;  %v29874_v0 = vand.u32 4294901760, %v22576_v39 }
 0x5c3   :  { %18972 = vmatprep.subr.mxu1 %v22292_v35  ;;  %29865 = vst [vmem:[#allocation36_spill] sm:$0xff] %v22584_v9  ;;  %19921 = vmatprep.subr.bf16.mxu0 %v19920_v23  ;;  %v22615_v23 = vsub.f32 %v22551_v55, %v29869_v15  ;;  %v29876_v39 = vand.u32 4294901760, %v22590_v16 }
 0x5c4   :  { %18962 = vmatmul.mubr.f32.gmra.mrb[10].mxu1 %v22273_v22  ;;  %v19922_v46 = vpack.c.bf16 %v29867_v13, %v29866_v36  ;;  %v29871_v22 = vand.u32 4294901760, %v22556_v25  ;;  %v29171_v36 = vand.u32 4294901760, %v22582_v18  ;;  %v29873_v33 = vand.u32 4294901760, %v22568_v30 }
 0x5c5   :  { %18966 = vmatprep.mubr.f32.mxu1 %v22252_v48  ;;  %29870 = vst [vmem:[#allocation37_spill] sm:$0xff] %v22615_v23  ;;  %v29172_v48 = vand.u32 4294901760, %v22608_v28  ;;  %v29174_v15 = vand.u32 4294901760, %v22615_v23 }
 0x5c6   :  { %v22620_v13 = vsub.f32 %v22556_v25, %v29871_v22  ;;  %v19924_v32 = vpack.c.bf16 %v29874_v0, %v29873_v33  ;;  %19923 = vmatpush3.bf16.msra.mxu0 %v19922_v46  ;;  %v22634_v22 = vsub.f32 %v22582_v18, %v29171_v36  ;;  %v22644_v46 = vsub.f32 %v22597_v51, %v29175_v37  ;;  %v22646_v0 = vpop.permute.xlu1 %4779 }
 0x5c7   :  { %v19926_v33 = vpack.c.bf16 %v29172_v48, %v29876_v39  ;;  %29878 = vst [vmem:[#allocation41_spill] sm:$0xff] %v22646_v0  ;;  %v29879_v48 = vand.u32 4294901760, %v22297_v38 }
 0x5c8   :  { %29872 = vst [vmem:[#allocation38_spill] sm:$0xff] %v22620_v13  ;;  %v29173_v34 = vand.u32 4294901760, %v22620_v13  ;;  %29875 = vst [vmem:[#allocation39_spill] sm:$0xff] %v22634_v22  ;;  %18967 = vmatmul.mubr.f32.vlgmr.msra.gmra.mrb[8].mxu1 %v22259_v14  ;;  %19925 = vmatprep.subr.bf16.mxu0 %v19924_v32  ;;  %v29177_v36 = vand.u32 4294901760, %v22634_v22  ;;  %v29176_v39 = vand.u32 4294901760, %v22644_v46  ;;  %v29919_v13 = vand.u32 4294901760, %v22535_v8 }
 0x5c9   :  { %29877 = vst [vmem:[#allocation40_spill] sm:$0xff] %v22644_v46  ;;  %18969 = vmatprep.mubr.f32.mxu1 %v22278_v24  ;;  %18973 = vmatpush3.msra.mxu1 %v22292_v35 }
 0x5ca   :  { %v19928_v32 = vpack.c.bf16 %v29173_v34, %v29174_v15  ;;  %18980 = vmatprep.subr.mxu1 %v22249_v10  ;;  %19927 = vmatpush3.bf16.msra.mxu0 %v19926_v33  ;;  %v19930_v35 = vpack.c.bf16 %v29176_v39, %v29177_v36  ;;  %v29880_v34 = vand.u32 4294901760, %v22302_v40  ;;  %v22669_v37 = vpop.permute.xlu1 %4763  ;;  %v22674_v33 = vpop.permute.xlu0 %4755 }
 0x5cb   :  { %29882 = vst [vmem:[#allocation43_spill] sm:$0xff] %v22669_v37  ;;  %29883 = vst [vmem:[#allocation44_spill] sm:$0xff] %v22674_v33 }
 0x5cc   :  { %18970 = vmatmul.mubr.f32.gmra.mrb[10].mxu1 %v22283_v26  ;;  %19929 = vmatprep.subr.bf16.mxu0 %v19928_v32  ;;  %v22667_v15 = vpack.c.bf16 %v29880_v34, %v29879_v48  ;;  %v29884_v34 = vand.u32 4294901760, %v22307_v42  ;;  %v29885_v48 = vand.u32 4294901760, %v22316_v50  ;;  %v29887_v32 = vand.u32 4294901760, %v22322_v53 }
 0x5cd   :  { %18974 = vmatprep.mubr.f32.mxu1 %v22232_v12  ;;  %v29890_v26 = vand.u32 4294901760, %v22337_v59  ;;  %v29891_v42 = vand.u32 4294901760, %v22359_v2  ;;  %v29893_v53 = vand.u32 4294901760, %v22376_v49  ;;  %v29896_v59 = vand.u32 4294901760, %v22403_v17 }
 0x5ce   :  { %29881 = vst [vmem:[#allocation42_spill] sm:$0xff] %v22667_v15  ;;  %19931 = vmatpush3.bf16.msra.mxu0 %v19930_v35  ;;  %v4630_v38 = vpop.permute.xlu1 %4629  ;;  %v22683_v40 = vpack.c.bf16 %v29885_v48, %v29884_v34  ;;  %v29888_v35 = vand.u32 4294901760, %v22331_v54  ;;  %v22691_v39 = vpop.permute.xlu0 %4663  ;;  %v29894_v54 = vand.u32 4294901760, %v22390_v6  ;;  %v29897_v2 = vand.u32 4294901760, %v22416_v44  ;;  %v22734_v44 = vld [vmem:[%s29104_s5 + $0xe8] sm:$0xff] }
 0x5cf   :  { %v22699_v50 = vpack.c.bf16 %v29891_v42, %v29890_v26  ;;  %v29900_v49 = vand.u32 4294901760, %v22433_v56  ;;  %v29901_v6 = vand.u32 4294901760, %v22438_v58  ;;  %v22741_v58 = vld [vmem:[%s29104_s5 + $0x60] sm:$0xff]  ;;  %v22746_v56 = vld [vmem:[%s29104_s5 + $0x68] sm:$0xff]  ;;  %v29907_v24 = vand.u32 4294901760, %v22734_v44 }
 0x5d0   :  { %18975 = vmatmul.mubr.f32.vlgmr.msra.gmra.mrb[8].mxu1 %v22236_v7  ;;  %29886 = vst [vmem:[#allocation45_spill] sm:$0xff] %v22683_v40  ;;  %v22707_v34 = vpack.c.bf16 %v29894_v54, %v29893_v53  ;;  %v22715_v26 = vpack.c.bf16 %v29897_v2, %v29896_v59  ;;  %v29184_v54 = vand.u32 4294901760, %v22741_v58  ;;  %v29187_v59 = vand.u32 4294901760, %v22746_v56 }
 0x5d1   :  { %18977 = vmatprep.mubr.f32.mxu1 %v22254_v20  ;;  %18981 = vmatpush3.msra.mxu1 %v22249_v10  ;;  %v22689_v10 = vpack.c.bf16 %v29888_v35, %v29887_v32  ;;  %29892 = vst [vmem:[#allocation47_spill] sm:$0xff] %v22699_v50  ;;  %v22724_v32 = vpack.c.bf16 %v29901_v6, %v29900_v49  ;;  %v22729_v35 = vld [vmem:[%s29104_s5 + $0xe0] sm:$0xff]  ;;  %v29903_v2 = vand.u32 4294901760, %v22462_v57  ;;  %v29904_v49 = vand.u32 4294901760, %v22475_v45 }
 0x5d2   :  { %19781 = vmatprep.subr.bf16.mxu1 %v22667_v15  ;;  %v4648_v36 = vpop.permute.xlu1 %4647  ;;  %29895 = vst [vmem:[#allocation48_spill] sm:$0xff] %v22707_v34  ;;  %29898 = vst [vmem:[#allocation49_spill] sm:$0xff] %v22715_v26  ;;  %v22717_v48 = vpop.permute.xlu0 %4783  ;;  %v29181_v42 = vand.u32 4294901760, %v22729_v35  ;;  %v22765_v14 = vsub.f32 %v22734_v44, %v29907_v24  ;;  %v22771_v57 = vsub.f32 %v22741_v58, %v29184_v54  ;;  %v5071_v24 = vld [vmem:[%s29104_s5 + $0xf8] sm:$0xff] }
 0x5d3   :  { %29889 = vst [vmem:[#allocation46_spill] sm:$0xff] %v22689_v10  ;;  %29899 = vst [vmem:[#allocation50_spill] sm:$0xff] %v22717_v48  ;;  %v22755_v6 = vpack.c.bf16 %v29904_v49, %v29903_v2  ;;  %v22776_v45 = vsub.f32 %v22746_v56, %v29187_v59  ;;  %v5070_v2 = vld [vmem:[%s29104_s5 + $0xf0] sm:$0xff] }
 0x5d4   :  { %18978 = vmatmul.mubr.f32.gmra.mrb[10].mxu1 %v22261_v47  ;;  %29902 = vst [vmem:[#allocation51_spill] sm:$0xff] %v22724_v32  ;;  %v22760_v53 = vsub.f32 %v22729_v35, %v29181_v42  ;;  %29908 = vst [vmem:[#allocation54_spill] sm:$0xff] %v22765_v14  ;;  %v5832_v54 = vand.u32 4294901760, %v5070_v2  ;;  %v5054_v59 = vld [vmem:[%s29104_s5 + $0x70] sm:$0xff]  ;;  %v29912_v42 = vand.u32 4294901760, %v22511_v43  ;;  %v29915_v15 = vand.u32 4294901760, %v22765_v14 }
 0x5d5   :  { %18982 = vmatprep.mubr.f32.mxu1 %v22232_v12  ;;  %29905 = vst [vmem:[#allocation52_spill] sm:$0xff] %v22755_v6  ;;  %29909 = vst [vmem:[#allocation55_spill] sm:$0xff] %v22771_v57 }
 0x5d6   :  { %v4646_v17 = vpop.permute.xlu1 %4645  ;;  %29906 = vst [vmem:[#allocation53_spill] sm:$0xff] %v22760_v53  ;;  %29910 = vst [vmem:[#allocation56_spill] sm:$0xff] %v22776_v45  ;;  %v4632_v12 = vpop.permute.xlu0 %4631  ;;  %v22805_v22 = vsub.f32 %v5070_v2, %v5832_v54 }
 0x5d8   :  { %18983 = vmatmul.mubr.f32.vlgmr.msra.gmra.mrb[8].mxu1 %v22236_v7  ;;  %v5055_v7 = vld [vmem:[%s29104_s5 + $0x78] sm:$0xff]  ;;  %29916 = vst [vmem:[#allocation58_spill] sm:$0xff] %v22805_v22 }
 0x5d9   :  { %19783 = vmatpush3.bf16.msra.mxu1 %v22683_v40  ;;  %18985 = vmatprep.mubr.f32.mxu1 %v22254_v20  ;;  %v5835_v20 = vand.u32 4294901760, %v5071_v24  ;;  %v29914_v40 = vand.u32 4294901760, %v22760_v53 }
 0x5da   :  { %19785 = vmatprep.subr.bf16.mxu1 %v22689_v10  ;;  %v4680_v49 = vpop.permute.xlu1 %4679 }
 0x5db   :  { %v19932_v46 = vpack.c.bf16 %v29915_v15, %v29914_v40  ;;  %v21758_v15 = vld [vmem:[%s29099_s0 + $0x8] sm:$0xff] }
 0x5dc   :  { %18986 = vmatmul.mubr.f32.gmra.mrb[10].mxu1 %v22261_v47  ;;  %v29911_v47 = vand.u32 4294901760, %v22491_v41  ;;  %v29921_v41 = vand.u32 4294901760, %v22771_v57  ;;  %v4707_v40 = vsel %vm4705_vm4, %v21758_v15, %v4632_v12 }
 0x5dd   :  { %19787 = vmatpush3.bf16.msra.mxu1 %v22699_v50  ;;  %v5787_v50 = vand.u32 4294901760, %v5055_v7  ;;  %19933 = vmatprep.subr.bf16.mxu0 %v19932_v46  ;;  %v29927_v46 = vand.u32 4294901760, %v22551_v55 }
 0x5de   :  { %19789 = vmatprep.subr.bf16.mxu1 %v22707_v34  ;;  %v5784_v34 = vand.u32 4294901760, %v5054_v59  ;;  %v22799_v10 = vpack.c.bf16 %v29912_v42, %v29911_v47  ;;  %v29922_v47 = vand.u32 4294901760, %v22776_v45 }
 0x5df   :  { %v22821_v23 = vsub.f32 %v5055_v7, %v5787_v50 }
 0x5e0   :  { %29913 = vst [vmem:[#allocation57_spill] sm:$0xff] %v22799_v10  ;;  %v19934_v43 = vpack.c.bf16 %v29922_v47, %v29921_v41  ;;  %v22819_v42 = vsub.f32 %v5054_v59, %v5784_v34  ;;  %v29930_v47 = vand.u32 4294901760, %v22582_v18 }
 0x5e1   :  { %19791 = vmatpush3.bf16.msra.mxu1 %v22715_v26  ;;  %v29918_v26 = vand.u32 4294901760, %v22522_v11  ;;  %29924 = vst [vmem:[#allocation62_spill] sm:$0xff] %v22821_v23  ;;  %v21759_v11 = vld [vmem:[%s29099_s0] sm:$0xff]  ;;  %v29218_v59 = vand.u32 4294901760, %v22821_v23 }
 0x5e2   :  { %19793 = vmatprep.subr.bf16.mxu1 %v22724_v32  ;;  %v22807_v32 = vsub.f32 %v5071_v24, %v5835_v20  ;;  %29923 = vst [vmem:[#allocation61_spill] sm:$0xff] %v22819_v42  ;;  %v4706_v8 = vsel %vm4705_vm4, %v21759_v11, %v4630_v38  ;;  %19935 = vmatpush3.bf16.msra.mxu0 %v19934_v43  ;;  %v29219_v12 = vand.u32 4294901760, %v22819_v42  ;;  %v4678_v38 = vpop.permute.xlu1 %4677  ;;  %v29928_v24 = vand.u32 4294901760, %v22556_v25 }
 0x5e3   :  { %v22840_v2 = vsel %vm4710_vm3, %v4706_v8, %v4646_v17  ;;  %v29931_v17 = vand.u32 4294901760, %v22597_v51 }
 0x5e4   :  { %29917 = vst [vmem:[#allocation59_spill] sm:$0xff] %v22807_v32  ;;  %v29220_v7 = vand.u32 4294901760, %v22807_v32  ;;  %29926 = vst [vmem:[#allocation64_spill] sm:$0xff] %v22840_v2  ;;  %v22847_v41 = vpack.c.bf16 %v29928_v24, %v29927_v46  ;;  %v19938_v55 = vpack.c.bf16 %v29218_v59, %v29219_v12  ;;  %v4716_v51 = vsel %vm4715_vm5, %v22840_v2, %v22493_v4 }
 0x5e5   :  { %19795 = vmatpush3.bf16.msra.mxu1 %v22755_v6  ;;  %v22813_v6 = vpack.c.bf16 %v29919_v13, %v29918_v26  ;;  %v29221_v13 = vand.u32 4294901760, %v22805_v22  ;;  %v22835_v26 = vsel %vm4710_vm3, %v4707_v40, %v4648_v36  ;;  %v22857_v43 = vpack.c.bf16 %v29931_v17, %v29930_v47 }
 0x5e6   :  { %19797 = vmatprep.subr.bf16.mxu1 %v22799_v10  ;;  %29925 = vst [vmem:[#allocation63_spill] sm:$0xff] %v22835_v26  ;;  %29929 = vst [vmem:[#allocation65_spill] sm:$0xff] %v22847_v41  ;;  %v4717_v25 = vsel %vm4715_vm5, %v22835_v26, %v22691_v39  ;;  %v4721_v40 = vsel %vm4720_vm6, %v4716_v51, %v4678_v38  ;;  %v29934_v39 = vand.u32 4294901760, %v22729_v35  ;;  %v29935_v46 = vand.u32 4294901760, %v22734_v44 }
 0x5e7   :  { %29920 = vst [vmem:[#allocation60_spill] sm:$0xff] %v22813_v6  ;;  %v19936_v36 = vpack.c.bf16 %v29220_v7, %v29221_v13  ;;  %29932 = vst [vmem:[#allocation66_spill] sm:$0xff] %v22857_v43  ;;  %v4722_v15 = vsel %vm4720_vm6, %v4717_v25, %v4680_v49  ;;  %v29937_v49 = vand.u32 4294901760, %v22741_v58  ;;  %v29938_v4 = vand.u32 4294901760, %v22746_v56  ;;  %v22911_v58 = vld [vmem:[%s29101_s2 + $0x10] sm:$0xff] }
 0x5e8   :  { %v22880_v24 = vpack.c.bf16 %v29935_v46, %v29934_v39  ;;  %v22893_v17 = vpack.c.bf16 %v5835_v20, %v5832_v54  ;;  %v22901_v44 = vpack.c.bf16 %v5787_v50, %v5784_v34  ;;  %v29943_v56 = vand.u32 4294901760, %v22343_v60 }
 0x5e9   :  { %19799 = vmatpush3.bf16.msra.mxu1 %v22813_v6  ;;  %19937 = vmatprep.subr.bf16.mxu0 %v19936_v36  ;;  %v22886_v36 = vpack.c.bf16 %v29938_v4, %v29937_v49  ;;  %v29944_v34 = vand.u32 4294901760, %v22348_v61  ;;  %v29992_v10 = vand.u32 4294901760, %v22590_v16 }
 0x5ea   :  { %19801 = vmatprep.subr.bf16.mxu1 %v22847_v41  ;;  %19939 = vmatpush3.bf16.msra.mxu0 %v19938_v55  ;;  %29936 = vst [vmem:[#allocation68_spill] sm:$0xff] %v22880_v24  ;;  %29941 = vst [vmem:[#allocation71_spill] sm:$0xff] %v22893_v17  ;;  %v6014_v50 = vsub.f32 %v22343_v60, %v29943_v56 }
 0x5eb   :  { %29939 = vst [vmem:[#allocation69_spill] sm:$0xff] %v22886_v36  ;;  %29942 = vst [vmem:[#allocation72_spill] sm:$0xff] %v22901_v44  ;;  %v6021_v54 = vsub.f32 %v22348_v61, %v29944_v34 }
 0x5ec   :  { %v6015_v25 = vand.u32 4294901760, %v6014_v50 }
 0x5ed   :  { %19803 = vmatpush3.bf16.msra.mxu1 %v22857_v43  ;;  %v29988_v43 = vld [vmem:[#allocation35_spill] sm:$0xff] }
 0x5ee   :  { %19805 = vmatprep.subr.bf16.mxu1 %v22880_v24  ;;  %v29989_v41 = vand.u32 4294901760, %v29988_v43 }
 0x5f1   :  { %19807 = vmatpush3.bf16.msra.mxu1 %v22886_v36 }
 0x5f2   :  { %19809 = vmatprep.subr.bf16.mxu1 %v22893_v17 }
 0x5f5   :  { %19811 = vmatpush3.bf16.msra.mxu1 %v22901_v44 }
 0x5ff   :  { %v4696_v18 = vpop.permute.xlu0 %4695 }
 0x600   :  { %v22873_v11 = vsel %vm4725_vm7, %v4722_v15, %v4696_v18  ;;  %v4694_v8 = vpop.permute.xlu1 %4693  ;;  %v6022_v15 = vand.u32 4294901760, %v6021_v54 }
 0x601   :  { %29933 = vst [vmem:[#allocation67_spill] sm:$0xff] %v22873_v11  ;;  %v22889_v38 = vsel %vm4725_vm7, %v4721_v40, %v4694_v8  ;;  %v4791_v47 = vmul.f32 %v22646_v0, %v22873_v11  ;;  %v4771_v55 = vmul.f32 %v22584_v9, %v22873_v11  ;;  %v29216_v40 = vmov 3  }
 0x602   :  { %29940 = vst [vmem:[#allocation70_spill] sm:$0xff] %v22889_v38  ;;  %v4770_v35 = vmul.f32 %v22674_v33, %v22889_v38  ;;  %v4790_v20 = vmul.f32 %v22405_v29, %v22889_v38  ;;  %v19812_v18 = vpack.c.bf16 %v6022_v15, %v6015_v25  ;;  %v29948_v15 = vand.u32 4294901760, %v22760_v53  ;;  %v29977_v29 = vld [vmem:[#allocation30_spill] sm:$0xff] }
 0x603   :  { %4916 = vrot.lane.b32.xlu0 %v4791_v47, %s21808_s10  ;;  %v4666_v8 = vpop.permute.xlu0 %4665  ;;  %v29978_v2 = vand.u32 4294901760, %v29977_v29 }
 0x604   :  { %4898 = vrot.lane.b32.xlu1 %v4770_v35, %s21809_s11  ;;  %v4634_v51 = vpop.permute.xlu1 %4633  ;;  %19813 = vmatprep.subr.bf16.mxu1 %v19812_v18  ;;  %v21761_v35 = vld [vmem:[%s29099_s0 + $0x10] sm:$0xff]  ;;  %v6098_v18 = vsub.f32 %v22760_v53, %v29948_v15 }
 0x605   :  { %v5937_v44 = vsub.f32 %v29977_v29, %v29978_v2  ;;  %v29987_v2 = vand.u32 4294901760, %v22568_v30 }
 0x608   :  { %4914 = vrot.lane.b32.xlu1 %v4790_v20, %s21808_s10  ;;  %v4650_v39 = vpop.permute.xlu1 %4649  ;;  %v4708_v20 = vsel %vm4705_vm4, %v21761_v35, %v4634_v51  ;;  %v29949_v51 = vand.u32 4294901760, %v22765_v14 }
 0x609   :  { %v22933_v56 = vsel %vm4710_vm3, %v4708_v20, %v4650_v39 }
 0x60a   :  { %29947 = vst [vmem:[#allocation75_spill] sm:$0xff] %v22933_v56  ;;  %v4718_v54 = vsel %vm4715_vm5, %v22933_v56, %v4666_v8  ;;  %v6105_v39 = vsub.f32 %v22765_v14, %v29949_v51  ;;  %v6099_v51 = vand.u32 4294901760, %v6098_v18  ;;  %v30001_v14 = vld [vmem:[#allocation40_spill] sm:$0xff] }
 0x60b   :  { %v30002_v53 = vand.u32 4294901760, %v30001_v14 }
 0x60c   :  { %4742 = vperm.xlu1 %21708, %v22911_v58  }
 0x610   :  { %4900 = vrot.lane.b32.xlu1 %v4771_v55, %s21809_s11  ;;  %v21762_v55 = vld [vmem:[%s29099_s0 + $0x18] sm:$0xff] }
 0x611   :  { %21709 = vset.pattern.permute.xlu1 %v29216_v40  ;;  %v29951_v40 = vand.u32 4294901760, %v22771_v57 }
 0x613   :  { %v5986_v59 = vsub.f32 %v22771_v57, %v29951_v40 }
 0x614   :  { %v22924_v46 = vpop.permute.xlu0 %4787 }
 0x615   :  { %29945 = vst [vmem:[#allocation73_spill] sm:$0xff] %v22924_v46 }
 0x618   :  { %v4636_v4 = vpop.permute.xlu0 %4635 }
 0x619   :  { %v22926_v49 = vpop.permute.xlu1 %4767  ;;  %v4709_v25 = vsel %vm4705_vm4, %v21762_v55, %v4636_v4  ;;  %v29952_v4 = vand.u32 4294901760, %v22776_v45 }
 0x61a   :  { %29946 = vst [vmem:[#allocation74_spill] sm:$0xff] %v22926_v49 }
 0x61b   :  { %v5993_v55 = vsub.f32 %v22776_v45, %v29952_v4  ;;  %v29955_v4 = vand.u32 4294901760, %v22805_v22  ;;  %v29999_v45 = vld [vmem:[#allocation39_spill] sm:$0xff] }
 0x61c   :  { %v4652_v34 = vpop.permute.xlu0 %4651  ;;  %v30000_v57 = vand.u32 4294901760, %v29999_v45 }
 0x61d   :  { %v4682_v47 = vpop.permute.xlu1 %4681  ;;  %v22948_v35 = vsel %vm4710_vm3, %v4709_v25, %v4652_v34  ;;  %v6106_v34 = vand.u32 4294901760, %v6105_v39  ;;  %v5987_v25 = vand.u32 4294901760, %v5986_v59  ;;  %v5994_v40 = vand.u32 4294901760, %v5993_v55 }
 0x61e   :  { %29950 = vst [vmem:[#allocation76_spill] sm:$0xff] %v22948_v35  ;;  %v4723_v20 = vsel %vm4720_vm6, %v4718_v54, %v4682_v47  ;;  %v29958_v55 = vand.u32 4294901760, %v22819_v42 }
 0x61f   :  { %v22966_v13 = vpack.c.bf16 %v6106_v34, %v6099_v51  ;;  %v22977_v59 = vpack.c.bf16 %v5994_v40, %v5987_v25 }
 0x620   :  { %v4684_v7 = vpop.permute.xlu0 %4683  ;;  %v6000_v51 = vsub.f32 %v22819_v42, %v29958_v55  ;;  %v29223_v55 = vmov 5   ;;  %v29994_v42 = vld [vmem:[#allocation37_spill] sm:$0xff] }
 0x621   :  { %v4668_v50 = vpop.permute.xlu1 %4667  ;;  %29954 = vst [vmem:[#allocation78_spill] sm:$0xff] %v22966_v13  ;;  %29957 = vst [vmem:[#allocation79_spill] sm:$0xff] %v22977_v59 }
 0x622   :  { %v4719_v15 = vsel %vm4715_vm5, %v22948_v35, %v4668_v50  ;;  %v6112_v50 = vsub.f32 %v22805_v22, %v29955_v4 }
 0x623   :  { %v4724_v39 = vsel %vm4720_vm6, %v4719_v15, %v4684_v7  ;;  %v6001_v15 = vand.u32 4294901760, %v6000_v51  ;;  %v29225_v51 = vmov 6  }
 0x624   :  { %v6113_v4 = vand.u32 4294901760, %v6112_v50 }
 0x625   :  { %v4698_v8 = vpop.permute.xlu1 %4697 }
 0x626   :  { %v22960_v12 = vsel %vm4725_vm7, %v4723_v20, %v4698_v8  ;;  %v29956_v20 = vand.u32 4294901760, %v22807_v32 }
 0x627   :  { %29953 = vst [vmem:[#allocation77_spill] sm:$0xff] %v22960_v12  ;;  %v4792_v47 = vmul.f32 %v22717_v48, %v22960_v12  ;;  %v4772_v54 = vmul.f32 %v22669_v37, %v22960_v12 }
 0x628   :  { %v6119_v18 = vsub.f32 %v22807_v32, %v29956_v20  ;;  %v29960_v20 = vand.u32 4294901760, %v22821_v23 }
 0x629   :  { %4918 = vrot.lane.b32.xlu0 %v4792_v47, %s21808_s10  ;;  %4902 = vrot.lane.b32.xlu1 %v4772_v54, %s21809_s11  ;;  %v4700_v8 = vpop.permute.xlu1 %4699 }
 0x62a   :  { %v22983_v34 = vsel %vm4725_vm7, %v4724_v39, %v4700_v8  ;;  %v6120_v35 = vand.u32 4294901760, %v6119_v18  ;;  %v6007_v47 = vsub.f32 %v22821_v23, %v29960_v20  ;;  %v23001_v18 = vld [vmem:[%s29101_s2] sm:$0xff]  ;;  %v29964_v39 = vmov 3  }
 0x62b   :  { %29959 = vst [vmem:[#allocation80_spill] sm:$0xff] %v22983_v34  ;;  %v4793_v54 = vmul.f32 %v22924_v46, %v22983_v34  ;;  %v4773_v7 = vmul.f32 %v22926_v49, %v22983_v34  ;;  %29963 = vst [vmem:[#allocation83_spill] sm:$0xff] %v23001_v18  ;;  %v29966_v8 = vmov 4   ;;  %v29975_v49 = vand.u32 4294901760, %v22456_v27 }
 0x62c   :  { %v22992_v25 = vpack.c.bf16 %v6120_v35, %v6113_v4  ;;  %v6008_v40 = vand.u32 4294901760, %v6007_v47  ;;  %v23009_v35 = vld [vmem:[%s29101_s2 + $0x8] sm:$0xff]  ;;  %v29967_v4 = vand.u32 4294901760, %v22353_v63  ;;  %v29968_v47 = vand.u32 4294901760, %v22365_v19 }
 0x62d   :  { %4920 = vrot.lane.b32.xlu0 %v4793_v54, %s21808_s10  ;;  %4904 = vrot.lane.b32.xlu1 %v4773_v7, %s21809_s11  ;;  %29965 = vst [vmem:[#allocation84_spill] sm:$0xff] %v23009_v35  ;;  %v23028_v7 = vpop.permute.xlu0 %4732  ;;  %v29976_v46 = vand.u32 4294901760, %v22468_v31  ;;  %v29993_v23 = vand.u32 4294901760, %v22608_v28 }
 0x62e   :  { %29961 = vst [vmem:[#allocation81_spill] sm:$0xff] %v22992_v25  ;;  %v22996_v50 = vpack.c.bf16 %v6008_v40, %v6001_v15  ;;  %v5902_v20 = vsub.f32 %v22353_v63, %v29967_v4  ;;  %v5909_v54 = vsub.f32 %v22365_v19, %v29968_v47  ;;  %29969 = vst [vmem:[#allocation85_spill] sm:$0xff] %v23028_v7  ;;  %v29971_v40 = vand.u32 4294901760, %v22385_v5 }
 0x62f   :  { %v29973_v4 = vand.u32 4294901760, %v22427_v62  ;;  %v29974_v47 = vand.u32 4294901760, %v22448_v52 }
 0x630   :  { %29962 = vst [vmem:[#allocation82_spill] sm:$0xff] %v22996_v50  ;;  %v5903_v37 = vand.u32 4294901760, %v5902_v20  ;;  %v5910_v48 = vand.u32 4294901760, %v5909_v54  ;;  %v29981_v54 = vld [vmem:[#allocation32_spill] sm:$0xff] }
 0x631   :  { %4815 = vperm.xlu0 %21710, %v23001_v18   ;;  %4795 = vperm.xlu1 %21709, %v23001_v18   ;;  %v23091_v32 = vpop.permute.xlu0 %4737 }
 0x632   :  { %29996 = vst [vmem:[#allocation32_spill] sm:$0xff] %v23091_v32  ;;  %v19814_v59 = vpack.c.bf16 %v5910_v48, %v5903_v37 }
 0x635   :  { %21712 = vset.pattern.permute.xlu0 %v29964_v39  ;;  %4799 = vperm.xlu1 %21709, %v23009_v35  }
 0x636   :  { %4803 = vperm.xlu0 %21712, %v22911_v58  }
 0x639   :  { %21711 = vset.pattern.permute.xlu1 %v29966_v8 }
 0x63a   :  { %21714 = vset.pattern.permute.xlu0 %v29966_v8  ;;  %4819 = vperm.xlu1 %21711, %v23009_v35   ;;  %v29995_v35 = vand.u32 4294901760, %v29994_v42 }
 0x63b   :  { %4827 = vperm.xlu0 %21714, %v22205_v3  }
 0x63e   :  { %4823 = vperm.xlu1 %21711, %v22911_v58   ;;  %v29970_v58 = vand.u32 4294901760, %v22370_v1 }
 0x63f   :  { %21715 = vset.pattern.permute.xlu0 %v29223_v55  ;;  %v5923_v55 = vsub.f32 %v22427_v62, %v29973_v4 }
 0x640   :  { %v6028_v15 = vsub.f32 %v22370_v1, %v29970_v58  ;;  %v6049_v58 = vsub.f32 %v22456_v27, %v29975_v49 }
 0x642   :  { %21713 = vset.pattern.permute.xlu1 %v29964_v39  ;;  %v29972_v39 = vand.u32 4294901760, %v22398_v21  ;;  %v6029_v56 = vand.u32 4294901760, %v6028_v15  ;;  %v6050_v49 = vand.u32 4294901760, %v6049_v58  ;;  %v29982_v15 = vand.u32 4294901760, %v29981_v54  ;;  %v29985_v58 = vld [vmem:[#allocation34_spill] sm:$0xff] }
 0x643   :  { %4807 = vperm.xlu1 %21713, %v22205_v3   ;;  %v6035_v3 = vsub.f32 %v22385_v5, %v29971_v40  ;;  %v5930_v40 = vsub.f32 %v22468_v31, %v29976_v46 }
 0x644   :  { %v5916_v8 = vsub.f32 %v22398_v21, %v29972_v39  ;;  %v4750_v39 = vmul.f32 %v23028_v7, %v22889_v38  ;;  %v29979_v7 = vld [vmem:[#allocation31_spill] sm:$0xff] }
 0x645   :  { %v6036_v9 = vand.u32 4294901760, %v6035_v3  ;;  %v5931_v17 = vand.u32 4294901760, %v5930_v40  ;;  %v29980_v36 = vand.u32 4294901760, %v29979_v7  ;;  %v6063_v3 = vsub.f32 %v29981_v54, %v29982_v15 }
 0x646   :  { %v5917_v0 = vand.u32 4294901760, %v5916_v8  ;;  %v6070_v40 = vsub.f32 %v22568_v30, %v29987_v2  ;;  %v6084_v2 = vsub.f32 %v29994_v42, %v29995_v35  ;;  %v5938_v35 = vand.u32 4294901760, %v5937_v44 }
 0x647   :  { %21716 = vset.pattern.permute.xlu1 %v29225_v51  ;;  %v6042_v51 = vsub.f32 %v22448_v52, %v29974_v47  ;;  %v5924_v47 = vand.u32 4294901760, %v5923_v55  ;;  %v6056_v20 = vsub.f32 %v29979_v7, %v29980_v36  ;;  %v29983_v55 = vld [vmem:[#allocation33_spill] sm:$0xff]  ;;  %v6077_v36 = vsub.f32 %v29988_v43, %v29989_v41  ;;  %v29997_v41 = vld [vmem:[#allocation38_spill] sm:$0xff] }
 0x648   :  { %v29984_v8 = vand.u32 4294901760, %v29983_v55  ;;  %v29998_v22 = vand.u32 4294901760, %v29997_v41  ;;  %v6064_v25 = vand.u32 4294901760, %v6063_v3  ;;  %v6071_v13 = vand.u32 4294901760, %v6070_v40 }
 0x649   :  { %v6043_v33 = vand.u32 4294901760, %v6042_v51  ;;  %v6057_v50 = vand.u32 4294901760, %v6056_v20 }
 0x64a   :  { %v5944_v51 = vsub.f32 %v29983_v55, %v29984_v8  ;;  %v5958_v8 = vsub.f32 %v22590_v16, %v29992_v10  ;;  %v6091_v18 = vsub.f32 %v29997_v41, %v29998_v22  ;;  %v5972_v10 = vsub.f32 %v29999_v45, %v30000_v57 }
 0x64b   :  { %v6078_v57 = vand.u32 4294901760, %v6077_v36  ;;  %v19820_v36 = vpack.c.bf16 %v6050_v49, %v6043_v33 }
 0x64c   :  { %v5959_v12 = vand.u32 4294901760, %v5958_v8  ;;  %v5973_v44 = vand.u32 4294901760, %v5972_v10 }
 0x64d   :  { %v23127_v37 = vpack.c.bf16 %v6078_v57, %v6071_v13 }
 0x676   :  { %v4899_v4 = vpop.permute.xlu1 %4898 }
 0x677   :  { %v5007_v26 = vsel %vm5006_vm8, %v4750_v39, %v4899_v4  ;;  %v29986_v39 = vand.u32 4294901760, %v29985_v58 }
 0x678   :  { %v23057_v46 = vand.u32 4294901760, %v5007_v26 }
 0x679   :  { %v5951_v24 = vsub.f32 %v29985_v58, %v29986_v39  ;;  %v5965_v39 = vsub.f32 %v22608_v28, %v29993_v23  ;;  %v5979_v23 = vsub.f32 %v30001_v14, %v30002_v53  ;;  %v6085_v53 = vand.u32 4294901760, %v6084_v2 }
 0x67a   :  { %v23078_v6 = vsub.f32 %v5007_v26, %v23057_v46  ;;  %v23080_v15 = vpop.permute.xlu1 %4914  ;;  %v6092_v14 = vand.u32 4294901760, %v6091_v18  ;;  %v23123_v18 = vpack.c.bf16 %v6064_v25, %v6057_v50  ;;  %v23159_v25 = vld [vmem:[%s29104_s5 + $0x188] sm:$0xff] }
 0x67b   :  { %29991 = vst [vmem:[#allocation31_spill] sm:$0xff] %v23080_v15  ;;  %v5012_v26 = vsel %vm5011_vm9, %v4899_v4, %v23080_v15  ;;  %v5945_v4 = vand.u32 4294901760, %v5944_v51  ;;  %v5952_v15 = vand.u32 4294901760, %v5951_v24  ;;  %v5966_v45 = vand.u32 4294901760, %v5965_v39  ;;  %v23113_v51 = vpop.permute.xlu0 %4747 }
 0x67c   :  { %29990 = vst [vmem:[#allocation30_spill] sm:$0xff] %v23078_v6  ;;  %v23104_v38 = vand.u32 4294901760, %v5012_v26  ;;  %v5980_v20 = vand.u32 4294901760, %v5979_v23  ;;  %30004 = vst [vmem:[#allocation34_spill] sm:$0xff] %v23113_v51  ;;  %v30005_v24 = vand.u32 4294901760, %v23078_v6  ;;  %v23121_v39 = vpack.c.bf16 %v5938_v35, %v5931_v17  ;;  %v23170_v35 = vld [vmem:[%s29104_s5 + $0x100] sm:$0xff] }
 0x67d   :  { %v23125_v2 = vpack.c.bf16 %v5952_v15, %v5945_v4  ;;  %v23129_v48 = vpack.c.bf16 %v5966_v45, %v5959_v12  ;;  %v23131_v10 = vpack.c.bf16 %v6092_v14, %v6085_v53  ;;  %v29283_v15 = vand.u32 4294901760, %v23159_v25  ;;  %v23175_v4 = vld [vmem:[%s29104_s5 + $0x108] sm:$0xff]  ;;  %v23228_v12 = vld [vmem:[%s29104_s5 + $0x110] sm:$0xff]  ;;  %v23233_v14 = vld [vmem:[%s29104_s5 + $0x118] sm:$0xff] }
 0x67e   :  { %30003 = vst [vmem:[#allocation33_spill] sm:$0xff] %v23104_v38  ;;  %v23108_v22 = vsub.f32 %v5012_v26, %v23104_v38  ;;  %6618 = vmatprep.mubr.f32.mxu0 %v23104_v38  ;;  %v5846_v40 = vsub.f32 %v23078_v6, %v30005_v24  ;;  %v19816_v26 = vpack.c.bf16 %v6036_v9, %v6029_v56  ;;  %v23154_v56 = vld [vmem:[%s29104_s5 + $0x180] sm:$0xff] }
 0x67f   :  { %6620 = vmatmul.mubr.f32.vlgmr.msra.gmra.mrb[10].mxu0 %v23057_v46  ;;  %v19818_v38 = vpack.c.bf16 %v5924_v47, %v5917_v0  ;;  %v23133_v23 = vpack.c.bf16 %v5980_v20, %v5973_v44  ;;  %v23137_v9 = vmul.f32 %v23091_v32, %v22873_v11  ;;  %v23141_v0 = vmul.f32 %v23113_v51, %v22983_v34 }
 0x680   :  { %v29280_v3 = vand.u32 4294901760, %v23108_v22  ;;  %v5847_v13 = vand.u32 4294901760, %v5846_v40  ;;  %v29284_v49 = vand.u32 4294901760, %v23154_v56  ;;  %v29282_v44 = vand.u32 4294901760, %v23170_v35 }
 0x681   :  { %v29281_v20 = vand.u32 4294901760, %v23175_v4 }
 0x682   :  { %v5840_v8 = vsub.f32 %v23108_v22, %v29280_v3  ;;  %v23204_v40 = vsub.f32 %v23170_v35, %v29282_v44 }
 0x683   :  { %v23209_v53 = vsub.f32 %v23175_v4, %v29281_v20 }
 0x684   :  { %v5841_v33 = vand.u32 4294901760, %v5840_v8  ;;  %v23190_v8 = vsub.f32 %v23154_v56, %v29284_v49  ;;  %30010 = vst [vmem:[#allocation86_spill] sm:$0xff] %v23204_v40  ;;  %v30013_v49 = vld [vmem:[#allocation77_spill] sm:$0xff] }
 0x685   :  { %30011 = vst [vmem:[#allocation87_spill] sm:$0xff] %v23209_v53 }
 0x686   :  { %5842 = vmatprep.mubr.f32.mxu1 %v5841_v33  ;;  %30006 = vst [vmem:[#allocation35_spill] sm:$0xff] %v23190_v8  ;;  %v23195_v33 = vsub.f32 %v23159_v25, %v29283_v15  ;;  %v29287_v24 = vand.u32 4294901760, %v23190_v8  ;;  %v30016_v15 = vand.u32 4294901760, %v23204_v40 }
 0x687   :  { %5848 = vmatmul.mubr.f32.vlgmr.msra.gmra.mrb[12].mxu1 %v5847_v13 }
 0x688   :  { %19815 = vmatpush3.bf16.msra.mxu1 %v19814_v59  ;;  %30007 = vst [vmem:[#allocation38_spill] sm:$0xff] %v23195_v33  ;;  %v23219_v59 = vld [vmem:[%s29104_s5 + $0x198] sm:$0xff]  ;;  %v29289_v57 = vand.u32 4294901760, %v23195_v33  ;;  %v7044_v47 = vsub.f32 %v23190_v8, %v29287_v24  ;;  %v6932_v44 = vsub.f32 %v23204_v40, %v30016_v15  ;;  %v30022_v15 = vand.u32 4294901760, %v23233_v14 }
 0x689   :  { %19817 = vmatprep.subr.bf16.mxu1 %v19816_v26  ;;  %v23214_v26 = vld [vmem:[%s29104_s5 + $0x190] sm:$0xff]  ;;  %v30018_v24 = vand.u32 4294901760, %v23219_v59 }
 0x68a   :  { %v7051_v51 = vsub.f32 %v23195_v33, %v29289_v57  ;;  %v30014_v17 = vand.u32 4294901760, %v23214_v26  ;;  %v30020_v57 = vand.u32 4294901760, %v23228_v12  ;;  %v23276_v3 = vsub.f32 %v23233_v14, %v30022_v15 }
 0x68b   :  { %v23235_v45 = vpop.permute.xlu1 %4742  ;;  %v23265_v32 = vsub.f32 %v23219_v59, %v30018_v24  ;;  %v6933_v8 = vand.u32 4294901760, %v6932_v44  ;;  %v23300_v44 = vld [vmem:[%s29104_s5 + $0x1a8] sm:$0xff] }
 0x68c   :  { %30012 = vst [vmem:[#allocation88_spill] sm:$0xff] %v23235_v45  ;;  %v23243_v50 = vmul.f32 %v23235_v45, %v30013_v49  ;;  %19819 = vmatpush3.bf16.msra.mxu1 %v19818_v38  ;;  %v23254_v20 = vsub.f32 %v23214_v26, %v30014_v17  ;;  %v30017_v38 = vand.u32 4294901760, %v23209_v53  ;;  %v23270_v6 = vsub.f32 %v23228_v12, %v30020_v57 }
 0x68d   :  { %19821 = vmatprep.subr.bf16.mxu1 %v19820_v36  ;;  %30019 = vst [vmem:[#allocation90_spill] sm:$0xff] %v23265_v32  ;;  %v7045_v17 = vand.u32 4294901760, %v7044_v47  ;;  %v7052_v36 = vand.u32 4294901760, %v7051_v51  ;;  %30023 = vst [vmem:[#allocation92_spill] sm:$0xff] %v23276_v3  ;;  %v23285_v51 = vld [vmem:[%s29104_s5 + $0x1a0] sm:$0xff] }
 0x68e   :  { %30015 = vst [vmem:[#allocation89_spill] sm:$0xff] %v23254_v20  ;;  %v6939_v45 = vsub.f32 %v23209_v53, %v30017_v38  ;;  %30021 = vst [vmem:[#allocation91_spill] sm:$0xff] %v23270_v6  ;;  %v29300_v13 = vand.u32 4294901760, %v23254_v20  ;;  %v23278_v38 = vpop.permute.xlu0 %4916 }
 0x68f   :  { %30024 = vst [vmem:[#allocation93_spill] sm:$0xff] %v23278_v38  ;;  %v4901_v33 = vpop.permute.xlu1 %4900  ;;  %v23292_v15 = vpack.c.bf16 %v7052_v36, %v7045_v17  ;;  %v23315_v17 = vld [vmem:[%s29104_s5 + $0x120] sm:$0xff] }
 0x690   :  { %v6940_v24 = vand.u32 4294901760, %v6939_v45  ;;  %v5008_v47 = vsel %vm5006_vm8, %v23137_v9, %v4901_v33  ;;  %v5013_v57 = vsel %vm5011_vm9, %v4901_v33, %v23278_v38  ;;  %19823 = vmatpush3.bf16.msra.mxu1 %v23121_v39  ;;  %v7058_v45 = vsub.f32 %v23254_v20, %v29300_v13 }
 0x691   :  { %30025 = vst [vmem:[#allocation94_spill] sm:$0xff] %v23292_v15  ;;  %v23302_v40 = vand.u32 4294901760, %v5013_v57  ;;  %v23304_v53 = vand.u32 4294901760, %v5008_v47  ;;  %19825 = vmatprep.subr.bf16.mxu1 %v23123_v18  ;;  %v30027_v39 = vand.u32 4294901760, %v23265_v32  ;;  %v30028_v13 = vand.u32 4294901760, %v23270_v6 }
 0x692   :  { %v23307_v9 = vpack.c.bf16 %v6940_v24, %v6933_v8  ;;  %v7059_v36 = vand.u32 4294901760, %v7058_v45  ;;  %v29304_v15 = vand.u32 4294901760, %v23276_v3  ;;  %v29305_v18 = vand.u32 4294901760, %v23285_v51  ;;  %v23333_v45 = vld [vmem:[%s29104_s5 + $0x128] sm:$0xff] }
 0x693   :  { %v7065_v33 = vsub.f32 %v23265_v32, %v30027_v39  ;;  %v6946_v38 = vsub.f32 %v23270_v6, %v30028_v13  ;;  %v23323_v8 = vsub.f32 %v5013_v57, %v23302_v40  ;;  %v23326_v24 = vsub.f32 %v5008_v47, %v23304_v53  ;;  %6625 = vmatprep.mubr.f32.mxu0 %v23302_v40 }
 0x694   :  { %30026 = vst [vmem:[#allocation95_spill] sm:$0xff] %v23307_v9  ;;  %6627 = vmatmul.mubr.f32.gmra.mrb[12].mxu0 %v23304_v53  ;;  %19827 = vmatpush3.bf16.msra.mxu1 %v23125_v2  ;;  %v6953_v47 = vsub.f32 %v23276_v3, %v29304_v15  ;;  %v23343_v57 = vsub.f32 %v23285_v51, %v29305_v18  ;;  %v23349_v9 = vld [vmem:[%s29104_s5 + $0x1b0] sm:$0xff]  ;;  %v30033_v15 = vand.u32 4294901760, %v23154_v56  ;;  %v30034_v18 = vand.u32 4294901760, %v23159_v25 }
 0x695   :  { %30029 = vst [vmem:[#allocation96_spill] sm:$0xff] %v23323_v8  ;;  %30030 = vst [vmem:[#allocation97_spill] sm:$0xff] %v23326_v24  ;;  %v7066_v39 = vand.u32 4294901760, %v7065_v33  ;;  %v6947_v13 = vand.u32 4294901760, %v6946_v38  ;;  %v29313_v6 = vand.u32 4294901760, %v23323_v8  ;;  %19829 = vmatprep.subr.bf16.mxu1 %v23127_v37  ;;  %v30036_v20 = vand.u32 4294901760, %v23300_v44 }
 0x696   :  { %30031 = vst [vmem:[#allocation98_spill] sm:$0xff] %v23343_v57  ;;  %v23360_v3 = vpack.c.bf16 %v30034_v18, %v30033_v15  ;;  %v6954_v33 = vand.u32 4294901760, %v6953_v47  ;;  %v29314_v32 = vand.u32 4294901760, %v23343_v57  ;;  %v30037_v56 = vand.u32 4294901760, %v23326_v24  ;;  %v23403_v18 = vld [vmem:[%s29104_s5 + $0x130] sm:$0xff] }
 0x697   :  { %v23354_v38 = vpack.c.bf16 %v7066_v39, %v7059_v36  ;;  %v23366_v42 = vsub.f32 %v23300_v44, %v30036_v20  ;;  %v5855_v37 = vsub.f32 %v23323_v8, %v29313_v6  ;;  %v30038_v15 = vand.u32 4294901760, %v23315_v17  ;;  %v23384_v20 = vld [vmem:[%s29104_s5 + $0x1b8] sm:$0xff] }
 0x698   :  { %30035 = vst [vmem:[#allocation100_spill] sm:$0xff] %v23360_v3  ;;  %v5861_v25 = vsub.f32 %v23326_v24, %v30037_v56  ;;  %19973 = vmatprep.subr.bf16.mxu0 %v23360_v3  ;;  %19831 = vmatpush3.bf16.msra.mxu1 %v23129_v48  ;;  %v23388_v39 = vpack.c.bf16 %v6954_v33, %v6947_v13  ;;  %v30041_v47 = vand.u32 4294901760, %v23170_v35  ;;  %v30042_v56 = vand.u32 4294901760, %v23175_v4 }
 0x699   :  { %30032 = vst [vmem:[#allocation99_spill] sm:$0xff] %v23354_v38  ;;  %v23379_v36 = vsub.f32 %v23315_v17, %v30038_v15  ;;  %v7072_v15 = vsub.f32 %v23343_v57, %v29314_v32  ;;  %v29319_v2 = vand.u32 4294901760, %v23366_v42  ;;  %v5856_v48 = vand.u32 4294901760, %v5855_v37  ;;  %19833 = vmatprep.subr.bf16.mxu1 %v23131_v10 }
 0x69a   :  { %30040 = vst [vmem:[#allocation102_spill] sm:$0xff] %v23388_v39  ;;  %v23394_v6 = vpack.c.bf16 %v30042_v56, %v30041_v47  ;;  %v5862_v13 = vand.u32 4294901760, %v5861_v25  ;;  %v30044_v4 = vand.u32 4294901760, %v23333_v45  ;;  %v30046_v32 = vand.u32 4294901760, %v23214_v26 }
 0x69b   :  { %30039 = vst [vmem:[#allocation101_spill] sm:$0xff] %v23379_v36  ;;  %v7073_v47 = vand.u32 4294901760, %v7072_v15  ;;  %v7079_v56 = vsub.f32 %v23366_v42, %v29319_v2  ;;  %v30047_v37 = vand.u32 4294901760, %v23219_v59  ;;  %v23423_v35 = vpop.permute.xlu0 %4918  ;;  %5857 = vmatprep.mubr.f32.mxu1 %v5856_v48  ;;  %v30050_v3 = vand.u32 4294901760, %v23379_v36 }
 0x69c   :  { %30043 = vst [vmem:[#allocation103_spill] sm:$0xff] %v23394_v6  ;;  %v23410_v33 = vsub.f32 %v23333_v45, %v30044_v4  ;;  %19975 = vmatpush3.bf16.msra.mxu0 %v23394_v6  ;;  %30049 = vst [vmem:[#allocation106_spill] sm:$0xff] %v23423_v35  ;;  %v4903_v4 = vpop.permute.xlu1 %4902  ;;  %v30051_v2 = vand.u32 4294901760, %v23349_v9  ;;  %5863 = vmatmul.mubr.f32.gmra.mrb[14].mxu1 %v5862_v13  ;;  %v30054_v10 = vand.u32 4294901760, %v23233_v14 }
 0x69d   :  { %v23420_v25 = vpack.c.bf16 %v30047_v37, %v30046_v32  ;;  %v6960_v15 = vsub.f32 %v23379_v36, %v30050_v3  ;;  %v23437_v32 = vld [vmem:[%s29104_s5 + $0x138] sm:$0xff]  ;;  %v5009_v48 = vsel %vm5006_vm8, %v23243_v50, %v4903_v4  ;;  %v5014_v3 = vsel %vm5011_vm9, %v4903_v4, %v23423_v35  ;;  %19835 = vmatpush3.bf16.msra.mxu1 %v23133_v23 }
 0x69e   :  { %30045 = vst [vmem:[#allocation104_spill] sm:$0xff] %v23410_v33  ;;  %v23432_v26 = vsub.f32 %v23349_v9, %v30051_v2  ;;  %v7080_v37 = vand.u32 4294901760, %v7079_v56  ;;  %v30053_v2 = vand.u32 4294901760, %v23228_v12  ;;  %v23451_v39 = vand.u32 4294901760, %v5014_v3  ;;  %v30057_v56 = vld [vmem:[#allocation78_spill] sm:$0xff] }
 0x69f   :  { %30048 = vst [vmem:[#allocation105_spill] sm:$0xff] %v23420_v25  ;;  %19977 = vmatprep.subr.bf16.mxu0 %v23420_v25  ;;  %v23453_v38 = vand.u32 4294901760, %v5009_v48  ;;  %v6961_v50 = vand.u32 4294901760, %v6960_v15  ;;  %v30056_v59 = vand.u32 4294901760, %v23410_v33  ;;  %19837 = vmatprep.subr.bf16.mxu1 %v30057_v56  ;;  %v30059_v12 = vand.u32 4294901760, %v23384_v20 }
 0x6a0   :  { %30052 = vst [vmem:[#allocation107_spill] sm:$0xff] %v23432_v26  ;;  %v23449_v6 = vpack.c.bf16 %v30054_v10, %v30053_v2  ;;  %v23460_v4 = vpack.c.bf16 %v7080_v37, %v7073_v47  ;;  %v23471_v15 = vsub.f32 %v5014_v3, %v23451_v39  ;;  %v23476_v2 = vpop.permute.xlu0 %4920  ;;  %6632 = vmatprep.mubr.f32.mxu0 %v23451_v39  ;;  %v4905_v47 = vpop.permute.xlu1 %4904  ;;  %v30064_v56 = vand.u32 4294901760, %v23403_v18 }
 0x6a1   :  { %v6967_v13 = vsub.f32 %v23410_v33, %v30056_v59  ;;  %v23467_v10 = vsub.f32 %v23384_v20, %v30059_v12  ;;  %v23474_v59 = vsub.f32 %v5009_v48, %v23453_v38  ;;  %30063 = vst [vmem:[#allocation112_spill] sm:$0xff] %v23476_v2  ;;  %v5010_v12 = vsel %vm5006_vm8, %v23141_v0, %v4905_v47  ;;  %v30068_v0 = vld [vmem:[#allocation79_spill] sm:$0xff] }
 0x6a2   :  { %30055 = vst [vmem:[#allocation108_spill] sm:$0xff] %v23449_v6  ;;  %30058 = vst [vmem:[#allocation78_spill] sm:$0xff] %v23460_v4  ;;  %19979 = vmatpush3.bf16.msra.mxu0 %v23449_v6  ;;  %v23482_v14 = vsub.f32 %v23403_v18, %v30064_v56  ;;  %v5015_v3 = vsel %vm5011_vm9, %v4905_v47, %v23476_v2  ;;  %v30066_v48 = vand.u32 4294901760, %v23432_v26  ;;  %v23495_v6 = vand.u32 4294901760, %v5010_v12  ;;  %v30069_v4 = vld [vmem:[#allocation81_spill] sm:$0xff] }
 0x6a3   :  { %30060 = vst [vmem:[#allocation109_spill] sm:$0xff] %v23467_v10  ;;  %30061 = vst [vmem:[#allocation110_spill] sm:$0xff] %v23471_v15  ;;  %v6968_v37 = vand.u32 4294901760, %v6967_v13  ;;  %6634 = vmatmul.mubr.f32.gmra.mrb[14].mxu0 %v23453_v38  ;;  %v29330_v35 = vand.u32 4294901760, %v23467_v10  ;;  %v23493_v13 = vand.u32 4294901760, %v5015_v3  ;;  %v29331_v25 = vand.u32 4294901760, %v23474_v59  ;;  %19839 = vmatpush3.bf16.msra.mxu1 %v30068_v0 }
 0x6a4   :  { %30062 = vst [vmem:[#allocation111_spill] sm:$0xff] %v23474_v59  ;;  %30065 = vst [vmem:[#allocation113_spill] sm:$0xff] %v23482_v14  ;;  %v7086_v23 = vsub.f32 %v23432_v26, %v30066_v48  ;;  %19841 = vmatprep.subr.bf16.mxu1 %v30069_v4  ;;  %v29332_v24 = vand.u32 4294901760, %v23482_v14  ;;  %v23511_v56 = vsub.f32 %v5010_v12, %v23495_v6  ;;  %v30073_v0 = vand.u32 4294901760, %v23471_v15 }
 0x6a5   :  { %30067 = vst [vmem:[#allocation114_spill] sm:$0xff] %v23495_v6  ;;  %v23501_v47 = vpack.c.bf16 %v6968_v37, %v6961_v50  ;;  %v7093_v48 = vsub.f32 %v23467_v10, %v29330_v35  ;;  %v23508_v8 = vsub.f32 %v5015_v3, %v23493_v13  ;;  %6639 = vmatprep.mubr.f32.mxu0 %v23493_v13  ;;  %v30074_v12 = vand.u32 4294901760, %v23437_v32 }
 0x6a6   :  { %v7087_v2 = vand.u32 4294901760, %v7086_v23  ;;  %30072 = vst [vmem:[#allocation115_spill] sm:$0xff] %v23511_v56  ;;  %v5870_v50 = vsub.f32 %v23471_v15, %v30073_v0  ;;  %v5876_v4 = vsub.f32 %v23474_v59, %v29331_v25  ;;  %v6974_v37 = vsub.f32 %v23482_v14, %v29332_v24  ;;  %v23538_v25 = vld [vmem:[%s29104_s5 + $0x1c0] sm:$0xff]  ;;  %v30079_v15 = vld [vmem:[#allocation82_spill] sm:$0xff] }
 0x6a7   :  { %30070 = vst [vmem:[#allocation79_spill] sm:$0xff] %v23501_v47  ;;  %30071 = vst [vmem:[#allocation81_spill] sm:$0xff] %v23508_v8  ;;  %6641 = vmatmul.mubr.f32.gmra.mrb[16].mxu0 %v23495_v6  ;;  %v7094_v23 = vand.u32 4294901760, %v7093_v48  ;;  %v23527_v3 = vsub.f32 %v23437_v32, %v30074_v12  ;;  %v30076_v35 = vand.u32 4294901760, %v23285_v51  ;;  %v30077_v0 = vand.u32 4294901760, %v23300_v44  ;;  %v23543_v48 = vld [vmem:[%s29104_s5 + $0x1c8] sm:$0xff]  ;;  %19843 = vmatpush3.bf16.msra.mxu1 %v30079_v15 }
 0x6a8   :  { %v5871_v24 = vand.u32 4294901760, %v5870_v50  ;;  %v5877_v59 = vand.u32 4294901760, %v5876_v4  ;;  %v23551_v44 = vld [vmem:[%s29104_s5 + $0x140] sm:$0xff]  ;;  %v30080_v50 = vpack.c.bf16 %v22348_v61, %v22343_v60  ;;  %v30082_v15 = vand.u32 4294901760, %v23315_v17 }
 0x6a9   :  { %30075 = vst [vmem:[#allocation116_spill] sm:$0xff] %v23527_v3  ;;  %v23533_v47 = vpack.c.bf16 %v30077_v0, %v30076_v35  ;;  %v23556_v35 = vld [vmem:[%s29104_s5 + $0x148] sm:$0xff]  ;;  %v23561_v4 = vpack.c.bf16 %v7094_v23, %v7087_v2  ;;  %v6975_v0 = vand.u32 4294901760, %v6974_v37  ;;  %v29343_v51 = vand.u32 4294901760, %v23527_v3 }
 0x6aa   :  { %19845 = vmatprep.subr.bf16.mxu1 %v30080_v50  ;;  %v30083_v12 = vand.u32 4294901760, %v23333_v45  ;;  %5872 = vmatprep.mubr.f32.mxu1 %v5871_v24  ;;  %v30085_v10 = vand.u32 4294901760, %v23508_v8  ;;  %v30086_v60 = vand.u32 4294901760, %v23511_v56  ;;  %v29345_v2 = vand.u32 4294901760, %v23538_v25  ;;  %v23599_v50 = vld [vmem:[%s29104_s5 + $0x1d8] sm:$0xff] }
 0x6ab   :  { %30078 = vst [vmem:[#allocation117_spill] sm:$0xff] %v23533_v47  ;;  %30081 = vst [vmem:[#allocation82_spill] sm:$0xff] %v23561_v4  ;;  %19981 = vmatprep.subr.bf16.mxu0 %v23533_v47  ;;  %v29344_v23 = vand.u32 4294901760, %v23543_v48  ;;  %5878 = vmatmul.mubr.f32.gmra.mrb[16].mxu1 %v5877_v59  ;;  %v6981_v17 = vsub.f32 %v23527_v3, %v29343_v51  ;;  %v29348_v24 = vand.u32 4294901760, %v23551_v44  ;;  %v29351_v45 = vand.u32 4294901760, %v23556_v35  ;;  %v23594_v59 = vld [vmem:[%s29104_s5 + $0x1d0] sm:$0xff] }
 0x6ac   :  { %v23569_v14 = vpack.c.bf16 %v30083_v12, %v30082_v15  ;;  %v5885_v26 = vsub.f32 %v23508_v8, %v30085_v10  ;;  %v5891_v61 = vsub.f32 %v23511_v56, %v30086_v60  ;;  %v30087_v10 = vand.u32 4294901760, %v23349_v9  ;;  %v30200_v3 = vld [vmem:[#allocation66_spill] sm:$0xff] }
 0x6ad   :  { %v30088_v37 = vand.u32 4294901760, %v23384_v20  ;;  %v23604_v9 = vsub.f32 %v23538_v25, %v29345_v2  ;;  %v23609_v20 = vsub.f32 %v23543_v48, %v29344_v23  ;;  %v30093_v51 = vand.u32 4294901760, %v23403_v18 }
 0x6ae   :  { %30084 = vst [vmem:[#allocation118_spill] sm:$0xff] %v23569_v14  ;;  %19983 = vmatpush3.bf16.msra.mxu0 %v23569_v14  ;;  %v5886_v15 = vand.u32 4294901760, %v5885_v26  ;;  %v5892_v60 = vand.u32 4294901760, %v5891_v61  ;;  %v23619_v26 = vsub.f32 %v23551_v44, %v29348_v24  ;;  %v23624_v61 = vsub.f32 %v23556_v35, %v29351_v45  ;;  %v23640_v45 = vld [vmem:[%s29104_s5 + $0x158] sm:$0xff] }
 0x6af   :  { %v23589_v12 = vpack.c.bf16 %v30088_v37, %v30087_v10  ;;  %30090 = vst [vmem:[#allocation120_spill] sm:$0xff] %v23604_v9  ;;  %v23614_v10 = vld [vmem:[%s29104_s5 + $0x150] sm:$0xff]  ;;  %v6982_v37 = vand.u32 4294901760, %v6981_v17  ;;  %v30094_v23 = vand.u32 4294901760, %v23437_v32  ;;  %v29352_v17 = vand.u32 4294901760, %v23604_v9 }
 0x6b0   :  { %30091 = vst [vmem:[#allocation121_spill] sm:$0xff] %v23619_v26  ;;  %30092 = vst [vmem:[#allocation122_spill] sm:$0xff] %v23624_v61  ;;  %5887 = vmatprep.mubr.f32.mxu1 %v5886_v15  ;;  %v29355_v14 = vand.u32 4294901760, %v23609_v20  ;;  %v29358_v24 = vand.u32 4294901760, %v23594_v59  ;;  %v29361_v32 = vand.u32 4294901760, %v23619_v26  ;;  %v30097_v15 = vld [vmem:[#allocation33_spill] sm:$0xff]  ;;  %v23679_v56 = vpop.permute.xlu0 %4815 }
 0x6b1   :  { %30089 = vst [vmem:[#allocation119_spill] sm:$0xff] %v23589_v12  ;;  %19985 = vmatprep.subr.bf16.mxu0 %v23589_v12  ;;  %v23631_v2 = vpack.c.bf16 %v30094_v23, %v30093_v51  ;;  %5893 = vmatmul.mubr.f32.gmra.mrb[18].mxu1 %v5892_v60  ;;  %v23642_v18 = vpack.c.bf16 %v6982_v37, %v6975_v0  ;;  %v30098_v37 = vand.u32 4294901760, %v23599_v50  ;;  %v30100_v12 = vand.u32 4294901760, %v23614_v10 }
 0x6b2   :  { %6123 = vmatprep.mubr.f32.mxu1 %v30097_v15  ;;  %v7100_v47 = vsub.f32 %v23604_v9, %v29352_v17  ;;  %v7107_v60 = vsub.f32 %v23609_v20, %v29355_v14  ;;  %v23658_v0 = vsub.f32 %v23594_v59, %v29358_v24  ;;  %v6988_v23 = vsub.f32 %v23619_v26, %v29361_v32  ;;  %v23682_v32 = vpop.permute.xlu1 %4795 }
 0x6b3   :  { %30095 = vst [vmem:[#allocation123_spill] sm:$0xff] %v23631_v2  ;;  %30096 = vst [vmem:[#allocation124_spill] sm:$0xff] %v23642_v18  ;;  %19987 = vmatpush3.bf16.msra.mxu0 %v23631_v2  ;;  %v23663_v51 = vsub.f32 %v23599_v50, %v30098_v37  ;;  %v30099_v17 = vand.u32 4294901760, %v23624_v61  ;;  %v23675_v24 = vsub.f32 %v23614_v10, %v30100_v12 }
 0x6b4   :  { %v7101_v18 = vand.u32 4294901760, %v7100_v47  ;;  %v7108_v4 = vand.u32 4294901760, %v7107_v60  ;;  %30101 = vst [vmem:[#allocation125_spill] sm:$0xff] %v23679_v56  ;;  %30102 = vst [vmem:[#allocation126_spill] sm:$0xff] %v23682_v32  ;;  %v23693_v47 = vld [vmem:[%s29104_s5 + $0x1e0] sm:$0xff]  ;;  %v30104_v60 = vld [vmem:[#allocation70_spill] sm:$0xff]  ;;  %v30105_v37 = vpack.c.bf16 %v22365_v19, %v22353_v63  ;;  %v30107_v14 = vpack.c.bf16 %v22385_v5, %v22370_v1 }
 0x6b5   :  { %v6995_v2 = vsub.f32 %v23624_v61, %v30099_v17  ;;  %6125 = vmatmul.mubr.f32.vlgmr.msra.gmra.mrb[20].mxu1 %v23057_v46  ;;  %v6989_v17 = vand.u32 4294901760, %v6988_v23  ;;  %v30103_v61 = vand.u32 4294901760, %v23640_v45  ;;  %v4830_v15 = vmul.f32 %v23679_v56, %v30104_v60 }
 0x6b6   :  { %19847 = vmatpush3.bf16.msra.mxu1 %v30105_v37  ;;  %6130 = vmatprep.mubr.f32.mxu1 %v23302_v40  ;;  %v23703_v23 = vpack.c.bf16 %v7108_v4, %v7101_v18  ;;  %v30109_v63 = vand.u32 4294901760, %v23658_v0  ;;  %v30110_v37 = vand.u32 4294901760, %v23663_v51  ;;  %v30111_v18 = vand.u32 4294901760, %v23675_v24 }
 0x6b7   :  { %v6996_v8 = vand.u32 4294901760, %v6995_v2  ;;  %v23688_v12 = vsub.f32 %v23640_v45, %v30103_v61  ;;  %v4810_v2 = vmul.f32 %v23682_v32, %v30104_v60  ;;  %v23708_v61 = vld [vmem:[%s29104_s5 + $0x1e8] sm:$0xff]  ;;  %19849 = vmatprep.subr.bf16.mxu1 %v30107_v14  ;;  %v23727_v60 = vld [vmem:[%s29104_s5 + $0x160] sm:$0xff]  ;;  %v30112_v5 = vand.u32 4294901760, %v23538_v25  ;;  %v23750_v25 = vpop.permute.xlu1 %4799 }
 0x6b8   :  { %30106 = vst [vmem:[#allocation127_spill] sm:$0xff] %v23703_v23  ;;  %v7114_v19 = vsub.f32 %v23658_v0, %v30109_v63  ;;  %v7121_v4 = vsub.f32 %v23663_v51, %v30110_v37  ;;  %v7002_v32 = vsub.f32 %v23675_v24, %v30111_v18  ;;  %v30116_v63 = vand.u32 4294901760, %v23556_v35  ;;  %30118 = vst [vmem:[#allocation131_spill] sm:$0xff] %v23750_v25 }
 0x6b9   :  { %v23713_v56 = vpack.c.bf16 %v6996_v8, %v6989_v17  ;;  %4930 = vrot.lane.b32.xlu1 %v4810_v2, %s21813_s19  ;;  %v29370_v1 = vand.u32 4294901760, %v23688_v12  ;;  %v30113_v8 = vand.u32 4294901760, %v23543_v48  ;;  %v30115_v17 = vand.u32 4294901760, %v23551_v44  ;;  %v23747_v2 = vld [vmem:[%s29104_s5 + $0x168] sm:$0xff]  ;;  %6132 = vmatmul.mubr.f32.gmra.mrb[22].mxu1 %v23304_v53 }
 0x6ba   :  { %v7115_v48 = vand.u32 4294901760, %v7114_v19  ;;  %v6859_v44 = vand.u32 4294901760, %v23708_v61  ;;  %v30119_v35 = vpack.c.bf16 %v22427_v62, %v22398_v21  ;;  %6137 = vmatprep.mubr.f32.mxu1 %v23451_v39  ;;  %v30121_v19 = vand.u32 4294901760, %v23693_v47  ;;  %v30123_v21 = vld [vmem:[#allocation53_spill] sm:$0xff] }
 0x6bb   :  { %30108 = vst [vmem:[#allocation128_spill] sm:$0xff] %v23713_v56  ;;  %v23735_v14 = vpack.c.bf16 %v30113_v8, %v30112_v5  ;;  %v23741_v37 = vpack.c.bf16 %v30116_v63, %v30115_v17  ;;  %v7122_v5 = vand.u32 4294901760, %v7121_v4  ;;  %v7003_v8 = vand.u32 4294901760, %v7002_v32  ;;  %v23758_v63 = vpop.permute.xlu0 %4803 }
 0x6bc   :  { %19851 = vmatpush3.bf16.msra.mxu1 %v30119_v35  ;;  %v4811_v17 = vmul.f32 %v23750_v25, %v22873_v11  ;;  %30120 = vst [vmem:[#allocation132_spill] sm:$0xff] %v23758_v63  ;;  %v7009_v18 = vsub.f32 %v23688_v12, %v29370_v1  ;;  %v23767_v32 = vsub.f32 %v23693_v47, %v30121_v19  ;;  %v29371_v4 = vand.u32 4294901760, %v23727_v60  ;;  %v30124_v35 = vld [vmem:[#allocation54_spill] sm:$0xff]  ;;  %v23785_v19 = vld [vmem:[%s29104_s5 + $0x1f0] sm:$0xff]  ;;  %v5103_v25 = vld [vmem:[%s29104_s5 + $0x1f8] sm:$0xff] }
 0x6bd   :  { %30114 = vst [vmem:[#allocation129_spill] sm:$0xff] %v23735_v14  ;;  %30117 = vst [vmem:[#allocation130_spill] sm:$0xff] %v23741_v37  ;;  %v30122_v62 = vpack.c.bf16 %v22456_v27, %v22448_v52  ;;  %v23775_v56 = vpack.c.bf16 %v7122_v5, %v7115_v48  ;;  %19989 = vmatprep.subr.bf16.mxu0 %v23735_v14  ;;  %v23779_v1 = vsub.f32 %v23708_v61, %v6859_v44  ;;  %v30126_v52 = vld [vmem:[#allocation55_spill] sm:$0xff]  ;;  %v30127_v27 = vld [vmem:[#allocation56_spill] sm:$0xff] }
 0x6be   :  { %v29374_v23 = vand.u32 4294901760, %v23747_v2  ;;  %4946 = vrot.lane.b32.xlu1 %v4830_v15, %s21814_s23  ;;  %4932 = vrot.lane.b32.xlu0 %v4811_v17, %s21813_s19  ;;  %v7010_v5 = vand.u32 4294901760, %v7009_v18  ;;  %v23795_v61 = vsub.f32 %v23727_v60, %v29371_v4  ;;  %v30128_v17 = vand.u32 4294901760, %v23594_v59 }
 0x6bf   :  { %19853 = vmatprep.subr.bf16.mxu1 %v30122_v62  ;;  %30125 = vst [vmem:[#allocation53_spill] sm:$0xff] %v23775_v56  ;;  %6139 = vmatmul.mubr.f32.gmra.mrb[24].mxu1 %v23453_v38  ;;  %v30129_v48 = vand.u32 4294901760, %v23599_v50  ;;  %v30131_v62 = vand.u32 4294901760, %v23614_v10  ;;  %v30132_v14 = vand.u32 4294901760, %v23640_v45  ;;  %v30134_v15 = vpack.c.bf16 %v29977_v29, %v22468_v31 }
 0x6c0   :  { %19991 = vmatpush3.bf16.msra.mxu0 %v23741_v37  ;;  %v23806_v18 = vsub.f32 %v23747_v2, %v29374_v23  ;;  %6144 = vmatprep.mubr.f32.mxu1 %v23493_v13  ;;  %v23824_v23 = vpop.permute.xlu1 %4819  ;;  %v23826_v37 = vpack.c.bf16 %v7010_v5, %v7003_v8  ;;  %v30137_v59 = vand.u32 4294901760, %v23767_v32  ;;  %v29383_v10 = vand.u32 4294901760, %v23795_v61 }
 0x6c1   :  { %v23812_v4 = vpack.c.bf16 %v30129_v48, %v30128_v17  ;;  %v23818_v56 = vpack.c.bf16 %v30132_v14, %v30131_v62  ;;  %19855 = vmatpush3.bf16.msra.mxu1 %v30134_v15  ;;  %30135 = vst [vmem:[#allocation56_spill] sm:$0xff] %v23824_v23  ;;  %v6862_v45 = vand.u32 4294901760, %v23785_v19  ;;  %v5086_v14 = vld [vmem:[%s29104_s5 + $0x170] sm:$0xff]  ;;  %v4831_v29 = vmul.f32 %v23824_v23, %v22873_v11  ;;  %v5087_v15 = vld [vmem:[%s29104_s5 + $0x178] sm:$0xff] }
 0x6c2   :  { %30136 = vst [vmem:[#allocation133_spill] sm:$0xff] %v23826_v37  ;;  %v7128_v50 = vsub.f32 %v23767_v32, %v30137_v59  ;;  %v30138_v31 = vpack.c.bf16 %v29981_v54, %v29979_v7  ;;  %v30139_v8 = vand.u32 4294901760, %v23779_v1  ;;  %v6865_v62 = vand.u32 4294901760, %v5103_v25  ;;  %v23851_v59 = vpop.permute.xlu0 %4827  ;;  %v30141_v7 = vld [vmem:[#allocation83_spill] sm:$0xff] }
 0x6c3   :  { %30130 = vst [vmem:[#allocation54_spill] sm:$0xff] %v23812_v4  ;;  %30133 = vst [vmem:[#allocation55_spill] sm:$0xff] %v23818_v56  ;;  %19993 = vmatprep.subr.bf16.mxu0 %v23812_v4  ;;  %v4812_v17 = vmul.f32 %v23758_v63, %v30013_v49  ;;  %4835 = vperm.xlu0 %21715, %v30141_v7   ;;  %v30142_v23 = vand.u32 4294901760, %v23806_v18  ;;  %v6814_v4 = vand.u32 4294901760, %v5086_v14 }
 0x6c4   :  { %19857 = vmatprep.subr.bf16.mxu1 %v30138_v31  ;;  %v7135_v48 = vsub.f32 %v23779_v1, %v30139_v8  ;;  %30140 = vst [vmem:[#allocation134_spill] sm:$0xff] %v23851_v59  ;;  %v7129_v54 = vand.u32 4294901760, %v7128_v50  ;;  %v7016_v31 = vsub.f32 %v23795_v61, %v29383_v10  ;;  %v23858_v8 = vsub.f32 %v23785_v19, %v6862_v45  ;;  %v23871_v19 = vpop.permute.xlu1 %4823 }
 0x6c5   :  { %6146 = vmatmul.mubr.f32.gmra.mrb[26].mxu1 %v23495_v6  ;;  %4948 = vrot.lane.b32.xlu1 %v4831_v29, %s21814_s23  ;;  %v7023_v63 = vsub.f32 %v23806_v18, %v30142_v23  ;;  %v23865_v11 = vsub.f32 %v5103_v25, %v6865_v62  ;;  %v30143_v50 = vpack.c.bf16 %v29985_v58, %v29983_v55  ;;  %v6817_v29 = vand.u32 4294901760, %v5087_v15 }
 0x6c6   :  { %v7136_v5 = vand.u32 4294901760, %v7135_v48  ;;  %6281 = vmatprep.mubr.f32.mxu1 %v23108_v22  ;;  %30144 = vst [vmem:[#allocation83_spill] sm:$0xff] %v23871_v19  ;;  %v7017_v10 = vand.u32 4294901760, %v7016_v31  ;;  %v29387_v37 = vand.u32 4294901760, %v23858_v8  ;;  %v30145_v48 = vand.u32 4294901760, %v23693_v47  ;;  %19995 = vmatpush3.bf16.msra.mxu0 %v23818_v56  ;;  %v30198_v56 = vld [vmem:[#allocation60_spill] sm:$0xff] }
 0x6c7   :  { %19859 = vmatpush3.bf16.msra.mxu1 %v30143_v50  ;;  %v4833_v23 = vmul.f32 %v23851_v59, %v22983_v34  ;;  %v30147_v25 = vpack.c.bf16 %v29988_v43, %v22568_v30  ;;  %v7024_v58 = vand.u32 4294901760, %v7023_v63  ;;  %v29385_v31 = vand.u32 4294901760, %v23865_v11  ;;  %4934 = vrot.lane.b32.xlu0 %v4812_v17, %s21813_s19 }
 0x6c8   :  { %v23876_v6 = vpack.c.bf16 %v6859_v44, %v30145_v48  ;;  %v23883_v55 = vpack.c.bf16 %v7136_v5, %v7129_v54  ;;  %v7142_v47 = vsub.f32 %v23858_v8, %v29387_v37  ;;  %v23891_v44 = vsub.f32 %v5086_v14, %v6814_v4  ;;  %v30165_v37 = vld [vmem:[#allocation40_spill] sm:$0xff] }
 0x6c9   :  { %19861 = vmatprep.subr.bf16.mxu1 %v30147_v25  ;;  %v23893_v50 = vsub.f32 %v5087_v15, %v6817_v29  ;;  %4855 = vperm.xlu1 %21716, %v30141_v7   ;;  %v23897_v30 = vpack.c.bf16 %v7024_v58, %v7017_v10  ;;  %v7149_v43 = vsub.f32 %v23865_v11, %v29385_v31  ;;  %v30148_v63 = vand.u32 4294901760, %v23727_v60  ;;  %v30153_v60 = vld [vmem:[#allocation37_spill] sm:$0xff] }
 0x6ca   :  { %30146 = vst [vmem:[#allocation135_spill] sm:$0xff] %v23876_v6  ;;  %19997 = vmatprep.subr.bf16.mxu0 %v23876_v6  ;;  %v30149_v5 = vand.u32 4294901760, %v23747_v2  ;;  %v23908_v14 = vpack.c.bf16 %v6865_v62, %v6862_v45  ;;  %v4832_v15 = vmul.f32 %v23871_v19, %v30013_v49  ;;  %v30152_v54 = vpack.c.bf16 %v22608_v28, %v22590_v16  ;;  %v30156_v62 = vld [vmem:[#allocation86_spill] sm:$0xff]  ;;  %v30158_v31 = vld [vmem:[#allocation89_spill] sm:$0xff]  ;;  %v30164_v28 = vld [vmem:[#allocation92_spill] sm:$0xff] }
 0x6cb   :  { %v7143_v10 = vand.u32 4294901760, %v7142_v47  ;;  %v29386_v48 = vand.u32 4294901760, %v23891_v44  ;;  %v29388_v25 = vand.u32 4294901760, %v23893_v50  ;;  %v30154_v58 = vpack.c.bf16 %v29997_v41, %v30153_v60  ;;  %v30159_v16 = vld [vmem:[#allocation90_spill] sm:$0xff]  ;;  %v23927_v47 = vpop.permute.xlu1 %4807  ;;  %4952 = vrot.lane.b32.xlu0 %v4833_v23, %s21814_s23  ;;  %v30197_v6 = vld [vmem:[#allocation57_spill] sm:$0xff] }
 0x6cc   :  { %v23906_v17 = vpack.c.bf16 %v30149_v5, %v30148_v63  ;;  %30151 = vst [vmem:[#allocation137_spill] sm:$0xff] %v23908_v14  ;;  %19863 = vmatpush3.bf16.msra.mxu1 %v30152_v54  ;;  %v7150_v2 = vand.u32 4294901760, %v7149_v43  ;;  %v23921_v45 = vpack.c.bf16 %v6817_v29, %v6814_v4  ;;  %v30157_v63 = vld [vmem:[#allocation87_spill] sm:$0xff]  ;;  %30160 = vst [vmem:[#allocation86_spill] sm:$0xff] %v23927_v47  ;;  %v30162_v29 = vld [vmem:[#allocation38_spill] sm:$0xff]  ;;  %v21815_v19 = vmov 7  }
 0x6cd   :  { %19865 = vmatprep.subr.bf16.mxu1 %v30154_v58  ;;  %v7030_v41 = vsub.f32 %v23891_v44, %v29386_v48  ;;  %v7037_v43 = vsub.f32 %v23893_v50, %v29388_v25  ;;  %v30161_v4 = vld [vmem:[#allocation35_spill] sm:$0xff]  ;;  %4950 = vrot.lane.b32.xlu1 %v4832_v15, %s21814_s23  ;;  %v4813_v5 = vmul.f32 %v23927_v47, %v22983_v34  ;;  %v30192_v47 = vld [vmem:[#allocation49_spill] sm:$0xff] }
 0x6ce   :  { %30150 = vst [vmem:[#allocation136_spill] sm:$0xff] %v23906_v17  ;;  %19999 = vmatpush3.bf16.msra.mxu0 %v23906_v17  ;;  %30155 = vst [vmem:[#allocation37_spill] sm:$0xff] %v23921_v45  ;;  %v20036_v54 = vpack.c.bf16 %v30162_v29, %v30161_v4  ;;  %v23940_v60 = vpack.c.bf16 %v7150_v2, %v7143_v10  ;;  %v30163_v58 = vld [vmem:[#allocation91_spill] sm:$0xff]  ;;  %21717 = vset.pattern.permute.xlu1 %v21815_v19  ;;  %v30172_v29 = vld [vmem:[#allocation58_spill] sm:$0xff]  ;;  %v30196_v4 = vand.u32 4294901760, %v23108_v22 }
 0x6cf   :  { %20001 = vmatprep.subr.bf16.mxu0 %v23908_v14  ;;  %v30166_v25 = vld [vmem:[#allocation39_spill] sm:$0xff]  ;;  %v7031_v49 = vand.u32 4294901760, %v7030_v41  ;;  %v7038_v14 = vand.u32 4294901760, %v7037_v43  ;;  %v30171_v48 = vpack.c.bf16 %v30124_v35, %v30123_v21  ;;  %v30175_v23 = vpack.c.bf16 %v30127_v27, %v30126_v52  ;;  %v30176_v21 = vld [vmem:[#allocation61_spill] sm:$0xff]  ;;  %v30177_v35 = vld [vmem:[#allocation62_spill] sm:$0xff] }
 0x6d0   :  { %v30167_v59 = vpack.c.bf16 %v30165_v37, %v30166_v25  ;;  %v30173_v37 = vld [vmem:[#allocation59_spill] sm:$0xff]  ;;  %v30174_v25 = vld [vmem:[#allocation84_spill] sm:$0xff]  ;;  %v30179_v52 = vld [vmem:[#allocation42_spill] sm:$0xff]  ;;  %v30189_v43 = vmov 5   ;;  %v30203_v22 = vand.u32 4294901760, %v23609_v20  ;;  %v30207_v10 = vand.u32 4294901760, %v23619_v26 }
 0x6d1   :  { %4839 = vperm.xlu0 %21715, %v30174_v25   ;;  %v23964_v41 = vpack.c.bf16 %v7038_v14, %v7031_v49  ;;  %4936 = vrot.lane.b32.xlu1 %v4813_v5, %s21813_s19  ;;  %v30180_v27 = vld [vmem:[#allocation30_spill] sm:$0xff]  ;;  %v21765_v5 = vld [vmem:[%s29101_s2 + $0x10] sm:$0xff]  ;;  %v30199_v17 = vld [vmem:[#allocation65_spill] sm:$0xff] }
 0x6d2   :  { %19867 = vmatpush3.bf16.msra.mxu1 %v30167_v59  ;;  %v19872_v59 = vpack.c.bf16 %v30173_v37, %v30172_v29  ;;  %20003 = vmatpush3.bf16.msra.mxu0 %v23921_v45  ;;  %v30178_v29 = vld [vmem:[#allocation122_spill] sm:$0xff]  ;;  %v21766_v37 = vld [vmem:[%s29101_s2 + $0x18] sm:$0xff]  ;;  %v30190_v2 = vld [vmem:[#allocation111_spill] sm:$0xff]  ;;  %v30217_v26 = vand.u32 4294901760, %v30180_v27  ;;  %s21816_s2 = smov 28  }
 0x6d3   :  { %19869 = vmatprep.subr.bf16.mxu1 %v30171_v48  ;;  %20037 = vmatprep.subr.bf16.mxu0 %v20036_v54  ;;  %v19874_v48 = vpack.c.bf16 %v30177_v35, %v30176_v21  ;;  %v30183_v21 = vmov 6   ;;  %v30184_v35 = vld [vmem:[#allocation46_spill] sm:$0xff]  ;;  %v30191_v54 = vld [vmem:[#allocation81_spill] sm:$0xff]  ;;  %v30193_v34 = vld [vmem:[#allocation51_spill] sm:$0xff]  ;;  %v30208_v36 = vand.u32 4294901760, %v30178_v29 }
 0x6d4   :  { %v30186_v14 = vld [vmem:[#allocation110_spill] sm:$0xff]  ;;  %v30194_v49 = vld [vmem:[#allocation115_spill] sm:$0xff]  ;;  %v30195_v45 = vld [vmem:[#allocation52_spill] sm:$0xff] }
 0x6d5   :  { %21719 = vset.pattern.permute.xlu0 %v21815_v19  ;;  %4875 = vperm.xlu1 %21717, %v30141_v7   ;;  %v30187_v7 = vld [vmem:[#allocation47_spill] sm:$0xff]  ;;  %v30205_v15 = vld [vmem:[#allocation69_spill] sm:$0xff]  ;;  %v24036_v33 = vpack.c.bf16 %v30208_v36, %v30207_v10  ;;  %v30218_v36 = vand.u32 4294901760, %v23767_v32  ;;  %v30219_v10 = vand.u32 4294901760, %v23779_v1 }
 0x6d6   :  { %19871 = vmatpush3.bf16.msra.mxu1 %v30175_v23  ;;  %4879 = vperm.xlu0 %21719, %v30174_v25   ;;  %v30181_v23 = vld [vmem:[#allocation96_spill] sm:$0xff] }
 0x6d7   :  { %19873 = vmatprep.subr.bf16.mxu1 %v19872_v59  ;;  %v30182_v59 = vld [vmem:[#allocation45_spill] sm:$0xff]  ;;  %30209 = vst [vmem:[#allocation89_spill] sm:$0xff] %v24036_v33  ;;  %v24058_v33 = vpack.c.bf16 %v30219_v10, %v30218_v36 }
 0x6d9   :  { %21718 = vset.pattern.permute.xlu1 %v30183_v21  ;;  %30220 = vst [vmem:[#allocation92_spill] sm:$0xff] %v24058_v33  ;;  %v30295_v33 = vld [vmem:[#allocation67_spill] sm:$0xff] }
 0x6da   :  { %19875 = vmatpush3.bf16.msra.mxu1 %v19874_v48  ;;  %4883 = vperm.xlu0 %21719, %v21765_v5   ;;  %v30185_v48 = vld [vmem:[#allocation97_spill] sm:$0xff] }
 0x6db   :  { %19877 = vmatprep.subr.bf16.mxu1 %v30179_v52  ;;  %4859 = vperm.xlu1 %21718, %v30174_v25   ;;  %v30188_v25 = vld [vmem:[#allocation48_spill] sm:$0xff] }
 0x6dd   :  { %6284 = vmatmul.mubr.f32.vlgmr.msra.gmra.mrb[28].mxu1 %v30180_v27  ;;  %v30226_v27 = vand.u32 4294901760, %v23858_v8 }
 0x6de   :  { %6290 = vmatprep.mubr.f32.mxu1 %v30181_v23  ;;  %19879 = vmatpush3.bf16.msra.mxu1 %v30182_v59 }
 0x6df   :  { %19881 = vmatprep.subr.bf16.mxu1 %v30184_v35  ;;  %21723 = vset.pattern.permute.xlu0 %v30183_v21 }
 0x6e0   :  { %4867 = vperm.xlu0 %21723, %v21766_v37   ;;  %21720 = vset.pattern.permute.xlu1 %v30189_v43 }
 0x6e1   :  { %6293 = vmatmul.mubr.f32.gmra.mrb[30].mxu1 %v30185_v48  ;;  %4843 = vperm.xlu1 %21720, %v21765_v5  }
 0x6e2   :  { %6299 = vmatprep.mubr.f32.mxu1 %v30186_v14  ;;  %19883 = vmatpush3.bf16.msra.mxu1 %v30187_v7 }
 0x6e3   :  { %19885 = vmatprep.subr.bf16.mxu1 %v30188_v25 }
 0x6e4   :  { %21725 = vset.pattern.permute.xlu0 %v21815_v19 }
 0x6e5   :  { %6302 = vmatmul.mubr.f32.gmra.mrb[32].mxu1 %v30190_v2  ;;  %21721 = vset.pattern.permute.xlu1 %v30183_v21  ;;  %v30201_v21 = vld [vmem:[#allocation68_spill] sm:$0xff] }
 0x6e6   :  { %6308 = vmatprep.mubr.f32.mxu1 %v30191_v54  ;;  %19887 = vmatpush3.bf16.msra.mxu1 %v30192_v47 }
 0x6e7   :  { %19889 = vmatprep.subr.bf16.mxu1 %v30193_v34  ;;  %4863 = vperm.xlu1 %21721, %v21765_v5   ;;  %v30202_v5 = vand.u32 4294901760, %v23604_v9  ;;  %v30213_v9 = vld [vmem:[#allocation72_spill] sm:$0xff] }
 0x6e9   :  { %6311 = vmatmul.mubr.f32.gmra.mrb[34].mxu1 %v30194_v49 }
 0x6ea   :  { %19891 = vmatpush3.bf16.msra.mxu1 %v30195_v45  ;;  %6415 = vmatprep.mubr.f32.mxu1 %v30196_v4  ;;  %v24028_v4 = vpack.c.bf16 %v30203_v22, %v30202_v5  ;;  %v30214_v5 = vand.u32 4294901760, %v23675_v24  ;;  %v30215_v22 = vand.u32 4294901760, %v23688_v12 }
 0x6eb   :  { %19893 = vmatprep.subr.bf16.mxu1 %v30197_v6  ;;  %21722 = vset.pattern.permute.xlu1 %v30189_v43  ;;  %v30206_v43 = vld [vmem:[#allocation71_spill] sm:$0xff] }
 0x6ec   :  { %4847 = vperm.xlu1 %21722, %v21766_v37   ;;  %30204 = vst [vmem:[#allocation87_spill] sm:$0xff] %v24028_v4  ;;  %v24049_v4 = vpack.c.bf16 %v30215_v22, %v30214_v5  ;;  %v30227_v22 = vand.u32 4294901760, %v23865_v11 }
 0x6ee   :  { %19895 = vmatpush3.bf16.msra.mxu1 %v30198_v56  ;;  %30216 = vst [vmem:[#allocation91_spill] sm:$0xff] %v24049_v4  ;;  %v24076_v36 = vpack.c.bf16 %v30227_v22, %v30226_v27 }
 0x6ef   :  { %19897 = vmatprep.subr.bf16.mxu1 %v30199_v17 }
 0x6f0   :  { %21724 = vset.pattern.permute.xlu1 %v21815_v19  ;;  %v30210_v19 = vand.u32 4294901760, %v23658_v0  ;;  %30228 = vst [vmem:[#allocation39_spill] sm:$0xff] %v24076_v36 }
 0x6f1   :  { %4887 = vperm.xlu1 %21724, %v21766_v37   ;;  %v30211_v37 = vand.u32 4294901760, %v23663_v51 }
 0x6f2   :  { %19899 = vmatpush3.bf16.msra.mxu1 %v30200_v3 }
 0x6f3   :  { %19901 = vmatprep.subr.bf16.mxu1 %v30201_v21  ;;  %v24042_v57 = vpack.c.bf16 %v30211_v37, %v30210_v19  ;;  %v30221_v19 = vand.u32 4294901760, %v30181_v23  ;;  %v30222_v37 = vand.u32 4294901760, %v23795_v61  ;;  %v30229_v23 = vand.u32 4294901760, %v30186_v14 }
 0x6f4   :  { %v30235_v14 = vand.u32 4294901760, %v30194_v49 }
 0x6f5   :  { %30212 = vst [vmem:[#allocation90_spill] sm:$0xff] %v24042_v57  ;;  %v30298_v57 = vld [vmem:[#allocation38_spill] sm:$0xff] }
 0x6f6   :  { %19903 = vmatpush3.bf16.msra.mxu1 %v30205_v15 }
 0x6f7   :  { %19905 = vmatprep.subr.bf16.mxu1 %v30206_v43 }
 0x6fa   :  { %19907 = vmatpush3.bf16.msra.mxu1 %v30213_v9 }
 0x6fb   :  { %19941 = vmatprep.subr.bf16.mxu1 %v30179_v52  ;;  %v30223_v52 = vand.u32 4294901760, %v23806_v18 }
 0x6fd   :  { %6419 = vmatmul.mubr.f32.vlgmr.msra.gmra.mrb[36].mxu1 %v30217_v26  ;;  %v24068_v5 = vpack.c.bf16 %v30223_v52, %v30222_v37  ;;  %v30225_v26 = vand.u32 4294901760, %v30185_v48  ;;  %v30233_v48 = vand.u32 4294901760, %v30190_v2  ;;  %v30250_v2 = vld [vmem:[#allocation31_spill] sm:$0xff] }
 0x6fe   :  { %6426 = vmatprep.mubr.f32.mxu1 %v30221_v19  ;;  %19943 = vmatpush3.bf16.msra.mxu1 %v30182_v59  ;;  %v30230_v59 = vand.u32 4294901760, %v23891_v44  ;;  %v30234_v19 = vand.u32 4294901760, %v30191_v54 }
 0x6ff   :  { %19945 = vmatprep.subr.bf16.mxu1 %v30184_v35  ;;  %30224 = vst [vmem:[#allocation40_spill] sm:$0xff] %v24068_v5  ;;  %v30231_v35 = vand.u32 4294901760, %v23893_v50 }
 0x701   :  { %6430 = vmatmul.mubr.f32.gmra.mrb[38].mxu1 %v30225_v26  ;;  %v24086_v10 = vpack.c.bf16 %v30231_v35, %v30230_v59  ;;  %v30256_v59 = vld [vmem:[#allocation100_spill] sm:$0xff] }
 0x702   :  { %6437 = vmatprep.mubr.f32.mxu1 %v30229_v23  ;;  %19947 = vmatpush3.bf16.msra.mxu1 %v30187_v7  ;;  %v30236_v7 = vld [vmem:[#allocation33_spill] sm:$0xff] }
 0x703   :  { %19949 = vmatprep.subr.bf16.mxu1 %v30188_v25  ;;  %30232 = vst [vmem:[#allocation58_spill] sm:$0xff] %v24086_v10  ;;  %v30290_v10 = vld [vmem:[#allocation55_spill] sm:$0xff] }
 0x705   :  { %6441 = vmatmul.mubr.f32.gmra.mrb[40].mxu1 %v30233_v48 }
 0x706   :  { %6448 = vmatprep.mubr.f32.mxu1 %v30234_v19  ;;  %19951 = vmatpush3.bf16.msra.mxu1 %v30192_v47  ;;  %v30246_v47 = vld [vmem:[#allocation127_spill] sm:$0xff] }
 0x707   :  { %19953 = vmatprep.subr.bf16.mxu1 %v30193_v34  ;;  %v30237_v34 = vld [vmem:[#allocation94_spill] sm:$0xff] }
 0x709   :  { %6452 = vmatmul.mubr.f32.gmra.mrb[42].mxu1 %v30235_v14 }
 0x70a   :  { %19955 = vmatpush3.bf16.msra.mxu1 %v30195_v45  ;;  %6743 = vmatprep.mubr.f32.mxu1 %v30236_v7  ;;  %v30245_v45 = vld [vmem:[#allocation124_spill] sm:$0xff] }
 0x70b   :  { %19957 = vmatprep.subr.bf16.mxu1 %v30197_v6  ;;  %v30238_v6 = vld [vmem:[#allocation95_spill] sm:$0xff] }
 0x70e   :  { %19959 = vmatpush3.bf16.msra.mxu1 %v30198_v56  ;;  %v30239_v56 = vld [vmem:[#allocation99_spill] sm:$0xff] }
 0x70f   :  { %19961 = vmatprep.subr.bf16.mxu1 %v30199_v17  ;;  %v30241_v17 = vld [vmem:[#allocation78_spill] sm:$0xff] }
 0x712   :  { %19963 = vmatpush3.bf16.msra.mxu1 %v30200_v3  ;;  %v30240_v3 = vld [vmem:[#allocation102_spill] sm:$0xff] }
 0x713   :  { %19965 = vmatprep.subr.bf16.mxu1 %v30201_v21 }
 0x716   :  { %19967 = vmatpush3.bf16.msra.mxu1 %v30205_v15  ;;  %v30249_v15 = vld [vmem:[#allocation133_spill] sm:$0xff] }
 0x717   :  { %19969 = vmatprep.subr.bf16.mxu1 %v30206_v43  ;;  %v30253_v43 = vld [vmem:[#allocation93_spill] sm:$0xff] }
 0x71a   :  { %19971 = vmatpush3.bf16.msra.mxu1 %v30213_v9  ;;  %v30242_v9 = vld [vmem:[#allocation79_spill] sm:$0xff] }
 0x71b   :  { %20005 = vmatprep.subr.bf16.mxu1 %v30237_v34 }
 0x71d   :  { %6745 = vmatmul.mubr.f32.vlgmr.msra.gmra.mrb[44].mxu1 %v23057_v46  ;;  %v30243_v46 = vld [vmem:[#allocation82_spill] sm:$0xff] }
 0x71e   :  { %6750 = vmatprep.mubr.f32.mxu1 %v23302_v40  ;;  %20007 = vmatpush3.bf16.msra.mxu1 %v30238_v6  ;;  %v30244_v40 = vld [vmem:[#allocation114_spill] sm:$0xff]  ;;  %v30259_v6 = vld [vmem:[#allocation105_spill] sm:$0xff] }
 0x71f   :  { %20009 = vmatprep.subr.bf16.mxu1 %v30239_v56 }
 0x721   :  { %6752 = vmatmul.mubr.f32.gmra.mrb[46].mxu1 %v23304_v53  ;;  %v30247_v53 = vld [vmem:[#allocation128_spill] sm:$0xff] }
 0x722   :  { %6757 = vmatprep.mubr.f32.mxu1 %v23451_v39  ;;  %20011 = vmatpush3.bf16.msra.mxu1 %v30240_v3  ;;  %v30248_v39 = vld [vmem:[#allocation53_spill] sm:$0xff] }
 0x723   :  { %20013 = vmatprep.subr.bf16.mxu1 %v30241_v17 }
 0x725   :  { %6759 = vmatmul.mubr.f32.gmra.mrb[48].mxu1 %v23453_v38 }
 0x726   :  { %6764 = vmatprep.mubr.f32.mxu1 %v23493_v13  ;;  %20015 = vmatpush3.bf16.msra.mxu1 %v30242_v9  ;;  %v30260_v9 = vld [vmem:[#allocation108_spill] sm:$0xff] }
 0x727   :  { %20017 = vmatprep.subr.bf16.mxu1 %v30243_v46 }
 0x729   :  { %6766 = vmatmul.mubr.f32.gmra.mrb[50].mxu1 %v30244_v40  ;;  %v30261_v40 = vld [vmem:[#allocation117_spill] sm:$0xff] }
 0x72a   :  { %20019 = vmatpush3.bf16.msra.mxu1 %v30245_v45 }
 0x72b   :  { %20021 = vmatprep.subr.bf16.mxu1 %v30246_v47  ;;  %v4931_v38 = vpop.permute.xlu1 %4930  ;;  %v30262_v47 = vpack.c.bf16 %v30157_v63, %v30156_v62 }
 0x72c   :  { %v5017_v13 = vsel %vm5016_vm10, %v30250_v2, %v4931_v38 }
 0x72d   :  { %v24128_v49 = vand.u32 4294901760, %v5017_v13 }
 0x72e   :  { %20023 = vmatpush3.bf16.msra.mxu1 %v30247_v53 }
 0x72f   :  { %20025 = vmatprep.subr.bf16.mxu1 %v30248_v39  ;;  %30251 = vst [vmem:[#allocation59_spill] sm:$0xff] %v24128_v49  ;;  %v24131_v54 = vsub.f32 %v5017_v13, %v24128_v49  ;;  %v30263_v39 = vpack.c.bf16 %v30159_v16, %v30158_v31  ;;  %v30266_v13 = vld [vmem:[#allocation119_spill] sm:$0xff] }
 0x730   :  { %v4933_v25 = vpop.permute.xlu0 %4932  ;;  %v24134_v21 = vpop.permute.xlu1 %4946 }
 0x731   :  { %30252 = vst [vmem:[#allocation84_spill] sm:$0xff] %v24134_v21  ;;  %v5018_v37 = vsel %vm5016_vm10, %v30253_v43, %v4933_v25  ;;  %v5022_v52 = vsel %vm5021_vm11, %v4931_v38, %v24134_v21  ;;  %v29417_v27 = vand.u32 4294901760, %v24131_v54 }
 0x732   :  { %20027 = vmatpush3.bf16.msra.mxu1 %v30249_v15  ;;  %v24143_v26 = vand.u32 4294901760, %v5022_v52  ;;  %v30264_v15 = vld [vmem:[#allocation118_spill] sm:$0xff] }
 0x733   :  { %20029 = vmatprep.subr.bf16.mxu1 %v23883_v55  ;;  %v24141_v55 = vand.u32 4294901760, %v5018_v37  ;;  %v6876_v48 = vsub.f32 %v24131_v54, %v29417_v27 }
 0x734   :  { %7153 = vmatprep.mubr.f32.mxu1 %v24143_v26 }
 0x735   :  { %30254 = vst [vmem:[#allocation61_spill] sm:$0xff] %v24141_v55  ;;  %v24147_v22 = vsub.f32 %v5018_v37, %v24141_v55  ;;  %v6877_v3 = vand.u32 4294901760, %v6876_v48  ;;  %v30268_v37 = vpack.c.bf16 %v30164_v28, %v30163_v58  ;;  %v30270_v48 = vld [vmem:[#allocation98_spill] sm:$0xff] }
 0x736   :  { %20031 = vmatpush3.bf16.msra.mxu1 %v23897_v30  ;;  %v24150_v30 = vsub.f32 %v5022_v52, %v24143_v26  ;;  %v30269_v52 = vld [vmem:[#allocation123_spill] sm:$0xff] }
 0x737   :  { %20033 = vmatprep.subr.bf16.mxu1 %v23940_v60  ;;  %v24154_v23 = vpop.permute.xlu1 %4948  ;;  %v29415_v7 = vand.u32 4294901760, %v24147_v22 }
 0x738   :  { %30255 = vst [vmem:[#allocation62_spill] sm:$0xff] %v24154_v23  ;;  %v5023_v60 = vsel %vm5021_vm11, %v4933_v25, %v24154_v23  ;;  %v29418_v35 = vand.u32 4294901760, %v24150_v30  ;;  %v30267_v25 = vld [vmem:[#allocation70_spill] sm:$0xff]  ;;  %v30287_v23 = vld [vmem:[#allocation113_spill] sm:$0xff] }
 0x739   :  { %v24163_v19 = vand.u32 4294901760, %v5023_v60  ;;  %v6891_v46 = vsub.f32 %v24147_v22, %v29415_v7  ;;  %v30280_v7 = vld [vmem:[#allocation109_spill] sm:$0xff] }
 0x73a   :  { %20035 = vmatpush3.bf16.msra.mxu1 %v23964_v41  ;;  %v30258_v41 = vld [vmem:[#allocation103_spill] sm:$0xff]  ;;  %v6870_v14 = vsub.f32 %v24150_v30, %v29418_v35  ;;  %v30284_v35 = vld [vmem:[#allocation54_spill] sm:$0xff] }
 0x73b   :  { %20069 = vmatprep.subr.bf16.mxu1 %v30256_v59  ;;  %30257 = vst [vmem:[#allocation122_spill] sm:$0xff] %v24163_v19  ;;  %v24172_v34 = vsub.f32 %v5023_v60, %v24163_v19  ;;  %v6892_v38 = vand.u32 4294901760, %v6891_v46 }
 0x73c   :  { %v6871_v56 = vand.u32 4294901760, %v6870_v14  ;;  %v30271_v14 = vpack.c.bf16 %v23366_v42, %v30270_v48 }
 0x73d   :  { %7155 = vmatmul.mubr.f32.vlgmr.msra.gmra.mrb[52].mxu1 %v24128_v49  ;;  %v29416_v17 = vand.u32 4294901760, %v24172_v34  ;;  %v30300_v49 = vld [vmem:[#allocation112_spill] sm:$0xff] }
 0x73e   :  { %20071 = vmatpush3.bf16.msra.mxu1 %v30258_v41  ;;  %7160 = vmatprep.mubr.f32.mxu1 %v24163_v19  ;;  %v30294_v19 = vld [vmem:[#allocation135_spill] sm:$0xff] }
 0x73f   :  { %20073 = vmatprep.subr.bf16.mxu1 %v30259_v6  ;;  %6872 = vmatprep.mubr.f32.mxu0 %v6871_v56  ;;  %v6885_v45 = vsub.f32 %v24172_v34, %v29416_v17  ;;  %v30272_v56 = vld [vmem:[#allocation129_spill] sm:$0xff] }
 0x740   :  { %6878 = vmatmul.mubr.f32.vlgmr.msra.gmra.mrb[18].mxu0 %v6877_v3  ;;  %v30273_v3 = vld [vmem:[#allocation106_spill] sm:$0xff] }
 0x741   :  { %7162 = vmatmul.mubr.f32.gmra.mrb[54].mxu1 %v24141_v55  ;;  %20039 = vmatpush3.bf16.msra.mxu0 %v30262_v47  ;;  %v6886_v53 = vand.u32 4294901760, %v6885_v45  ;;  %v30291_v55 = vld [vmem:[#allocation120_spill] sm:$0xff] }
 0x742   :  { %20075 = vmatpush3.bf16.msra.mxu1 %v30260_v9  ;;  %20041 = vmatprep.subr.bf16.mxu0 %v30263_v39  ;;  %v24193_v2 = vpop.permute.xlu0 %4835  ;;  %v30276_v39 = vld [vmem:[#allocation104_spill] sm:$0xff]  ;;  %v30292_v36 = vpack.c.bf16 %v23609_v20, %v30291_v55 }
 0x743   :  { %20077 = vmatprep.subr.bf16.mxu1 %v30261_v40  ;;  %30265 = vst [vmem:[#allocation42_spill] sm:$0xff] %v24193_v2  ;;  %6887 = vmatprep.mubr.f32.mxu0 %v6886_v53  ;;  %v4850_v43 = vmul.f32 %v24193_v2, %v30267_v25 }
 0x744   :  { %6893 = vmatmul.mubr.f32.gmra.mrb[20].mxu0 %v6892_v38  ;;  %v30277_v38 = vld [vmem:[#allocation101_spill] sm:$0xff] }
 0x745   :  { %20043 = vmatpush3.bf16.msra.mxu0 %v30268_v37  ;;  %4962 = vrot.lane.b32.xlu1 %v4850_v43, %s21816_s2  ;;  %v30278_v43 = vpack.c.bf16 %v30276_v39, %v30277_v38  ;;  %v30279_v37 = vld [vmem:[#allocation130_spill] sm:$0xff] }
 0x746   :  { %20079 = vmatpush3.bf16.msra.mxu1 %v30264_v15  ;;  %v4935_v60 = vpop.permute.xlu0 %4934  ;;  %20045 = vmatprep.subr.bf16.mxu0 %v30271_v14  ;;  %v30281_v14 = vld [vmem:[#allocation107_spill] sm:$0xff] }
 0x747   :  { %20081 = vmatprep.subr.bf16.mxu1 %v30266_v13  ;;  %v5019_v46 = vsel %vm5016_vm10, %v30273_v3, %v4935_v60  ;;  %v30282_v17 = vpack.c.bf16 %v30280_v7, %v30281_v14 }
 0x748   :  { %v24209_v45 = vpop.permute.xlu1 %4855  ;;  %v24211_v47 = vand.u32 4294901760, %v5019_v46 }
 0x749   :  { %30274 = vst [vmem:[#allocation30_spill] sm:$0xff] %v24209_v45  ;;  %v4870_v53 = vmul.f32 %v24209_v45, %v30267_v25  ;;  %20047 = vmatpush3.bf16.msra.mxu0 %v30278_v43  ;;  %v24234_v43 = vld [vmem:[%s29104_s5 + $0x280] sm:$0xff]  ;;  %v30286_v45 = vld [vmem:[#allocation116_spill] sm:$0xff] }
 0x74a   :  { %20083 = vmatpush3.bf16.msra.mxu1 %v30269_v52  ;;  %30275 = vst [vmem:[#allocation96_spill] sm:$0xff] %v24211_v47  ;;  %20049 = vmatprep.subr.bf16.mxu0 %v30282_v17  ;;  %v24223_v27 = vsub.f32 %v5019_v46, %v24211_v47  ;;  %v24225_v3 = vpop.permute.xlu0 %4952  ;;  %v24239_v17 = vld [vmem:[%s29104_s5 + $0x288] sm:$0xff] }
 0x74b   :  { %20085 = vmatprep.subr.bf16.mxu1 %v30272_v56  ;;  %30283 = vst [vmem:[#allocation45_spill] sm:$0xff] %v24225_v3  ;;  %4978 = vrot.lane.b32.xlu0 %v4870_v53, %s21803_s4  ;;  %v30288_v53 = vpack.c.bf16 %v30286_v45, %v30287_v23 }
 0x74c   :  { %v24229_v2 = vpop.permute.xlu1 %4950 }
 0x74d   :  { %30285 = vst [vmem:[#allocation46_spill] sm:$0xff] %v24229_v2  ;;  %v5024_v46 = vsel %vm5021_vm11, %v4935_v60, %v24229_v2  ;;  %20051 = vmatpush3.bf16.msra.mxu0 %v30288_v53 }
 0x74e   :  { %20087 = vmatpush3.bf16.msra.mxu1 %v30279_v37  ;;  %v24246_v21 = vand.u32 4294901760, %v5024_v46  ;;  %20053 = vmatprep.subr.bf16.mxu0 %v30292_v36  ;;  %v30296_v36 = vld [vmem:[#allocation35_spill] sm:$0xff] }
 0x74f   :  { %20089 = vmatprep.subr.bf16.mxu1 %v30284_v35  ;;  %v30297_v55 = vand.u32 4294901760, %v30296_v36  ;;  %v30304_v36 = vand.u32 4294901760, %v30157_v63  ;;  %v30310_v63 = vpack.c.bf16 %v23663_v51, %v23658_v0 }
 0x750   :  { %30289 = vst [vmem:[#allocation97_spill] sm:$0xff] %v24246_v21  ;;  %v24252_v5 = vpop.permute.xlu0 %4839  ;;  %v24259_v53 = vsub.f32 %v5024_v46, %v24246_v21  ;;  %7167 = vmatprep.mubr.f32.mxu1 %v24246_v21  ;;  %v4937_v20 = vpop.permute.xlu1 %4936  ;;  %v30301_v46 = vld [vmem:[#allocation121_spill] sm:$0xff]  ;;  %v30303_v21 = vand.u32 4294901760, %v30156_v62 }
 0x751   :  { %30293 = vst [vmem:[#allocation110_spill] sm:$0xff] %v24252_v5  ;;  %v4851_v4 = vmul.f32 %v24252_v5, %v30295_v33  ;;  %v5020_v60 = vsel %vm5016_vm10, %v30300_v49, %v4937_v20  ;;  %v5025_v2 = vsel %vm5021_vm11, %v4937_v20, %v24225_v3  ;;  %7169 = vmatmul.mubr.f32.gmra.mrb[56].mxu1 %v24211_v47  ;;  %v30307_v49 = vld [vmem:[#allocation136_spill] sm:$0xff]  ;;  %v24300_v62 = vld [vmem:[%s29104_s5 + $0x200] sm:$0xff] }
 0x752   :  { %20091 = vmatpush3.bf16.msra.mxu1 %v30290_v10  ;;  %v30299_v10 = vand.u32 4294901760, %v30298_v57  ;;  %v30302_v5 = vpack.c.bf16 %v30178_v29, %v30301_v46  ;;  %v24282_v35 = vpack.c.bf16 %v30304_v36, %v30303_v21  ;;  %v24284_v57 = vand.u32 4294901760, %v5025_v2  ;;  %v30311_v21 = vld [vmem:[#allocation137_spill] sm:$0xff] }
 0x753   :  { %20093 = vmatprep.subr.bf16.mxu1 %v30294_v19  ;;  %4964 = vrot.lane.b32.xlu0 %v4851_v4, %s21816_s2  ;;  %v29436_v20 = vand.u32 4294901760, %v24259_v53  ;;  %v30309_v29 = vand.u32 4294901760, %v30159_v16  ;;  %v30312_v4 = vand.u32 4294901760, %v24223_v27  ;;  %v30315_v36 = vand.u32 4294901760, %v24239_v17 }
 0x754   :  { %v24268_v19 = vpack.c.bf16 %v30299_v10, %v30297_v55  ;;  %20055 = vmatpush3.bf16.msra.mxu0 %v30302_v5  ;;  %30305 = vst [vmem:[#allocation47_spill] sm:$0xff] %v24284_v57  ;;  %v24286_v10 = vand.u32 4294901760, %v5020_v60  ;;  %v30308_v55 = vand.u32 4294901760, %v30158_v31  ;;  %v30313_v31 = vand.u32 4294901760, %v24234_v43  ;;  %7174 = vmatprep.mubr.f32.mxu1 %v24284_v57 }
 0x755   :  { %20057 = vmatprep.subr.bf16.mxu0 %v30310_v63  ;;  %v6906_v46 = vsub.f32 %v24223_v27, %v30312_v4  ;;  %v24325_v0 = vpop.permute.xlu0 %4879  ;;  %v24328_v63 = vpop.permute.xlu1 %4875  ;;  %v6900_v4 = vsub.f32 %v24259_v53, %v29436_v20 }
 0x756   :  { %30306 = vst [vmem:[#allocation48_spill] sm:$0xff] %v24286_v10  ;;  %20095 = vmatpush3.bf16.msra.mxu1 %v30307_v49  ;;  %v24295_v5 = vpack.c.bf16 %v30309_v29, %v30308_v55  ;;  %v24312_v16 = vsub.f32 %v24234_v43, %v30313_v31  ;;  %v24317_v55 = vsub.f32 %v24239_v17, %v30315_v36  ;;  %30317 = vst [vmem:[#allocation49_spill] sm:$0xff] %v24325_v0 }
 0x757   :  { %20097 = vmatprep.subr.bf16.mxu1 %v30311_v21  ;;  %v24320_v29 = vsub.f32 %v5025_v2, %v24284_v57  ;;  %v24323_v51 = vsub.f32 %v5020_v60, %v24286_v10  ;;  %30318 = vst [vmem:[#allocation51_spill] sm:$0xff] %v24328_v63  ;;  %v30319_v31 = vand.u32 4294901760, %v30163_v58  ;;  %v30320_v36 = vand.u32 4294901760, %v30164_v28  ;;  %v24342_v2 = vld [vmem:[%s29104_s5 + $0x208] sm:$0xff]  ;;  %7176 = vmatmul.mubr.f32.gmra.mrb[58].mxu1 %v24286_v10 }
 0x758   :  { %30314 = vst [vmem:[#allocation111_spill] sm:$0xff] %v24312_v16  ;;  %30316 = vst [vmem:[#allocation81_spill] sm:$0xff] %v24317_v55  ;;  %v4891_v60 = vmul.f32 %v24325_v0, %v30295_v33  ;;  %v4890_v57 = vmul.f32 %v24328_v63, %v30267_v25  ;;  %v30321_v58 = vpack.c.bf16 %v23688_v12, %v23675_v24  ;;  %v30322_v28 = vand.u32 4294901760, %v30270_v48  ;;  %v24362_v0 = vld [vmem:[%s29104_s5 + $0x290] sm:$0xff]  ;;  %v24367_v25 = vld [vmem:[%s29104_s5 + $0x298] sm:$0xff] }
 0x759   :  { %v24337_v3 = vpack.c.bf16 %v30320_v36, %v30319_v31  ;;  %v30323_v31 = vand.u32 4294901760, %v23366_v42  ;;  %v30324_v24 = vld [vmem:[#allocation37_spill] sm:$0xff]  ;;  %v30325_v12 = vand.u32 4294901760, %v24150_v30  ;;  %v6901_v42 = vand.u32 4294901760, %v6900_v4  ;;  %v24383_v63 = vld [vmem:[%s29104_s5 + $0x210] sm:$0xff] }
 0x75a   :  { %20059 = vmatpush3.bf16.msra.mxu0 %v30321_v58  ;;  %20099 = vmatpush3.bf16.msra.mxu1 %v30324_v24  ;;  %v29439_v48 = vand.u32 4294901760, %v24320_v29  ;;  %30328 = vst [vmem:[#allocation115_spill] sm:$0xff] %v24383_v63  ;;  %v6907_v4 = vand.u32 4294901760, %v6906_v46  ;;  %v30338_v58 = vand.u32 4294901760, %v24300_v62 }
 0x75b   :  { %v24356_v36 = vpack.c.bf16 %v30323_v31, %v30322_v28  ;;  %7445 = vmatprep.mubr.f32.mxu1 %v30325_v12  ;;  %v30326_v28 = vand.u32 4294901760, %v30277_v38  ;;  %v30327_v31 = vand.u32 4294901760, %v30276_v39  ;;  %4996 = vrot.lane.b32.xlu0 %v4891_v60, %s21817_s13  ;;  %v24393_v39 = vld [vmem:[%s29104_s5 + $0x218] sm:$0xff]  ;;  %v30332_v60 = vand.u32 4294901760, %v24323_v51 }
 0x75c   :  { %4994 = vrot.lane.b32.xlu1 %v4890_v57, %s21817_s13  ;;  %30329 = vst [vmem:[#allocation52_spill] sm:$0xff] %v24393_v39  ;;  %6902 = vmatprep.mubr.f32.mxu0 %v6901_v42  ;;  %v30331_v57 = vpack.c.bf16 %v23779_v1, %v23767_v32  ;;  %v6915_v46 = vsub.f32 %v24320_v29, %v29439_v48  ;;  %v24414_v42 = vld [vmem:[%s29104_s5 + $0x2a8] sm:$0xff]  ;;  %v30334_v1 = vand.u32 4294901760, %v30281_v14  ;;  %v30335_v32 = vand.u32 4294901760, %v30280_v7  ;;  %v24438_v14 = vld [vmem:[%s29104_s5 + $0x220] sm:$0xff] }
 0x75d   :  { %v24378_v20 = vpack.c.bf16 %v30327_v31, %v30326_v28  ;;  %v24398_v28 = vld [vmem:[%s29104_s5 + $0x2a0] sm:$0xff]  ;;  %v6921_v31 = vsub.f32 %v24323_v51, %v30332_v60  ;;  %30333 = vst [vmem:[#allocation60_spill] sm:$0xff] %v24414_v42  ;;  %20133 = vmatprep.subr.bf16.mxu1 %v30256_v59  ;;  %6908 = vmatmul.mubr.f32.gmra.mrb[22].mxu0 %v6907_v4  ;;  %v30336_v60 = vand.u32 4294901760, %v30287_v23  ;;  %v30337_v48 = vand.u32 4294901760, %v30286_v45 }
 0x75e   :  { %30330 = vst [vmem:[#allocation57_spill] sm:$0xff] %v24398_v28  ;;  %20061 = vmatprep.subr.bf16.mxu0 %v30331_v57  ;;  %v24421_v57 = vpack.c.bf16 %v30335_v32, %v30334_v1  ;;  %v24432_v12 = vsub.f32 %v24300_v62, %v30338_v58  ;;  %30340 = vst [vmem:[#allocation66_spill] sm:$0xff] %v24438_v14  ;;  %v30341_v7 = vpack.c.bf16 %v23806_v18, %v23795_v61  ;;  %v24450_v1 = vld [vmem:[%s29104_s5 + $0x228] sm:$0xff]  ;;  %v24455_v32 = vld [vmem:[%s29104_s5 + $0x2b0] sm:$0xff]  ;;  %v24458_v61 = vpop.permute.xlu1 %4859 }
 0x75f   :  { %v24427_v38 = vpack.c.bf16 %v30337_v48, %v30336_v60  ;;  %v30342_v23 = vand.u32 4294901760, %v24131_v54  ;;  %v6916_v45 = vand.u32 4294901760, %v6915_v46  ;;  %v6922_v48 = vand.u32 4294901760, %v6921_v31  ;;  %30343 = vst [vmem:[#allocation68_spill] sm:$0xff] %v24450_v1  ;;  %30344 = vst [vmem:[#allocation69_spill] sm:$0xff] %v24455_v32  ;;  %v16868_v46 = vpop.f32.mrb[10].mxu0 }
 0x760   :  { %30339 = vst [vmem:[#allocation65_spill] sm:$0xff] %v24432_v12  ;;  %20063 = vmatpush3.bf16.msra.mxu0 %v30341_v7  ;;  %30345 = vst [vmem:[#allocation71_spill] sm:$0xff] %v24458_v61  ;;  %v30346_v18 = vand.u32 4294901760, %v24172_v34  ;;  %v30347_v31 = vand.u32 4294901760, %v24312_v16  ;;  %v30348_v7 = vand.u32 4294901760, %v24317_v55  ;;  %v30349_v58 = vand.u32 4294901760, %v24342_v2 }
 0x761   :  { %7449 = vmatmul.mubr.f32.vlgmr.msra.gmra.mrb[60].mxu1 %v30342_v23  ;;  %v16869_v59 = vpop.f32.mrb[11].mxu0  ;;  %6917 = vmatprep.mubr.f32.mxu0 %v6916_v45  ;;  %v30353_v4 = vand.u32 4294901760, %v24362_v0  ;;  %v30367_v47 = vand.u32 4294901760, %v24398_v28 }
 0x762   :  { %20135 = vmatpush3.bf16.msra.mxu1 %v30258_v41  ;;  %7456 = vmatprep.mubr.f32.mxu1 %v30346_v18  ;;  %v24465_v60 = vsub.f32 %v24312_v16, %v30347_v31  ;;  %v24470_v23 = vsub.f32 %v24317_v55, %v30348_v7  ;;  %v24475_v41 = vsub.f32 %v24342_v2, %v30349_v58  ;;  %v24481_v18 = vld [vmem:[%s29104_s5 + $0x2b8] sm:$0xff]  ;;  %v24486_v31 = vld [vmem:[%s29104_s5 + $0x230] sm:$0xff]  ;;  %v30355_v16 = vand.u32 4294901760, %v24367_v25 }
 0x763   :  { %30351 = vst [vmem:[#allocation33_spill] sm:$0xff] %v24481_v18  ;;  %v4871_v7 = vmul.f32 %v24458_v61, %v30295_v33  ;;  %v30352_v58 = vpack.c.bf16 %v23865_v11, %v23858_v8  ;;  %v24496_v55 = vsub.f32 %v24362_v0, %v30353_v4  ;;  %v24507_v33 = vld [vmem:[%s29104_s5 + $0x238] sm:$0xff]  ;;  %v24512_v11 = vld [vmem:[%s29104_s5 + $0x2c0] sm:$0xff]  ;;  %v24517_v8 = vld [vmem:[%s29104_s5 + $0x2c8] sm:$0xff]  ;;  %v24519_v45 = vadd.f32 %v16869_v59, %v16868_v46 }
 0x764   :  { %30350 = vst [vmem:[#allocation72_spill] sm:$0xff] %v24475_v41  ;;  %v24501_v10 = vsub.f32 %v24367_v25, %v30355_v16  ;;  %30357 = vst [vmem:[#allocation99_spill] sm:$0xff] %v24507_v33  ;;  %20137 = vmatprep.subr.bf16.mxu1 %v30259_v6  ;;  %6923 = vmatmul.mubr.f32.gmra.mrb[24].mxu0 %v6922_v48  ;;  %v30361_v16 = vand.u32 4294901760, %v24383_v63  ;;  %v24532_v61 = vld [vmem:[%s29104_s5 + $0x240] sm:$0xff]  ;;  %v24537_v59 = vld [vmem:[%s29104_s5 + $0x248] sm:$0xff]  ;;  %v30364_v48 = vpack.c.bf16 %v23893_v50, %v23891_v44 }
 0x765   :  { %20065 = vmatprep.subr.bf16.mxu0 %v30352_v58  ;;  %30354 = vst [vmem:[#allocation94_spill] sm:$0xff] %v24496_v55  ;;  %30358 = vst [vmem:[#allocation102_spill] sm:$0xff] %v24512_v11  ;;  %v24542_v6 = vld [vmem:[%s29104_s5 + $0x2d0] sm:$0xff]  ;;  %4980 = vrot.lane.b32.xlu1 %v4871_v7, %s21803_s4  ;;  %v30365_v46 = vand.u32 4294901760, %v24393_v39  ;;  %v24556_v58 = vsub.f32 %v24398_v28, %v30367_v47  ;;  %v30369_v7 = vand.u32 4294901760, %v24147_v22  ;;  %v30370_v44 = vand.u32 4294901760, %v24414_v42  ;;  %v24594_v28 = vpop.permute.xlu0 %4883 }
 0x766   :  { %30356 = vst [vmem:[#allocation95_spill] sm:$0xff] %v24501_v10  ;;  %30359 = vst [vmem:[#allocation78_spill] sm:$0xff] %v24517_v8  ;;  %v24525_v4 = vsub.f32 %v24383_v63, %v30361_v16  ;;  %20067 = vmatpush3.bf16.msra.mxu0 %v30364_v48  ;;  %7311 = vmatprep.mubr.f32.mxu0 %v24150_v30  ;;  %v24574_v63 = vld [vmem:[%s29104_s5 + $0x2d8] sm:$0xff]  ;;  %v24579_v30 = vld [vmem:[%s29104_s5 + $0x250] sm:$0xff]  ;;  %v30381_v48 = vand.u32 4294901760, %v24455_v32 }
 0x767   :  { %30360 = vst [vmem:[#allocation79_spill] sm:$0xff] %v24519_v45  ;;  %30363 = vst [vmem:[#allocation114_spill] sm:$0xff] %v24532_v61  ;;  %v24551_v16 = vsub.f32 %v24393_v39, %v30365_v46  ;;  %7460 = vmatmul.mubr.f32.gmra.mrb[62].mxu1 %v30369_v7  ;;  %v24566_v50 = vsub.f32 %v24414_v42, %v30370_v44  ;;  %v30373_v7 = vand.u32 4294901760, %v24259_v53  ;;  %v24584_v44 = vpop.permute.xlu1 %4843  ;;  %v30375_v46 = vand.u32 4294901760, %v24438_v14  ;;  %v30378_v39 = vld [vmem:[#allocation77_spill] sm:$0xff]  ;;  %v24613_v42 = vld [vmem:[%s29104_s5 + $0x258] sm:$0xff] }
 0x768   :  { %30362 = vst [vmem:[#allocation82_spill] sm:$0xff] %v24525_v4  ;;  %30368 = vst [vmem:[#allocation127_spill] sm:$0xff] %v24556_v58  ;;  %20139 = vmatpush3.bf16.msra.mxu1 %v30260_v9  ;;  %v4852_v9 = vmul.f32 %v24584_v44, %v30378_v39  ;;  %20101 = vmatprep.subr.bf16.mxu0 %v24268_v19  ;;  %v24608_v45 = vsub.f32 %v24455_v32, %v30381_v48  ;;  %v30384_v19 = vand.u32 4294901760, %v24481_v18 }
 0x769   :  { %30366 = vst [vmem:[#allocation124_spill] sm:$0xff] %v24551_v16  ;;  %30371 = vst [vmem:[#allocation128_spill] sm:$0xff] %v24566_v50  ;;  %7467 = vmatprep.mubr.f32.mxu1 %v30373_v7  ;;  %v24589_v47 = vsub.f32 %v24438_v14, %v30375_v46  ;;  %20141 = vmatprep.subr.bf16.mxu1 %v30261_v40  ;;  %v30379_v7 = vand.u32 4294901760, %v24450_v1  ;;  %v30388_v14 = vand.u32 4294901760, %v24507_v33  ;;  %v30391_v48 = vand.u32 4294901760, %v24517_v8 }
 0x76a   :  { %30372 = vst [vmem:[#allocation53_spill] sm:$0xff] %v24579_v30  ;;  %30374 = vst [vmem:[#allocation133_spill] sm:$0xff] %v24584_v44  ;;  %7314 = vmatmul.mubr.f32.vlgmr.msra.gmra.mrb[26].mxu0 %v24131_v54  ;;  %v24619_v40 = vsub.f32 %v24481_v18, %v30384_v19  ;;  %v16692_v54 = vpop.f32.mrb[12].mxu1  ;;  %v30389_v18 = vand.u32 4294901760, %v24512_v11  ;;  %4966 = vrot.lane.b32.xlu1 %v4852_v9, %s21816_s2  ;;  %v30398_v9 = vand.u32 4294901760, %v24320_v29 }
 0x76b   :  { %30376 = vst [vmem:[#allocation31_spill] sm:$0xff] %v24589_v47  ;;  %30377 = vst [vmem:[#allocation93_spill] sm:$0xff] %v24594_v28  ;;  %v24603_v46 = vsub.f32 %v24450_v1, %v30379_v7  ;;  %v30386_v7 = vand.u32 4294901760, %v24486_v31  ;;  %v30387_v1 = vand.u32 4294901760, %v24223_v27  ;;  %20103 = vmatpush3.bf16.msra.mxu0 %v24282_v35  ;;  %v24634_v19 = vsub.f32 %v24507_v33, %v30388_v14  ;;  %v16693_v35 = vpop.f32.mrb[13].mxu1 }
 0x76c   :  { %30382 = vst [vmem:[#allocation103_spill] sm:$0xff] %v24608_v45  ;;  %30383 = vst [vmem:[#allocation105_spill] sm:$0xff] %v24613_v42  ;;  %v24644_v32 = vsub.f32 %v24517_v8, %v30391_v48  ;;  %20143 = vmatpush3.bf16.msra.mxu1 %v30264_v15  ;;  %v30395_v33 = vand.u32 4294901760, %v24537_v59  ;;  %7320 = vmatprep.mubr.f32.mxu0 %v24172_v34  ;;  %v24667_v8 = vpop.permute.xlu1 %4863  ;;  %v30401_v15 = vand.u32 4294901760, %v24579_v30  ;;  %v24699_v34 = vld [vmem:[%s29104_s5 + $0x2e8] sm:$0xff] }
 0x76d   :  { %30380 = vst [vmem:[#allocation100_spill] sm:$0xff] %v24603_v46  ;;  %30385 = vst [vmem:[#allocation108_spill] sm:$0xff] %v24619_v40  ;;  %v24624_v44 = vsub.f32 %v24486_v31, %v30386_v7  ;;  %7471 = vmatmul.mubr.f32.gmra.mrb[64].mxu1 %v30387_v1  ;;  %v24639_v7 = vsub.f32 %v24512_v11, %v30389_v18  ;;  %v30393_v1 = vand.u32 4294901760, %v24532_v61  ;;  %v30397_v11 = vand.u32 4294901760, %v24542_v6 }
 0x76e   :  { %30392 = vst [vmem:[#allocation118_spill] sm:$0xff] %v24644_v32  ;;  %v24656_v18 = vsub.f32 %v24537_v59, %v30395_v33  ;;  %7478 = vmatprep.mubr.f32.mxu1 %v30398_v9  ;;  %30399 = vst [vmem:[#allocation123_spill] sm:$0xff] %v24667_v8  ;;  %v24675_v33 = vld [vmem:[%s29104_s5 + $0x2e0] sm:$0xff]  ;;  %v4872_v9 = vmul.f32 %v24667_v8, %v30378_v39  ;;  %20105 = vmatprep.subr.bf16.mxu0 %v24295_v5  ;;  %v24703_v5 = vpop.permute.xlu0 %4867  ;;  %v24717_v8 = vld [vmem:[%s29104_s5 + $0x268] sm:$0xff] }
 0x76f   :  { %30390 = vst [vmem:[#allocation117_spill] sm:$0xff] %v24639_v7  ;;  %v24651_v14 = vsub.f32 %v24532_v61, %v30393_v1  ;;  %v24661_v48 = vsub.f32 %v24542_v6, %v30397_v11  ;;  %v24669_v1 = vadd.f32 %v16693_v35, %v16692_v54  ;;  %20145 = vmatprep.subr.bf16.mxu1 %v30266_v13  ;;  %v30400_v35 = vand.u32 4294901760, %v24574_v63 }
 0x770   :  { %30396 = vst [vmem:[#allocation70_spill] sm:$0xff] %v24656_v18  ;;  %v24694_v11 = vsub.f32 %v24579_v30, %v30401_v15  ;;  %v4892_v13 = vmul.f32 %v24594_v28, %v30378_v39  ;;  %30402 = vst [vmem:[#allocation98_spill] sm:$0xff] %v24703_v5  ;;  %7323 = vmatmul.mubr.f32.gmra.mrb[28].mxu0 %v24147_v22  ;;  %v24712_v15 = vld [vmem:[%s29104_s5 + $0x260] sm:$0xff]  ;;  %20147 = vmatpush3.bf16.msra.mxu1 %v30269_v52  ;;  %v30407_v28 = vld [vmem:[#allocation80_spill] sm:$0xff] }
 0x771   :  { %30394 = vst [vmem:[#allocation119_spill] sm:$0xff] %v24651_v14  ;;  %v24689_v61 = vsub.f32 %v24574_v63, %v30400_v35  ;;  %v30403_v35 = vand.u32 4294901760, %v24323_v51  ;;  %30404 = vst [vmem:[#allocation129_spill] sm:$0xff] %v24717_v8  ;;  %20107 = vmatpush3.bf16.msra.mxu0 %v24337_v3  ;;  %7329 = vmatprep.mubr.f32.mxu0 %v24259_v53  ;;  %v4873_v30 = vmul.f32 %v24703_v5, %v30407_v28  ;;  %v24761_v22 = vld [vmem:[%s29104_s5 + $0x2f8] sm:$0xff]  ;;  %v24771_v52 = vld [vmem:[%s29104_s5 + $0x270] sm:$0xff] }
 0x772   :  { %4998 = vrot.lane.b32.xlu1 %v4892_v13, %s21817_s13  ;;  %4982 = vrot.lane.b32.xlu0 %v4872_v9, %s21803_s4  ;;  %v24748_v13 = vpop.permute.xlu1 %4847  ;;  %30409 = vst [vmem:[#allocation101_spill] sm:$0xff] %v24771_v52  ;;  %v24776_v39 = vld [vmem:[%s29104_s5 + $0x278] sm:$0xff]  ;;  %v30411_v53 = vand.u32 4294901760, %v24432_v12  ;;  %v30412_v5 = vand.u32 4294901760, %v24475_v41 }
 0x773   :  { %7482 = vmatmul.mubr.f32.gmra.mrb[66].mxu1 %v30403_v35  ;;  %v30405_v35 = vand.u32 4294901760, %v24613_v42  ;;  %30408 = vst [vmem:[#allocation104_spill] sm:$0xff] %v24748_v13  ;;  %20109 = vmatprep.subr.bf16.mxu0 %v24356_v36  ;;  %v4853_v9 = vmul.f32 %v24748_v13, %v30407_v28  ;;  %30410 = vst [vmem:[#allocation130_spill] sm:$0xff] %v24776_v39 }
 0x774   :  { %7773 = vmatprep.mubr.f32.mxu1 %v24143_v26  ;;  %20149 = vmatprep.subr.bf16.mxu1 %v30272_v56  ;;  %v24787_v3 = vsub.f32 %v24432_v12, %v30411_v53  ;;  %v7969_v13 = vsub.f32 %v24475_v41, %v30412_v5  ;;  %v30415_v53 = vand.u32 4294901760, %v24699_v34  ;;  %v30423_v41 = vand.u32 4294901760, %v24525_v4  ;;  %v16871_v12 = vpop.f32.mrb[12].mxu0 }
 0x775   :  { %v24728_v54 = vsub.f32 %v24613_v42, %v30405_v35  ;;  %v24756_v35 = vld [vmem:[%s29104_s5 + $0x2f0] sm:$0xff]  ;;  %7332 = vmatmul.mubr.f32.gmra.mrb[30].mxu0 %v24223_v27  ;;  %20151 = vmatpush3.bf16.msra.mxu1 %v30279_v37  ;;  %v30413_v42 = vand.u32 4294901760, %v24496_v55  ;;  %v30414_v27 = vand.u32 4294901760, %v24675_v33 }
 0x776   :  { %20111 = vmatpush3.bf16.msra.mxu0 %v24378_v20  ;;  %4984 = vrot.lane.b32.xlu1 %v4873_v30, %s21803_s4  ;;  %v24808_v5 = vsub.f32 %v24699_v34, %v30415_v53  ;;  %v30416_v20 = vand.u32 4294901760, %v24712_v15 }
 0x777   :  { %30406 = vst [vmem:[#allocation106_spill] sm:$0xff] %v24728_v54  ;;  %v24795_v36 = vsub.f32 %v24496_v55, %v30413_v42  ;;  %v24803_v37 = vsub.f32 %v24675_v33, %v30414_v27  ;;  %7338 = vmatprep.mubr.f32.mxu0 %v24320_v29  ;;  %4968 = vrot.lane.b32.xlu0 %v4853_v9, %s21816_s2  ;;  %v30418_v27 = vand.u32 4294901760, %v24717_v8  ;;  %v30420_v42 = vld [vmem:[#allocation54_spill] sm:$0xff]  ;;  %v24828_v29 = vpop.permute.xlu1 %4887  ;;  %v8075_v9 = vand.u32 4294901760, %v24465_v60 }
 0x778   :  { %v24817_v30 = vsub.f32 %v24712_v15, %v30416_v20  ;;  %20113 = vmatprep.subr.bf16.mxu0 %v24421_v57  ;;  %20153 = vmatprep.subr.bf16.mxu1 %v30420_v42  ;;  %30421 = vst [vmem:[#allocation116_spill] sm:$0xff] %v24828_v29  ;;  %v30422_v20 = vand.u32 4294901760, %v24501_v10  ;;  %v30424_v57 = vld [vmem:[#allocation55_spill] sm:$0xff]  ;;  %v4893_v42 = vmul.f32 %v24828_v29, %v30407_v28  ;;  %v30426_v28 = vand.u32 4294901760, %v24756_v35 }
 0x779   :  { %v24822_v56 = vsub.f32 %v24717_v8, %v30418_v27  ;;  %v7976_v27 = vsub.f32 %v24525_v4, %v30423_v41  ;;  %7341 = vmatmul.mubr.f32.gmra.mrb[32].mxu0 %v24323_v51  ;;  %20155 = vmatpush3.bf16.msra.mxu1 %v30424_v57  ;;  %v16872_v41 = vpop.f32.mrb[13].mxu0  ;;  %v8082_v51 = vand.u32 4294901760, %v24470_v23  ;;  %v30425_v57 = vand.u32 4294901760, %v24551_v16 }
 0x77a   :  { %30417 = vst [vmem:[#allocation109_spill] sm:$0xff] %v24817_v30  ;;  %v8095_v55 = vsub.f32 %v24501_v10, %v30422_v20  ;;  %20115 = vmatpush3.bf16.msra.mxu0 %v24427_v38  ;;  %7648 = vmatprep.mubr.f32.mxu0 %v24143_v26  ;;  %v24856_v60 = vsub.f32 %v24756_v35, %v30426_v28  ;;  %v30428_v8 = vand.u32 4294901760, %v24761_v22  ;;  %v30429_v38 = vld [vmem:[#allocation87_spill] sm:$0xff]  ;;  %v7963_v23 = vand.u32 4294901760, %v24787_v3 }
 0x77b   :  { %30419 = vst [vmem:[#allocation107_spill] sm:$0xff] %v24822_v56  ;;  %v7983_v53 = vsub.f32 %v24551_v16, %v30425_v57  ;;  %20117 = vmatprep.subr.bf16.mxu0 %v30429_v38  ;;  %v30430_v26 = vld [vmem:[#allocation135_spill] sm:$0xff]  ;;  %v24865_v29 = vadd.f32 %v16872_v41, %v16871_v12  ;;  %v30432_v57 = vand.u32 4294901760, %v24771_v52  ;;  %v30433_v28 = vand.u32 4294901760, %v24776_v39  ;;  %5000 = vrot.lane.b32.xlu0 %v4893_v42, %s21817_s13  ;;  %v30437_v12 = vld [vmem:[#allocation90_spill] sm:$0xff] }
 0x77c   :  { %30427 = vst [vmem:[#allocation113_spill] sm:$0xff] %v24856_v60  ;;  %v24861_v20 = vsub.f32 %v24761_v22, %v30428_v8  ;;  %20157 = vmatprep.subr.bf16.mxu1 %v30430_v26  ;;  %v7970_v8 = vand.u32 4294901760, %v7969_v13  ;;  %v8089_v38 = vand.u32 4294901760, %v24795_v36  ;;  %v8096_v26 = vand.u32 4294901760, %v8095_v55  ;;  %v30436_v36 = vld [vmem:[#allocation89_spill] sm:$0xff] }
 0x77d   :  { %30431 = vst [vmem:[#allocation120_spill] sm:$0xff] %v24865_v29  ;;  %v24871_v4 = vsub.f32 %v24771_v52, %v30432_v57  ;;  %v24876_v16 = vsub.f32 %v24776_v39, %v30433_v28  ;;  %20159 = vmatpush3.bf16.msra.mxu1 %v30307_v49  ;;  %v30434_v3 = vand.u32 4294901760, %v24556_v58  ;;  %v30435_v57 = vand.u32 4294901760, %v24566_v50 }
 0x77e   :  { %20119 = vmatpush3.bf16.msra.mxu0 %v30436_v36  ;;  %20161 = vmatprep.subr.bf16.mxu1 %v30311_v21  ;;  %v20196_v55 = vpack.c.bf16 %v8082_v51, %v8075_v9  ;;  %v29487_v10 = vand.u32 4294901760, %v24624_v44  ;;  %v16695_v36 = vpop.f32.mrb[14].mxu1  ;;  %v20200_v21 = vpack.c.bf16 %v8096_v26, %v8089_v38  ;;  %v30438_v49 = vand.u32 4294901760, %v24589_v47 }
 0x77f   :  { %v8102_v41 = vsub.f32 %v24556_v58, %v30434_v3  ;;  %v8109_v28 = vsub.f32 %v24566_v50, %v30435_v57  ;;  %20121 = vmatprep.subr.bf16.mxu0 %v30437_v12  ;;  %v7977_v3 = vand.u32 4294901760, %v7976_v27  ;;  %v7984_v58 = vand.u32 4294901760, %v7983_v53  ;;  %v30439_v12 = vld [vmem:[#allocation91_spill] sm:$0xff]  ;;  %v16696_v53 = vpop.f32.mrb[15].mxu1 }
 0x780   :  { %v29486_v57 = vand.u32 4294901760, %v24619_v40  ;;  %v20198_v50 = vpack.c.bf16 %v7970_v8, %v7963_v23  ;;  %v7990_v42 = vsub.f32 %v24589_v47, %v30438_v49  ;;  %v30440_v27 = vand.u32 4294901760, %v24603_v46 }
 0x781   :  { %20163 = vmatpush3.bf16.msra.mxu1 %v30324_v24  ;;  %v8103_v9 = vand.u32 4294901760, %v8102_v41  ;;  %v8110_v51 = vand.u32 4294901760, %v8109_v28  ;;  %v30441_v8 = vand.u32 4294901760, %v24608_v45  ;;  %v30442_v41 = vld [vmem:[#allocation92_spill] sm:$0xff]  ;;  %v24914_v28 = vadd.f32 %v16696_v53, %v16695_v36 }
 0x782   :  { %20123 = vmatpush3.bf16.msra.mxu0 %v30439_v12  ;;  %20197 = vmatprep.subr.bf16.mxu1 %v20196_v55  ;;  %v7997_v23 = vsub.f32 %v24603_v46, %v30440_v27  ;;  %v20202_v49 = vpack.c.bf16 %v7984_v58, %v7977_v3  ;;  %v30443_v12 = vand.u32 4294901760, %v24234_v43  ;;  %v30444_v55 = vand.u32 4294901760, %v24239_v17 }
 0x783   :  { %v8116_v24 = vsub.f32 %v24608_v45, %v30441_v8  ;;  %20125 = vmatprep.subr.bf16.mxu0 %v30442_v41  ;;  %v8123_v27 = vsub.f32 %v24619_v40, %v29486_v57  ;;  %v30445_v8 = vld [vmem:[#allocation59_spill] sm:$0xff]  ;;  %v30446_v38 = vand.u32 4294901760, %v24300_v62  ;;  %v30447_v26 = vand.u32 4294901760, %v24342_v2  ;;  %v16874_v62 = vpop.f32.mrb[14].mxu0  ;;  %v30460_v40 = vld [vmem:[#allocation52_spill] sm:$0xff] }
 0x784   :  { %v24920_v13 = vpack.c.bf16 %v30444_v55, %v30443_v12  ;;  %7775 = vmatmul.mubr.f32.vlgmr.msra.gmra.mrb[68].mxu1 %v30445_v8  ;;  %v30448_v58 = vand.u32 4294901760, %v24362_v0  ;;  %v30449_v43 = vand.u32 4294901760, %v24367_v25  ;;  %v8004_v17 = vsub.f32 %v24624_v44, %v29487_v10  ;;  %v30451_v12 = vld [vmem:[#allocation122_spill] sm:$0xff]  ;;  %v16875_v55 = vpop.f32.mrb[15].mxu0 }
 0x785   :  { %v24930_v41 = vpack.c.bf16 %v30447_v26, %v30446_v38  ;;  %v30450_v36 = vand.u32 4294901760, %v24634_v19  ;;  %7780 = vmatprep.mubr.f32.mxu1 %v30451_v12  ;;  %20199 = vmatpush3.bf16.msra.mxu1 %v20198_v50  ;;  %v20204_v2 = vpack.c.bf16 %v8110_v51, %v8103_v9  ;;  %v7991_v38 = vand.u32 4294901760, %v7990_v42  ;;  %v30452_v26 = vld [vmem:[#allocation40_spill] sm:$0xff]  ;;  %v30455_v9 = vld [vmem:[#allocation39_spill] sm:$0xff]  ;;  %v16877_v45 = vpop.f32.mrb[16].mxu0 }
 0x786   :  { %v24936_v3 = vpack.c.bf16 %v30449_v43, %v30448_v58  ;;  %v8017_v0 = vand.u32 4294901760, %v24651_v14  ;;  %v8024_v25 = vand.u32 4294901760, %v24656_v18  ;;  %20127 = vmatpush3.bf16.msra.mxu0 %v30452_v26  ;;  %20201 = vmatprep.subr.bf16.mxu1 %v20200_v21  ;;  %v7998_v58 = vand.u32 4294901760, %v7997_v23  ;;  %v30457_v21 = vld [vmem:[#allocation61_spill] sm:$0xff]  ;;  %v30458_v23 = vld [vmem:[#allocation115_spill] sm:$0xff] }
 0x787   :  { %v8011_v53 = vsub.f32 %v24634_v19, %v30450_v36  ;;  %v8117_v43 = vand.u32 4294901760, %v8116_v24  ;;  %v30453_v57 = vand.u32 4294901760, %v24639_v7  ;;  %v30454_v10 = vand.u32 4294901760, %v24644_v32  ;;  %20129 = vmatprep.subr.bf16.mxu0 %v30455_v9  ;;  %v30464_v9 = vld [vmem:[#allocation60_spill] sm:$0xff] }
 0x788   :  { %v24955_v42 = vadd.f32 %v16875_v55, %v16874_v62  ;;  %v8124_v51 = vand.u32 4294901760, %v8123_v27  ;;  %7782 = vmatmul.mubr.f32.gmra.mrb[70].mxu1 %v30457_v21  ;;  %v30459_v24 = vand.u32 4294901760, %v30458_v23  ;;  %v30461_v47 = vand.u32 4294901760, %v30460_v40  ;;  %v30466_v27 = vld [vmem:[#allocation97_spill] sm:$0xff] }
 0x789   :  { %v8130_v36 = vsub.f32 %v24639_v7, %v30453_v57  ;;  %v8137_v50 = vsub.f32 %v24644_v32, %v30454_v10  ;;  %v8005_v46 = vand.u32 4294901760, %v8004_v17  ;;  %v8012_v29 = vand.u32 4294901760, %v8011_v53  ;;  %v30462_v10 = vld [vmem:[#allocation57_spill] sm:$0xff]  ;;  %7787 = vmatprep.mubr.f32.mxu1 %v30466_v27  ;;  %20203 = vmatpush3.bf16.msra.mxu1 %v20202_v49  ;;  %v30467_v17 = vld [vmem:[#allocation58_spill] sm:$0xff]  ;;  %v16878_v53 = vpop.f32.mrb[17].mxu0 }
 0x78a   :  { %30456 = vst [vmem:[#allocation67_spill] sm:$0xff] %v24955_v42  ;;  %v24964_v57 = vpack.c.bf16 %v30461_v47, %v30459_v24  ;;  %v30463_v39 = vand.u32 4294901760, %v30462_v10  ;;  %v30465_v62 = vand.u32 4294901760, %v30464_v9  ;;  %v8018_v26 = vsub.f32 %v24651_v14, %v8017_v0  ;;  %20131 = vmatpush3.bf16.msra.mxu0 %v30467_v17  ;;  %20205 = vmatprep.subr.bf16.mxu1 %v20204_v2  ;;  %v30468_v9 = vld [vmem:[#allocation66_spill] sm:$0xff]  ;;  %v30470_v42 = vld [vmem:[#allocation68_spill] sm:$0xff] }
 0x78b   :  { %v8025_v23 = vsub.f32 %v24656_v18, %v8024_v25  ;;  %v8038_v47 = vand.u32 4294901760, %v24728_v54  ;;  %v20206_v24 = vpack.c.bf16 %v7998_v58, %v7991_v38  ;;  %v8131_v10 = vand.u32 4294901760, %v8130_v36  ;;  %20165 = vmatprep.subr.bf16.mxu0 %v24920_v13  ;;  %v30474_v58 = vld [vmem:[#allocation96_spill] sm:$0xff] }
 0x78c   :  { %v24970_v55 = vpack.c.bf16 %v30465_v62, %v30463_v39  ;;  %v8138_v39 = vand.u32 4294901760, %v8137_v50  ;;  %v30469_v62 = vand.u32 4294901760, %v30468_v9  ;;  %v30471_v52 = vand.u32 4294901760, %v30470_v42  ;;  %7789 = vmatmul.mubr.f32.gmra.mrb[72].mxu1 %v30474_v58 }
 0x78d   :  { %v24984_v14 = vadd.f32 %v16878_v53, %v16877_v45  ;;  %v20208_v40 = vpack.c.bf16 %v8124_v51, %v8117_v43  ;;  %v30472_v18 = vand.u32 4294901760, %v24661_v48  ;;  %v30473_v2 = vand.u32 4294901760, %v24689_v61  ;;  %7650 = vmatmul.mubr.f32.vlgmr.msra.gmra.mrb[34].mxu0 %v30445_v8  ;;  %v16698_v51 = vpop.f32.mrb[16].mxu1  ;;  %20207 = vmatpush3.bf16.msra.mxu1 %v20206_v24 }
 0x78e   :  { %v24982_v49 = vpack.c.bf16 %v30471_v52, %v30469_v62  ;;  %v20210_v36 = vpack.c.bf16 %v8012_v29, %v8005_v46  ;;  %v30475_v45 = vand.u32 4294901760, %v24624_v44  ;;  %v30476_v42 = vand.u32 4294901760, %v24634_v19  ;;  %7655 = vmatprep.mubr.f32.mxu0 %v30451_v12  ;;  %20167 = vmatpush3.bf16.msra.mxu0 %v24930_v41 }
 0x78f   :  { %v8144_v17 = vsub.f32 %v24661_v48, %v30472_v18  ;;  %v8151_v38 = vsub.f32 %v24689_v61, %v30473_v2  ;;  %v30478_v18 = vld [vmem:[#allocation47_spill] sm:$0xff]  ;;  %v8019_v53 = vand.u32 4294901760, %v8018_v26  ;;  %v8026_v9 = vand.u32 4294901760, %v8025_v23  ;;  %v16699_v2 = vpop.f32.mrb[17].mxu1  ;;  %20169 = vmatprep.subr.bf16.mxu0 %v24936_v3  ;;  %20209 = vmatprep.subr.bf16.mxu1 %v20208_v40 }
 0x790   :  { %v25000_v43 = vpack.c.bf16 %v30476_v42, %v30475_v45  ;;  %7794 = vmatprep.mubr.f32.mxu1 %v30478_v18  ;;  %v30479_v62 = vand.u32 4294901760, %v24694_v11  ;;  %v8039_v29 = vsub.f32 %v24728_v54, %v8038_v47  ;;  %v20212_v45 = vpack.c.bf16 %v8138_v39, %v8131_v10  ;;  %v30484_v10 = vld [vmem:[#allocation48_spill] sm:$0xff] }
 0x791   :  { %v8045_v42 = vand.u32 4294901760, %v24817_v30  ;;  %v8052_v8 = vand.u32 4294901760, %v24822_v56  ;;  %v30480_v52 = vand.u32 4294901760, %v24639_v7  ;;  %v30481_v26 = vand.u32 4294901760, %v24644_v32  ;;  %7796 = vmatmul.mubr.f32.gmra.mrb[74].mxu1 %v30484_v10  ;;  %7657 = vmatmul.mubr.f32.gmra.mrb[36].mxu0 %v30457_v21 }
 0x792   :  { %30477 = vst [vmem:[#allocation35_spill] sm:$0xff] %v25000_v43  ;;  %v8032_v46 = vsub.f32 %v24694_v11, %v30479_v62  ;;  %v25018_v50 = vadd.f32 %v16699_v2, %v16698_v51  ;;  %v8145_v12 = vand.u32 4294901760, %v8144_v17  ;;  %v8152_v62 = vand.u32 4294901760, %v8151_v38  ;;  %v16701_v17 = vpop.f32.mrb[18].mxu1  ;;  %v30489_v2 = vld [vmem:[#allocation33_spill] sm:$0xff]  ;;  %7662 = vmatprep.mubr.f32.mxu0 %v30466_v27  ;;  %20171 = vmatpush3.bf16.msra.mxu0 %v24964_v57 }
 0x793   :  { %v25016_v23 = vpack.c.bf16 %v30481_v26, %v30480_v52  ;;  %v25021_v43 = vpack.c.bf16 %v8024_v25, %v8017_v0  ;;  %v30485_v39 = vand.u32 4294901760, %v24803_v37  ;;  %v30486_v7 = vand.u32 4294901760, %v24808_v5  ;;  %v30487_v25 = vld [vmem:[#allocation69_spill] sm:$0xff]  ;;  %20211 = vmatpush3.bf16.msra.mxu1 %v20210_v36  ;;  %20173 = vmatprep.subr.bf16.mxu0 %v24970_v55 }
 0x794   :  { %v8171_v51 = vand.u32 4294901760, %v24856_v60  ;;  %v8178_v24 = vand.u32 4294901760, %v24861_v20  ;;  %v20214_v0 = vpack.c.bf16 %v8026_v9, %v8019_v53  ;;  %v30488_v38 = vand.u32 4294901760, %v30487_v25  ;;  %20213 = vmatprep.subr.bf16.mxu1 %v20212_v45 }
 0x795   :  { %30482 = vst [vmem:[#allocation38_spill] sm:$0xff] %v25016_v23  ;;  %30483 = vst [vmem:[#allocation112_spill] sm:$0xff] %v25021_v43  ;;  %v8158_v54 = vsub.f32 %v24803_v37, %v30485_v39  ;;  %v8165_v52 = vsub.f32 %v24808_v5, %v30486_v7  ;;  %v30490_v40 = vand.u32 4294901760, %v30489_v2  ;;  %v8033_v43 = vand.u32 4294901760, %v8032_v46  ;;  %v16702_v23 = vpop.f32.mrb[19].mxu1  ;;  %7664 = vmatmul.mubr.f32.gmra.mrb[38].mxu0 %v30474_v58 }
 0x796   :  { %v8040_v39 = vand.u32 4294901760, %v8039_v29  ;;  %v8046_v7 = vsub.f32 %v24817_v30, %v8045_v42  ;;  %v8053_v32 = vsub.f32 %v24822_v56, %v8052_v8  ;;  %v8059_v21 = vand.u32 4294901760, %v24871_v4  ;;  %7669 = vmatprep.mubr.f32.mxu0 %v30478_v18  ;;  %20175 = vmatpush3.bf16.msra.mxu0 %v24982_v49 }
 0x797   :  { %v25037_v26 = vpack.c.bf16 %v30490_v40, %v30488_v38  ;;  %v30491_v53 = vand.u32 4294901760, %v24661_v48  ;;  %v30492_v9 = vand.u32 4294901760, %v24689_v61  ;;  %v25050_v38 = vadd.f32 %v16702_v23, %v16701_v17  ;;  %v16736_v23 = vpop.f32.mrb[20].mxu1  ;;  %v30497_v17 = vld [vmem:[#allocation99_spill] sm:$0xff]  ;;  %20215 = vmatpush3.bf16.msra.mxu1 %v20214_v0 }
 0x798   :  { %v20216_v27 = vpack.c.bf16 %v8152_v62, %v8145_v12  ;;  %v8066_v46 = vand.u32 4294901760, %v24876_v16  ;;  %v30494_v29 = vand.u32 4294901760, %v24694_v11  ;;  %v8159_v40 = vand.u32 4294901760, %v8158_v54  ;;  %v16737_v54 = vpop.f32.mrb[21].mxu1 }
 0x799   :  { %v25048_v25 = vpack.c.bf16 %v30492_v9, %v30491_v53  ;;  %v8166_v30 = vand.u32 4294901760, %v8165_v52  ;;  %v8172_v56 = vsub.f32 %v24856_v60, %v8171_v51  ;;  %v8179_v53 = vsub.f32 %v24861_v20, %v8178_v24  ;;  %v30499_v9 = vld [vmem:[#allocation102_spill] sm:$0xff]  ;;  %20177 = vmatprep.subr.bf16.mxu0 %v25037_v26  ;;  %7671 = vmatmul.mubr.f32.gmra.mrb[40].mxu0 %v30484_v10 }
 0x79a   :  { %v25056_v2 = vpack.c.bf16 %v8038_v47, %v30494_v29  ;;  %v30496_v36 = vand.u32 4294901760, %v24486_v31  ;;  %v30498_v12 = vand.u32 4294901760, %v30497_v17  ;;  %v30501_v47 = vld [vmem:[#allocation78_spill] sm:$0xff]  ;;  %v20218_v52 = vpack.c.bf16 %v8040_v39, %v8033_v43  ;;  %20217 = vmatprep.subr.bf16.mxu1 %v20216_v27  ;;  %v16739_v39 = vpop.f32.mrb[22].mxu1 }
 0x79b   :  { %30493 = vst [vmem:[#allocation121_spill] sm:$0xff] %v25048_v25  ;;  %v30500_v25 = vand.u32 4294901760, %v30499_v9  ;;  %v30502_v29 = vand.u32 4294901760, %v30501_v47  ;;  %v8047_v58 = vand.u32 4294901760, %v8046_v7  ;;  %v8060_v31 = vsub.f32 %v24871_v4, %v8059_v21  ;;  %v16740_v7 = vpop.f32.mrb[23].mxu1 }
 0x79c   :  { %30495 = vst [vmem:[#allocation136_spill] sm:$0xff] %v25056_v2  ;;  %v25065_v62 = vpack.c.bf16 %v30498_v12, %v30496_v36  ;;  %v8054_v2 = vand.u32 4294901760, %v8053_v32  ;;  %v16738_v60 = vadd.f32 %v16737_v54, %v16736_v23  ;;  %v8067_v36 = vsub.f32 %v24876_v16, %v8066_v46  ;;  %v30507_v23 = vld [vmem:[#allocation114_spill] sm:$0xff]  ;;  %20219 = vmatpush3.bf16.msra.mxu1 %v20218_v52 }
 0x79d   :  { %v25071_v45 = vpack.c.bf16 %v30502_v29, %v30500_v25  ;;  %v30503_v17 = vand.u32 4294901760, %v24803_v37  ;;  %v30504_v25 = vand.u32 4294901760, %v24808_v5  ;;  %v20220_v18 = vpack.c.bf16 %v8166_v30, %v8159_v40 }
 0x79e   :  { %v8173_v9 = vand.u32 4294901760, %v8172_v56  ;;  %v8180_v43 = vand.u32 4294901760, %v8179_v53  ;;  %v21334_v32 = vadd.f32 %v16738_v60, %v24669_v1  ;;  %v25086_v0 = vpack.c.bf16 %v8052_v8, %v8045_v42  ;;  %20179 = vmatpush3.bf16.msra.mxu0 %v25065_v62  ;;  %v16742_v53 = vpop.f32.mrb[24].mxu1 }
 0x79f   :  { %v25082_v12 = vpack.c.bf16 %v30504_v25, %v30503_v17  ;;  %v30508_v47 = vand.u32 4294901760, %v30507_v23  ;;  %v30509_v29 = vand.u32 4294901760, %v24537_v59  ;;  %v20222_v27 = vpack.c.bf16 %v8054_v2, %v8047_v58  ;;  %20181 = vmatprep.subr.bf16.mxu0 %v25071_v45  ;;  %20221 = vmatprep.subr.bf16.mxu1 %v20220_v18  ;;  %v30516_v17 = vld [vmem:[#allocation105_spill] sm:$0xff] }
 0x7a0   :  { %30506 = vst [vmem:[#allocation37_spill] sm:$0xff] %v25086_v0  ;;  %v30510_v56 = vand.u32 4294901760, %v24542_v6  ;;  %v30511_v30 = vand.u32 4294901760, %v24574_v63  ;;  %v16741_v1 = vadd.f32 %v16740_v7, %v16739_v39  ;;  %v8061_v60 = vand.u32 4294901760, %v8060_v31  ;;  %v16743_v6 = vpop.f32.mrb[25].mxu1  ;;  %v30514_v63 = vld [vmem:[#allocation53_spill] sm:$0xff] }
 0x7a1   :  { %30505 = vst [vmem:[#allocation137_spill] sm:$0xff] %v25082_v12  ;;  %v25093_v54 = vpack.c.bf16 %v30509_v29, %v30508_v47  ;;  %v8068_v42 = vand.u32 4294901760, %v8067_v36  ;;  %v25102_v8 = vpack.c.bf16 %v8178_v24, %v8171_v51  ;;  %v20224_v40 = vpack.c.bf16 %v8180_v43, %v8173_v9  ;;  %20223 = vmatpush3.bf16.msra.mxu1 %v20222_v27  ;;  %v16745_v36 = vpop.f32.mrb[26].mxu1  ;;  %v30523_v43 = vld [vmem:[#allocation129_spill] sm:$0xff]  ;;  %v30529_v27 = vld [vmem:[#allocation130_spill] sm:$0xff]  ;;  %v30563_v12 = vld [vmem:[#allocation103_spill] sm:$0xff] }
 0x7a2   :  { %v25099_v10 = vpack.c.bf16 %v30511_v30, %v30510_v56  ;;  %v21316_v59 = vadd.f32 %v16741_v1, %v24914_v28  ;;  %v25105_v2 = vpack.c.bf16 %v8066_v46, %v8059_v21  ;;  %v30515_v58 = vand.u32 4294901760, %v30514_v63  ;;  %v16746_v18 = vpop.f32.mrb[27].mxu1  ;;  %v30531_v1 = vld [vmem:[#allocation111_spill] sm:$0xff] }
 0x7a3   :  { %30512 = vst [vmem:[#allocation77_spill] sm:$0xff] %v25102_v8  ;;  %20183 = vmatpush3.bf16.msra.mxu0 %v25093_v54  ;;  %v30517_v52 = vand.u32 4294901760, %v30516_v17  ;;  %v16744_v31 = vadd.f32 %v16743_v6, %v16742_v53  ;;  %v20226_v51 = vpack.c.bf16 %v8068_v42, %v8061_v60  ;;  %v30519_v24 = vand.u32 4294901760, %v24675_v33  ;;  %20225 = vmatprep.subr.bf16.mxu1 %v20224_v40 }
 0x7a4   :  { %30513 = vst [vmem:[#allocation80_spill] sm:$0xff] %v25105_v2  ;;  %20185 = vmatprep.subr.bf16.mxu0 %v25099_v10  ;;  %v30520_v28 = vand.u32 4294901760, %v24699_v34  ;;  %v30522_v9 = vand.u32 4294901760, %v24712_v15  ;;  %v30524_v39 = vand.u32 4294901760, %v30523_v43  ;;  %v16747_v23 = vadd.f32 %v16746_v18, %v16745_v36  ;;  %v30527_v15 = vld [vmem:[#allocation101_spill] sm:$0xff]  ;;  %v30533_v43 = vld [vmem:[#allocation84_spill] sm:$0xff] }
 0x7a5   :  { %v25112_v25 = vpack.c.bf16 %v30517_v52, %v30515_v58  ;;  %v21370_v46 = vadd.f32 %v16744_v31, %v25018_v50  ;;  %20227 = vmatpush3.bf16.msra.mxu1 %v20226_v51  ;;  %v30525_v33 = vand.u32 4294901760, %v24756_v35  ;;  %v30526_v34 = vand.u32 4294901760, %v24761_v22  ;;  %v30532_v35 = vld [vmem:[#allocation81_spill] sm:$0xff]  ;;  %v30550_v2 = vld [vmem:[#allocation67_spill] sm:$0xff] }
 0x7a6   :  { %v25119_v21 = vpack.c.bf16 %v30520_v28, %v30519_v24  ;;  %v25127_v7 = vpack.c.bf16 %v30524_v39, %v30522_v9  ;;  %20261 = vmatprep.subr.bf16.mxu1 %v24920_v13  ;;  %v21352_v50 = vadd.f32 %v16747_v23, %v25050_v38  ;;  %v30528_v29 = vand.u32 4294901760, %v30527_v15 }
 0x7a7   :  { %30518 = vst [vmem:[#allocation54_spill] sm:$0xff] %v25112_v25  ;;  %20187 = vmatpush3.bf16.msra.mxu0 %v25112_v25  ;;  %v25134_v47 = vpack.c.bf16 %v30526_v34, %v30525_v33  ;;  %v30530_v56 = vand.u32 4294901760, %v30529_v27  ;;  %v20228_v60 = vpack.c.bf16 %v30532_v35, %v30531_v1  ;;  %v30535_v34 = vld [vmem:[#allocation62_spill] sm:$0xff] }
 0x7a8   :  { %30521 = vst [vmem:[#allocation55_spill] sm:$0xff] %v25119_v21  ;;  %20189 = vmatprep.subr.bf16.mxu0 %v25119_v21 }
 0x7a9   :  { %v25143_v30 = vpack.c.bf16 %v30530_v56, %v30528_v29 }
 0x7ab   :  { %20191 = vmatpush3.bf16.msra.mxu0 %v25127_v7 }
 0x7ac   :  { %20193 = vmatprep.subr.bf16.mxu0 %v25134_v47 }
 0x7af   :  { %20195 = vmatpush3.bf16.msra.mxu0 %v25143_v30 }
 0x7b0   :  { %20229 = vmatprep.subr.bf16.mxu0 %v20228_v60  ;;  %v16780_v22 = vpop.f32.mrb[28].mxu1 }
 0x7b1   :  { %v16781_v42 = vpop.f32.mrb[29].mxu1 }
 0x7b2   :  { %v16782_v40 = vadd.f32 %v16781_v42, %v16780_v22 }
 0x7b4   :  { %v21335_v38 = vadd.f32 %v21334_v32, %v16782_v40  ;;  %v16783_v53 = vpop.f32.mrb[30].mxu1 }
 0x7b5   :  { %v16784_v6 = vpop.f32.mrb[31].mxu1 }
 0x7b6   :  { %v16785_v63 = vadd.f32 %v16784_v6, %v16783_v53 }
 0x7b7   :  { %v4963_v9 = vpop.permute.xlu1 %4962 }
 0x7b8   :  { %v21317_v58 = vadd.f32 %v21316_v59, %v16785_v63  ;;  %v16786_v17 = vpop.f32.mrb[32].mxu1  ;;  %v5027_v39 = vsel %vm5026_vm12, %v30533_v43, %v4963_v9 }
 0x7b9   :  { %v16787_v52 = vpop.f32.mrb[33].mxu1  ;;  %v25155_v23 = vand.u32 4294901760, %v5027_v39 }
 0x7ba   :  { %v16788_v31 = vadd.f32 %v16787_v52, %v16786_v17 }
 0x7bb   :  { %30534 = vst [vmem:[#allocation87_spill] sm:$0xff] %v25155_v23  ;;  %v25158_v59 = vsub.f32 %v5027_v39, %v25155_v23 }
 0x7bc   :  { %v25149_v51 = vadd.f32 %v21370_v46, %v16788_v31  ;;  %v16789_v24 = vpop.f32.mrb[34].mxu1 }
 0x7bd   :  { %v16790_v28 = vpop.f32.mrb[35].mxu1  ;;  %v4979_v32 = vpop.permute.xlu0 %4978  ;;  %v29506_v56 = vand.u32 4294901760, %v25158_v59 }
 0x7be   :  { %v16791_v36 = vadd.f32 %v16790_v28, %v16789_v24  ;;  %v5031_v46 = vsel %vm4710_vm3, %v4963_v9, %v4979_v32 }
 0x7bf   :  { %v7906_v63 = vsub.f32 %v25158_v59, %v29506_v56  ;;  %v30548_v56 = vld [vmem:[#allocation94_spill] sm:$0xff] }
 0x7c0   :  { %v25151_v18 = vadd.f32 %v21352_v50, %v16791_v36 }
 0x7c5   :  { %v4965_v33 = vpop.permute.xlu0 %4964 }
 0x7c6   :  { %v5028_v15 = vsel %vm5026_vm12, %v30535_v34, %v4965_v33 }
 0x7c7   :  { %v25170_v60 = vand.u32 4294901760, %v5028_v15 }
 0x7c9   :  { %30537 = vst [vmem:[#allocation89_spill] sm:$0xff] %v25170_v60  ;;  %v25183_v17 = vsub.f32 %v5028_v15, %v25170_v60 }
 0x7cd   :  { %v25186_v28 = vpop.permute.xlu0 %4996 }
 0x7ce   :  { %v25163_v50 = vpop.permute.xlu1 %4994  ;;  %30538 = vst [vmem:[#allocation90_spill] sm:$0xff] %v25186_v28 }
 0x7cf   :  { %30536 = vst [vmem:[#allocation135_spill] sm:$0xff] %v25163_v50  ;;  %v5036_v29 = vsel %vm5035_vm13, %v5031_v46, %v25163_v50  ;;  %v30539_v46 = vld [vmem:[#allocation79_spill] sm:$0xff] }
 0x7d0   :  { %v25167_v27 = vand.u32 4294901760, %v5036_v29  ;;  %v16824_v22 = vpop.f32.mrb[36].mxu1 }
 0x7d1   :  { %v16825_v40 = vpop.f32.mrb[37].mxu1 }
 0x7d2   :  { %v25173_v42 = vsub.f32 %v5036_v29, %v25167_v27  ;;  %8183 = vmatprep.mubr.f32.mxu1 %v25167_v27  ;;  %v16826_v53 = vadd.f32 %v16825_v40, %v16824_v22  ;;  %v7907_v29 = vand.u32 4294901760, %v7906_v63  ;;  %v29511_v40 = vand.u32 4294901760, %v25183_v17 }
 0x7d3   :  { %8185 = vmatmul.mubr.f32.vlgmr.msra.gmra.mrb[76].mxu1 %v25155_v23  ;;  %v30554_v23 = vld [vmem:[#allocation128_spill] sm:$0xff] }
 0x7d4   :  { %20263 = vmatpush3.bf16.msra.mxu1 %v24930_v41  ;;  %v29507_v6 = vand.u32 4294901760, %v25173_v42  ;;  %v21336_v52 = vadd.f32 %v21335_v38, %v16826_v53  ;;  %v16827_v24 = vpop.f32.mrb[38].mxu1 }
 0x7d5   :  { %20265 = vmatprep.subr.bf16.mxu1 %v24936_v3  ;;  %v16828_v9 = vpop.f32.mrb[39].mxu1 }
 0x7d6   :  { %v7900_v43 = vsub.f32 %v25173_v42, %v29507_v6  ;;  %v16829_v32 = vadd.f32 %v16828_v9, %v16827_v24  ;;  %v25195_v34 = vadd.f32 %v21336_v52, %v30539_v46 }
 0x7d7   :  { %v4981_v31 = vpop.permute.xlu1 %4980 }
 0x7d8   :  { %v5032_v36 = vsel %vm4710_vm3, %v4965_v33, %v4981_v31  ;;  %20267 = vmatpush3.bf16.msra.mxu1 %v24964_v57  ;;  %v7901_v15 = vand.u32 4294901760, %v7900_v43  ;;  %v21318_v22 = vadd.f32 %v21317_v58, %v16829_v32  ;;  %v16830_v33 = vpop.f32.mrb[40].mxu1  ;;  %v30542_v58 = vld [vmem:[#allocation46_spill] sm:$0xff]  ;;  %v30543_v43 = vld [vmem:[#allocation72_spill] sm:$0xff]  ;;  %v30544_v32 = vld [vmem:[#allocation65_spill] sm:$0xff] }
 0x7d9   :  { %v5037_v39 = vsel %vm5035_vm13, %v5032_v36, %v25186_v28  ;;  %20269 = vmatprep.subr.bf16.mxu1 %v24970_v55  ;;  %v16831_v31 = vpop.f32.mrb[41].mxu1  ;;  %v30541_v36 = vld [vmem:[#allocation120_spill] sm:$0xff]  ;;  %v30545_v46 = vpack.c.bf16 %v30543_v43, %v30544_v32 }
 0x7da   :  { %v25197_v38 = vand.u32 4294901760, %v5037_v39  ;;  %7902 = vmatprep.mubr.f32.mxu0 %v7901_v15  ;;  %v16832_v24 = vadd.f32 %v16831_v31, %v16830_v33  ;;  %v25208_v63 = vadd.f32 %v21318_v22, %v30541_v36  ;;  %v7921_v36 = vsub.f32 %v25183_v17, %v29511_v40 }
 0x7db   :  { %7908 = vmatmul.mubr.f32.vlgmr.msra.gmra.mrb[42].mxu0 %v7907_v29  ;;  %v30547_v29 = vld [vmem:[#allocation95_spill] sm:$0xff] }
 0x7dc   :  { %30540 = vst [vmem:[#allocation91_spill] sm:$0xff] %v25197_v38  ;;  %v25203_v53 = vsub.f32 %v5037_v39, %v25197_v38  ;;  %8190 = vmatprep.mubr.f32.mxu1 %v25197_v38  ;;  %v4967_v52 = vpop.permute.xlu1 %4966  ;;  %20231 = vmatpush3.bf16.msra.mxu0 %v30545_v46  ;;  %v21372_v33 = vadd.f32 %v25149_v51, %v16832_v24  ;;  %v16833_v31 = vpop.f32.mrb[42].mxu1  ;;  %v30551_v51 = vld [vmem:[#allocation124_spill] sm:$0xff]  ;;  %v30552_v24 = vld [vmem:[#allocation82_spill] sm:$0xff]  ;;  %v7922_v0 = vand.u32 4294901760, %v7921_v36  ;;  %v30560_v36 = vld [vmem:[#allocation31_spill] sm:$0xff] }
 0x7dd   :  { %8192 = vmatmul.mubr.f32.gmra.mrb[78].mxu1 %v25170_v60  ;;  %v5029_v9 = vsel %vm5026_vm12, %v30542_v58, %v4967_v52  ;;  %v30549_v22 = vpack.c.bf16 %v30547_v29, %v30548_v56  ;;  %v16834_v58 = vpop.f32.mrb[43].mxu1  ;;  %v30553_v28 = vpack.c.bf16 %v30551_v51, %v30552_v24 }
 0x7de   :  { %20271 = vmatpush3.bf16.msra.mxu1 %v24982_v49  ;;  %v29516_v39 = vand.u32 4294901760, %v25203_v53  ;;  %v25217_v15 = vand.u32 4294901760, %v5029_v9  ;;  %v16835_v6 = vadd.f32 %v16834_v58, %v16833_v31  ;;  %v25231_v60 = vadd.f32 %v21372_v33, %v30550_v2 }
 0x7df   :  { %20233 = vmatprep.subr.bf16.mxu0 %v30549_v22  ;;  %20273 = vmatprep.subr.bf16.mxu1 %v25037_v26 }
 0x7e0   :  { %30546 = vst [vmem:[#allocation92_spill] sm:$0xff] %v25217_v15  ;;  %v7915_v46 = vsub.f32 %v25203_v53, %v29516_v39  ;;  %20235 = vmatpush3.bf16.msra.mxu0 %v30553_v28  ;;  %v25238_v8 = vsub.f32 %v5029_v9, %v25217_v15  ;;  %v21354_v40 = vadd.f32 %v25151_v18, %v16835_v6  ;;  %v30555_v39 = vld [vmem:[#allocation127_spill] sm:$0xff]  ;;  %v30559_v6 = vld [vmem:[#allocation100_spill] sm:$0xff] }
 0x7e1   :  { %v30556_v31 = vpack.c.bf16 %v30554_v23, %v30555_v39  ;;  %v30561_v58 = vpack.c.bf16 %v30559_v6, %v30560_v36 }
 0x7e2   :  { %20275 = vmatpush3.bf16.msra.mxu1 %v25065_v62  ;;  %v7916_v22 = vand.u32 4294901760, %v7915_v46  ;;  %v25251_v9 = vadd.f32 %v21354_v40, %v24984_v14  ;;  %v30565_v40 = vld [vmem:[#allocation45_spill] sm:$0xff] }
 0x7e3   :  { %20237 = vmatprep.subr.bf16.mxu0 %v30556_v31  ;;  %20277 = vmatprep.subr.bf16.mxu1 %v25071_v45  ;;  %v30562_v31 = vld [vmem:[#allocation108_spill] sm:$0xff] }
 0x7e4   :  { %v4983_v38 = vpop.permute.xlu0 %4982  ;;  %v25245_v2 = vpop.permute.xlu1 %4998  ;;  %7917 = vmatprep.mubr.f32.mxu0 %v7916_v22  ;;  %20239 = vmatpush3.bf16.msra.mxu0 %v30561_v58 }
 0x7e5   :  { %30557 = vst [vmem:[#allocation59_spill] sm:$0xff] %v25245_v2  ;;  %v5033_v28 = vsel %vm4710_vm3, %v4967_v52, %v4983_v38  ;;  %7923 = vmatmul.mubr.f32.gmra.mrb[44].mxu0 %v7922_v0  ;;  %v30564_v38 = vpack.c.bf16 %v30562_v31, %v30563_v12  ;;  %v30567_v0 = vld [vmem:[#allocation118_spill] sm:$0xff] }
 0x7e6   :  { %v5038_v33 = vsel %vm5035_vm13, %v5033_v28, %v25245_v2  ;;  %20279 = vmatpush3.bf16.msra.mxu1 %v25093_v54  ;;  %v30566_v28 = vpack.c.bf16 %v24634_v19, %v24624_v44 }
 0x7e7   :  { %v25253_v18 = vand.u32 4294901760, %v5038_v33  ;;  %20241 = vmatprep.subr.bf16.mxu0 %v30564_v38  ;;  %20281 = vmatprep.subr.bf16.mxu1 %v25099_v10 }
 0x7e8   :  { %20243 = vmatpush3.bf16.msra.mxu0 %v30566_v28  ;;  %v4985_v38 = vpop.permute.xlu1 %4984 }
 0x7e9   :  { %30558 = vst [vmem:[#allocation122_spill] sm:$0xff] %v25253_v18  ;;  %v4969_v46 = vpop.permute.xlu0 %4968  ;;  %v25265_v14 = vsub.f32 %v5038_v33, %v25253_v18  ;;  %8197 = vmatprep.mubr.f32.mxu1 %v25253_v18 }
 0x7ea   :  { %v5030_v52 = vsel %vm5026_vm12, %v30565_v40, %v4969_v46  ;;  %8199 = vmatmul.mubr.f32.gmra.mrb[80].mxu1 %v25217_v15  ;;  %v30568_v40 = vld [vmem:[#allocation117_spill] sm:$0xff]  ;;  %v30570_v15 = vand.u32 4294901760, %v25238_v8  ;;  %v5034_v44 = vsel %vm4710_vm3, %v4969_v46, %v4985_v38 }
 0x7eb   :  { %v25270_v22 = vand.u32 4294901760, %v5030_v52  ;;  %20283 = vmatpush3.bf16.msra.mxu1 %v25112_v25  ;;  %v7929_v58 = vand.u32 4294901760, %v25265_v14  ;;  %v30569_v2 = vpack.c.bf16 %v30567_v0, %v30568_v40  ;;  %v30571_v0 = vld [vmem:[#allocation70_spill] sm:$0xff] }
 0x7ec   :  { %20285 = vmatprep.subr.bf16.mxu1 %v25119_v21  ;;  %v7936_v18 = vsub.f32 %v25238_v8, %v30570_v15  ;;  %v30574_v15 = vpack.c.bf16 %v24689_v61, %v24661_v48 }
 0x7ed   :  { %v25279_v33 = vsub.f32 %v5030_v52, %v25270_v22  ;;  %20245 = vmatprep.subr.bf16.mxu0 %v30569_v2  ;;  %v25289_v19 = vpop.permute.xlu0 %5000  ;;  %v7930_v28 = vsub.f32 %v25265_v14, %v7929_v58  ;;  %v30572_v2 = vld [vmem:[#allocation119_spill] sm:$0xff] }
 0x7ee   :  { %v5039_v52 = vsel %vm5035_vm13, %v5034_v44, %v25289_v19  ;;  %v30573_v40 = vpack.c.bf16 %v30571_v0, %v30572_v2  ;;  %v7937_v21 = vand.u32 4294901760, %v7936_v18  ;;  %v30575_v44 = vand.u32 4294901760, %v25173_v42  ;;  %v30576_v18 = vld [vmem:[#allocation106_spill] sm:$0xff] }
 0x7ef   :  { %v25294_v50 = vand.u32 4294901760, %v5039_v52  ;;  %v7931_v25 = vand.u32 4294901760, %v7930_v28  ;;  %20287 = vmatpush3.bf16.msra.mxu1 %v25127_v7  ;;  %v7950_v46 = vand.u32 4294901760, %v25279_v33  ;;  %v30577_v61 = vpack.c.bf16 %v30576_v18, %v24694_v11 }
 0x7f0   :  { %20247 = vmatpush3.bf16.msra.mxu0 %v30573_v40  ;;  %20289 = vmatprep.subr.bf16.mxu1 %v25134_v47  ;;  %v16912_v28 = vpop.f32.mrb[44].mxu1  ;;  %v30579_v11 = vand.u32 4294901760, %v25158_v59 }
 0x7f1   :  { %20249 = vmatprep.subr.bf16.mxu0 %v30574_v15  ;;  %v25306_v38 = vsub.f32 %v5039_v52, %v25294_v50  ;;  %7932 = vmatprep.mubr.f32.mxu0 %v7931_v25  ;;  %v30578_v25 = vpack.c.bf16 %v24808_v5, %v24803_v37  ;;  %v16913_v52 = vpop.f32.mrb[45].mxu1  ;;  %v30580_v15 = vld [vmem:[#allocation107_spill] sm:$0xff]  ;;  %v30583_v37 = vand.u32 4294901760, %v25203_v53 }
 0x7f2   :  { %8204 = vmatprep.mubr.f32.mxu1 %v25294_v50  ;;  %7938 = vmatmul.mubr.f32.gmra.mrb[46].mxu0 %v7937_v21  ;;  %v7951_v21 = vsub.f32 %v25279_v33, %v7950_v46  ;;  %v16914_v2 = vadd.f32 %v16913_v52, %v16912_v28 }
 0x7f3   :  { %8206 = vmatmul.mubr.f32.gmra.mrb[82].mxu1 %v25270_v22  ;;  %v7944_v48 = vand.u32 4294901760, %v25306_v38 }
 0x7f4   :  { %8475 = vmatprep.mubr.f32.mxu1 %v30575_v44  ;;  %20251 = vmatpush3.bf16.msra.mxu0 %v30577_v61  ;;  %v30581_v44 = vld [vmem:[#allocation109_spill] sm:$0xff]  ;;  %v25329_v61 = vadd.f32 %v25195_v34, %v16914_v2  ;;  %v16915_v5 = vpop.f32.mrb[46].mxu1 }
 0x7f5   :  { %20291 = vmatpush3.bf16.msra.mxu1 %v25143_v30  ;;  %20253 = vmatprep.subr.bf16.mxu0 %v30578_v25  ;;  %v7945_v0 = vsub.f32 %v25306_v38, %v7944_v48  ;;  %v30582_v18 = vpack.c.bf16 %v30580_v15, %v30581_v44  ;;  %v16916_v28 = vpop.f32.mrb[47].mxu1  ;;  %v30584_v25 = vld [vmem:[#allocation113_spill] sm:$0xff]  ;;  %v30593_v44 = vand.u32 4294901760, %v30547_v29 }
 0x7f6   :  { %20325 = vmatprep.subr.bf16.mxu1 %v24920_v13  ;;  %v7952_v13 = vand.u32 4294901760, %v7951_v21  ;;  %v30585_v52 = vpack.c.bf16 %v24861_v20, %v30584_v25  ;;  %v16917_v34 = vadd.f32 %v16916_v28, %v16915_v5  ;;  %v30589_v20 = vpack.c.bf16 %v24876_v16, %v24871_v4  ;;  %v30610_v28 = vld [vmem:[#allocation136_spill] sm:$0xff] }
 0x7f7   :  { %v7946_v40 = vand.u32 4294901760, %v7945_v0  ;;  %v30586_v0 = vand.u32 4294901760, %v30531_v1  ;;  %v30594_v16 = vand.u32 4294901760, %v25238_v8 }
 0x7f8   :  { %8479 = vmatmul.mubr.f32.vlgmr.msra.gmra.mrb[84].mxu1 %v30579_v11  ;;  %20255 = vmatpush3.bf16.msra.mxu0 %v30582_v18  ;;  %v30587_v11 = vand.u32 4294901760, %v30532_v35  ;;  %v25346_v21 = vadd.f32 %v25208_v63, %v16917_v34  ;;  %v16918_v1 = vpop.f32.mrb[48].mxu1  ;;  %v30592_v63 = vand.u32 4294901760, %v30548_v56  ;;  %v30595_v56 = vand.u32 4294901760, %v30552_v24  ;;  %v25432_v18 = vld [vmem:[%s29104_s5 + $0x328] sm:$0xff] }
 0x7f9   :  { %8486 = vmatprep.mubr.f32.mxu1 %v30583_v37  ;;  %20327 = vmatpush3.bf16.msra.mxu1 %v24930_v41  ;;  %v30588_v41 = vand.u32 4294901760, %v25183_v17  ;;  %v16919_v35 = vpop.f32.mrb[49].mxu1 }
 0x7fa   :  { %7947 = vmatprep.mubr.f32.mxu0 %v7946_v40  ;;  %20257 = vmatprep.subr.bf16.mxu0 %v30585_v52  ;;  %v20292_v15 = vpack.c.bf16 %v30587_v11, %v30586_v0  ;;  %v16920_v40 = vadd.f32 %v16919_v35, %v16918_v1  ;;  %v20296_v4 = vpack.c.bf16 %v30593_v44, %v30592_v63  ;;  %v8847_v52 = vand.u32 4294901760, %v25432_v18  ;;  %v30611_v11 = vld [vmem:[#allocation137_spill] sm:$0xff] }
 0x7fb   :  { %7953 = vmatmul.mubr.f32.gmra.mrb[48].mxu0 %v7952_v13  ;;  %20329 = vmatprep.subr.bf16.mxu1 %v24936_v3  ;;  %v30590_v3 = vand.u32 4294901760, %v30544_v32  ;;  %v30596_v32 = vand.u32 4294901760, %v30551_v51  ;;  %v25461_v35 = vld [vmem:[%s29104_s5 + $0x340] sm:$0xff] }
 0x7fc   :  { %8341 = vmatprep.mubr.f32.mxu0 %v25173_v42  ;;  %8490 = vmatmul.mubr.f32.gmra.mrb[86].mxu1 %v30588_v41  ;;  %v30591_v42 = vand.u32 4294901760, %v30543_v43  ;;  %v16921_v43 = vpop.f32.mrb[50].mxu1 }
 0x7fd   :  { %20259 = vmatpush3.bf16.msra.mxu0 %v30589_v20  ;;  %8497 = vmatprep.mubr.f32.mxu1 %v7929_v58  ;;  %v20298_v29 = vpack.c.bf16 %v30596_v32, %v30595_v56  ;;  %v30598_v58 = vand.u32 4294901760, %v30554_v23  ;;  %v30601_v23 = vand.u32 4294901760, %v30563_v12  ;;  %v30603_v12 = vld [vmem:[#allocation35_spill] sm:$0xff] }
 0x7fe   :  { %20331 = vmatpush3.bf16.msra.mxu1 %v24964_v57  ;;  %20293 = vmatprep.subr.bf16.mxu0 %v20292_v15  ;;  %v20294_v2 = vpack.c.bf16 %v30591_v42, %v30590_v3  ;;  %v25365_v57 = vadd.f32 %v25231_v60, %v16920_v40  ;;  %v30597_v60 = vand.u32 4294901760, %v30555_v39  ;;  %v30600_v39 = vand.u32 4294901760, %v30559_v6  ;;  %v25445_v15 = vld [vmem:[%s29104_s5 + $0x330] sm:$0xff]  ;;  %v25466_v3 = vld [vmem:[%s29104_s5 + $0x348] sm:$0xff]  ;;  %v30613_v42 = vld [vmem:[#allocation37_spill] sm:$0xff] }
 0x7ff   :  { %20333 = vmatprep.subr.bf16.mxu1 %v24970_v55  ;;  %v16922_v55 = vpop.f32.mrb[51].mxu1  ;;  %v30612_v20 = vld [vmem:[#allocation87_spill] sm:$0xff]  ;;  %v8850_v44 = vand.u32 4294901760, %v25445_v15 }
 0x800   :  { %8344 = vmatmul.mubr.f32.vlgmr.msra.gmra.mrb[50].mxu0 %v25158_v59  ;;  %8501 = vmatmul.mubr.f32.gmra.mrb[88].mxu1 %v30594_v16  ;;  %v16923_v59 = vadd.f32 %v16922_v55, %v16921_v43  ;;  %v30615_v16 = vld [vmem:[#allocation77_spill] sm:$0xff] }
 0x801   :  { %8350 = vmatprep.mubr.f32.mxu0 %v25203_v53  ;;  %8508 = vmatprep.mubr.f32.mxu1 %v7944_v48  ;;  %v20300_v53 = vpack.c.bf16 %v30598_v58, %v30597_v60  ;;  %v25427_v48 = vld [vmem:[%s29104_s5 + $0x320] sm:$0xff]  ;;  %v8856_v60 = vand.u32 4294901760, %v25461_v35  ;;  %v8859_v58 = vand.u32 4294901760, %v25466_v3 }
 0x802   :  { %20295 = vmatpush3.bf16.msra.mxu0 %v20294_v2  ;;  %20335 = vmatpush3.bf16.msra.mxu1 %v24982_v49  ;;  %v25380_v49 = vadd.f32 %v25251_v9, %v16923_v59  ;;  %v8844_v25 = vand.u32 4294901760, %v25427_v48  ;;  %v30614_v2 = vld [vmem:[#allocation91_spill] sm:$0xff] }
 0x803   :  { %20297 = vmatprep.subr.bf16.mxu0 %v20296_v4  ;;  %20337 = vmatprep.subr.bf16.mxu1 %v25037_v26  ;;  %v30599_v26 = vand.u32 4294901760, %v30560_v36  ;;  %v30607_v36 = vld [vmem:[#allocation135_spill] sm:$0xff] }
 0x804   :  { %8353 = vmatmul.mubr.f32.gmra.mrb[52].mxu0 %v25183_v17  ;;  %8512 = vmatmul.mubr.f32.gmra.mrb[90].mxu1 %v7950_v46  ;;  %v30602_v17 = vand.u32 4294901760, %v30562_v31  ;;  %v5733_v31 = vsel %vm5732_vm14, %v30607_v36, 0  ;;  %v30609_v46 = vld [vmem:[#allocation121_spill] sm:$0xff]  ;;  %v25470_v63 = vpack.c.bf16 %v8847_v52, %v8844_v25 }
 0x805   :  { %8359 = vmatprep.mubr.f32.mxu0 %v25265_v14  ;;  %8803 = vmatprep.mubr.f32.mxu1 %v25167_v27  ;;  %v20302_v51 = vpack.c.bf16 %v30600_v39, %v30599_v26  ;;  %v5138_v14 = vld [vmem:[%s29104_s5 + $0x310] sm:$0xff]  ;;  %v25434_v37 = vand.u32 4294901760, %v5733_v31  ;;  %v30616_v26 = vld [vmem:[#allocation90_spill] sm:$0xff] }
 0x806   :  { %20299 = vmatpush3.bf16.msra.mxu0 %v20298_v29  ;;  %20339 = vmatpush3.bf16.msra.mxu1 %v25065_v62  ;;  %v20304_v24 = vpack.c.bf16 %v30602_v17, %v30601_v23  ;;  %v5136_v62 = vld [vmem:[%s29104_s5 + $0x300] sm:$0xff]  ;;  %v8838_v5 = vand.u32 4294901760, %v5138_v14  ;;  %v5735_v39 = vsel %vm5732_vm14, %v30616_v26, 0  ;;  %v25580_v26 = vsub.f32 %v25445_v15, %v8850_v44 }
 0x807   :  { %20301 = vmatprep.subr.bf16.mxu0 %v20300_v53  ;;  %20341 = vmatprep.subr.bf16.mxu1 %v25071_v45  ;;  %v5137_v45 = vld [vmem:[%s29104_s5 + $0x308] sm:$0xff]  ;;  %v8832_v9 = vand.u32 4294901760, %v5136_v62  ;;  %v25448_v34 = vsub.f32 %v5733_v31, %v25434_v37 }
 0x808   :  { %8362 = vmatmul.mubr.f32.gmra.mrb[54].mxu0 %v25238_v8  ;;  %v30604_v8 = vld [vmem:[#allocation54_spill] sm:$0xff]  ;;  %v8835_v6 = vand.u32 4294901760, %v5137_v45  ;;  %v25486_v53 = vsub.f32 %v5138_v14, %v8838_v5  ;;  %v25522_v14 = vld [vmem:[%s29104_s5 + $0x350] sm:$0xff] }
 0x809   :  { %8368 = vmatprep.mubr.f32.mxu0 %v25306_v38  ;;  %v25478_v56 = vsub.f32 %v5136_v62, %v8832_v9  ;;  %v8910_v59 = vand.u32 4294901760, %v25448_v34 }
 0x80a   :  { %20303 = vmatpush3.bf16.msra.mxu0 %v20302_v51  ;;  %20343 = vmatpush3.bf16.msra.mxu1 %v25093_v54  ;;  %v30605_v54 = vld [vmem:[#allocation38_spill] sm:$0xff]  ;;  %v25422_v38 = vpack.c.bf16 %v8835_v6, %v8832_v9  ;;  %v25480_v32 = vsub.f32 %v5137_v45, %v8835_v6  ;;  %v30617_v51 = vld [vmem:[#allocation89_spill] sm:$0xff]  ;;  %v30619_v45 = vld [vmem:[#allocation80_spill] sm:$0xff]  ;;  %v25507_v6 = vand.u32 4294901760, %v5735_v39 }
 0x80b   :  { %20305 = vmatprep.subr.bf16.mxu0 %v20304_v24  ;;  %20345 = vmatprep.subr.bf16.mxu1 %v25099_v10  ;;  %v30606_v10 = vld [vmem:[#allocation55_spill] sm:$0xff]  ;;  %v8911_v31 = vsub.f32 %v25448_v34, %v8910_v59 }
 0x80c   :  { %8371 = vmatmul.mubr.f32.gmra.mrb[56].mxu0 %v25279_v33  ;;  %v30608_v33 = vld [vmem:[#allocation112_spill] sm:$0xff]  ;;  %v30618_v24 = vld [vmem:[#allocation59_spill] sm:$0xff]  ;;  %v8958_v9 = vand.u32 4294901760, %v25480_v32 }
 0x80d   :  { %8678 = vmatprep.mubr.f32.mxu0 %v25167_v27  ;;  %v5139_v27 = vld [vmem:[%s29104_s5 + $0x318] sm:$0xff]  ;;  %v5737_v62 = vsel %vm5732_vm14, %v30618_v24, 0 }
 0x80e   :  { %20307 = vmatpush3.bf16.msra.mxu0 %v30603_v12  ;;  %20347 = vmatpush3.bf16.msra.mxu1 %v30604_v8  ;;  %v30620_v12 = vld [vmem:[#allocation122_spill] sm:$0xff] }
 0x80f   :  { %20309 = vmatprep.subr.bf16.mxu0 %v30605_v54  ;;  %20349 = vmatprep.subr.bf16.mxu1 %v30606_v10  ;;  %v8951_v10 = vand.u32 4294901760, %v25478_v56 }
 0x810   :  { %v17000_v13 = vpop.f32.mrb[52].mxu1 }
 0x812   :  { %20311 = vmatpush3.bf16.msra.mxu0 %v30608_v33  ;;  %20351 = vmatpush3.bf16.msra.mxu1 %v25127_v7  ;;  %v8841_v7 = vand.u32 4294901760, %v5139_v27  ;;  %v8965_v33 = vand.u32 4294901760, %v25486_v53 }
 0x813   :  { %20313 = vmatprep.subr.bf16.mxu0 %v30609_v46  ;;  %20353 = vmatprep.subr.bf16.mxu1 %v25134_v47  ;;  %v17001_v47 = vpop.f32.mrb[53].mxu1  ;;  %v16956_v43 = vpop.f32.mrb[18].mxu0  ;;  %v25530_v46 = vand.u32 4294901760, %v5737_v62 }
 0x814   :  { %v17002_v0 = vadd.f32 %v17001_v47, %v17000_v13  ;;  %v25450_v41 = vpack.c.bf16 %v8841_v7, %v8838_v5  ;;  %v17003_v1 = vpop.f32.mrb[54].mxu1  ;;  %v16957_v29 = vpop.f32.mrb[19].mxu0  ;;  %v25491_v17 = vsub.f32 %v5139_v27, %v8841_v7  ;;  %v25527_v27 = vld [vmem:[%s29104_s5 + $0x358] sm:$0xff]  ;;  %v5739_v5 = vsel %vm5732_vm14, %v25289_v19, 0 }
 0x815   :  { %v17004_v40 = vpop.f32.mrb[55].mxu1  ;;  %v16958_v23 = vadd.f32 %v16957_v29, %v16956_v43  ;;  %v30621_v7 = vld [vmem:[#allocation92_spill] sm:$0xff]  ;;  %v8862_v19 = vand.u32 4294901760, %v25522_v14 }
 0x816   :  { %20315 = vmatpush3.bf16.msra.mxu0 %v30610_v28  ;;  %20355 = vmatpush3.bf16.msra.mxu1 %v25143_v30  ;;  %v25455_v30 = vld [vmem:[%s29104_s5 + $0x338] sm:$0xff]  ;;  %v25474_v4 = vadd.f32 %v17004_v40, %v17003_v1  ;;  %v8972_v28 = vand.u32 4294901760, %v25491_v17  ;;  %v25542_v1 = vsub.f32 %v25427_v48, %v8844_v25  ;;  %v25557_v48 = vsub.f32 %v5735_v39, %v25507_v6 }
 0x817   :  { %20317 = vmatprep.subr.bf16.mxu0 %v30611_v11  ;;  %20357 = vmatprep.subr.bf16.mxu1 %v25422_v38  ;;  %v8853_v55 = vand.u32 4294901760, %v25455_v30  ;;  %v21339_v8 = vadd.f32 %v25329_v61, %v16958_v23  ;;  %v16959_v36 = vpop.f32.mrb[20].mxu0  ;;  %v25517_v61 = vpack.c.bf16 %v8859_v58, %v8856_v60  ;;  %v25559_v25 = vand.u32 4294901760, %v5739_v5 }
 0x818   :  { %v16960_v13 = vpop.f32.mrb[21].mxu0  ;;  %v25564_v40 = vsub.f32 %v5737_v62, %v25530_v46  ;;  %v8973_v43 = vsub.f32 %v25491_v17, %v8972_v28  ;;  %v8920_v24 = vand.u32 4294901760, %v25557_v48 }
 0x819   :  { %8805 = vmatmul.mubr.f32.vlgmr.msra.gmra.mrb[92].mxu1 %v30612_v20  ;;  %v25503_v54 = vpack.c.bf16 %v8853_v55, %v8850_v44  ;;  %v25537_v47 = vadd.f32 %v21339_v8, %v17002_v0  ;;  %v16961_v11 = vadd.f32 %v16960_v13, %v16959_v36  ;;  %v8952_v0 = vsub.f32 %v25478_v56, %v8951_v10 }
 0x81a   :  { %20319 = vmatpush3.bf16.msra.mxu0 %v30613_v42  ;;  %8810 = vmatprep.mubr.f32.mxu1 %v30614_v2  ;;  %v25545_v42 = vsub.f32 %v25432_v18, %v8847_v52  ;;  %v8912_v52 = vand.u32 4294901760, %v8911_v31  ;;  %v25591_v23 = vsub.f32 %v25455_v30, %v8853_v55  ;;  %v25595_v62 = vsub.f32 %v5739_v5, %v25559_v25 }
 0x81b   :  { %20359 = vmatpush3.bf16.msra.mxu1 %v25422_v38  ;;  %20321 = vmatprep.subr.bf16.mxu0 %v30615_v16  ;;  %v21321_v18 = vadd.f32 %v25346_v21, %v16961_v11  ;;  %v8966_v16 = vsub.f32 %v25486_v53, %v8965_v33  ;;  %v29533_v21 = vand.u32 4294901760, %v25542_v1  ;;  %v8953_v15 = vand.u32 4294901760, %v8952_v0 }
 0x81c   :  { %20361 = vmatprep.subr.bf16.mxu1 %v25450_v41  ;;  %v29528_v29 = vand.u32 4294901760, %v25545_v42  ;;  %v29526_v8 = vand.u32 4294901760, %v25580_v26  ;;  %v29525_v36 = vand.u32 4294901760, %v25591_v23  ;;  %v25613_v31 = vsub.f32 %v25461_v35, %v8856_v60  ;;  %v30622_v60 = vld [vmem:[#allocation11_spill] sm:$0xff] }
 0x81d   :  { %8812 = vmatmul.mubr.f32.gmra.mrb[94].mxu1 %v30617_v51  ;;  %v25583_v39 = vadd.f32 %v21321_v18, %v25474_v4  ;;  %v29534_v4 = vand.u32 4294901760, %v25564_v40  ;;  %v8980_v30 = vsub.f32 %v25542_v1, %v29533_v21  ;;  %v8921_v5 = vsub.f32 %v25557_v48, %v8920_v24 }
 0x81e   :  { %20323 = vmatpush3.bf16.msra.mxu0 %v30619_v45  ;;  %8817 = vmatprep.mubr.f32.mxu1 %v30620_v12  ;;  %v8967_v45 = vand.u32 4294901760, %v8966_v16  ;;  %v8987_v55 = vsub.f32 %v25545_v42, %v29528_v29  ;;  %v29527_v13 = vand.u32 4294901760, %v25595_v62  ;;  %v8994_v18 = vsub.f32 %v25580_v26, %v29526_v8 }
 0x81f   :  { %20363 = vmatpush3.bf16.msra.mxu1 %v25450_v41  ;;  %v8931_v35 = vsub.f32 %v25564_v40, %v29534_v4  ;;  %v8981_v0 = vand.u32 4294901760, %v8980_v30  ;;  %v29531_v16 = vand.u32 4294901760, %v25613_v31 }
 0x820   :  { %20365 = vmatprep.subr.bf16.mxu1 %v25470_v63 }
 0x821   :  { %8680 = vmatmul.mubr.f32.vlgmr.msra.gmra.mrb[58].mxu0 %v30612_v20  ;;  %8819 = vmatmul.mubr.f32.gmra.mrb[96].mxu1 %v30621_v7  ;;  %v8865_v20 = vand.u32 4294901760, %v25527_v27  ;;  %v8932_v30 = vand.u32 4294901760, %v8931_v35 }
 0x822   :  { %8685 = vmatprep.mubr.f32.mxu0 %v30614_v2  ;;  %8824 = vmatprep.mubr.f32.mxu1 %v25294_v50  ;;  %v8959_v2 = vsub.f32 %v25480_v32, %v8958_v9 }
 0x823   :  { %20367 = vmatpush3.bf16.msra.mxu1 %v25470_v63 }
 0x824   :  { %20369 = vmatprep.subr.bf16.mxu1 %v25503_v54  ;;  %v8960_v44 = vand.u32 4294901760, %v8959_v2  ;;  %v17006_v11 = vpop.f32.mrb[56].mxu1  ;;  %v8988_v2 = vand.u32 4294901760, %v8987_v55 }
 0x825   :  { %8687 = vmatmul.mubr.f32.gmra.mrb[60].mxu0 %v30617_v51  ;;  %8826 = vmatmul.mubr.f32.gmra.mrb[98].mxu1 %v25270_v22  ;;  %v25586_v51 = vpack.c.bf16 %v8865_v20, %v8862_v19 }
 0x826   :  { %8692 = vmatprep.mubr.f32.mxu0 %v30620_v12  ;;  %19012 = vmatprep.mubr.f32.mxu1 %v8912_v52  ;;  %v8974_v12 = vand.u32 4294901760, %v8973_v43 }
 0x827   :  { %20371 = vmatpush3.bf16.msra.mxu1 %v25503_v54 }
 0x828   :  { %20373 = vmatprep.subr.bf16.mxu1 %v25517_v61 }
 0x829   :  { %8694 = vmatmul.mubr.f32.gmra.mrb[62].mxu0 %v30621_v7  ;;  %v20380_v7 = vpack.c.bf16 %v8960_v44, %v8953_v15  ;;  %v8922_v15 = vand.u32 4294901760, %v8921_v5  ;;  %v8941_v44 = vsub.f32 %v25595_v62, %v29527_v13  ;;  %v8995_v5 = vand.u32 4294901760, %v8994_v18 }
 0x82a   :  { %8699 = vmatprep.mubr.f32.mxu0 %v25294_v50  ;;  %v25618_v50 = vsub.f32 %v25466_v3, %v8859_v58  ;;  %v17007_v3 = vpop.f32.mrb[57].mxu1  ;;  %v20384_v58 = vpack.c.bf16 %v8974_v12, %v8967_v45  ;;  %v25643_v45 = vsub.f32 %v25522_v14, %v8862_v19  ;;  %v25646_v12 = vsub.f32 %v25527_v27, %v8865_v20 }
 0x82b   :  { %20375 = vmatpush3.bf16.msra.mxu1 %v25517_v61  ;;  %v17008_v52 = vadd.f32 %v17007_v3, %v17006_v11  ;;  %v17009_v55 = vpop.f32.mrb[58].mxu1  ;;  %v20388_v3 = vpack.c.bf16 %v8988_v2, %v8981_v0  ;;  %v9008_v13 = vsub.f32 %v25613_v31, %v29531_v16  ;;  %v8942_v29 = vand.u32 4294901760, %v8941_v44 }
 0x82c   :  { %20377 = vmatprep.subr.bf16.mxu1 %v25586_v51  ;;  %v29530_v43 = vand.u32 4294901760, %v25618_v50  ;;  %v17010_v11 = vpop.f32.mrb[59].mxu1  ;;  %v29529_v27 = vand.u32 4294901760, %v25643_v45  ;;  %v29532_v19 = vand.u32 4294901760, %v25646_v12 }
 0x82d   :  { %8701 = vmatmul.mubr.f32.gmra.mrb[64].mxu0 %v25270_v22  ;;  %v9001_v22 = vsub.f32 %v25591_v23, %v29525_v36  ;;  %v17011_v36 = vadd.f32 %v17010_v11, %v17009_v55 }
 0x82e   :  { %19172 = vmatprep.mubr.f32.mxu0 %v30622_v60  ;;  %v9015_v14 = vsub.f32 %v25618_v50, %v29530_v43 }
 0x82f   :  { %20379 = vmatpush3.bf16.msra.mxu1 %v25586_v51  ;;  %v9002_v8 = vand.u32 4294901760, %v9001_v22  ;;  %v9009_v22 = vand.u32 4294901760, %v9008_v13 }
 0x830   :  { %20381 = vmatprep.subr.bf16.mxu1 %v20380_v7  ;;  %v16962_v20 = vpop.f32.mrb[22].mxu0  ;;  %v9016_v44 = vand.u32 4294901760, %v9015_v14 }
 0x831   :  { %v16963_v35 = vpop.f32.mrb[23].mxu0  ;;  %v20392_v18 = vpack.c.bf16 %v9002_v8, %v8995_v5 }
 0x832   :  { %19013 = vmatmul.mubr.f32.vlgmr.msra.gmra.mrb[8].mxu1 %v8922_v15  ;;  %v16964_v0 = vadd.f32 %v16963_v35, %v16962_v20  ;;  %v20396_v5 = vpack.c.bf16 %v9016_v44, %v9009_v22 }
 0x833   :  { %19015 = vmatprep.mubr.f32.mxu1 %v8932_v30  ;;  %20383 = vmatpush3.bf16.msra.mxu1 %v20380_v7  ;;  %v9022_v30 = vsub.f32 %v25643_v45, %v29529_v27 }
 0x834   :  { %20385 = vmatprep.subr.bf16.mxu1 %v20384_v58  ;;  %v17088_v7 = vpop.f32.mrb[60].mxu1  ;;  %v21375_v55 = vadd.f32 %v25365_v57, %v16964_v0 }
 0x835   :  { %v17089_v2 = vpop.f32.mrb[61].mxu1  ;;  %v9023_v14 = vand.u32 4294901760, %v9022_v30 }
 0x836   :  { %19016 = vmatmul.mubr.f32.gmra.mrb[10].mxu1 %v8942_v29  ;;  %v17090_v15 = vadd.f32 %v17089_v2, %v17088_v7  ;;  %v9029_v29 = vsub.f32 %v25646_v12, %v29532_v19  ;;  %v21376_v8 = vadd.f32 %v21375_v55, %v17008_v52 }
 0x837   :  { %20387 = vmatpush3.bf16.msra.mxu1 %v20384_v58  ;;  %19042 = vmatprep.mubr.f32.mxu1 %v25434_v37  ;;  %v16965_v58 = vpop.f32.mrb[24].mxu0 }
 0x838   :  { %20389 = vmatprep.subr.bf16.mxu1 %v20388_v3  ;;  %v16966_v11 = vpop.f32.mrb[25].mxu0  ;;  %v9030_v7 = vand.u32 4294901760, %v9029_v29 }
 0x839   :  { %v16967_v35 = vadd.f32 %v16966_v11, %v16965_v58 }
 0x83a   :  { %v17091_v20 = vpop.f32.mrb[62].mxu1 }
 0x83b   :  { %20391 = vmatpush3.bf16.msra.mxu1 %v20388_v3  ;;  %v17092_v13 = vpop.f32.mrb[63].mxu1  ;;  %v21357_v2 = vadd.f32 %v25380_v49, %v16967_v35  ;;  %v20400_v3 = vpack.c.bf16 %v9030_v7, %v9023_v14  ;;  %v20404_v49 = vpack.c.bf16 %v25480_v32, %v25478_v56  ;;  %v20416_v14 = vpack.c.bf16 %v25591_v23, %v25580_v26 }
 0x83c   :  { %20393 = vmatprep.subr.bf16.mxu1 %v20392_v18  ;;  %v17093_v27 = vadd.f32 %v17092_v13, %v17091_v20  ;;  %v30624_v56 = vand.u32 4294901760, %v25542_v1  ;;  %v30625_v32 = vand.u32 4294901760, %v25545_v42 }
 0x83d   :  { %v17044_v43 = vpop.f32.mrb[26].mxu0  ;;  %v21358_v21 = vadd.f32 %v21357_v2, %v17011_v36 }
 0x83e   :  { %v17045_v19 = vpop.f32.mrb[27].mxu0 }
 0x83f   :  { %20395 = vmatpush3.bf16.msra.mxu1 %v20392_v18  ;;  %v17046_v57 = vadd.f32 %v17045_v19, %v17044_v43 }
 0x840   :  { %v17094_v16 = vpop.f32.mrb[64].mxu1  ;;  %20397 = vmatprep.subr.bf16.mxu1 %v20396_v5 }
 0x841   :  { %v17095_v0 = vpop.f32.mrb[65].mxu1  ;;  %v21341_v52 = vadd.f32 %v25537_v47, %v17046_v57  ;;  %v20408_v47 = vpack.c.bf16 %v25491_v17, %v25486_v53  ;;  %v30627_v53 = vand.u32 4294901760, %v25580_v26  ;;  %v30628_v17 = vand.u32 4294901760, %v25591_v23 }
 0x842   :  { %v17096_v4 = vadd.f32 %v17095_v0, %v17094_v16 }
 0x843   :  { %20399 = vmatpush3.bf16.msra.mxu1 %v20396_v5  ;;  %v17047_v55 = vpop.f32.mrb[28].mxu0  ;;  %v21342_v18 = vadd.f32 %v21341_v52, %v17090_v15 }
 0x844   :  { %v17048_v44 = vpop.f32.mrb[29].mxu0  ;;  %20401 = vmatprep.subr.bf16.mxu1 %v20400_v3 }
 0x845   :  { %v17049_v29 = vadd.f32 %v17048_v44, %v17047_v55 }
 0x846   :  { %v17097_v22 = vpop.f32.mrb[66].mxu1 }
 0x847   :  { %v17098_v30 = vpop.f32.mrb[67].mxu1  ;;  %v21323_v36 = vadd.f32 %v25583_v39, %v17049_v29  ;;  %20403 = vmatpush3.bf16.msra.mxu1 %v20400_v3  ;;  %v20412_v39 = vpack.c.bf16 %v25545_v42, %v25542_v1  ;;  %v30630_v1 = vand.u32 4294901760, %v25618_v50 }
 0x848   :  { %v17099_v58 = vadd.f32 %v17098_v30, %v17097_v22  ;;  %v17050_v43 = vpop.f32.mrb[30].mxu0  ;;  %20405 = vmatprep.subr.bf16.mxu1 %v20404_v49 }
 0x849   :  { %v17051_v16 = vpop.f32.mrb[31].mxu0  ;;  %v21324_v19 = vadd.f32 %v21323_v36, %v17093_v27 }
 0x84a   :  { %v17052_v11 = vadd.f32 %v17051_v16, %v17050_v43  ;;  %19043 = vmatmul.mubr.f32.vlgmr.msra.gmra.mrb[8].mxu1 %v25507_v6 }
 0x84b   :  { %19045 = vmatprep.mubr.f32.mxu1 %v25530_v46  ;;  %20407 = vmatpush3.bf16.msra.mxu1 %v20404_v49 }
 0x84c   :  { %v21377_v20 = vadd.f32 %v21376_v8, %v17052_v11  ;;  %v17053_v15 = vpop.f32.mrb[32].mxu0  ;;  %20409 = vmatprep.subr.bf16.mxu1 %v20408_v47  ;;  %v20420_v8 = vpack.c.bf16 %v25618_v50, %v25613_v31 }
 0x84d   :  { %v17054_v35 = vpop.f32.mrb[33].mxu0 }
 0x84e   :  { %v17055_v13 = vadd.f32 %v17054_v35, %v17053_v15  ;;  %19046 = vmatmul.mubr.f32.gmra.mrb[10].mxu1 %v25559_v25  ;;  %v21378_v5 = vadd.f32 %v21377_v20, %v17096_v4  ;;  %v20424_v4 = vpack.c.bf16 %v25646_v12, %v25643_v45 }
 0x84f   :  { %20411 = vmatpush3.bf16.msra.mxu1 %v20408_v47  ;;  %19072 = vmatprep.mubr.f32.mxu1 %v25448_v34 }
 0x850   :  { %v21359_v27 = vadd.f32 %v21358_v21, %v17055_v13  ;;  %20413 = vmatprep.subr.bf16.mxu1 %v20412_v39 }
 0x852   :  { %v21360_v7 = vadd.f32 %v21359_v27, %v17099_v58 }
 0x853   :  { %20415 = vmatpush3.bf16.msra.mxu1 %v20412_v39 }
 0x854   :  { %20417 = vmatprep.subr.bf16.mxu1 %v20416_v14 }
 0x857   :  { %20419 = vmatpush3.bf16.msra.mxu1 %v20416_v14  ;;  %v17176_v2 = vpop.f32.mrb[68].mxu1 }
 0x858   :  { %v17177_v57 = vpop.f32.mrb[69].mxu1  ;;  %20421 = vmatprep.subr.bf16.mxu1 %v20420_v8 }
 0x859   :  { %v17178_v0 = vadd.f32 %v17177_v57, %v17176_v2 }
 0x85b   :  { %20423 = vmatpush3.bf16.msra.mxu1 %v20420_v8  ;;  %v17179_v21 = vpop.f32.mrb[70].mxu1 }
 0x85c   :  { %v17180_v3 = vpop.f32.mrb[71].mxu1  ;;  %20425 = vmatprep.subr.bf16.mxu1 %v20424_v4 }
 0x85d   :  { %v17181_v52 = vadd.f32 %v17180_v3, %v17179_v21 }
 0x85f   :  { %20427 = vmatpush3.bf16.msra.mxu1 %v20424_v4  ;;  %v17182_v55 = vpop.f32.mrb[72].mxu1 }
 0x860   :  { %v17132_v22 = vpop.f32.mrb[34].mxu0  ;;  %v17183_v44 = vpop.f32.mrb[73].mxu1  ;;  %20429 = vmatprep.subr.bf16.mxu1 %v25422_v38 }
 0x861   :  { %v17133_v30 = vpop.f32.mrb[35].mxu0  ;;  %v17184_v49 = vadd.f32 %v17183_v44, %v17182_v55 }
 0x862   :  { %v17134_v29 = vadd.f32 %v17133_v30, %v17132_v22  ;;  %19073 = vmatmul.mubr.f32.vlgmr.msra.gmra.mrb[8].mxu1 %v25557_v48  ;;  %v30631_v48 = vand.u32 4294901760, %v25643_v45 }
 0x863   :  { %19075 = vmatprep.mubr.f32.mxu1 %v25564_v40  ;;  %20431 = vmatpush3.bf16.msra.mxu1 %v25422_v38 }
 0x864   :  { %v17185_v58 = vpop.f32.mrb[74].mxu1  ;;  %v21343_v36 = vadd.f32 %v21342_v18, %v17134_v29  ;;  %v17135_v43 = vpop.f32.mrb[36].mxu0  ;;  %20433 = vmatprep.subr.bf16.mxu1 %v25450_v41 }
 0x865   :  { %v17186_v47 = vpop.f32.mrb[75].mxu1  ;;  %v17136_v16 = vpop.f32.mrb[37].mxu0 }
 0x866   :  { %v17187_v11 = vadd.f32 %v17186_v47, %v17185_v58  ;;  %v17137_v20 = vadd.f32 %v17136_v16, %v17135_v43  ;;  %19076 = vmatmul.mubr.f32.gmra.mrb[10].mxu1 %v25595_v62  ;;  %v25689_v15 = vadd.f32 %v21343_v36, %v17178_v0 }
 0x867   :  { %20435 = vmatpush3.bf16.msra.mxu1 %v25450_v41  ;;  %19102 = vmatprep.mubr.f32.mxu1 %v8910_v59 }
 0x868   :  { %v21325_v39 = vadd.f32 %v21324_v19, %v17137_v20  ;;  %v17138_v35 = vpop.f32.mrb[38].mxu0  ;;  %20437 = vmatprep.subr.bf16.mxu1 %v25470_v63  ;;  %v20452_v19 = vpack.c.bf16 %v8958_v9, %v8951_v10  ;;  %v20460_v10 = vpack.c.bf16 %v30625_v32, %v30624_v56  ;;  %v30626_v9 = vand.u32 4294901760, %v25595_v62 }
 0x869   :  { %v17139_v18 = vpop.f32.mrb[39].mxu0 }
 0x86a   :  { %v17140_v13 = vadd.f32 %v17139_v18, %v17138_v35  ;;  %v25695_v27 = vadd.f32 %v21325_v39, %v17181_v52 }
 0x86b   :  { %20439 = vmatpush3.bf16.msra.mxu1 %v25470_v63 }
 0x86c   :  { %v21379_v14 = vadd.f32 %v21378_v5, %v17140_v13  ;;  %v17141_v8 = vpop.f32.mrb[40].mxu0  ;;  %20441 = vmatprep.subr.bf16.mxu1 %v25503_v54  ;;  %v20456_v5 = vpack.c.bf16 %v8972_v28, %v8965_v33  ;;  %v20464_v33 = vpack.c.bf16 %v30628_v17, %v30627_v53  ;;  %v30629_v28 = vand.u32 4294901760, %v25613_v31 }
 0x86d   :  { %v17142_v2 = vpop.f32.mrb[41].mxu0 }
 0x86e   :  { %v17143_v57 = vadd.f32 %v17142_v2, %v17141_v8  ;;  %v25699_v4 = vadd.f32 %v21379_v14, %v17184_v49  ;;  %v20468_v42 = vpack.c.bf16 %v30630_v1, %v30629_v28 }
 0x86f   :  { %20443 = vmatpush3.bf16.msra.mxu1 %v25503_v54 }
 0x870   :  { %v21361_v34 = vadd.f32 %v21360_v7, %v17143_v57  ;;  %20445 = vmatprep.subr.bf16.mxu1 %v25517_v61  ;;  %v30623_v7 = vand.u32 4294901760, %v25564_v40  ;;  %v30632_v40 = vand.u32 4294901760, %v25646_v12 }
 0x872   :  { %v25703_v59 = vadd.f32 %v21361_v34, %v17187_v11 }
 0x873   :  { %20447 = vmatpush3.bf16.msra.mxu1 %v25517_v61 }
 0x874   :  { %20449 = vmatprep.subr.bf16.mxu1 %v25586_v51 }
 0x877   :  { %20451 = vmatpush3.bf16.msra.mxu1 %v25586_v51 }
 0x878   :  { %20453 = vmatprep.subr.bf16.mxu1 %v20452_v19 }
 0x87a   :  { %19103 = vmatmul.mubr.f32.vlgmr.msra.gmra.mrb[8].mxu1 %v8920_v24  ;;  %v20472_v24 = vpack.c.bf16 %v30632_v40, %v30631_v48 }
 0x87b   :  { %19105 = vmatprep.mubr.f32.mxu1 %v30623_v7  ;;  %20455 = vmatpush3.bf16.msra.mxu1 %v20452_v19 }
 0x87c   :  { %20457 = vmatprep.subr.bf16.mxu1 %v20456_v5 }
 0x87e   :  { %19106 = vmatmul.mubr.f32.gmra.mrb[10].mxu1 %v30626_v9 }
 0x87f   :  { %20459 = vmatpush3.bf16.msra.mxu1 %v20456_v5  ;;  %19132 = vmatprep.mubr.f32.mxu1 %v25434_v37 }
 0x880   :  { %20461 = vmatprep.subr.bf16.mxu1 %v20460_v10 }
 0x883   :  { %20463 = vmatpush3.bf16.msra.mxu1 %v20460_v10 }
 0x884   :  { %20465 = vmatprep.subr.bf16.mxu1 %v20464_v33 }
 0x887   :  { %20467 = vmatpush3.bf16.msra.mxu1 %v20464_v33 }
 0x888   :  { %20469 = vmatprep.subr.bf16.mxu1 %v20468_v42 }
 0x88b   :  { %20471 = vmatpush3.bf16.msra.mxu1 %v20468_v42 }
 0x88c   :  { %20473 = vmatprep.subr.bf16.mxu1 %v20472_v24 }
 0x88f   :  { %20475 = vmatpush3.bf16.msra.mxu1 %v20472_v24 }
 0x890   :  { %20477 = vmatprep.subr.bf16.mxu1 %v25422_v38 }
 0x892   :  { %19133 = vmatmul.mubr.f32.vlgmr.msra.gmra.mrb[8].mxu1 %v25507_v6 }
 0x893   :  { %19135 = vmatprep.mubr.f32.mxu1 %v25530_v46  ;;  %20479 = vmatpush3.bf16.msra.mxu1 %v25422_v38 }
 0x894   :  { %20481 = vmatprep.subr.bf16.mxu1 %v25450_v41 }
 0x896   :  { %19136 = vmatmul.mubr.f32.gmra.mrb[10].mxu1 %v25559_v25 }
 0x897   :  { %20483 = vmatpush3.bf16.msra.mxu1 %v25450_v41  ;;  %19162 = vmatprep.mubr.f32.mxu1 %v25434_v37 }
 0x898   :  { %20485 = vmatprep.subr.bf16.mxu1 %v25470_v63 }
 0x89b   :  { %20487 = vmatpush3.bf16.msra.mxu1 %v25470_v63 }
 0x89c   :  { %20489 = vmatprep.subr.bf16.mxu1 %v25503_v54 }
 0x89f   :  { %20491 = vmatpush3.bf16.msra.mxu1 %v25503_v54 }
 0x8a0   :  { %20493 = vmatprep.subr.bf16.mxu1 %v25517_v61 }
 0x8a3   :  { %20495 = vmatpush3.bf16.msra.mxu1 %v25517_v61 }
 0x8a4   :  { %20497 = vmatprep.subr.bf16.mxu1 %v25586_v51 }
 0x8a6   :  { %v17264_v38 = vpop.f32.mrb[76].mxu1 }
 0x8a7   :  { %20499 = vmatpush3.bf16.msra.mxu1 %v25586_v51  ;;  %v17265_v37 = vpop.f32.mrb[77].mxu1 }
 0x8a8   :  { %v17266_v41 = vadd.f32 %v17265_v37, %v17264_v38 }
 0x8aa   :  { %19163 = vmatmul.mubr.f32.vlgmr.msra.gmra.mrb[8].mxu1 %v25507_v6 }
 0x8ab   :  { %19165 = vmatprep.mubr.f32.mxu1 %v25530_v46 }
 0x8ae   :  { %19166 = vmatmul.mubr.f32.gmra.mrb[10].mxu1 %v25559_v25  ;;  %v17220_v26 = vpop.f32.mrb[42].mxu0 }
 0x8af   :  { %v17221_v23 = vpop.f32.mrb[43].mxu0 }
 0x8b0   :  { %v17267_v63 = vpop.f32.mrb[78].mxu1  ;;  %v17222_v31 = vadd.f32 %v17221_v23, %v17220_v26 }
 0x8b1   :  { %v17268_v54 = vpop.f32.mrb[79].mxu1 }
 0x8b2   :  { %v17269_v62 = vadd.f32 %v17268_v54, %v17267_v63  ;;  %v21345_v61 = vadd.f32 %v25689_v15, %v17222_v31 }
 0x8b4   :  { %v21346_v50 = vadd.f32 %v21345_v61, %v17266_v41 }
 0x8b8   :  { %v17223_v45 = vpop.f32.mrb[44].mxu0 }
 0x8b9   :  { %v17224_v51 = vpop.f32.mrb[45].mxu0 }
 0x8ba   :  { %v17225_v12 = vadd.f32 %v17224_v51, %v17223_v45 }
 0x8bc   :  { %v21327_v6 = vadd.f32 %v25695_v27, %v17225_v12 }
 0x8bd   :  { %v17270_v0 = vpop.f32.mrb[80].mxu1 }
 0x8be   :  { %v17271_v46 = vpop.f32.mrb[81].mxu1  ;;  %v21328_v3 = vadd.f32 %v21327_v6, %v17269_v62 }
 0x8bf   :  { %v17272_v21 = vadd.f32 %v17271_v46, %v17270_v0 }
 0x8c5   :  { %v17226_v52 = vpop.f32.mrb[46].mxu0 }
 0x8c6   :  { %v17273_v25 = vpop.f32.mrb[82].mxu1  ;;  %v17227_v55 = vpop.f32.mrb[47].mxu0 }
 0x8c7   :  { %v17274_v22 = vpop.f32.mrb[83].mxu1  ;;  %v17228_v44 = vadd.f32 %v17227_v55, %v17226_v52 }
 0x8c8   :  { %v17275_v30 = vadd.f32 %v17274_v22, %v17273_v25 }
 0x8c9   :  { %v21381_v49 = vadd.f32 %v25699_v4, %v17228_v44 }
 0x8cb   :  { %v17352_v29 = vpop.f32.mrb[84].mxu1  ;;  %v21382_v36 = vadd.f32 %v21381_v49, %v17272_v21 }
 0x8cc   :  { %v17353_v58 = vpop.f32.mrb[85].mxu1 }
 0x8cd   :  { %v17354_v43 = vadd.f32 %v17353_v58, %v17352_v29 }
 0x8ce   :  { %v17229_v47 = vpop.f32.mrb[48].mxu0 }
 0x8cf   :  { %v17230_v16 = vpop.f32.mrb[49].mxu0  ;;  %v17355_v11 = vpop.f32.mrb[86].mxu1 }
 0x8d0   :  { %v17231_v20 = vadd.f32 %v17230_v16, %v17229_v47  ;;  %v17356_v15 = vpop.f32.mrb[87].mxu1 }
 0x8d1   :  { %v17357_v39 = vadd.f32 %v17356_v15, %v17355_v11 }
 0x8d2   :  { %v21363_v35 = vadd.f32 %v25703_v59, %v17231_v20 }
 0x8d3   :  { %v17308_v18 = vpop.f32.mrb[50].mxu0  ;;  %v17358_v13 = vpop.f32.mrb[88].mxu1 }
 0x8d4   :  { %v17309_v27 = vpop.f32.mrb[51].mxu0  ;;  %v17359_v14 = vpop.f32.mrb[89].mxu1  ;;  %v21364_v8 = vadd.f32 %v21363_v35, %v17275_v30 }
 0x8d5   :  { %v17310_v2 = vadd.f32 %v17309_v27, %v17308_v18  ;;  %v17360_v57 = vadd.f32 %v17359_v14, %v17358_v13 }
 0x8d7   :  { %v21347_v4 = vadd.f32 %v21346_v50, %v17310_v2  ;;  %v17311_v34 = vpop.f32.mrb[52].mxu0  ;;  %v17361_v19 = vpop.f32.mrb[90].mxu1 }
 0x8d8   :  { %v17312_v5 = vpop.f32.mrb[53].mxu0  ;;  %v17362_v7 = vpop.f32.mrb[91].mxu1 }
 0x8d9   :  { %v17313_v56 = vadd.f32 %v17312_v5, %v17311_v34  ;;  %v17363_v32 = vadd.f32 %v17362_v7, %v17361_v19  ;;  %v21348_v10 = vadd.f32 %v21347_v4, %v17354_v43 }
 0x8db   :  { %v21329_v9 = vadd.f32 %v21328_v3, %v17313_v56  ;;  %v17314_v53 = vpop.f32.mrb[54].mxu0 }
 0x8dc   :  { %v17315_v17 = vpop.f32.mrb[55].mxu0 }
 0x8dd   :  { %v17316_v33 = vadd.f32 %v17315_v17, %v17314_v53  ;;  %v21330_v59 = vadd.f32 %v21329_v9, %v17357_v39  ;;  %v21768_v53 = vld [vmem:[%s29100_s1] sm:$0xff] }
 0x8df   :  { %v21383_v28 = vadd.f32 %v21382_v36, %v17316_v33  ;;  %v17317_v1 = vpop.f32.mrb[56].mxu0 }
 0x8e0   :  { %v17318_v42 = vpop.f32.mrb[57].mxu0 }
 0x8e1   :  { %v17319_v48 = vadd.f32 %v17318_v42, %v17317_v1  ;;  %v21384_v40 = vadd.f32 %v21383_v28, %v17360_v57 }
 0x8e3   :  { %v21365_v24 = vadd.f32 %v21364_v8, %v17319_v48 }
 0x8e5   :  { %v21366_v38 = vadd.f32 %v21365_v24, %v17363_v32 }
 0x8ec   :  { %v17440_v37 = vpop.f32.mrb[92].mxu1 }
 0x8ed   :  { %v17441_v41 = vpop.f32.mrb[93].mxu1 }
 0x8ee   :  { %v17442_v63 = vadd.f32 %v17441_v41, %v17440_v37 }
 0x8f0   :  { %v17443_v26 = vpop.f32.mrb[94].mxu1 }
 0x8f1   :  { %v17444_v54 = vpop.f32.mrb[95].mxu1 }
 0x8f2   :  { %v17445_v23 = vadd.f32 %v17444_v54, %v17443_v26 }
 0x8f4   :  { %v17396_v62 = vpop.f32.mrb[58].mxu0  ;;  %v17446_v31 = vpop.f32.mrb[96].mxu1 }
 0x8f5   :  { %v17397_v61 = vpop.f32.mrb[59].mxu0  ;;  %v17447_v50 = vpop.f32.mrb[97].mxu1 }
 0x8f6   :  { %v17398_v45 = vadd.f32 %v17397_v61, %v17396_v62  ;;  %v17448_v51 = vadd.f32 %v17447_v50, %v17446_v31  ;;  %v30636_v31 = vld [vmem:[#allocation5_spill] sm:$0xff] }
 0x8f8   :  { %v21349_v12 = vadd.f32 %v21348_v10, %v17398_v45  ;;  %v17399_v6 = vpop.f32.mrb[60].mxu0  ;;  %v17449_v0 = vpop.f32.mrb[98].mxu1  ;;  %v21767_v10 = vld [vmem:[%s29100_s1 + $0x8] sm:$0xff]  ;;  %v30637_v45 = vld [vmem:[#allocation8_spill] sm:$0xff] }
 0x8f9   :  { %v17400_v46 = vpop.f32.mrb[61].mxu0  ;;  %v17450_v21 = vpop.f32.mrb[99].mxu1 }
 0x8fa   :  { %v17401_v3 = vadd.f32 %v17400_v46, %v17399_v6  ;;  %v17451_v52 = vadd.f32 %v17450_v21, %v17449_v0  ;;  %v21350_v25 = vadd.f32 %v21349_v12, %v17442_v63  ;;  %v30641_v0 = vld [vmem:[#allocation9_spill] sm:$0xff]  ;;  %v21769_v21 = vld [vmem:[%s29100_s1 + $0x10] sm:$0xff] }
 0x8fc   :  { %v21331_v55 = vadd.f32 %v21330_v59, %v17401_v3  ;;  %v17402_v22 = vpop.f32.mrb[62].mxu0 }
 0x8fd   :  { %v17403_v44 = vpop.f32.mrb[63].mxu0 }
 0x8fe   :  { %v17404_v30 = vadd.f32 %v17403_v44, %v17402_v22  ;;  %v21332_v49 = vadd.f32 %v21331_v55, %v17445_v23  ;;  %v30635_v23 = vld [vmem:[#allocation12_spill] sm:$0xff]  ;;  %v30642_v55 = vld [vmem:[#allocation7_spill] sm:$0xff] }
 0x900   :  { %v21385_v29 = vadd.f32 %v21384_v40, %v17404_v30  ;;  %v17405_v58 = vpop.f32.mrb[64].mxu0  ;;  %v30643_v30 = vld [vmem:[#allocation10_spill] sm:$0xff] }
 0x901   :  { %v17406_v36 = vpop.f32.mrb[65].mxu0 }
 0x902   :  { %v17407_v43 = vadd.f32 %v17406_v36, %v17405_v58  ;;  %v21386_v47 = vadd.f32 %v21385_v29, %v17448_v51  ;;  %v30638_v51 = vld [vmem:[#allocation6_spill] sm:$0xff] }
 0x904   :  { %v21367_v16 = vadd.f32 %v21366_v38, %v17407_v43 }
 0x906   :  { %v21368_v11 = vadd.f32 %v21367_v16, %v17451_v52  ;;  %v21770_v52 = vld [vmem:[%s29100_s1 + $0x18] sm:$0xff] }
 0x97d   :  { %v19164_v20 = vpop.f32.mrb[8].mxu1 }
 0x97e   :  { %v21333_v15 = vadd.f32 %v21332_v49, %v19164_v20  ;;  %v9527_v39 = vpop.f32.mrb[9].mxu1 }
 0x97f   :  { %v21351_v35 = vadd.f32 %v21350_v25, %v9527_v39 }
 0x980   :  { %v16411_v18 = vmul.f32 -1.442695, %v21333_v15 }
 0x981   :  { %v16410_v13 = vmul.f32 -1.442695, %v21351_v35  ;;  %v19167_v27 = vpop.f32.mrb[10].mxu1 }
 0x982   :  { %21734 = vpow2.f32 %v16411_v18  ;;  %v21369_v14 = vadd.f32 %v21368_v11, %v19167_v27  ;;  %v9539_v8 = vpop.f32.mrb[11].mxu1 }
 0x983   :  { %21736 = vpow2.f32 %v16410_v13  ;;  %v21387_v2 = vadd.f32 %v21386_v47, %v9539_v8 }
 0x984   :  { %v16413_v5 = vmul.f32 -1.442695, %v21369_v14 }
 0x985   :  { %v16412_v7 = vmul.f32 -1.442695, %v21387_v2 }
 0x98c   :  { %v21735_v57 = vpop.eup %21734 }
 0x98d   :  { %v21737_v4 = vpop.eup %21736  ;;  %v9562_v34 = vadd.f32 1.0, %v21735_v57 }
 0x98e   :  { %v9561_v19 = vadd.f32 1.0, %v21737_v4 }
 0x98f   :  { %21738 = vrcp.f32 %v9562_v34 }
 0x990   :  { %21740 = vrcp.f32 %v9561_v19 }
 0x991   :  { %21742 = vpow2.f32 %v16413_v5 }
 0x992   :  { %21744 = vpow2.f32 %v16412_v7 }
 0x999   :  { %v25762_v56 = vpop.eup %21738 }
 0x99a   :  { %30633 = vst [vmem:[#allocation40_spill] sm:$0xff] %v25762_v56  ;;  %v25764_v32 = vpop.eup %21740  ;;  %v25770_v9 = vmul.f32 %v21767_v10, %v25762_v56 }
 0x99b   :  { %30634 = vst [vmem:[#allocation39_spill] sm:$0xff] %v25764_v32  ;;  %v25776_v17 = vmul.f32 %v21768_v53, %v25764_v32  ;;  %v21743_v48 = vpop.eup %21742 }
 0x99c   :  { %v9581_v33 = vand.u32 4294901760, %v25770_v9  ;;  %v21745_v24 = vpop.eup %21744  ;;  %v9564_v41 = vadd.f32 1.0, %v21743_v48 }
 0x99d   :  { %11597 = vrot.lane.b32.xlu1 %v25776_v17, %s21801_s29  ;;  %v9578_v59 = vand.u32 4294901760, %v25776_v17  ;;  %v9563_v26 = vadd.f32 1.0, %v21745_v24 }
 0x99e   :  { %v9673_v28 = vsub.f32 %v25770_v9, %v9581_v33  ;;  %21746 = vrcp.f32 %v9564_v41 }
 0x99f   :  { %v20500_v1 = vpack.c.bf16 %v9581_v33, %v9578_v59  ;;  %v9666_v42 = vsub.f32 %v25776_v17, %v9578_v59  ;;  %21748 = vrcp.f32 %v9563_v26 }
 0x9a0   :  { %v9674_v40 = vand.u32 4294901760, %v9673_v28 }
 0x9a1   :  { %20501 = vmatprep.subr.bf16.mxu0 %v20500_v1  ;;  %v9667_v38 = vand.u32 4294901760, %v9666_v42  ;;  %v20508_v50 = vpack.c.bf16 %v9673_v28, %v9666_v42 }
 0x9a2   :  { %20503 = vmatpush3.bf16.msra.mxu0 %v20500_v1  ;;  %v9675_v37 = vsub.f32 %v9673_v28, %v9674_v40 }
 0x9a3   :  { %v9668_v63 = vsub.f32 %v9666_v42, %v9667_v38  ;;  %v20516_v46 = vpack.c.bf16 %v9674_v40, %v9667_v38 }
 0x9a4   :  { %v9676_v54 = vand.u32 4294901760, %v9675_v37 }
 0x9a5   :  { %19173 = vmatmul.mubr.f32.vlgmr.msra.gmra.mrb[66].mxu0 %v30635_v23  ;;  %v9669_v62 = vand.u32 4294901760, %v9668_v63 }
 0x9a6   :  { %19179 = vmatprep.mubr.f32.mxu0 %v30636_v31 }
 0x9a7   :  { %v20504_v61 = vpack.c.bf16 %v9676_v54, %v9669_v62 }
 0x9a8   :  { %v25788_v12 = vpop.eup %21746 }
 0x9a9   :  { %20505 = vmatprep.subr.bf16.mxu0 %v20504_v61  ;;  %30639 = vst [vmem:[#allocation61_spill] sm:$0xff] %v25788_v12  ;;  %v25790_v6 = vpop.eup %21748  ;;  %v25803_v25 = vmul.f32 %v21770_v52, %v25788_v12 }
 0x9aa   :  { %20507 = vmatpush3.bf16.msra.mxu0 %v20504_v61  ;;  %30640 = vst [vmem:[#allocation115_spill] sm:$0xff] %v25790_v6  ;;  %v25797_v3 = vmul.f32 %v21769_v21, %v25790_v6 }
 0x9ab   :  { %20509 = vmatprep.subr.bf16.mxu0 %v20508_v50  ;;  %v10083_v44 = vand.u32 4294901760, %v25803_v25 }
 0x9ac   :  { %v10080_v22 = vand.u32 4294901760, %v25797_v3 }
 0x9ad   :  { %19180 = vmatmul.mubr.f32.vlgmr.msra.gmra.mrb[66].mxu0 %v30637_v45  ;;  %v10175_v29 = vsub.f32 %v25803_v25, %v10083_v44 }
 0x9ae   :  { %20511 = vmatpush3.bf16.msra.mxu0 %v20508_v50  ;;  %19186 = vmatprep.mubr.f32.mxu0 %v30638_v51  ;;  %v10168_v49 = vsub.f32 %v25797_v3, %v10080_v22  ;;  %v20524_v43 = vpack.c.bf16 %v10083_v44, %v10080_v22 }
 0x9af   :  { %20513 = vmatprep.subr.bf16.mxu0 %v20500_v1  ;;  %v10176_v36 = vand.u32 4294901760, %v10175_v29 }
 0x9b0   :  { %v10169_v58 = vand.u32 4294901760, %v10168_v49  ;;  %v20532_v39 = vpack.c.bf16 %v10175_v29, %v10168_v49 }
 0x9b1   :  { %v10177_v16 = vsub.f32 %v10175_v29, %v10176_v36 }
 0x9b2   :  { %v10170_v47 = vsub.f32 %v10168_v49, %v10169_v58  ;;  %v20540_v35 = vpack.c.bf16 %v10176_v36, %v10169_v58  ;;  %v30645_v58 = vld [vmem:[#allocation25_spill] sm:$0xff] }
 0x9b3   :  { %v10178_v20 = vand.u32 4294901760, %v10177_v16  ;;  %v30648_v16 = vld [vmem:[#allocation13_spill] sm:$0xff] }
 0x9b4   :  { %v10171_v11 = vand.u32 4294901760, %v10170_v47 }
 0x9b5   :  { %19187 = vmatmul.mubr.f32.vlgmr.msra.gmra.mrb[66].mxu0 %v30641_v0 }
 0x9b6   :  { %20515 = vmatpush3.bf16.msra.mxu0 %v20500_v1  ;;  %19193 = vmatprep.mubr.f32.mxu0 %v30642_v55  ;;  %v20528_v15 = vpack.c.bf16 %v10178_v20, %v10171_v11  ;;  %v30649_v11 = vld [vmem:[#allocation14_spill] sm:$0xff] }
 0x9b7   :  { %20517 = vmatprep.subr.bf16.mxu0 %v20516_v46  ;;  %v30650_v20 = vld [vmem:[#allocation18_spill] sm:$0xff] }
 0x9bd   :  { %19194 = vmatmul.mubr.f32.vlgmr.msra.gmra.mrb[66].mxu0 %v30643_v30 }
 0x9be   :  { %20519 = vmatpush3.bf16.msra.mxu0 %v20516_v46  ;;  %19200 = vmatprep.mubr.f32.mxu0 %v30636_v31 }
 0x9bf   :  { %20521 = vmatprep.subr.bf16.mxu0 %v20500_v1 }
 0x9c5   :  { %19201 = vmatmul.mubr.f32.vlgmr.msra.gmra.mrb[66].mxu0 %v30637_v45 }
 0x9c6   :  { %20523 = vmatpush3.bf16.msra.mxu0 %v20500_v1  ;;  %19207 = vmatprep.mubr.f32.mxu0 %v30636_v31 }
 0x9c7   :  { %20525 = vmatprep.subr.bf16.mxu0 %v20524_v43 }
 0x9cd   :  { %19208 = vmatmul.mubr.f32.vlgmr.msra.gmra.mrb[66].mxu0 %v30637_v45 }
 0x9ce   :  { %20527 = vmatpush3.bf16.msra.mxu0 %v20524_v43  ;;  %19214 = vmatprep.mubr.f32.mxu0 %v30622_v60 }
 0x9cf   :  { %20529 = vmatprep.subr.bf16.mxu0 %v20528_v15 }
 0x9d1   :  { %19215 = vmatmul.mubr.f32.vlgmr.msra.gmra.mrb[68].mxu0 %v30635_v23 }
 0x9d2   :  { %20531 = vmatpush3.bf16.msra.mxu0 %v20528_v15  ;;  %19221 = vmatprep.mubr.f32.mxu0 %v30636_v31  ;;  %v30651_v15 = vld [vmem:[#allocation20_spill] sm:$0xff] }
 0x9d3   :  { %20533 = vmatprep.subr.bf16.mxu0 %v20532_v39 }
 0x9d9   :  { %19222 = vmatmul.mubr.f32.vlgmr.msra.gmra.mrb[68].mxu0 %v30637_v45 }
 0x9da   :  { %20535 = vmatpush3.bf16.msra.mxu0 %v20532_v39  ;;  %19228 = vmatprep.mubr.f32.mxu0 %v30638_v51  ;;  %v30652_v39 = vld [vmem:[#allocation15_spill] sm:$0xff] }
 0x9db   :  { %20537 = vmatprep.subr.bf16.mxu0 %v20524_v43 }
 0x9e1   :  { %19229 = vmatmul.mubr.f32.vlgmr.msra.gmra.mrb[68].mxu0 %v30641_v0 }
 0x9e2   :  { %20539 = vmatpush3.bf16.msra.mxu0 %v20524_v43  ;;  %19235 = vmatprep.mubr.f32.mxu0 %v30642_v55 }
 0x9e3   :  { %20541 = vmatprep.subr.bf16.mxu0 %v20540_v35 }
 0x9e9   :  { %19236 = vmatmul.mubr.f32.vlgmr.msra.gmra.mrb[68].mxu0 %v30643_v30 }
 0x9ea   :  { %20543 = vmatpush3.bf16.msra.mxu0 %v20540_v35  ;;  %19242 = vmatprep.mubr.f32.mxu0 %v30636_v31  ;;  %v30653_v35 = vld [vmem:[#allocation16_spill] sm:$0xff] }
 0x9eb   :  { %20545 = vmatprep.subr.bf16.mxu0 %v20524_v43 }
 0x9f1   :  { %19243 = vmatmul.mubr.f32.vlgmr.msra.gmra.mrb[68].mxu0 %v30637_v45 }
 0x9f2   :  { %20547 = vmatpush3.bf16.msra.mxu0 %v20524_v43  ;;  %19249 = vmatprep.mubr.f32.mxu0 %v30636_v31  ;;  %v30647_v43 = vld [vmem:[#allocation28_spill] sm:$0xff] }
 0x9f9   :  { %19250 = vmatmul.mubr.f32.vlgmr.msra.gmra.mrb[68].mxu0 %v30637_v45 }
 0x9fa   :  { %19256 = vmatprep.mubr.f32.mxu0 %v30622_v60 }
 0xaa0   :  { %v25828_v18 = vpop.f32.mrb[66].mxu0 }
 0xaa1   :  { %v10585_v13 = vand.u32 4294901760, %v25828_v18  ;;  %v10069_v27 = vpop.f32.mrb[67].mxu0 }
 0xaa2   :  { %v10582_v14 = vand.u32 4294901760, %v10069_v27  ;;  %11613 = vrot.lane.b32.xlu0 %v10069_v27, %s21804_s17 }
 0xaa3   :  { %v10677_v8 = vsub.f32 %v25828_v18, %v10585_v13 }
 0xaa4   :  { %v20548_v2 = vpack.c.bf16 %v10585_v13, %v10582_v14  ;;  %v10670_v57 = vsub.f32 %v10069_v27, %v10582_v14  ;;  %v25903_v13 = vld [vmem:[%s29106_s7 + $0x80] sm:$0xff]  ;;  %v25908_v27 = vld [vmem:[%s29106_s7 + $0x88] sm:$0xff] }
 0xaa5   :  { %v10678_v4 = vand.u32 4294901760, %v10677_v8  ;;  %v12566_v14 = vand.u32 4294901760, %v25903_v13 }
 0xaa6   :  { %v10671_v34 = vand.u32 4294901760, %v10670_v57  ;;  %11599 = vrot.lane.b32.xlu0 %v25770_v9, %s21801_s29  ;;  %20549 = vmatprep.subr.bf16.mxu0 %v20548_v2  ;;  %v20556_v19 = vpack.c.bf16 %v10677_v8, %v10670_v57 }
 0xaa7   :  { %20551 = vmatpush3.bf16.msra.mxu0 %v20548_v2  ;;  %v10679_v5 = vsub.f32 %v10677_v8, %v10678_v4  ;;  %v12569_v8 = vand.u32 4294901760, %v25908_v27 }
 0xaa8   :  { %v10672_v7 = vsub.f32 %v10670_v57, %v10671_v34  ;;  %v20564_v10 = vpack.c.bf16 %v10678_v4, %v10671_v34  ;;  %v25920_v57 = vld [vmem:[%s29106_s7 + $0x8] sm:$0xff] }
 0xaa9   :  { %v10680_v53 = vand.u32 4294901760, %v10679_v5  ;;  %v30655_v4 = vld [vmem:[#allocation22_spill] sm:$0xff]  ;;  %v30656_v5 = vld [vmem:[#allocation17_spill] sm:$0xff] }
 0xaaa   :  { %19257 = vmatmul.mubr.f32.vlgmr.msra.gmra.mrb[70].mxu0 %v30635_v23  ;;  %v10673_v33 = vand.u32 4294901760, %v10672_v7  ;;  %v25929_v7 = vsub.f32 %v25903_v13, %v12566_v14  ;;  %v26125_v13 = vld [vmem:[%s29106_s7 + $0xc0] sm:$0xff] }
 0xaab   :  { %19263 = vmatprep.mubr.f32.mxu0 %v30636_v31 }
 0xaac   :  { %v20552_v59 = vpack.c.bf16 %v10680_v53, %v10673_v33 }
 0xaae   :  { %20553 = vmatprep.subr.bf16.mxu0 %v20552_v59 }
 0xaaf   :  { %20555 = vmatpush3.bf16.msra.mxu0 %v20552_v59  ;;  %v25949_v59 = vld [vmem:[%s29106_s7 + $0x90] sm:$0xff] }
 0xab0   :  { %20557 = vmatprep.subr.bf16.mxu0 %v20556_v19 }
 0xab2   :  { %19264 = vmatmul.mubr.f32.vlgmr.msra.gmra.mrb[70].mxu0 %v30637_v45 }
 0xab3   :  { %20559 = vmatpush3.bf16.msra.mxu0 %v20556_v19  ;;  %19270 = vmatprep.mubr.f32.mxu0 %v30638_v51  ;;  %v12521_v19 = vand.u32 4294901760, %v25920_v57 }
 0xab4   :  { %20561 = vmatprep.subr.bf16.mxu0 %v20548_v2 }
 0xab5   :  { %v25944_v33 = vsub.f32 %v25920_v57, %v12521_v19 }
 0xaba   :  { %19271 = vmatmul.mubr.f32.vlgmr.msra.gmra.mrb[70].mxu0 %v30641_v0 }
 0xabb   :  { %20563 = vmatpush3.bf16.msra.mxu0 %v20548_v2  ;;  %19277 = vmatprep.mubr.f32.mxu0 %v30642_v55 }
 0xabc   :  { %20565 = vmatprep.subr.bf16.mxu0 %v20564_v10 }
 0xac2   :  { %19278 = vmatmul.mubr.f32.vlgmr.msra.gmra.mrb[70].mxu0 %v30643_v30 }
 0xac3   :  { %20567 = vmatpush3.bf16.msra.mxu0 %v20564_v10  ;;  %19284 = vmatprep.mubr.f32.mxu0 %v30636_v31  ;;  %v25934_v10 = vsub.f32 %v25908_v27, %v12569_v8 }
 0xac4   :  { %20569 = vmatprep.subr.bf16.mxu0 %v20548_v2 }
 0xaca   :  { %19285 = vmatmul.mubr.f32.vlgmr.msra.gmra.mrb[70].mxu0 %v30637_v45 }
 0xacb   :  { %20571 = vmatpush3.bf16.msra.mxu0 %v20548_v2  ;;  %19291 = vmatprep.mubr.f32.mxu0 %v30636_v31  ;;  %v25915_v2 = vld [vmem:[%s29106_s7] sm:$0xff] }
 0xacc   :  { %v25845_v28 = vpop.f32.mrb[68].mxu0  ;;  %v12518_v34 = vand.u32 4294901760, %v25915_v2 }
 0xacd   :  { %v11087_v1 = vand.u32 4294901760, %v25845_v28  ;;  %v10571_v42 = vpop.f32.mrb[69].mxu0 }
 0xace   :  { %v11084_v48 = vand.u32 4294901760, %v10571_v42  ;;  %v25939_v53 = vsub.f32 %v25915_v2, %v12518_v34 }
 0xacf   :  { %v11179_v40 = vsub.f32 %v25845_v28, %v11087_v1 }
 0xad0   :  { %v20572_v24 = vpack.c.bf16 %v11087_v1, %v11084_v48  ;;  %v11172_v38 = vsub.f32 %v10571_v42, %v11084_v48  ;;  %v29557_v1 = vand.u32 4294901760, %v25929_v7  ;;  %v12572_v48 = vand.u32 4294901760, %v25949_v59 }
 0xad1   :  { %v11180_v37 = vand.u32 4294901760, %v11179_v40 }
 0xad2   :  { %v11173_v41 = vand.u32 4294901760, %v11172_v38  ;;  %19292 = vmatmul.mubr.f32.vlgmr.msra.gmra.mrb[70].mxu0 %v30637_v45  ;;  %20573 = vmatprep.subr.bf16.mxu0 %v20572_v24  ;;  %v20580_v63 = vpack.c.bf16 %v11179_v40, %v11172_v38 }
 0xad3   :  { %20575 = vmatpush3.bf16.msra.mxu0 %v20572_v24  ;;  %19298 = vmatprep.mubr.f32.mxu0 %v30622_v60  ;;  %v11181_v26 = vsub.f32 %v11179_v40, %v11180_v37  ;;  %v30644_v60 = vld [vmem:[#allocation23_spill] sm:$0xff] }
 0xad4   :  { %v11174_v54 = vsub.f32 %v11172_v38, %v11173_v41  ;;  %v20588_v62 = vpack.c.bf16 %v11180_v37, %v11173_v41  ;;  %v25968_v38 = vld [vmem:[%s29106_s7 + $0x18] sm:$0xff]  ;;  %v30657_v37 = vld [vmem:[#allocation19_spill] sm:$0xff]  ;;  %v29555_v41 = vand.u32 4294901760, %v25939_v53 }
 0xad5   :  { %v11182_v61 = vand.u32 4294901760, %v11181_v26 }
 0xad6   :  { %19299 = vmatmul.mubr.f32.vlgmr.msra.gmra.mrb[72].mxu0 %v30635_v23  ;;  %v11175_v50 = vand.u32 4294901760, %v11174_v54  ;;  %v12527_v54 = vand.u32 4294901760, %v25968_v38 }
 0xad7   :  { %19305 = vmatprep.mubr.f32.mxu0 %v30636_v31 }
 0xad8   :  { %v20576_v46 = vpack.c.bf16 %v11182_v61, %v11175_v50  ;;  %v12790_v61 = vsub.f32 %v25929_v7, %v29557_v1 }
 0xada   :  { %20577 = vmatprep.subr.bf16.mxu0 %v20576_v46 }
 0xadb   :  { %20579 = vmatpush3.bf16.msra.mxu0 %v20576_v46  ;;  %v25985_v46 = vsub.f32 %v25949_v59, %v12572_v48 }
 0xadc   :  { %20581 = vmatprep.subr.bf16.mxu0 %v20580_v63 }
 0xade   :  { %19306 = vmatmul.mubr.f32.vlgmr.msra.gmra.mrb[72].mxu0 %v30637_v45 }
 0xadf   :  { %20583 = vmatpush3.bf16.msra.mxu0 %v20580_v63  ;;  %19312 = vmatprep.mubr.f32.mxu0 %v30638_v51  ;;  %v29553_v63 = vand.u32 4294901760, %v25944_v33 }
 0xae0   :  { %20585 = vmatprep.subr.bf16.mxu0 %v20572_v24 }
 0xae6   :  { %19313 = vmatmul.mubr.f32.vlgmr.msra.gmra.mrb[72].mxu0 %v30641_v0 }
 0xae7   :  { %20587 = vmatpush3.bf16.msra.mxu0 %v20572_v24  ;;  %19319 = vmatprep.mubr.f32.mxu0 %v30642_v55 }
 0xae8   :  { %20589 = vmatprep.subr.bf16.mxu0 %v20588_v62 }
 0xaee   :  { %19320 = vmatmul.mubr.f32.vlgmr.msra.gmra.mrb[72].mxu0 %v30643_v30  ;;  %v11933_v30 = vld [vmem:[%s29107_s8] sm:$0xff] }
 0xaef   :  { %20591 = vmatpush3.bf16.msra.mxu0 %v20588_v62  ;;  %19326 = vmatprep.mubr.f32.mxu0 %v30636_v31  ;;  %v25880_v49 = vand.u32 4294901760, %v11933_v30  ;;  %v30658_v62 = vld [vmem:[#allocation24_spill] sm:$0xff] }
 0xaf0   :  { %20593 = vmatprep.subr.bf16.mxu0 %v20572_v24 }
 0xaf1   :  { %v12042_v29 = vsub.f32 %v11933_v30, %v25880_v49 }
 0xaf6   :  { %19327 = vmatmul.mubr.f32.vlgmr.msra.gmra.mrb[72].mxu0 %v30637_v45 }
 0xaf7   :  { %20595 = vmatpush3.bf16.msra.mxu0 %v20572_v24  ;;  %19333 = vmatprep.mubr.f32.mxu0 %v30636_v31  ;;  %v25963_v24 = vld [vmem:[%s29106_s7 + $0x10] sm:$0xff] }
 0xaf8   :  { %19336 = vmatprep.subr.mxu0 %v25880_v49  ;;  %v12524_v26 = vand.u32 4294901760, %v25963_v24 }
 0xafe   :  { %19334 = vmatmul.mubr.f32.vlgmr.msra.gmra.mrb[72].mxu0 %v30637_v45 }
 0xaff   :  { %19338 = vmatprep.mubr.f32.mxu0 %v30644_v60  ;;  %19337 = vmatpush3.msra.mxu0 %v25880_v49  ;;  %v12678_v60 = vsub.f32 %v25939_v53, %v29555_v41 }
 0xb02   :  { %19339 = vmatmul.mubr.f32.vlgmr.msra.gmra.mrb[74].mxu0 %v30645_v58  ;;  %v26026_v58 = vld [vmem:[%s29106_s7 + $0x20] sm:$0xff] }
 0xb14   :  { %v11614_v56 = vpop.permute.xlu0 %11613 }
 0xba5   :  { %v19293_v23 = vpop.f32.mrb[70].mxu0 }
 0xba6   :  { %v11586_v51 = vmul.f32 2.0, %v19293_v23  ;;  %v11073_v0 = vpop.f32.mrb[71].mxu0  ;;  %v12685_v23 = vsub.f32 %v25944_v33, %v29553_v63 }
 0xba7   :  { %v11585_v21 = vmul.f32 2.0, %v11073_v0  ;;  %v26001_v0 = vsub.f32 %v25963_v24, %v12524_v26 }
 0xba8   :  { %v11590_v52 = vsub.f32 %v11586_v51, %v25770_v9 }
 0xba9   :  { %v11589_v55 = vsub.f32 %v11585_v21, %v25776_v17  ;;  %v26007_v21 = vld [vmem:[%s29106_s7 + $0xa0] sm:$0xff] }
 0xbaa   :  { %11631 = vrot.lane.b32.xlu0 %v11590_v52, %s21805_s18  ;;  %v12791_v52 = vand.u32 4294901760, %v12790_v61 }
 0xbab   :  { %11629 = vrot.lane.b32.xlu1 %v11589_v55, %s21805_s18 }
 0xbae   :  { %11617 = vrot.lane.b32.xlu0 %v10571_v42, %s21804_s17  ;;  %v29556_v42 = vand.u32 4294901760, %v25934_v10 }
 0xbaf   :  { %11615 = vrot.lane.b32.xlu1 %v25828_v18, %s21804_s17  ;;  %v30654_v18 = vld [vmem:[#allocation21_spill] sm:$0xff] }
 0xbb0   :  { %v12797_v50 = vsub.f32 %v25934_v10, %v29556_v42 }
 0xbb2   :  { %11603 = vrot.lane.b32.xlu0 %v25803_v25, %s21801_s29  ;;  %v12798_v55 = vand.u32 4294901760, %v12797_v50  ;;  %v12530_v50 = vand.u32 4294901760, %v26026_v58 }
 0xbb3   :  { %11601 = vrot.lane.b32.xlu1 %v25797_v3, %s21801_s29 }
 0xbd1   :  { %v19335_v31 = vpop.f32.mrb[72].mxu0 }
 0xbd2   :  { %v11588_v45 = vmul.f32 2.0, %v19335_v31  ;;  %v11575_v9 = vpop.f32.mrb[73].mxu0  ;;  %v29543_v31 = vand.u32 4294901760, %v25985_v46 }
 0xbd3   :  { %v11587_v22 = vmul.f32 2.0, %v11575_v9  ;;  %v26018_v9 = vld [vmem:[%s29106_s7 + $0xa8] sm:$0xff] }
 0xbd4   :  { %v11592_v17 = vsub.f32 %v11588_v45, %v25803_v25  ;;  %v12043_v25 = vand.u32 4294901760, %v12042_v29  ;;  %v26013_v45 = vsub.f32 %v25968_v38, %v12527_v54 }
 0xbd5   :  { %v11591_v44 = vsub.f32 %v11587_v22, %v25797_v3  ;;  %v30646_v3 = vld [vmem:[#allocation27_spill] sm:$0xff]  ;;  %v30659_v22 = vld [vmem:[#allocation26_spill] sm:$0xff] }
 0xbd6   :  { %11635 = vrot.lane.b32.xlu0 %v11592_v17, %s21805_s18  ;;  %19341 = vmatprep.mubr.f32.mxu0 %v30646_v3  ;;  %v12044_v36 = vsub.f32 %v12042_v29, %v12043_v25  ;;  %v12679_v17 = vand.u32 4294901760, %v12678_v60  ;;  %v12804_v3 = vsub.f32 %v25985_v46, %v29543_v31  ;;  %v26063_v60 = vld [vmem:[%s29106_s7 + $0xb8] sm:$0xff] }
 0xbd7   :  { %11633 = vrot.lane.b32.xlu1 %v11591_v44, %s21805_s18  ;;  %19342 = vmatmul.mubr.f32.gmra.mrb[76].mxu0 %v30647_v43  ;;  %v12686_v44 = vand.u32 4294901760, %v12685_v23  ;;  %v12578_v43 = vand.u32 4294901760, %v26007_v21 }
 0xbd8   :  { %v12045_v47 = vand.u32 4294901760, %v12044_v36  ;;  %19346 = vmatprep.mubr.f32.mxu0 %v30648_v16  ;;  %v29535_v36 = vand.u32 4294901760, %v26013_v45 }
 0xbd9   :  { %v26057_v61 = vsub.f32 %v26007_v21, %v12578_v43 }
 0xbda   :  { %19344 = vmatprep.subr.mxu0 %v12045_v47 }
 0xbdb   :  { %11619 = vrot.lane.b32.xlu1 %v25845_v28, %s21804_s17  ;;  %19345 = vmatpush3.msra.mxu0 %v12045_v47  ;;  %v25954_v28 = vld [vmem:[%s29106_s7 + $0x98] sm:$0xff]  ;;  %v26037_v47 = vld [vmem:[%s29106_s7 + $0x28] sm:$0xff] }
 0xbdc   :  { %19347 = vmatmul.mubr.f32.vlgmr.msra.gmra.mrb[74].mxu0 %v30649_v11  ;;  %19352 = vmatprep.subr.mxu0 %v12042_v29  ;;  %v12575_v40 = vand.u32 4294901760, %v25954_v28 }
 0xbdd   :  { %19349 = vmatprep.mubr.f32.mxu0 %v30650_v20  ;;  %19353 = vmatpush3.msra.mxu0 %v12042_v29  ;;  %v29536_v29 = vand.u32 4294901760, %v26001_v0 }
 0xbde   :  { %19360 = vmatprep.subr.mxu0 %v25880_v49  ;;  %v25996_v51 = vsub.f32 %v25954_v28, %v12575_v40 }
 0xbe0   :  { %19350 = vmatmul.mubr.f32.gmra.mrb[76].mxu0 %v30651_v15  ;;  %v29537_v30 = vand.u32 4294901760, %v25996_v51 }
 0xbe1   :  { %19354 = vmatprep.mubr.f32.mxu0 %v30652_v39  ;;  %v20630_v39 = vpack.c.bf16 %v12686_v44, %v12679_v17  ;;  %v29540_v44 = vand.u32 4294901760, %v26057_v61 }
 0xbe4   :  { %19355 = vmatmul.mubr.f32.vlgmr.msra.gmra.mrb[74].mxu0 %v30653_v35  ;;  %v12811_v35 = vsub.f32 %v25996_v51, %v29537_v30 }
 0xbe5   :  { %19357 = vmatprep.mubr.f32.mxu0 %v30654_v18  ;;  %19361 = vmatpush3.msra.mxu0 %v25880_v49  ;;  %v12692_v18 = vsub.f32 %v26001_v0, %v29536_v29 }
 0xbe6   :  { %19368 = vmatprep.subr.mxu0 %v12043_v25  ;;  %v12812_v23 = vand.u32 4294901760, %v12811_v35 }
 0xbe8   :  { %19358 = vmatmul.mubr.f32.gmra.mrb[76].mxu0 %v30655_v4  ;;  %v12581_v4 = vand.u32 4294901760, %v26018_v9 }
 0xbe9   :  { %19362 = vmatprep.mubr.f32.mxu0 %v30656_v5  ;;  %v26049_v5 = vld [vmem:[%s29106_s7 + $0xb0] sm:$0xff] }
 0xbea   :  { %v26194_v38 = vpack.c.bf16 %v12581_v4, %v12578_v43 }
 0xbec   :  { %19363 = vmatmul.mubr.f32.vlgmr.msra.gmra.mrb[74].mxu0 %v30657_v37  ;;  %v12805_v37 = vand.u32 4294901760, %v12804_v3  ;;  %v12584_v3 = vand.u32 4294901760, %v26049_v5 }
 0xbed   :  { %19365 = vmatprep.mubr.f32.mxu0 %v30658_v62  ;;  %19369 = vmatpush3.msra.mxu0 %v12043_v25  ;;  %v20628_v25 = vpack.c.bf16 %v12798_v55, %v12791_v52  ;;  %v12699_v62 = vsub.f32 %v26013_v45, %v29535_v36  ;;  %v12693_v52 = vand.u32 4294901760, %v12692_v18  ;;  %v26069_v55 = vsub.f32 %v26018_v9, %v12581_v4 }
 0xbee   :  { %19376 = vmatprep.subr.mxu0 %v25880_v49  ;;  %v12587_v36 = vand.u32 4294901760, %v26063_v60  ;;  %v26093_v30 = vsub.f32 %v26049_v5, %v12584_v3 }
 0xbef   :  { %20629 = vmatprep.subr.bf16.mxu1 %v20628_v25  ;;  %v12700_v17 = vand.u32 4294901760, %v12699_v62  ;;  %v26078_v25 = vsub.f32 %v26026_v58, %v12530_v50  ;;  %v29539_v35 = vand.u32 4294901760, %v26069_v55  ;;  %v26222_v58 = vld [vmem:[%s29106_s7 + $0xd8] sm:$0xff] }
 0xbf0   :  { %19366 = vmatmul.mubr.f32.gmra.mrb[76].mxu0 %v30659_v22  ;;  %20631 = vmatpush3.bf16.msra.mxu1 %v20630_v39  ;;  %v12533_v22 = vand.u32 4294901760, %v26037_v47  ;;  %v20632_v39 = vpack.c.bf16 %v12812_v23, %v12805_v37  ;;  %30660 = vst [vmem:[#allocation52_spill] sm:$0xff] %v26093_v30  ;;  %v26098_v37 = vld [vmem:[%s29106_s7 + $0x30] sm:$0xff]  ;;  %v26110_v23 = vpack.c.bf16 %v12569_v8, %v12566_v14  ;;  %v29542_v8 = vand.u32 4294901760, %v26093_v30 }
 0xbf1   :  { %19370 = vmatprep.mubr.f32.mxu0 %v30648_v16  ;;  %v20634_v62 = vpack.c.bf16 %v12700_v17, %v12693_v52  ;;  %v29538_v29 = vand.u32 4294901760, %v26078_v25  ;;  %v12825_v52 = vsub.f32 %v26069_v55, %v29539_v35  ;;  %v26119_v17 = vpack.c.bf16 %v12521_v19, %v12518_v34  ;;  %v26150_v35 = vld [vmem:[%s29106_s7 + $0xc8] sm:$0xff] }
 0xbf2   :  { %v26083_v18 = vsub.f32 %v26037_v47, %v12533_v22  ;;  %v26103_v47 = vld [vmem:[%s29106_s7 + $0x38] sm:$0xff]  ;;  %20633 = vmatprep.subr.bf16.mxu1 %v20632_v39  ;;  %v26135_v2 = vsub.f32 %v26063_v60, %v12587_v36  ;;  %v12599_v60 = vand.u32 4294901760, %v26222_v58 }
 0xbf3   :  { %v12706_v14 = vsub.f32 %v26078_v25, %v29538_v29  ;;  %v12826_v57 = vand.u32 4294901760, %v12825_v52  ;;  %v12539_v19 = vand.u32 4294901760, %v26103_v47  ;;  %v12590_v52 = vand.u32 4294901760, %v26125_v13 }
 0xbf4   :  { %19371 = vmatmul.mubr.f32.vlgmr.msra.gmra.mrb[74].mxu0 %v30649_v11  ;;  %v29541_v39 = vand.u32 4294901760, %v26083_v18  ;;  %20635 = vmatpush3.bf16.msra.mxu1 %v20634_v62  ;;  %30661 = vst [vmem:[#allocation57_spill] sm:$0xff] %v26135_v2  ;;  %v29552_v29 = vand.u32 4294901760, %v26135_v2 }
 0xbf5   :  { %19373 = vmatprep.mubr.f32.mxu0 %v30650_v20  ;;  %19377 = vmatpush3.msra.mxu0 %v25880_v49  ;;  %v12818_v49 = vsub.f32 %v26057_v61, %v29540_v44  ;;  %v12707_v62 = vand.u32 4294901760, %v12706_v14  ;;  %v26158_v14 = vpack.c.bf16 %v12575_v40, %v12572_v48  ;;  %v26176_v28 = vsub.f32 %v26103_v47, %v12539_v19  ;;  %v26181_v48 = vld [vmem:[%s29106_s7 + $0x40] sm:$0xff]  ;;  %v26186_v40 = vld [vmem:[%s29106_s7 + $0x48] sm:$0xff] }
 0xbf6   :  { %20597 = vmatprep.subr.bf16.mxu0 %v26110_v23  ;;  %v12713_v34 = vsub.f32 %v26083_v18, %v29541_v39  ;;  %v12542_v43 = vand.u32 4294901760, %v26181_v48  ;;  %v12545_v4 = vand.u32 4294901760, %v26186_v40 }
 0xbf7   :  { %v12819_v27 = vand.u32 4294901760, %v12818_v49  ;;  %v12832_v49 = vsub.f32 %v26093_v30, %v29542_v8  ;;  %v26164_v8 = vpack.c.bf16 %v12527_v54, %v12524_v26  ;;  %v12593_v26 = vand.u32 4294901760, %v26150_v35 }
 0xbf8   :  { %19374 = vmatmul.mubr.f32.gmra.mrb[76].mxu0 %v30651_v15  ;;  %v12714_v39 = vand.u32 4294901760, %v12713_v34  ;;  %v26200_v54 = vsub.f32 %v26125_v13, %v12590_v52  ;;  %v26244_v34 = vsub.f32 %v26181_v48, %v12542_v43 }
 0xbf9   :  { %19378 = vmatprep.mubr.f32.mxu0 %v30648_v16  ;;  %v12536_v16 = vand.u32 4294901760, %v26098_v37  ;;  %v20636_v44 = vpack.c.bf16 %v12826_v57, %v12819_v27  ;;  %v12833_v31 = vand.u32 4294901760, %v12832_v49  ;;  %v26210_v9 = vsub.f32 %v26150_v35, %v12593_v26  ;;  %v26217_v27 = vld [vmem:[%s29106_s7 + $0xd0] sm:$0xff] }
 0xbfa   :  { %v20638_v24 = vpack.c.bf16 %v12714_v39, %v12707_v62  ;;  %v26206_v39 = vpack.c.bf16 %v12533_v22, %v12530_v50  ;;  %v29545_v21 = vand.u32 4294901760, %v26200_v54  ;;  %v26236_v57 = vpack.c.bf16 %v12587_v36, %v12584_v3  ;;  %v26254_v3 = vld [vmem:[%s29106_s7 + $0x50] sm:$0xff] }
 0xbfb   :  { %v26173_v59 = vsub.f32 %v26098_v37, %v12536_v16  ;;  %20637 = vmatprep.subr.bf16.mxu1 %v20636_v44  ;;  %v29548_v44 = vand.u32 4294901760, %v26176_v28  ;;  %v26247_v62 = vsub.f32 %v26186_v40, %v12545_v4  ;;  %v12596_v36 = vand.u32 4294901760, %v26217_v27 }
 0xbfc   :  { %19379 = vmatmul.mubr.f32.vlgmr.msra.gmra.mrb[74].mxu0 %v30649_v11  ;;  %v12839_v11 = vsub.f32 %v26135_v2, %v29552_v29  ;;  %20639 = vmatpush3.bf16.msra.mxu1 %v20638_v24  ;;  %v29547_v40 = vand.u32 4294901760, %v26244_v34 }
 0xbfd   :  { %20599 = vmatpush3.bf16.msra.mxu0 %v26119_v17  ;;  %19381 = vmatprep.mubr.f32.mxu0 %v30650_v20  ;;  %v29549_v20 = vand.u32 4294901760, %v26173_v59  ;;  %v12727_v35 = vsub.f32 %v26176_v28, %v29548_v44  ;;  %v29546_v24 = vand.u32 4294901760, %v26247_v62 }
 0xbfe   :  { %20601 = vmatprep.subr.bf16.mxu0 %v26158_v14  ;;  %v12840_v47 = vand.u32 4294901760, %v12839_v11 }
 0xbff   :  { %v12720_v22 = vsub.f32 %v26173_v59, %v29549_v20  ;;  %v12728_v49 = vand.u32 4294901760, %v12727_v35  ;;  %v26271_v35 = vsub.f32 %v26222_v58, %v12599_v60  ;;  %v26288_v58 = vld [vmem:[%s29106_s7 + $0xe0] sm:$0xff] }
 0xc00   :  { %19382 = vmatmul.mubr.f32.gmra.mrb[76].mxu0 %v30651_v15  ;;  %v20640_v50 = vpack.c.bf16 %v12840_v47, %v12833_v31  ;;  %v12846_v15 = vsub.f32 %v26200_v54, %v29545_v21  ;;  %v29544_v31 = vand.u32 4294901760, %v26210_v9  ;;  %v26264_v47 = vld [vmem:[%s29106_s7 + $0x58] sm:$0xff]  ;;  %v12734_v21 = vsub.f32 %v26244_v34, %v29547_v40 }
 0xc01   :  { %20603 = vmatpush3.bf16.msra.mxu0 %v26164_v8  ;;  %v12721_v5 = vand.u32 4294901760, %v12720_v22  ;;  %v26268_v22 = vsub.f32 %v26217_v27, %v12596_v36  ;;  %v12548_v27 = vand.u32 4294901760, %v26254_v3 }
 0xc02   :  { %20605 = vmatprep.subr.bf16.mxu0 %v26194_v38  ;;  %20641 = vmatprep.subr.bf16.mxu1 %v20640_v50  ;;  %v12847_v11 = vand.u32 4294901760, %v12846_v15  ;;  %v12853_v48 = vsub.f32 %v26210_v9, %v29544_v31  ;;  %v26275_v15 = vpack.c.bf16 %v12539_v19, %v12536_v16  ;;  %v29550_v16 = vand.u32 4294901760, %v26271_v35 }
 0xc03   :  { %v20642_v50 = vpack.c.bf16 %v12728_v49, %v12721_v5  ;;  %v12741_v5 = vsub.f32 %v26247_v62, %v29546_v24  ;;  %v29551_v37 = vand.u32 4294901760, %v26268_v22  ;;  %v12551_v19 = vand.u32 4294901760, %v26264_v47 }
 0xc04   :  { %v12854_v31 = vand.u32 4294901760, %v12853_v48  ;;  %v26295_v49 = vpack.c.bf16 %v12593_v26, %v12590_v52  ;;  %v26300_v48 = vld [vmem:[%s29106_s7 + $0xe8] sm:$0xff]  ;;  %v12735_v40 = vand.u32 4294901760, %v12734_v21  ;;  %v12867_v13 = vsub.f32 %v26271_v35, %v29550_v16  ;;  %v26319_v21 = vld [vmem:[%s29106_s7 + $0x60] sm:$0xff] }
 0xc05   :  { %20607 = vmatpush3.bf16.msra.mxu0 %v26206_v39  ;;  %20643 = vmatpush3.bf16.msra.mxu1 %v20642_v50  ;;  %v12742_v44 = vand.u32 4294901760, %v12741_v5  ;;  %v26303_v50 = vsub.f32 %v26254_v3, %v12548_v27  ;;  %v12860_v20 = vsub.f32 %v26268_v22, %v29551_v37  ;;  %v26313_v52 = vsub.f32 %v26264_v47, %v12551_v19 }
 0xc06   :  { %20609 = vmatprep.subr.bf16.mxu0 %v26236_v57  ;;  %v20644_v24 = vpack.c.bf16 %v12854_v31, %v12847_v11  ;;  %v12602_v26 = vand.u32 4294901760, %v26288_v58  ;;  %v26324_v31 = vld [vmem:[%s29106_s7 + $0x68] sm:$0xff]  ;;  %v12605_v47 = vand.u32 4294901760, %v26300_v48  ;;  %v26329_v5 = vpack.c.bf16 %v12545_v4, %v12542_v43  ;;  %v11856_v4 = vld [vmem:[%s29106_s7 + $0xf8] sm:$0xff] }
 0xc07   :  { %v20646_v3 = vpack.c.bf16 %v12742_v44, %v12735_v40  ;;  %v29554_v11 = vand.u32 4294901760, %v26303_v50  ;;  %v12861_v16 = vand.u32 4294901760, %v12860_v20  ;;  %v12868_v37 = vand.u32 4294901760, %v12867_v13  ;;  %v11855_v20 = vld [vmem:[%s29106_s7 + $0xf0] sm:$0xff] }
 0xc08   :  { %20645 = vmatprep.subr.bf16.mxu1 %v20644_v24  ;;  %30662 = vst [vmem:[#allocation60_spill] sm:$0xff] %v26329_v5  ;;  %v29558_v29 = vand.u32 4294901760, %v26313_v52  ;;  %v26333_v63 = vsub.f32 %v26288_v58, %v12602_v26  ;;  %v26339_v40 = vsub.f32 %v26300_v48, %v12605_v47  ;;  %v12554_v24 = vand.u32 4294901760, %v26319_v21 }
 0xc09   :  { %20611 = vmatpush3.bf16.msra.mxu0 %v26275_v15  ;;  %20647 = vmatpush3.bf16.msra.mxu1 %v20646_v3  ;;  %v12748_v44 = vsub.f32 %v26303_v50, %v29554_v11  ;;  %v12557_v43 = vand.u32 4294901760, %v26324_v31  ;;  %v20648_v58 = vpack.c.bf16 %v12868_v37, %v12861_v16  ;;  %v26354_v3 = vpack.c.bf16 %v12599_v60, %v12596_v36  ;;  %v11839_v60 = vld [vmem:[%s29106_s7 + $0x70] sm:$0xff] }
 0xc0a   :  { %20613 = vmatprep.subr.bf16.mxu0 %v26295_v49  ;;  %v12755_v13 = vsub.f32 %v26313_v52, %v29558_v29  ;;  %v29559_v48 = vand.u32 4294901760, %v26333_v63  ;;  %v29570_v41 = vand.u32 4294901760, %v26339_v40  ;;  %v26358_v42 = vsub.f32 %v26319_v21, %v12554_v24 }
 0xc0b   :  { %30663 = vst [vmem:[#allocation97_spill] sm:$0xff] %v26354_v3  ;;  %v12749_v11 = vand.u32 4294901760, %v12748_v44  ;;  %v26361_v1 = vsub.f32 %v26324_v31, %v12557_v43  ;;  %20649 = vmatprep.subr.bf16.mxu1 %v20648_v58  ;;  %v12608_v29 = vand.u32 4294901760, %v11855_v20  ;;  %v12611_v36 = vand.u32 4294901760, %v11856_v4 }
 0xc0c   :  { %v12756_v37 = vand.u32 4294901760, %v12755_v13  ;;  %v12874_v16 = vsub.f32 %v26333_v63, %v29559_v48  ;;  %v12881_v21 = vsub.f32 %v26339_v40, %v29570_v41  ;;  %v29575_v31 = vand.u32 4294901760, %v26358_v42  ;;  %v11840_v13 = vld [vmem:[%s29106_s7 + $0x78] sm:$0xff] }
 0xc0d   :  { %20615 = vmatpush3.bf16.msra.mxu0 %v26329_v5  ;;  %30664 = vst [vmem:[#allocation58_spill] sm:$0xff] %v26361_v1  ;;  %v29576_v44 = vand.u32 4294901760, %v26361_v1  ;;  %v26375_v58 = vpack.c.bf16 %v12551_v19, %v12548_v27  ;;  %v26380_v12 = vsub.f32 %v11855_v20, %v12608_v29  ;;  %v26382_v32 = vsub.f32 %v11856_v4, %v12611_v36  ;;  %v11598_v5 = vpop.permute.xlu1 %11597 }
 0xc0e   :  { %20617 = vmatprep.subr.bf16.mxu0 %v26354_v3  ;;  %v20650_v48 = vpack.c.bf16 %v12756_v37, %v12749_v11  ;;  %v12875_v6 = vand.u32 4294901760, %v12874_v16  ;;  %v12882_v3 = vand.u32 4294901760, %v12881_v21  ;;  %v12762_v41 = vsub.f32 %v26358_v42, %v29575_v31 }
 0xc0f   :  { %30665 = vst [vmem:[#allocation66_spill] sm:$0xff] %v26375_v58  ;;  %30666 = vst [vmem:[#allocation68_spill] sm:$0xff] %v26380_v12  ;;  %v12769_v27 = vsub.f32 %v26361_v1, %v29576_v44  ;;  %v12560_v19 = vand.u32 4294901760, %v11839_v60  ;;  %v29581_v11 = vand.u32 4294901760, %v26380_v12  ;;  %v29582_v20 = vand.u32 4294901760, %v26382_v32 }
 0xc10   :  { %30667 = vst [vmem:[#allocation96_spill] sm:$0xff] %v26382_v32  ;;  %20651 = vmatpush3.bf16.msra.mxu1 %v20650_v48  ;;  %v12563_v4 = vand.u32 4294901760, %v11840_v13  ;;  %v26393_v37 = vpack.c.bf16 %v12605_v47, %v12602_v26  ;;  %v20652_v16 = vpack.c.bf16 %v12882_v3, %v12875_v6  ;;  %v12763_v21 = vand.u32 4294901760, %v12762_v41  ;;  %v30672_v26 = vld [vmem:[#allocation64_spill] sm:$0xff] }
 0xc11   :  { %20619 = vmatpush3.bf16.msra.mxu0 %v26375_v58  ;;  %v12770_v2 = vand.u32 4294901760, %v12769_v27  ;;  %v26395_v31 = vsub.f32 %v11839_v60, %v12560_v19  ;;  %v12888_v44 = vsub.f32 %v26380_v12, %v29581_v11  ;;  %v12895_v48 = vsub.f32 %v26382_v32, %v29582_v20 }
 0xc12   :  { %30668 = vst [vmem:[#allocation47_spill] sm:$0xff] %v26393_v37  ;;  %v26403_v58 = vsub.f32 %v11840_v13, %v12563_v4  ;;  %20621 = vmatprep.subr.bf16.mxu0 %v26393_v37  ;;  %v26406_v30 = vpack.c.bf16 %v12557_v43, %v12554_v24  ;;  %v11641_v6 = vsel %vm4715_vm5, %v30672_v26, %v11598_v5  ;;  %v11600_v24 = vpop.permute.xlu0 %11599 }
 0xc13   :  { %30669 = vst [vmem:[#allocation48_spill] sm:$0xff] %v26395_v31  ;;  %20653 = vmatprep.subr.bf16.mxu1 %v20652_v16  ;;  %v20654_v41 = vpack.c.bf16 %v12770_v2, %v12763_v21  ;;  %v29584_v47 = vand.u32 4294901760, %v26395_v31  ;;  %v26411_v3 = vpack.c.bf16 %v12611_v36, %v12608_v29  ;;  %v11645_v60 = vsel %vm4720_vm6, %v11641_v6, %v11614_v56  ;;  %v30675_v56 = vld [vmem:[#allocation29_spill] sm:$0xff]  ;;  %v30676_v36 = vld [vmem:[#allocation44_spill] sm:$0xff]  ;;  %v30677_v16 = vld [vmem:[#allocation63_spill] sm:$0xff] }
 0xc14   :  { %30670 = vst [vmem:[#allocation69_spill] sm:$0xff] %v26403_v58  ;;  %30671 = vst [vmem:[#allocation33_spill] sm:$0xff] %v26406_v30  ;;  %v12889_v11 = vand.u32 4294901760, %v12888_v44  ;;  %v12896_v20 = vand.u32 4294901760, %v12895_v48  ;;  %v29583_v13 = vand.u32 4294901760, %v26403_v58  ;;  %v26423_v29 = vpack.c.bf16 %v12563_v4, %v12560_v19 }
 0xc15   :  { %30673 = vst [vmem:[#allocation99_spill] sm:$0xff] %v26411_v3  ;;  %20623 = vmatpush3.bf16.msra.mxu0 %v26406_v30  ;;  %20655 = vmatpush3.bf16.msra.mxu1 %v20654_v41  ;;  %v12776_v2 = vsub.f32 %v26395_v31, %v29584_v47  ;;  %v11642_v21 = vsel %vm4715_vm5, %v30677_v16, %v11600_v24  ;;  %v30678_v24 = vld [vmem:[#allocation41_spill] sm:$0xff]  ;;  %v30681_v47 = vld [vmem:[#allocation50_spill] sm:$0xff] }
 0xc16   :  { %20625 = vmatprep.subr.bf16.mxu0 %v26411_v3  ;;  %30674 = vst [vmem:[#allocation102_spill] sm:$0xff] %v26423_v29  ;;  %v20656_v26 = vpack.c.bf16 %v12896_v20, %v12889_v11  ;;  %v12783_v19 = vsub.f32 %v26403_v58, %v29583_v13 }
 0xc17   :  { %v12777_v41 = vand.u32 4294901760, %v12776_v2  ;;  %v20660_v2 = vpack.c.bf16 %v25934_v10, %v25929_v7 }
 0xc18   :  { %20657 = vmatprep.subr.bf16.mxu1 %v20656_v26 }
 0xc19   :  { %20627 = vmatpush3.bf16.msra.mxu0 %v26423_v29 }
 0xc1a   :  { %20661 = vmatprep.subr.bf16.mxu0 %v20660_v2 }
 0xc1c   :  { %v11632_v4 = vpop.permute.xlu0 %11631 }
 0xc1d   :  { %v11630_v27 = vpop.permute.xlu1 %11629 }
 0xc1e   :  { %v26417_v43 = vsel %vm4725_vm7, %v11645_v60, %v11630_v27  ;;  %v12784_v27 = vand.u32 4294901760, %v12783_v19 }
 0xc1f   :  { %v11661_v5 = vmul.f32 %v26417_v43, %v30675_v56  ;;  %v11657_v44 = vmul.f32 %v26417_v43, %v30676_v36 }
 0xc20   :  { %v20658_v20 = vpack.c.bf16 %v12784_v27, %v12777_v41  ;;  %v30680_v27 = vld [vmem:[#allocation75_spill] sm:$0xff] }
 0xc21   :  { %v11616_v48 = vpop.permute.xlu1 %11615  ;;  %11705 = vrot.lane.b32.xlu0 %v11661_v5, %s21808_s10  ;;  %11689 = vrot.lane.b32.xlu1 %v11657_v44, %s21809_s11  ;;  %v30679_v5 = vld [vmem:[#allocation36_spill] sm:$0xff]  ;;  %v30682_v41 = vld [vmem:[#allocation43_spill] sm:$0xff] }
 0xc22   :  { %v11646_v6 = vsel %vm4720_vm6, %v11642_v21, %v11616_v48  ;;  %20659 = vmatpush3.bf16.msra.mxu1 %v20658_v20 }
 0xc23   :  { %v26439_v60 = vsel %vm4725_vm7, %v11646_v6, %v11632_v4  ;;  %20693 = vmatprep.subr.bf16.mxu1 %v26110_v23  ;;  %v11618_v4 = vpop.permute.xlu0 %11617 }
 0xc24   :  { %v11662_v56 = vmul.f32 %v26439_v60, %v30678_v24  ;;  %v11658_v11 = vmul.f32 %v26439_v60, %v30679_v5 }
 0xc25   :  { %v11602_v19 = vpop.permute.xlu1 %11601 }
 0xc26   :  { %11707 = vrot.lane.b32.xlu0 %v11662_v56, %s21808_s10  ;;  %11691 = vrot.lane.b32.xlu1 %v11658_v11, %s21809_s11  ;;  %v11643_v24 = vsel %vm4715_vm5, %v30680_v27, %v11602_v19  ;;  %v30683_v19 = vld [vmem:[#allocation76_spill] sm:$0xff] }
 0xc27   :  { %v11647_v5 = vsel %vm4720_vm6, %v11643_v24, %v11618_v4  ;;  %v11604_v2 = vpop.permute.xlu0 %11603 }
 0xc28   :  { %v11644_v27 = vsel %vm4715_vm5, %v30683_v19, %v11604_v2  ;;  %v30685_v19 = vld [vmem:[#allocation74_spill] sm:$0xff] }
 0xc49   :  { %v11634_v11 = vpop.permute.xlu1 %11633 }
 0xc4a   :  { %v26474_v13 = vsel %vm4725_vm7, %v11647_v5, %v11634_v11  ;;  %v11636_v11 = vpop.permute.xlu0 %11635  ;;  %v30690_v5 = vld [vmem:[#allocation83_spill] sm:$0xff] }
 0xc4b   :  { %v11663_v6 = vmul.f32 %v26474_v13, %v30681_v47  ;;  %v11659_v26 = vmul.f32 %v26474_v13, %v30682_v41  ;;  %v30684_v41 = vld [vmem:[#allocation73_spill] sm:$0xff] }
 0xc4d   :  { %11709 = vrot.lane.b32.xlu0 %v11663_v6, %s21808_s10  ;;  %11693 = vrot.lane.b32.xlu1 %v11659_v26, %s21809_s11  ;;  %v11620_v4 = vpop.permute.xlu1 %11619  ;;  %v30691_v26 = vld [vmem:[#allocation132_spill] sm:$0xff] }
 0xc4e   :  { %v11648_v47 = vsel %vm4720_vm6, %v11644_v27, %v11620_v4  ;;  %v30686_v27 = vld [vmem:[#allocation125_spill] sm:$0xff] }
 0xc4f   :  { %v26490_v20 = vsel %vm4725_vm7, %v11648_v47, %v11636_v11  ;;  %v11669_v4 = vmul.f32 %v26417_v43, %v30686_v27  ;;  %v30687_v11 = vld [vmem:[#allocation126_spill] sm:$0xff]  ;;  %v11671_v27 = vmul.f32 %v26474_v13, %v30690_v5 }
 0xc50   :  { %v11664_v2 = vmul.f32 %v26490_v20, %v30684_v41  ;;  %v11660_v6 = vmul.f32 %v26490_v20, %v30685_v19  ;;  %v11665_v47 = vmul.f32 %v26417_v43, %v30687_v11  ;;  %v30688_v41 = vld [vmem:[#allocation56_spill] sm:$0xff]  ;;  %v30689_v19 = vld [vmem:[#allocation131_spill] sm:$0xff]  ;;  %v11667_v11 = vmul.f32 %v26474_v13, %v30691_v26 }
 0xc52   :  { %11711 = vrot.lane.b32.xlu0 %v11664_v2, %s21808_s10  ;;  %11695 = vrot.lane.b32.xlu1 %v11660_v6, %s21809_s11  ;;  %v11670_v2 = vmul.f32 %v26439_v60, %v30688_v41  ;;  %v11666_v6 = vmul.f32 %v26439_v60, %v30689_v19  ;;  %v30693_v41 = vld [vmem:[#allocation86_spill] sm:$0xff] }
 0xc53   :  { %v11668_v19 = vmul.f32 %v26490_v20, %v30693_v41 }
 0xc56   :  { %11737 = vrot.lane.b32.xlu0 %v11669_v4, %s21814_s23  ;;  %11721 = vrot.lane.b32.xlu1 %v11665_v47, %s21813_s19  ;;  %v30692_v4 = vld [vmem:[#allocation134_spill] sm:$0xff] }
 0xc57   :  { %v11672_v47 = vmul.f32 %v26490_v20, %v30692_v4  ;;  %v30697_v4 = vld [vmem:[#allocation51_spill] sm:$0xff] }
 0xc58   :  { %v11681_v41 = vmul.f32 %v26417_v43, %v30697_v4 }
 0xc5a   :  { %11739 = vrot.lane.b32.xlu0 %v11670_v2, %s21814_s23  ;;  %11723 = vrot.lane.b32.xlu1 %v11666_v6, %s21813_s19  ;;  %v30694_v2 = vld [vmem:[#allocation30_spill] sm:$0xff] }
 0xc5b   :  { %v11677_v5 = vmul.f32 %v26417_v43, %v30694_v2  ;;  %v30695_v6 = vld [vmem:[#allocation42_spill] sm:$0xff]  ;;  %v30699_v2 = vld [vmem:[#allocation71_spill] sm:$0xff] }
 0xc5c   :  { %v11673_v26 = vmul.f32 %v26417_v43, %v30695_v6  ;;  %v11678_v6 = vmul.f32 %v26439_v60, %v30699_v2 }
 0xc5e   :  { %11741 = vrot.lane.b32.xlu0 %v11671_v27, %s21814_s23  ;;  %11725 = vrot.lane.b32.xlu1 %v11667_v11, %s21813_s19  ;;  %v30696_v27 = vld [vmem:[#allocation110_spill] sm:$0xff] }
 0xc5f   :  { %v11674_v11 = vmul.f32 %v26439_v60, %v30696_v27  ;;  %v30701_v27 = vld [vmem:[#allocation133_spill] sm:$0xff] }
 0xc60   :  { %v11675_v4 = vmul.f32 %v26474_v13, %v30701_v27 }
 0xc62   :  { %11743 = vrot.lane.b32.xlu0 %v11672_v47, %s21814_s23  ;;  %11727 = vrot.lane.b32.xlu1 %v11668_v19, %s21813_s19  ;;  %v30698_v47 = vld [vmem:[#allocation49_spill] sm:$0xff]  ;;  %s21818_s19 = smov 32  }
 0xc63   :  { %v11682_v19 = vmul.f32 %v26439_v60, %v30698_v47  ;;  %v30703_v47 = vld [vmem:[#allocation93_spill] sm:$0xff] }
 0xc64   :  { %v11683_v2 = vmul.f32 %v26474_v13, %v30703_v47  ;;  %v30706_v47 = vld [vmem:[#allocation85_spill] sm:$0xff] }
 0xc66   :  { %11769 = vrot.lane.b32.xlu0 %v11677_v5, %s21803_s4  ;;  %11753 = vrot.lane.b32.xlu1 %v11673_v26, %s21816_s2  ;;  %v30700_v5 = vld [vmem:[#allocation123_spill] sm:$0xff] }
 0xc67   :  { %v11679_v26 = vmul.f32 %v26474_v13, %v30700_v5  ;;  %v30705_v5 = vld [vmem:[#allocation98_spill] sm:$0xff] }
 0xc68   :  { %v11680_v27 = vmul.f32 %v26490_v20, %v30705_v5 }
 0xc6a   :  { %11755 = vrot.lane.b32.xlu0 %v11674_v11, %s21816_s2  ;;  %11785 = vrot.lane.b32.xlu1 %v11681_v41, %s21817_s13  ;;  %v30702_v11 = vld [vmem:[#allocation104_spill] sm:$0xff] }
 0xc6b   :  { %v11676_v41 = vmul.f32 %v26490_v20, %v30702_v11  ;;  %v21773_v11 = vld [vmem:[%s29100_s1 + $0x18] sm:$0xff] }
 0xc6e   :  { %11787 = vrot.lane.b32.xlu0 %v11682_v19, %s21817_s13  ;;  %11771 = vrot.lane.b32.xlu1 %v11678_v6, %s21803_s4  ;;  %v30704_v19 = vld [vmem:[#allocation116_spill] sm:$0xff] }
 0xc6f   :  { %v11684_v6 = vmul.f32 %v26490_v20, %v30704_v19 }
 0xc72   :  { %11773 = vrot.lane.b32.xlu0 %v11679_v26, %s21803_s4  ;;  %11757 = vrot.lane.b32.xlu1 %v11675_v4, %s21816_s2  ;;  %v21771_v26 = vld [vmem:[%s29100_s1 + $0x8] sm:$0xff]  ;;  %v21772_v4 = vld [vmem:[%s29100_s1] sm:$0xff] }
 0xc76   :  { %11759 = vrot.lane.b32.xlu0 %v11676_v41, %s21816_s2  ;;  %11789 = vrot.lane.b32.xlu1 %v11683_v2, %s21817_s13  ;;  %v21774_v41 = vld [vmem:[%s29100_s1 + $0x10] sm:$0xff]  ;;  %v11653_v2 = vmul.f32 %v26417_v43, %v30706_v47  ;;  %v30709_v43 = vld [vmem:[#allocation32_spill] sm:$0xff] }
 0xc77   :  { %v11654_v47 = vmul.f32 %v26439_v60, %v30709_v43 }
 0xc7a   :  { %11791 = vrot.lane.b32.xlu0 %v11684_v6, %s21817_s13  ;;  %11775 = vrot.lane.b32.xlu1 %v11680_v27, %s21803_s4 }
 0xc7e   :  { %16331 = vrot.lane.b32.xlu0 %v21771_v26, %s21818_s19  ;;  %16329 = vrot.lane.b32.xlu1 %v21772_v4, %s21818_s19 }
 0xc82   :  { %16335 = vrot.lane.b32.xlu0 %v21773_v11, %s21818_s19  ;;  %16333 = vrot.lane.b32.xlu1 %v21774_v41, %s21818_s19 }
 0xc93   :  { %v26580_v19 = vpop.permute.xlu0 %11705  ;;  %v11690_v6 = vpop.permute.xlu1 %11689 }
 0xc94   :  { %30707 = vst [vmem:[#allocation78_spill] sm:$0xff] %v26580_v19  ;;  %v11797_v5 = vsel %vm5006_vm8, %v11653_v2, %v11690_v6  ;;  %v11801_v27 = vsel %vm5011_vm9, %v11690_v6, %v26580_v19 }
 0xc95   :  { %v26585_v26 = vand.u32 4294901760, %v11801_v27  ;;  %v26587_v4 = vand.u32 4294901760, %v11797_v5 }
 0xc97   :  { %30708 = vst [vmem:[#allocation114_spill] sm:$0xff] %v26587_v4  ;;  %v26590_v11 = vsub.f32 %v11801_v27, %v26585_v26  ;;  %v26593_v41 = vsub.f32 %v11797_v5, %v26587_v4  ;;  %12899 = vmatprep.mubr.f32.mxu1 %v26585_v26 }
 0xc98   :  { %v26598_v24 = vpop.permute.xlu0 %11707  ;;  %12901 = vmatmul.mubr.f32.vlgmr.msra.gmra.mrb[100].mxu1 %v26587_v4  ;;  %v11692_v2 = vpop.permute.xlu1 %11691 }
 0xc99   :  { %30710 = vst [vmem:[#allocation53_spill] sm:$0xff] %v26598_v24  ;;  %v29585_v6 = vand.u32 4294901760, %v26593_v41  ;;  %v11798_v56 = vsel %vm5006_vm8, %v11654_v47, %v11692_v2  ;;  %v11802_v27 = vsel %vm5011_vm9, %v11692_v2, %v26598_v24  ;;  %v29586_v5 = vand.u32 4294901760, %v26590_v11  ;;  %20695 = vmatpush3.bf16.msra.mxu1 %v26119_v17 }
 0xc9a   :  { %v26607_v48 = vand.u32 4294901760, %v11802_v27  ;;  %v26609_v21 = vand.u32 4294901760, %v11798_v56  ;;  %20697 = vmatprep.subr.bf16.mxu1 %v26158_v14  ;;  %v30731_v24 = vand.u32 4294901760, %v25929_v7 }
 0xc9b   :  { %v12622_v60 = vsub.f32 %v26593_v41, %v29585_v6  ;;  %v12616_v43 = vsub.f32 %v26590_v11, %v29586_v5 }
 0xc9c   :  { %30711 = vst [vmem:[#allocation105_spill] sm:$0xff] %v26607_v48  ;;  %30712 = vst [vmem:[#allocation129_spill] sm:$0xff] %v26609_v21  ;;  %v26619_v47 = vsub.f32 %v11802_v27, %v26607_v48  ;;  %v26622_v2 = vsub.f32 %v11798_v56, %v26609_v21  ;;  %12906 = vmatprep.mubr.f32.mxu1 %v26607_v48 }
 0xc9d   :  { %v12623_v16 = vand.u32 4294901760, %v12622_v60  ;;  %12908 = vmatmul.mubr.f32.gmra.mrb[102].mxu1 %v26609_v21  ;;  %v12617_v44 = vand.u32 4294901760, %v12616_v43  ;;  %v30713_v60 = vpack.c.bf16 %v25944_v33, %v25939_v53  ;;  %v30733_v21 = vld [vmem:[#allocation88_spill] sm:$0xff] }
 0xc9e   :  { %v29588_v36 = vand.u32 4294901760, %v26619_v47  ;;  %v29587_v6 = vand.u32 4294901760, %v26622_v2  ;;  %20699 = vmatpush3.bf16.msra.mxu1 %v26164_v8  ;;  %v11655_v48 = vmul.f32 %v26474_v13, %v30733_v21  ;;  %v30738_v21 = vld [vmem:[#allocation34_spill] sm:$0xff] }
 0xc9f   :  { %12618 = vmatprep.mubr.f32.mxu0 %v12617_v44  ;;  %20701 = vmatprep.subr.bf16.mxu1 %v26194_v38  ;;  %v30714_v44 = vpack.c.bf16 %v25996_v51, %v25985_v46 }
 0xca0   :  { %12624 = vmatmul.mubr.f32.vlgmr.msra.gmra.mrb[78].mxu0 %v12623_v16  ;;  %v12631_v56 = vsub.f32 %v26619_v47, %v29588_v36  ;;  %v12637_v27 = vsub.f32 %v26622_v2, %v29587_v6  ;;  %v30715_v16 = vpack.c.bf16 %v26013_v45, %v26001_v0  ;;  %v30723_v36 = vld [vmem:[#allocation66_spill] sm:$0xff] }
 0xca1   :  { %20663 = vmatpush3.bf16.msra.mxu0 %v30713_v60  ;;  %v30718_v60 = vld [vmem:[#allocation57_spill] sm:$0xff] }
 0xca2   :  { %v12632_v43 = vand.u32 4294901760, %v12631_v56  ;;  %v12638_v5 = vand.u32 4294901760, %v12637_v27  ;;  %20703 = vmatpush3.bf16.msra.mxu1 %v26206_v39  ;;  %20665 = vmatprep.subr.bf16.mxu0 %v30714_v44  ;;  %v30716_v56 = vpack.c.bf16 %v26069_v55, %v26057_v61  ;;  %v30717_v27 = vld [vmem:[#allocation52_spill] sm:$0xff]  ;;  %v30719_v44 = vpack.c.bf16 %v26083_v18, %v26078_v25 }
 0xca3   :  { %20705 = vmatprep.subr.bf16.mxu1 %v26236_v57  ;;  %v20672_v6 = vpack.c.bf16 %v30718_v60, %v30717_v27 }
 0xca4   :  { %12633 = vmatprep.mubr.f32.mxu0 %v12632_v43  ;;  %v30721_v43 = vld [vmem:[#allocation97_spill] sm:$0xff] }
 0xca5   :  { %12639 = vmatmul.mubr.f32.gmra.mrb[80].mxu0 %v12638_v5  ;;  %v30720_v5 = vld [vmem:[#allocation60_spill] sm:$0xff] }
 0xca6   :  { %20667 = vmatpush3.bf16.msra.mxu0 %v30715_v16  ;;  %20707 = vmatpush3.bf16.msra.mxu1 %v26275_v15  ;;  %v30722_v16 = vpack.c.bf16 %v26176_v28, %v26173_v59 }
 0xca7   :  { %20669 = vmatprep.subr.bf16.mxu0 %v30716_v56  ;;  %20709 = vmatprep.subr.bf16.mxu1 %v26295_v49  ;;  %v30724_v56 = vpack.c.bf16 %v26210_v9, %v26200_v54 }
 0xcaa   :  { %20671 = vmatpush3.bf16.msra.mxu0 %v30719_v44  ;;  %20711 = vmatpush3.bf16.msra.mxu1 %v30720_v5  ;;  %v30725_v44 = vpack.c.bf16 %v26247_v62, %v26244_v34 }
 0xcab   :  { %20673 = vmatprep.subr.bf16.mxu0 %v20672_v6  ;;  %20713 = vmatprep.subr.bf16.mxu1 %v30721_v43  ;;  %v30726_v6 = vpack.c.bf16 %v26271_v35, %v26268_v22 }
 0xcae   :  { %20675 = vmatpush3.bf16.msra.mxu0 %v30722_v16  ;;  %20715 = vmatpush3.bf16.msra.mxu1 %v30723_v36  ;;  %v30727_v16 = vpack.c.bf16 %v26313_v52, %v26303_v50 }
 0xcaf   :  { %20677 = vmatprep.subr.bf16.mxu0 %v30724_v56  ;;  %20717 = vmatprep.subr.bf16.mxu1 %v26393_v37  ;;  %v30728_v56 = vpack.c.bf16 %v26339_v40, %v26333_v63 }
 0xcb2   :  { %20679 = vmatpush3.bf16.msra.mxu0 %v30725_v44  ;;  %20719 = vmatpush3.bf16.msra.mxu1 %v26406_v30  ;;  %v30729_v44 = vpack.c.bf16 %v26361_v1, %v26358_v42 }
 0xcb3   :  { %20681 = vmatprep.subr.bf16.mxu0 %v30726_v6  ;;  %20721 = vmatprep.subr.bf16.mxu1 %v26411_v3  ;;  %v30730_v6 = vpack.c.bf16 %v26382_v32, %v26380_v12  ;;  %v30750_v12 = vand.u32 4294901760, %v25944_v33 }
 0xcb6   :  { %20683 = vmatpush3.bf16.msra.mxu0 %v30727_v16  ;;  %20723 = vmatpush3.bf16.msra.mxu1 %v26423_v29  ;;  %v30732_v16 = vand.u32 4294901760, %v25934_v10  ;;  %v26752_v29 = vld [vmem:[%s29106_s7 + $0x100] sm:$0xff] }
 0xcb7   :  { %20685 = vmatprep.subr.bf16.mxu0 %v30728_v56  ;;  %20757 = vmatprep.subr.bf16.mxu1 %v26110_v23  ;;  %v30734_v56 = vpack.c.bf16 %v26403_v58, %v26395_v31 }
 0xcb8   :  { %v20724_v19 = vpack.c.bf16 %v30732_v16, %v30731_v24 }
 0xcba   :  { %20687 = vmatpush3.bf16.msra.mxu0 %v30729_v44 }
 0xcbb   :  { %20689 = vmatprep.subr.bf16.mxu0 %v30730_v6 }
 0xcbe   :  { %20691 = vmatpush3.bf16.msra.mxu0 %v30734_v56 }
 0xcbf   :  { %v26698_v23 = vpop.permute.xlu0 %11709  ;;  %v11694_v4 = vpop.permute.xlu1 %11693  ;;  %20725 = vmatprep.subr.bf16.mxu0 %v20724_v19  ;;  %v11656_v19 = vmul.f32 %v26490_v20, %v30738_v21  ;;  %v26731_v20 = vld [vmem:[%s29106_s7 + $0x180] sm:$0xff]  ;;  %v26736_v21 = vld [vmem:[%s29106_s7 + $0x188] sm:$0xff] }
 0xcc0   :  { %30735 = vst [vmem:[#allocation101_spill] sm:$0xff] %v26698_v23  ;;  %v11799_v44 = vsel %vm5006_vm8, %v11655_v48, %v11694_v4  ;;  %v11803_v6 = vsel %vm5011_vm9, %v11694_v4, %v26698_v23  ;;  %30742 = vst [vmem:[#allocation79_spill] sm:$0xff] %v26731_v20 }
 0xcc1   :  { %v26703_v7 = vand.u32 4294901760, %v11803_v6  ;;  %v26705_v10 = vand.u32 4294901760, %v11799_v44  ;;  %30743 = vst [vmem:[#allocation120_spill] sm:$0xff] %v26736_v21 }
 0xcc3   :  { %30736 = vst [vmem:[#allocation130_spill] sm:$0xff] %v26703_v7  ;;  %30737 = vst [vmem:[#allocation111_spill] sm:$0xff] %v26705_v10  ;;  %v26708_v24 = vsub.f32 %v11803_v6, %v26703_v7  ;;  %v26711_v13 = vsub.f32 %v11799_v44, %v26705_v10  ;;  %12913 = vmatprep.mubr.f32.mxu1 %v26703_v7 }
 0xcc4   :  { %v26716_v16 = vpop.permute.xlu0 %11711  ;;  %12915 = vmatmul.mubr.f32.gmra.mrb[104].mxu1 %v26705_v10  ;;  %v11696_v48 = vpop.permute.xlu1 %11695 }
 0xcc5   :  { %30739 = vst [vmem:[#allocation81_spill] sm:$0xff] %v26716_v16  ;;  %v11800_v4 = vsel %vm5006_vm8, %v11656_v19, %v11696_v48  ;;  %v11804_v56 = vsel %vm5011_vm9, %v11696_v48, %v26716_v16  ;;  %v12645_v6 = vand.u32 4294901760, %v26708_v24  ;;  %v29607_v44 = vand.u32 4294901760, %v26711_v13 }
 0xcc6   :  { %v26724_v23 = vand.u32 4294901760, %v11804_v56  ;;  %v26726_v7 = vand.u32 4294901760, %v11800_v4 }
 0xcc7   :  { %v12646_v19 = vsub.f32 %v26708_v24, %v12645_v6  ;;  %v12652_v48 = vsub.f32 %v26711_v13, %v29607_v44  ;;  %v30746_v44 = vand.u32 4294901760, %v26731_v20 }
 0xcc8   :  { %30740 = vst [vmem:[#allocation84_spill] sm:$0xff] %v26724_v23  ;;  %30741 = vst [vmem:[#allocation62_spill] sm:$0xff] %v26726_v7  ;;  %v26743_v16 = vsub.f32 %v11804_v56, %v26724_v23  ;;  %v26746_v10 = vsub.f32 %v11800_v4, %v26726_v7  ;;  %12920 = vmatprep.mubr.f32.mxu1 %v26724_v23  ;;  %v26760_v4 = vld [vmem:[%s29106_s7 + $0x108] sm:$0xff]  ;;  %v30744_v56 = vand.u32 4294901760, %v26590_v11 }
 0xcc9   :  { %12922 = vmatmul.mubr.f32.gmra.mrb[106].mxu1 %v26726_v7  ;;  %v12647_v3 = vand.u32 4294901760, %v12646_v19  ;;  %v12653_v30 = vand.u32 4294901760, %v12652_v48  ;;  %v26769_v19 = vld [vmem:[%s29106_s7 + $0x190] sm:$0xff]  ;;  %v26774_v48 = vld [vmem:[%s29106_s7 + $0x198] sm:$0xff]  ;;  %v26794_v36 = vsub.f32 %v26731_v20, %v30746_v44  ;;  %v30751_v20 = vand.u32 4294901760, %v26752_v29 }
 0xcca   :  { %13191 = vmatprep.mubr.f32.mxu1 %v30744_v56  ;;  %v29615_v23 = vand.u32 4294901760, %v26743_v16  ;;  %v29617_v58 = vand.u32 4294901760, %v26746_v10  ;;  %v26780_v56 = vld [vmem:[%s29106_s7 + $0x110] sm:$0xff] }
 0xccb   :  { %12648 = vmatprep.mubr.f32.mxu0 %v12647_v3  ;;  %v30745_v3 = vand.u32 4294901760, %v26593_v41  ;;  %v26820_v1 = vsub.f32 %v26752_v29, %v30751_v20  ;;  %v30757_v20 = vand.u32 4294901760, %v26760_v4 }
 0xccc   :  { %12654 = vmatmul.mubr.f32.gmra.mrb[82].mxu0 %v12653_v30  ;;  %v12661_v37 = vsub.f32 %v26743_v16, %v29615_v23  ;;  %v12667_v7 = vsub.f32 %v26746_v10, %v29617_v58  ;;  %v30747_v30 = vand.u32 4294901760, %v26736_v21  ;;  %v26806_v58 = vld [vmem:[%s29106_s7 + $0x118] sm:$0xff]  ;;  %v30749_v23 = vand.u32 4294901760, %v25939_v53 }
 0xccd   :  { %13195 = vmatmul.mubr.f32.vlgmr.msra.gmra.mrb[108].mxu1 %v30745_v3  ;;  %v30748_v3 = vand.u32 4294901760, %v26619_v47  ;;  %30752 = vst [vmem:[#allocation46_spill] sm:$0xff] %v26820_v1  ;;  %v30753_v53 = vand.u32 4294901760, %v25985_v46  ;;  %v29623_v31 = vand.u32 4294901760, %v26806_v58  ;;  %v29621_v46 = vand.u32 4294901760, %v26794_v36 }
 0xcce   :  { %v26799_v32 = vsub.f32 %v26736_v21, %v30747_v30  ;;  %20759 = vmatpush3.bf16.msra.mxu1 %v26119_v17  ;;  %v12662_v44 = vand.u32 4294901760, %v12661_v37  ;;  %v12668_v30 = vand.u32 4294901760, %v12667_v7  ;;  %v20726_v21 = vpack.c.bf16 %v30750_v12, %v30749_v23  ;;  %v26825_v17 = vld [vmem:[%s29106_s7 + $0x1a0] sm:$0xff] }
 0xccf   :  { %13202 = vmatprep.mubr.f32.mxu1 %v30748_v3  ;;  %20761 = vmatprep.subr.bf16.mxu1 %v26158_v14  ;;  %v26830_v14 = vld [vmem:[%s29106_s7 + $0x1a8] sm:$0xff]  ;;  %v30754_v12 = vand.u32 4294901760, %v25996_v51  ;;  %v30755_v37 = vand.u32 4294901760, %v26001_v0  ;;  %v30756_v23 = vand.u32 4294901760, %v26013_v45  ;;  %v26843_v3 = vsub.f32 %v26760_v4, %v30757_v20 }
 0xcd0   :  { %12663 = vmatprep.mubr.f32.mxu0 %v12662_v44  ;;  %v30759_v44 = vand.u32 4294901760, %v26622_v2  ;;  %v30760_v0 = vand.u32 4294901760, %v26769_v19  ;;  %v30766_v20 = vand.u32 4294901760, %v26780_v56 }
 0xcd1   :  { %v20728_v33 = vpack.c.bf16 %v30754_v12, %v30753_v53  ;;  %v20730_v7 = vpack.c.bf16 %v30756_v23, %v30755_v37  ;;  %30758 = vst [vmem:[#allocation72_spill] sm:$0xff] %v26843_v3  ;;  %12669 = vmatmul.mubr.f32.gmra.mrb[84].mxu0 %v12668_v30  ;;  %v30762_v53 = vand.u32 4294901760, %v26774_v48  ;;  %v30764_v30 = vand.u32 4294901760, %v26057_v61 }
 0xcd2   :  { %13206 = vmatmul.mubr.f32.gmra.mrb[110].mxu1 %v30759_v44  ;;  %v26853_v45 = vsub.f32 %v26769_v19, %v30760_v0  ;;  %13057 = vmatprep.mubr.f32.mxu0 %v26590_v11  ;;  %v30765_v37 = vand.u32 4294901760, %v26069_v55  ;;  %v26869_v44 = vsub.f32 %v26780_v56, %v30766_v20  ;;  %v29622_v0 = vand.u32 4294901760, %v26825_v17 }
 0xcd3   :  { %v26858_v12 = vsub.f32 %v26774_v48, %v30762_v53  ;;  %20763 = vmatpush3.bf16.msra.mxu1 %v26164_v8  ;;  %13213 = vmatprep.mubr.f32.mxu1 %v12645_v6  ;;  %v30768_v8 = vand.u32 4294901760, %v26078_v25  ;;  %v30769_v11 = vand.u32 4294901760, %v26083_v18  ;;  %v30770_v55 = vand.u32 4294901760, %v30717_v27  ;;  %v26896_v25 = vld [vmem:[%s29106_s7 + $0x120] sm:$0xff] }
 0xcd4   :  { %30761 = vst [vmem:[#allocation65_spill] sm:$0xff] %v26853_v45  ;;  %v20732_v23 = vpack.c.bf16 %v30765_v37, %v30764_v30  ;;  %30767 = vst [vmem:[#allocation94_spill] sm:$0xff] %v26869_v44  ;;  %20765 = vmatprep.subr.bf16.mxu1 %v26194_v38  ;;  %v30771_v53 = vand.u32 4294901760, %v30718_v60  ;;  %v30772_v37 = vand.u32 4294901760, %v26173_v59  ;;  %v30773_v20 = vand.u32 4294901760, %v26176_v28 }
 0xcd5   :  { %30763 = vst [vmem:[#allocation95_spill] sm:$0xff] %v26858_v12  ;;  %v26878_v61 = vpack.c.bf16 %v30769_v11, %v30768_v8  ;;  %v29627_v38 = vand.u32 4294901760, %v26820_v1  ;;  %v30774_v18 = vand.u32 4294901760, %v26200_v54  ;;  %v30775_v27 = vand.u32 4294901760, %v26210_v9  ;;  %v26919_v54 = vld [vmem:[%s29106_s7 + $0x128] sm:$0xff]  ;;  %13060 = vmatmul.mubr.f32.vlgmr.msra.gmra.mrb[86].mxu0 %v26593_v41  ;;  %v26940_v41 = vld [vmem:[%s29106_s7 + $0x1b8] sm:$0xff] }
 0xcd6   :  { %v26884_v30 = vpack.c.bf16 %v30771_v53, %v30770_v55  ;;  %v26890_v51 = vpack.c.bf16 %v30773_v20, %v30772_v37  ;;  %v30776_v6 = vand.u32 4294901760, %v26244_v34  ;;  %v30777_v59 = vand.u32 4294901760, %v26247_v62  ;;  %v26935_v20 = vld [vmem:[%s29106_s7 + $0x1b0] sm:$0xff]  ;;  %20727 = vmatpush3.bf16.msra.mxu0 %v20726_v21  ;;  %13066 = vmatprep.mubr.f32.mxu0 %v26619_v47 }
 0xcd7   :  { %v26902_v60 = vpack.c.bf16 %v30775_v27, %v30774_v18  ;;  %v29624_v8 = vand.u32 4294901760, %v26843_v3  ;;  %v26914_v11 = vsub.f32 %v26806_v58, %v29623_v31  ;;  %v30779_v9 = vand.u32 4294901760, %v26711_v13  ;;  %20767 = vmatpush3.bf16.msra.mxu1 %v26206_v39  ;;  %20729 = vmatprep.subr.bf16.mxu0 %v20728_v33  ;;  %v26989_v33 = vld [vmem:[%s29106_s7 + $0x138] sm:$0xff] }
 0xcd8   :  { %v26908_v28 = vpack.c.bf16 %v30777_v59, %v30776_v6  ;;  %v13820_v34 = vsub.f32 %v26794_v36, %v29621_v46  ;;  %v30780_v62 = vand.u32 4294901760, %v26799_v32  ;;  %v29626_v53 = vand.u32 4294901760, %v26853_v45  ;;  %20769 = vmatprep.subr.bf16.mxu1 %v26236_v57 }
 0xcd9   :  { %30778 = vst [vmem:[#allocation67_spill] sm:$0xff] %v26914_v11  ;;  %13217 = vmatmul.mubr.f32.gmra.mrb[112].mxu1 %v30779_v9  ;;  %v29625_v37 = vand.u32 4294901760, %v26858_v12  ;;  %v26947_v27 = vsub.f32 %v26825_v17, %v29622_v0  ;;  %v30782_v6 = vand.u32 4294901760, %v26830_v14  ;;  %v29631_v9 = vand.u32 4294901760, %v26896_v25  ;;  %13069 = vmatmul.mubr.f32.gmra.mrb[88].mxu0 %v26622_v2 }
 0xcda   :  { %v13827_v55 = vsub.f32 %v26799_v32, %v30780_v62  ;;  %v30784_v21 = vand.u32 4294901760, %v26743_v16  ;;  %v30785_v39 = vand.u32 4294901760, %v26268_v22  ;;  %v30786_v62 = vand.u32 4294901760, %v26271_v35  ;;  %20731 = vmatpush3.bf16.msra.mxu0 %v20730_v7  ;;  %13075 = vmatprep.mubr.f32.mxu0 %v26708_v24 }
 0xcdb   :  { %30781 = vst [vmem:[#allocation124_spill] sm:$0xff] %v26947_v27  ;;  %v26952_v59 = vsub.f32 %v26830_v14, %v30782_v6  ;;  %v30787_v0 = vand.u32 4294901760, %v26303_v50  ;;  %v30788_v31 = vand.u32 4294901760, %v26313_v52  ;;  %v13708_v6 = vsub.f32 %v26820_v1, %v29627_v38  ;;  %20771 = vmatpush3.bf16.msra.mxu1 %v26275_v15  ;;  %20733 = vmatprep.subr.bf16.mxu0 %v20732_v23  ;;  %v27039_v23 = vld [vmem:[%s29106_s7 + $0x1c0] sm:$0xff] }
 0xcdc   :  { %13224 = vmatprep.mubr.f32.mxu1 %v30784_v21  ;;  %v26962_v46 = vpack.c.bf16 %v30786_v62, %v30785_v39  ;;  %v29630_v47 = vand.u32 4294901760, %v26919_v54  ;;  %v13715_v22 = vsub.f32 %v26843_v3, %v29624_v8  ;;  %v29628_v35 = vand.u32 4294901760, %v26914_v11  ;;  %20773 = vmatprep.subr.bf16.mxu1 %v26295_v49 }
 0xcdd   :  { %30783 = vst [vmem:[#allocation82_spill] sm:$0xff] %v26952_v59  ;;  %v26968_v18 = vpack.c.bf16 %v30788_v31, %v30787_v0  ;;  %v29629_v50 = vand.u32 4294901760, %v26935_v20  ;;  %v29632_v52 = vand.u32 4294901760, %v26940_v41  ;;  %v26984_v31 = vld [vmem:[%s29106_s7 + $0x130] sm:$0xff]  ;;  %v30789_v57 = vand.u32 4294901760, %v26746_v10  ;;  %13078 = vmatmul.mubr.f32.gmra.mrb[90].mxu0 %v26711_v13 }
 0xcde   :  { %v13821_v0 = vand.u32 4294901760, %v13820_v34  ;;  %v13828_v21 = vand.u32 4294901760, %v13827_v55  ;;  %v13834_v39 = vsub.f32 %v26853_v45, %v29626_v53  ;;  %v13841_v62 = vsub.f32 %v26858_v12, %v29625_v37  ;;  %20735 = vmatpush3.bf16.msra.mxu0 %v26878_v61  ;;  %13084 = vmatprep.mubr.f32.mxu0 %v26743_v16 }
 0xcdf   :  { %13228 = vmatmul.mubr.f32.gmra.mrb[114].mxu1 %v30789_v57  ;;  %v30790_v8 = vand.u32 4294901760, %v26869_v44  ;;  %v29634_v57 = vand.u32 4294901760, %v26947_v27  ;;  %v29633_v34 = vand.u32 4294901760, %v26952_v59  ;;  %v27011_v55 = vsub.f32 %v26896_v25, %v29631_v9  ;;  %20737 = vmatprep.subr.bf16.mxu0 %v26884_v30  ;;  %v30809_v30 = vld [vmem:[#allocation69_spill] sm:$0xff] }
 0xce0   :  { %13519 = vmatprep.mubr.f32.mxu1 %v26585_v26  ;;  %v13709_v7 = vand.u32 4294901760, %v13708_v6  ;;  %v27018_v15 = vsub.f32 %v26919_v54, %v29630_v47  ;;  %v29635_v37 = vand.u32 4294901760, %v26989_v33  ;;  %v13716_v53 = vand.u32 4294901760, %v13715_v22  ;;  %20775 = vmatpush3.bf16.msra.mxu1 %v30720_v5 }
 0xce1   :  { %v27004_v2 = vsub.f32 %v26869_v44, %v30790_v8  ;;  %30791 = vst [vmem:[#allocation128_spill] sm:$0xff] %v27011_v55  ;;  %v29636_v8 = vand.u32 4294901760, %v26984_v31  ;;  %v13729_v24 = vsub.f32 %v26914_v11, %v29628_v35  ;;  %v27029_v6 = vsub.f32 %v26935_v20, %v29629_v50  ;;  %20777 = vmatprep.subr.bf16.mxu1 %v30721_v43  ;;  %v30804_v43 = vld [vmem:[#allocation96_spill] sm:$0xff]  ;;  %v30863_v11 = vld [vmem:[#allocation130_spill] sm:$0xff] }
 0xce2   :  { %30792 = vst [vmem:[#allocation127_spill] sm:$0xff] %v27018_v15  ;;  %v27034_v38 = vsub.f32 %v26940_v41, %v29632_v52  ;;  %v30795_v49 = vand.u32 4294901760, %v26333_v63  ;;  %v30796_v22 = vand.u32 4294901760, %v26339_v40  ;;  %v27048_v50 = vpack.c.bf16 %v13828_v21, %v13821_v0  ;;  %v27053_v52 = vld [vmem:[%s29106_s7 + $0x1c8] sm:$0xff]  ;;  %13087 = vmatmul.mubr.f32.gmra.mrb[92].mxu0 %v26746_v10  ;;  %v30807_v10 = vld [vmem:[#allocation48_spill] sm:$0xff] }
 0xce3   :  { %30793 = vst [vmem:[#allocation100_spill] sm:$0xff] %v27029_v6  ;;  %v13835_v47 = vand.u32 4294901760, %v13834_v39  ;;  %v13842_v9 = vand.u32 4294901760, %v13841_v62  ;;  %v13723_v13 = vand.u32 4294901760, %v27004_v2  ;;  %v13848_v63 = vsub.f32 %v26947_v27, %v29634_v57  ;;  %20739 = vmatpush3.bf16.msra.mxu0 %v26890_v51  ;;  %v30806_v2 = vld [vmem:[#allocation66_spill] sm:$0xff]  ;;  %13394 = vmatprep.mubr.f32.mxu0 %v26585_v26  ;;  %v30814_v26 = vld [vmem:[#allocation47_spill] sm:$0xff] }
 0xce4   :  { %30794 = vst [vmem:[#allocation31_spill] sm:$0xff] %v27034_v38  ;;  %v27046_v35 = vpack.c.bf16 %v30796_v22, %v30795_v49  ;;  %v13855_v40 = vsub.f32 %v26952_v59, %v29633_v34  ;;  %v29637_v0 = vand.u32 4294901760, %v27011_v55  ;;  %v27071_v5 = vsub.f32 %v26984_v31, %v29636_v8  ;;  %v30800_v22 = vld [vmem:[#allocation58_spill] sm:$0xff]  ;;  %v30802_v8 = vld [vmem:[#allocation68_spill] sm:$0xff]  ;;  %20779 = vmatpush3.bf16.msra.mxu1 %v30806_v2 }
 0xce5   :  { %v27076_v21 = vsub.f32 %v26989_v33, %v29635_v37  ;;  %v13730_v62 = vand.u32 4294901760, %v13729_v24  ;;  %v30799_v49 = vand.u32 4294901760, %v26358_v42  ;;  %v30801_v34 = vand.u32 4294901760, %v30800_v22  ;;  %v27119_v51 = vld [vmem:[%s29106_s7 + $0x148] sm:$0xff]  ;;  %20741 = vmatprep.subr.bf16.mxu0 %v26902_v60  ;;  %20781 = vmatprep.subr.bf16.mxu1 %v30814_v26 }
 0xce6   :  { %30797 = vst [vmem:[#allocation108_spill] sm:$0xff] %v27071_v5  ;;  %v27090_v37 = vpack.c.bf16 %v13716_v53, %v13709_v7  ;;  %v30803_v39 = vand.u32 4294901760, %v30802_v8  ;;  %v30805_v24 = vand.u32 4294901760, %v30804_v43  ;;  %v27098_v16 = vpack.c.bf16 %v13842_v9, %v13835_v47  ;;  %v27114_v9 = vld [vmem:[%s29106_s7 + $0x140] sm:$0xff]  ;;  %v27124_v47 = vld [vmem:[%s29106_s7 + $0x1d0] sm:$0xff]  ;;  %v27141_v43 = vld [vmem:[%s29106_s7 + $0x1d8] sm:$0xff] }
 0xce7   :  { %30798 = vst [vmem:[#allocation103_spill] sm:$0xff] %v27076_v21  ;;  %v27088_v57 = vpack.c.bf16 %v30801_v34, %v30799_v49  ;;  %v30808_v42 = vand.u32 4294901760, %v30807_v10  ;;  %v30810_v22 = vand.u32 4294901760, %v30809_v30  ;;  %v13849_v53 = vand.u32 4294901760, %v13848_v63  ;;  %20743 = vmatpush3.bf16.msra.mxu0 %v26908_v28 }
 0xce8   :  { %v27096_v61 = vpack.c.bf16 %v30805_v24, %v30803_v39  ;;  %v13856_v7 = vand.u32 4294901760, %v13855_v40  ;;  %v13736_v8 = vsub.f32 %v27011_v55, %v29637_v0  ;;  %v30811_v63 = vand.u32 4294901760, %v27018_v15  ;;  %v30819_v0 = vld [vmem:[#allocation79_spill] sm:$0xff]  ;;  %v30821_v39 = vld [vmem:[#allocation120_spill] sm:$0xff]  ;;  %20745 = vmatprep.subr.bf16.mxu0 %v26962_v46 }
 0xce9   :  { %v27106_v34 = vpack.c.bf16 %v30810_v22, %v30808_v42  ;;  %v30812_v2 = vand.u32 4294901760, %v27039_v23  ;;  %v27144_v60 = vpack.c.bf16 %v13730_v62, %v13723_v13  ;;  %v30815_v24 = vand.u32 4294901760, %v27029_v6  ;;  %v27194_v46 = vld [vmem:[%s29106_s7 + $0x158] sm:$0xff] }
 0xcea   :  { %v13743_v40 = vsub.f32 %v27018_v15, %v30811_v63  ;;  %v30816_v42 = vand.u32 4294901760, %v27034_v38  ;;  %v30817_v63 = vand.u32 4294901760, %v27053_v52  ;;  %v30820_v30 = vand.u32 4294901760, %v30819_v0 }
 0xceb   :  { %v27136_v49 = vsub.f32 %v27039_v23, %v30812_v2  ;;  %v13862_v10 = vsub.f32 %v27029_v6, %v30815_v24  ;;  %v30822_v15 = vand.u32 4294901760, %v30821_v39  ;;  %v29646_v13 = vand.u32 4294901760, %v27114_v9  ;;  %20747 = vmatpush3.bf16.msra.mxu0 %v26968_v18 }
 0xcec   :  { %v13869_v22 = vsub.f32 %v27034_v38, %v30816_v42  ;;  %v27155_v2 = vsub.f32 %v27053_v52, %v30817_v63  ;;  %v30823_v42 = vld [vmem:[#allocation33_spill] sm:$0xff]  ;;  %v27168_v38 = vpack.c.bf16 %v13856_v7, %v13849_v53  ;;  %v30824_v63 = vand.u32 4294901760, %v26752_v29  ;;  %v27189_v7 = vld [vmem:[%s29106_s7 + $0x150] sm:$0xff]  ;;  %20749 = vmatprep.subr.bf16.mxu0 %v27046_v35 }
 0xced   :  { %30813 = vst [vmem:[#allocation45_spill] sm:$0xff] %v27136_v49  ;;  %v27161_v26 = vpack.c.bf16 %v30822_v15, %v30820_v30  ;;  %20783 = vmatpush3.bf16.msra.mxu1 %v30823_v42  ;;  %v30825_v0 = vand.u32 4294901760, %v26760_v4  ;;  %v13737_v15 = vand.u32 4294901760, %v13736_v8  ;;  %v30826_v30 = vld [vmem:[#allocation99_spill] sm:$0xff]  ;;  %v13744_v24 = vand.u32 4294901760, %v13743_v40  ;;  %v27199_v8 = vld [vmem:[%s29106_s7 + $0x1e0] sm:$0xff] }
 0xcee   :  { %30818 = vst [vmem:[#allocation118_spill] sm:$0xff] %v27155_v2  ;;  %20785 = vmatprep.subr.bf16.mxu1 %v30826_v30  ;;  %v30827_v28 = vand.u32 4294901760, %v27071_v5  ;;  %v30828_v53 = vand.u32 4294901760, %v27076_v21  ;;  %v30829_v40 = vand.u32 4294901760, %v26769_v19  ;;  %v13863_v30 = vand.u32 4294901760, %v13862_v10 }
 0xcef   :  { %v27174_v6 = vpack.c.bf16 %v30825_v0, %v30824_v63  ;;  %v30830_v63 = vand.u32 4294901760, %v26774_v48  ;;  %v30832_v4 = vand.u32 4294901760, %v26780_v56  ;;  %v30833_v39 = vand.u32 4294901760, %v26806_v58  ;;  %v27232_v58 = vld [vmem:[%s29106_s7 + $0x1e8] sm:$0xff]  ;;  %v27234_v56 = vpop.permute.xlu0 %11737  ;;  %20751 = vmatpush3.bf16.msra.mxu0 %v27088_v57 }
 0xcf0   :  { %v13750_v42 = vsub.f32 %v27071_v5, %v30827_v28  ;;  %v13757_v29 = vsub.f32 %v27076_v21, %v30828_v53  ;;  %v13870_v28 = vand.u32 4294901760, %v13869_v22  ;;  %v27217_v21 = vsub.f32 %v27114_v9, %v29646_v13  ;;  %30840 = vst [vmem:[#allocation109_spill] sm:$0xff] %v27234_v56  ;;  %20753 = vmatprep.subr.bf16.mxu0 %v27096_v61 }
 0xcf1   :  { %v27205_v0 = vpack.c.bf16 %v30830_v63, %v30829_v40  ;;  %v27212_v62 = vpack.c.bf16 %v30833_v39, %v30832_v4  ;;  %v30836_v19 = vand.u32 4294901760, %v27119_v51  ;;  %v30838_v10 = vand.u32 4294901760, %v27124_v47  ;;  %v27236_v39 = vpop.permute.xlu1 %11721  ;;  %v30841_v4 = vld [vmem:[#allocation102_spill] sm:$0xff] }
 0xcf2   :  { %30835 = vst [vmem:[#allocation119_spill] sm:$0xff] %v27217_v21  ;;  %20787 = vmatpush3.bf16.msra.mxu1 %v30841_v4  ;;  %v30842_v40 = vand.u32 4294901760, %v27141_v43  ;;  %v29658_v13 = vand.u32 4294901760, %v27199_v8  ;;  %v27250_v53 = vpack.c.bf16 %v13744_v24, %v13737_v15  ;;  %v13751_v18 = vand.u32 4294901760, %v13750_v42  ;;  %v27270_v15 = vld [vmem:[%s29106_s7 + $0x160] sm:$0xff]  ;;  %v27275_v42 = vld [vmem:[%s29106_s7 + $0x168] sm:$0xff] }
 0xcf3   :  { %30831 = vst [vmem:[#allocation117_spill] sm:$0xff] %v27205_v0  ;;  %30834 = vst [vmem:[#allocation70_spill] sm:$0xff] %v27212_v62  ;;  %v27222_v48 = vsub.f32 %v27119_v51, %v30836_v19  ;;  %v27227_v22 = vsub.f32 %v27124_v47, %v30838_v10  ;;  %20821 = vmatprep.subr.bf16.mxu1 %v27048_v50  ;;  %v13758_v5 = vand.u32 4294901760, %v13757_v29  ;;  %v30844_v4 = vand.u32 4294901760, %v27136_v49 }
 0xcf4   :  { %v27243_v63 = vsub.f32 %v27141_v43, %v30842_v40  ;;  %v27255_v40 = vpack.c.bf16 %v13870_v28, %v13863_v30  ;;  %v30845_v19 = vand.u32 4294901760, %v26825_v17  ;;  %v30846_v10 = vand.u32 4294901760, %v26830_v14  ;;  %v30849_v14 = vld [vmem:[#allocation114_spill] sm:$0xff]  ;;  %20755 = vmatpush3.bf16.msra.mxu0 %v27106_v34 }
 0xcf5   :  { %30837 = vst [vmem:[#allocation106_spill] sm:$0xff] %v27222_v48  ;;  %30839 = vst [vmem:[#allocation107_spill] sm:$0xff] %v27227_v22  ;;  %v13876_v55 = vsub.f32 %v27136_v49, %v30844_v4  ;;  %v30848_v35 = vand.u32 4294901760, %v27155_v2  ;;  %v11809_v17 = vsel %vm5021_vm11, %v27236_v39, %v27234_v56  ;;  %13521 = vmatmul.mubr.f32.vlgmr.msra.gmra.mrb[116].mxu1 %v30849_v14  ;;  %v30850_v4 = vld [vmem:[#allocation105_spill] sm:$0xff]  ;;  %v30851_v30 = vand.u32 4294901760, %v27189_v7 }
 0xcf6   :  { %30843 = vst [vmem:[#allocation113_spill] sm:$0xff] %v27243_v63  ;;  %v27261_v59 = vpack.c.bf16 %v30846_v10, %v30845_v19  ;;  %v27287_v19 = vld [vmem:[%s29106_s7 + $0x1f0] sm:$0xff]  ;;  %v27292_v10 = vld [vmem:[%s29106_s7 + $0x1f8] sm:$0xff]  ;;  %13526 = vmatprep.mubr.f32.mxu1 %v30850_v4  ;;  %v30853_v29 = vand.u32 4294901760, %v27194_v46  ;;  %v27310_v56 = vsub.f32 %v27199_v8, %v29658_v13  ;;  %20823 = vmatpush3.bf16.msra.mxu1 %v27090_v37  ;;  %v27318_v49 = vand.u32 4294901760, %v11809_v17 }
 0xcf7   :  { %v13883_v50 = vsub.f32 %v27155_v2, %v30848_v35  ;;  %v27300_v28 = vsub.f32 %v27189_v7, %v30851_v30  ;;  %v27314_v57 = vpack.c.bf16 %v13758_v5, %v13751_v18  ;;  %v13877_v35 = vand.u32 4294901760, %v13876_v55  ;;  %20825 = vmatprep.subr.bf16.mxu1 %v27098_v16  ;;  %v27331_v55 = vld [vmem:[%s29106_s7 + $0x170] sm:$0xff]  ;;  %v27336_v5 = vld [vmem:[%s29106_s7 + $0x178] sm:$0xff]  ;;  %v30859_v16 = vld [vmem:[#allocation129_spill] sm:$0xff]  ;;  %20789 = vmatprep.subr.bf16.mxu0 %v27161_v26 }
 0xcf8   :  { %30847 = vst [vmem:[#allocation35_spill] sm:$0xff] %v27261_v59  ;;  %v27305_v24 = vsub.f32 %v27194_v46, %v30853_v29  ;;  %30855 = vst [vmem:[#allocation55_spill] sm:$0xff] %v27310_v56  ;;  %v30857_v29 = vand.u32 4294901760, %v27232_v58  ;;  %v30861_v37 = vand.u32 4294901760, %v27222_v48  ;;  %v30862_v30 = vand.u32 4294901760, %v27227_v22  ;;  %13396 = vmatmul.mubr.f32.vlgmr.msra.gmra.mrb[94].mxu0 %v30849_v14 }
 0xcf9   :  { %30852 = vst [vmem:[#allocation54_spill] sm:$0xff] %v27300_v28  ;;  %30856 = vst [vmem:[#allocation135_spill] sm:$0xff] %v27318_v49  ;;  %13528 = vmatmul.mubr.f32.gmra.mrb[118].mxu1 %v30859_v16  ;;  %v13884_v18 = vand.u32 4294901760, %v13883_v50  ;;  %v30864_v44 = vand.u32 4294901760, %v27243_v63  ;;  %v30867_v12 = vand.u32 4294901760, %v27287_v19  ;;  %13401 = vmatprep.mubr.f32.mxu0 %v30850_v4  ;;  %v30873_v14 = vand.u32 4294901760, %v27310_v56 }
 0xcfa   :  { %30854 = vst [vmem:[#allocation38_spill] sm:$0xff] %v27305_v24  ;;  %v27324_v13 = vsub.f32 %v27232_v58, %v30857_v29  ;;  %v30860_v29 = vand.u32 4294901760, %v27217_v21  ;;  %v13771_v61 = vsub.f32 %v27222_v48, %v30861_v37  ;;  %v13890_v27 = vsub.f32 %v27227_v22, %v30862_v30  ;;  %13533 = vmatprep.mubr.f32.mxu1 %v30863_v11 }
 0xcfb   :  { %v13897_v50 = vsub.f32 %v27243_v63, %v30864_v44  ;;  %20827 = vmatpush3.bf16.msra.mxu1 %v27144_v60  ;;  %v30865_v30 = vand.u32 4294901760, %v27270_v15  ;;  %v30866_v37 = vand.u32 4294901760, %v27275_v42  ;;  %v30868_v63 = vand.u32 4294901760, %v27292_v10  ;;  %v30870_v60 = vld [vmem:[#allocation84_spill] sm:$0xff]  ;;  %20791 = vmatpush3.bf16.msra.mxu0 %v27174_v6 }
 0xcfc   :  { %30858 = vst [vmem:[#allocation112_spill] sm:$0xff] %v27324_v13  ;;  %v13764_v2 = vsub.f32 %v27217_v21, %v30860_v29  ;;  %v27371_v21 = vsub.f32 %v11809_v17, %v27318_v49  ;;  %20829 = vmatprep.subr.bf16.mxu1 %v27168_v38  ;;  %v30869_v29 = vld [vmem:[#allocation111_spill] sm:$0xff]  ;;  %v20836_v17 = vpack.c.bf16 %v13884_v18, %v13877_v35  ;;  %v13772_v48 = vand.u32 4294901760, %v13771_v61 }
 0xcfd   :  { %v27361_v34 = vsub.f32 %v27270_v15, %v30865_v30  ;;  %v27366_v22 = vsub.f32 %v27275_v42, %v30866_v37  ;;  %v27378_v30 = vsub.f32 %v27287_v19, %v30867_v12  ;;  %v27383_v37 = vsub.f32 %v27292_v10, %v30868_v63  ;;  %13535 = vmatmul.mubr.f32.gmra.mrb[120].mxu1 %v30869_v29 }
 0xcfe   :  { %v13765_v44 = vand.u32 4294901760, %v13764_v2  ;;  %v13891_v38 = vand.u32 4294901760, %v13890_v27  ;;  %13540 = vmatprep.mubr.f32.mxu1 %v30870_v60  ;;  %v13898_v45 = vand.u32 4294901760, %v13897_v50  ;;  %v30871_v12 = vand.u32 4294901760, %v27300_v28  ;;  %20793 = vmatprep.subr.bf16.mxu0 %v27205_v0 }
 0xcff   :  { %v30872_v63 = vand.u32 4294901760, %v27305_v24  ;;  %v13904_v35 = vsub.f32 %v27310_v56, %v30873_v14  ;;  %20831 = vmatpush3.bf16.msra.mxu1 %v27250_v53  ;;  %v30874_v4 = vand.u32 4294901760, %v27331_v55  ;;  %v30875_v18 = vand.u32 4294901760, %v27336_v5  ;;  %13403 = vmatmul.mubr.f32.gmra.mrb[96].mxu0 %v30859_v16 }
 0xd00   :  { %v13778_v3 = vsub.f32 %v27300_v28, %v30871_v12  ;;  %v27412_v12 = vpop.permute.xlu0 %11739  ;;  %20833 = vmatprep.subr.bf16.mxu1 %v27255_v40  ;;  %v30877_v14 = vand.u32 4294901760, %v27324_v13  ;;  %v30879_v56 = vand.u32 4294901760, %v26896_v25  ;;  %v20838_v40 = vpack.c.bf16 %v13772_v48, %v13765_v44  ;;  %13408 = vmatprep.mubr.f32.mxu0 %v30863_v11 }
 0xd01   :  { %v13785_v1 = vsub.f32 %v27305_v24, %v30872_v63  ;;  %v27405_v61 = vsub.f32 %v27331_v55, %v30874_v4  ;;  %v27410_v50 = vsub.f32 %v27336_v5, %v30875_v18  ;;  %30876 = vst [vmem:[#allocation121_spill] sm:$0xff] %v27412_v12  ;;  %v27414_v63 = vpop.permute.xlu1 %11723  ;;  %v30878_v18 = vld [vmem:[#allocation62_spill] sm:$0xff]  ;;  %v30880_v24 = vand.u32 4294901760, %v26919_v54  ;;  %20795 = vmatpush3.bf16.msra.mxu0 %v27212_v62 }
 0xd02   :  { %v13911_v4 = vsub.f32 %v27324_v13, %v30877_v14  ;;  %13542 = vmatmul.mubr.f32.gmra.mrb[122].mxu1 %v30878_v18  ;;  %v30881_v53 = vand.u32 4294901760, %v26935_v20  ;;  %v30882_v0 = vand.u32 4294901760, %v26940_v41  ;;  %v20840_v16 = vpack.c.bf16 %v13898_v45, %v13891_v38  ;;  %20797 = vmatprep.subr.bf16.mxu0 %v27261_v59 }
 0xd03   :  { %v27430_v28 = vpack.c.bf16 %v30880_v24, %v30879_v56  ;;  %13929 = vmatprep.mubr.f32.mxu1 %v27318_v49  ;;  %v13779_v27 = vand.u32 4294901760, %v13778_v3  ;;  %v13786_v2 = vand.u32 4294901760, %v13785_v1  ;;  %v13905_v13 = vand.u32 4294901760, %v13904_v35  ;;  %20835 = vmatpush3.bf16.msra.mxu1 %v27314_v57 }
 0xd04   :  { %v27436_v14 = vpack.c.bf16 %v30882_v0, %v30881_v53  ;;  %v30884_v25 = vand.u32 4294901760, %v27361_v34  ;;  %v30885_v20 = vand.u32 4294901760, %v27366_v22  ;;  %v29692_v11 = vand.u32 4294901760, %v27405_v61  ;;  %20837 = vmatprep.subr.bf16.mxu1 %v20836_v17  ;;  %13410 = vmatmul.mubr.f32.gmra.mrb[98].mxu0 %v30869_v29  ;;  %v27461_v44 = vpop.permute.xlu0 %11741 }
 0xd05   :  { %v29691_v0 = vand.u32 4294901760, %v27410_v50  ;;  %v30886_v1 = vand.u32 4294901760, %v27371_v21  ;;  %v13912_v45 = vand.u32 4294901760, %v13911_v4  ;;  %v30887_v48 = vand.u32 4294901760, %v27378_v30  ;;  %30889 = vst [vmem:[#allocation137_spill] sm:$0xff] %v27461_v44  ;;  %v11726_v38 = vpop.permute.xlu1 %11725  ;;  %13415 = vmatprep.mubr.f32.mxu0 %v30870_v60  ;;  %20799 = vmatpush3.bf16.msra.mxu0 %v27430_v28 }
 0xd06   :  { %30883 = vst [vmem:[#allocation136_spill] sm:$0xff] %v27436_v14  ;;  %v13792_v54 = vsub.f32 %v27361_v34, %v30884_v25  ;;  %v13799_v41 = vsub.f32 %v27366_v22, %v30885_v20  ;;  %v30888_v24 = vand.u32 4294901760, %v27383_v37  ;;  %v30890_v17 = vand.u32 4294901760, %v26984_v31  ;;  %20801 = vmatprep.subr.bf16.mxu0 %v27436_v14 }
 0xd07   :  { %v13646_v3 = vsub.f32 %v27371_v21, %v30886_v1  ;;  %v13918_v56 = vsub.f32 %v27378_v30, %v30887_v48  ;;  %v30891_v35 = vand.u32 4294901760, %v26989_v33  ;;  %v20842_v4 = vpack.c.bf16 %v13786_v2, %v13779_v27  ;;  %20839 = vmatpush3.bf16.msra.mxu1 %v20838_v40  ;;  %v30896_v2 = vld [vmem:[#allocation78_spill] sm:$0xff] }
 0xd08   :  { %v13925_v57 = vsub.f32 %v27383_v37, %v30888_v24  ;;  %v30893_v25 = vand.u32 4294901760, %v27039_v23  ;;  %v30894_v20 = vand.u32 4294901760, %v27053_v52  ;;  %v13793_v29 = vand.u32 4294901760, %v13792_v54  ;;  %20841 = vmatprep.subr.bf16.mxu1 %v20840_v16  ;;  %13417 = vmatmul.mubr.f32.gmra.mrb[100].mxu0 %v30878_v18 }
 0xd09   :  { %v27468_v53 = vpack.c.bf16 %v30891_v35, %v30890_v17  ;;  %v13800_v48 = vand.u32 4294901760, %v13799_v41  ;;  %v13806_v31 = vsub.f32 %v27405_v61, %v29692_v11  ;;  %v13813_v33 = vsub.f32 %v27410_v50, %v29691_v0  ;;  %v11728_v18 = vpop.permute.xlu1 %11727  ;;  %v27632_v0 = vld [vmem:[%s29106_s7 + $0x218] sm:$0xff]  ;;  %v30935_v11 = vld [vmem:[#allocation94_spill] sm:$0xff] }
 0xd0a   :  { %v27474_v1 = vpack.c.bf16 %v30894_v20, %v30893_v25  ;;  %v13647_v23 = vand.u32 4294901760, %v13646_v3  ;;  %v20844_v52 = vpack.c.bf16 %v13912_v45, %v13905_v13  ;;  %v13919_v60 = vand.u32 4294901760, %v13918_v56  ;;  %v30905_v20 = vld [vmem:[#allocation101_spill] sm:$0xff]  ;;  %30934 = vst [vmem:[#allocation10_spill] sm:$0xff] %v27632_v0 }
 0xd0b   :  { %30892 = vst [vmem:[#allocation87_spill] sm:$0xff] %v27468_v53  ;;  %v13926_v27 = vand.u32 4294901760, %v13925_v57  ;;  %v11805_v40 = vsel %vm5016_vm10, %v30896_v2, %v27236_v39  ;;  %v11810_v54 = vsel %vm5021_vm11, %v27414_v63, %v27412_v12  ;;  %20803 = vmatpush3.bf16.msra.mxu0 %v27468_v53  ;;  %20843 = vmatpush3.bf16.msra.mxu1 %v20842_v4  ;;  %v30897_v16 = vand.u32 4294901760, %v27114_v9  ;;  %v27502_v57 = vpop.permute.xlu0 %11743  ;;  %v30904_v4 = vld [vmem:[#allocation53_spill] sm:$0xff] }
 0xd0c   :  { %30895 = vst [vmem:[#allocation37_spill] sm:$0xff] %v27474_v1  ;;  %13648 = vmatprep.mubr.f32.mxu0 %v13647_v23  ;;  %v30898_v13 = vand.u32 4294901760, %v27119_v51  ;;  %v20846_v3 = vpack.c.bf16 %v13800_v48, %v13793_v29  ;;  %v13807_v45 = vand.u32 4294901760, %v13806_v31  ;;  %v13814_v56 = vand.u32 4294901760, %v13813_v33  ;;  %30901 = vst [vmem:[#allocation90_spill] sm:$0xff] %v27502_v57  ;;  %20805 = vmatprep.subr.bf16.mxu0 %v27474_v1 }
 0xd0d   :  { %v27498_v39 = vand.u32 4294901760, %v11805_v40  ;;  %v27500_v24 = vand.u32 4294901760, %v11810_v54  ;;  %20845 = vmatprep.subr.bf16.mxu1 %v20844_v52  ;;  %v30902_v17 = vand.u32 4294901760, %v27124_v47  ;;  %v30903_v9 = vand.u32 4294901760, %v27141_v43  ;;  %v30908_v43 = vld [vmem:[#allocation81_spill] sm:$0xff] }
 0xd0e   :  { %v27496_v41 = vpack.c.bf16 %v30898_v13, %v30897_v16  ;;  %v20848_v35 = vpack.c.bf16 %v13926_v27, %v13919_v60  ;;  %v11806_v25 = vsel %vm5016_vm10, %v30904_v4, %v27414_v63  ;;  %v11807_v29 = vsel %vm5016_vm10, %v30905_v20, %v11726_v38 }
 0xd0f   :  { %30899 = vst [vmem:[#allocation91_spill] sm:$0xff] %v27498_v39  ;;  %30900 = vst [vmem:[#allocation77_spill] sm:$0xff] %v27500_v24  ;;  %v27509_v51 = vpack.c.bf16 %v30903_v9, %v30902_v17  ;;  %v11811_v48 = vsel %vm5021_vm11, %v11726_v38, %v27461_v44  ;;  %v30906_v31 = vand.u32 4294901760, %v27189_v7  ;;  %v30907_v33 = vand.u32 4294901760, %v27194_v46  ;;  %20847 = vmatpush3.bf16.msra.mxu1 %v20846_v3  ;;  %v27650_v44 = vld [vmem:[%s29106_s7 + $0x2a8] sm:$0xff] }
 0xd10   :  { %v11808_v23 = vsel %vm5016_vm10, %v30908_v43, %v11728_v18  ;;  %v11812_v52 = vsel %vm5021_vm11, %v11728_v18, %v27502_v57  ;;  %20807 = vmatpush3.bf16.msra.mxu0 %v27496_v41  ;;  %v20850_v63 = vpack.c.bf16 %v13814_v56, %v13807_v45  ;;  %v27530_v60 = vsub.f32 %v11805_v40, %v27498_v39  ;;  %v30928_v43 = vld [vmem:[#allocation117_spill] sm:$0xff] }
 0xd11   :  { %v27522_v47 = vpack.c.bf16 %v30907_v33, %v30906_v31  ;;  %v27533_v38 = vsub.f32 %v11810_v54, %v27500_v24  ;;  %v27535_v7 = vand.u32 4294901760, %v11806_v25  ;;  %20809 = vmatprep.subr.bf16.mxu0 %v27509_v51  ;;  %20849 = vmatprep.subr.bf16.mxu1 %v20848_v35  ;;  %v30910_v46 = vand.u32 4294901760, %v27199_v8  ;;  %v27612_v33 = vld [vmem:[%s29106_s7 + $0x298] sm:$0xff]  ;;  %v27645_v57 = vld [vmem:[%s29106_s7 + $0x2a0] sm:$0xff]  ;;  %30940 = vst [vmem:[#allocation25_spill] sm:$0xff] %v27650_v44 }
 0xd12   :  { %v30911_v27 = vand.u32 4294901760, %v27232_v58  ;;  %v27544_v16 = vand.u32 4294901760, %v11811_v48  ;;  %v27546_v13 = vand.u32 4294901760, %v11807_v29  ;;  %v27548_v40 = vand.u32 4294901760, %v11812_v52  ;;  %30927 = vst [vmem:[#allocation9_spill] sm:$0xff] %v27612_v33  ;;  %30939 = vst [vmem:[#allocation23_spill] sm:$0xff] %v27645_v57 }
 0xd13   :  { %30909 = vst [vmem:[#allocation89_spill] sm:$0xff] %v27535_v7  ;;  %v27550_v3 = vand.u32 4294901760, %v11808_v23  ;;  %20851 = vmatpush3.bf16.msra.mxu1 %v20850_v63  ;;  %v30916_v54 = vand.u32 4294901760, %v27270_v15  ;;  %v30917_v45 = vand.u32 4294901760, %v27275_v42  ;;  %v29694_v58 = vand.u32 4294901760, %v27530_v60  ;;  %v30929_v63 = vld [vmem:[#allocation46_spill] sm:$0xff] }
 0xd14   :  { %v27542_v2 = vpack.c.bf16 %v30911_v27, %v30910_v46  ;;  %30912 = vst [vmem:[#allocation59_spill] sm:$0xff] %v27544_v16  ;;  %30913 = vst [vmem:[#allocation80_spill] sm:$0xff] %v27546_v13  ;;  %20811 = vmatpush3.bf16.msra.mxu0 %v27522_v47  ;;  %v27561_v56 = vsub.f32 %v11806_v25, %v27535_v7  ;;  %20885 = vmatprep.subr.bf16.mxu1 %v27161_v26  ;;  %v30919_v18 = vand.u32 4294901760, %v27287_v19  ;;  %v30930_v46 = vld [vmem:[#allocation72_spill] sm:$0xff] }
 0xd15   :  { %30914 = vst [vmem:[#allocation122_spill] sm:$0xff] %v27548_v40  ;;  %30915 = vst [vmem:[#allocation92_spill] sm:$0xff] %v27550_v3  ;;  %v27557_v8 = vpack.c.bf16 %v30917_v45, %v30916_v54  ;;  %v30920_v17 = vand.u32 4294901760, %v27292_v10  ;;  %v29693_v15 = vand.u32 4294901760, %v27533_v38  ;;  %v27573_v42 = vsub.f32 %v11811_v48, %v27544_v16  ;;  %v30931_v54 = vld [vmem:[#allocation65_spill] sm:$0xff]  ;;  %v30932_v45 = vld [vmem:[#allocation95_spill] sm:$0xff] }
 0xd16   :  { %20813 = vmatprep.subr.bf16.mxu0 %v27542_v2  ;;  %v27576_v35 = vsub.f32 %v11807_v29, %v27546_v13  ;;  %v27579_v4 = vsub.f32 %v11812_v52, %v27548_v40  ;;  %v27582_v25 = vsub.f32 %v11808_v23, %v27550_v3  ;;  %13931 = vmatmul.mubr.f32.vlgmr.msra.gmra.mrb[124].mxu1 %v27498_v39  ;;  %v30924_v19 = vand.u32 4294901760, %v27331_v55  ;;  %v30938_v52 = vld [vmem:[#allocation82_spill] sm:$0xff]  ;;  %v30942_v55 = vld [vmem:[#allocation128_spill] sm:$0xff]  ;;  %v27661_v39 = vld [vmem:[%s29106_s7 + $0x220] sm:$0xff] }
 0xd17   :  { %30918 = vst [vmem:[#allocation11_spill] sm:$0xff] %v27557_v8  ;;  %v27569_v9 = vpack.c.bf16 %v30920_v17, %v30919_v18  ;;  %13936 = vmatprep.mubr.f32.mxu1 %v27500_v24  ;;  %v30925_v10 = vand.u32 4294901760, %v27336_v5  ;;  %v13652_v29 = vsub.f32 %v27530_v60, %v29694_v58  ;;  %20887 = vmatpush3.bf16.msra.mxu1 %v27174_v6  ;;  %v27607_v5 = vld [vmem:[%s29106_s7 + $0x290] sm:$0xff]  ;;  %v30937_v17 = vld [vmem:[#allocation124_spill] sm:$0xff]  ;;  %30944 = vst [vmem:[#allocation27_spill] sm:$0xff] %v27661_v39 }
 0xd18   :  { %30921 = vst [vmem:[#allocation12_spill] sm:$0xff] %v27576_v35  ;;  %30922 = vst [vmem:[#allocation5_spill] sm:$0xff] %v27579_v4  ;;  %20815 = vmatpush3.bf16.msra.mxu0 %v27557_v8  ;;  %v20852_v48 = vpack.c.bf16 %v26799_v32, %v26794_v36  ;;  %v13661_v31 = vsub.f32 %v27533_v38, %v29693_v15  ;;  %20889 = vmatprep.subr.bf16.mxu1 %v30928_v43  ;;  %v30936_v15 = vld [vmem:[#allocation67_spill] sm:$0xff]  ;;  %v27675_v24 = vld [vmem:[%s29106_s7 + $0x228] sm:$0xff] }
 0xd19   :  { %30923 = vst [vmem:[#allocation8_spill] sm:$0xff] %v27582_v25  ;;  %v27591_v20 = vpack.c.bf16 %v30925_v10, %v30924_v19  ;;  %20817 = vmatprep.subr.bf16.mxu0 %v27569_v9  ;;  %30926 = vst [vmem:[#allocation6_spill] sm:$0xff] %v27607_v5  ;;  %v20854_v27 = vpack.c.bf16 %v30930_v46, %v30929_v63  ;;  %v20856_v18 = vpack.c.bf16 %v30932_v45, %v30931_v54  ;;  %v27627_v10 = vld [vmem:[%s29106_s7 + $0x210] sm:$0xff]  ;;  %v30958_v54 = vld [vmem:[#allocation45_spill] sm:$0xff] }
 0xd1a   :  { %13938 = vmatmul.mubr.f32.gmra.mrb[126].mxu1 %v27535_v7  ;;  %30933 = vst [vmem:[#allocation7_spill] sm:$0xff] %v27627_v10  ;;  %v20858_v58 = vpack.c.bf16 %v30936_v15, %v30935_v11  ;;  %v13653_v12 = vand.u32 4294901760, %v13652_v29  ;;  %v30941_v19 = vand.u32 4294901760, %v27561_v56  ;;  %v30943_v7 = vld [vmem:[#allocation127_spill] sm:$0xff]  ;;  %v30945_v29 = vand.u32 4294901760, %v27573_v42  ;;  %30947 = vst [vmem:[#allocation28_spill] sm:$0xff] %v27675_v24 }
 0xd1b   :  { %13943 = vmatprep.mubr.f32.mxu1 %v27544_v16  ;;  %20891 = vmatpush3.bf16.msra.mxu1 %v27212_v62  ;;  %v13662_v16 = vand.u32 4294901760, %v13661_v31  ;;  %v30948_v11 = vand.u32 4294901760, %v27579_v4  ;;  %v30949_v45 = vand.u32 4294901760, %v27582_v25  ;;  %v30956_v15 = vld [vmem:[#allocation108_spill] sm:$0xff] }
 0xd1c   :  { %20819 = vmatpush3.bf16.msra.mxu0 %v27591_v20  ;;  %v13667_v23 = vsub.f32 %v27561_v56, %v30941_v19  ;;  %20893 = vmatprep.subr.bf16.mxu1 %v27261_v59  ;;  %v13676_v49 = vsub.f32 %v27573_v42, %v30945_v29 }
 0xd1d   :  { %20853 = vmatprep.subr.bf16.mxu0 %v20852_v48  ;;  %v30946_v48 = vand.u32 4294901760, %v27576_v35  ;;  %v13691_v29 = vsub.f32 %v27579_v4, %v30948_v11  ;;  %v30954_v11 = vand.u32 4294901760, %v27612_v33  ;;  %v30959_v4 = vld [vmem:[#allocation118_spill] sm:$0xff] }
 0xd1e   :  { %13945 = vmatmul.mubr.f32.gmra.mrb[128].mxu1 %v27546_v13  ;;  %v30952_v13 = vand.u32 4294901760, %v27607_v5 }
 0xd1f   :  { %v13682_v31 = vsub.f32 %v27576_v35, %v30946_v48  ;;  %13654 = vmatmul.mubr.f32.vlgmr.msra.gmra.mrb[102].mxu0 %v13653_v12  ;;  %v27684_v48 = vsub.f32 %v27582_v25, %v30949_v45  ;;  %13950 = vmatprep.mubr.f32.mxu1 %v27548_v40  ;;  %v30950_v35 = vld [vmem:[#allocation100_spill] sm:$0xff]  ;;  %v30951_v12 = vld [vmem:[#allocation31_spill] sm:$0xff]  ;;  %v27699_v45 = vsub.f32 %v27612_v33, %v30954_v11  ;;  %v30963_v25 = vand.u32 4294901760, %v27632_v0 }
 0xd20   :  { %13663 = vmatprep.mubr.f32.mxu0 %v13662_v16  ;;  %v27694_v59 = vsub.f32 %v27607_v5, %v30952_v13  ;;  %20855 = vmatpush3.bf16.msra.mxu0 %v20854_v27  ;;  %v13668_v16 = vand.u32 4294901760, %v13667_v23  ;;  %v30957_v40 = vld [vmem:[#allocation103_spill] sm:$0xff]  ;;  %v13677_v27 = vand.u32 4294901760, %v13676_v49  ;;  %v30961_v23 = vand.u32 4294901760, %v27627_v10  ;;  %v27727_v13 = vld [vmem:[%s29106_s7 + $0x2b8] sm:$0xff] }
 0xd21   :  { %30955 = vst [vmem:[#allocation14_spill] sm:$0xff] %v27699_v45  ;;  %20895 = vmatpush3.bf16.msra.mxu1 %v27430_v28  ;;  %v27711_v5 = vld [vmem:[%s29106_s7 + $0x2b0] sm:$0xff]  ;;  %20857 = vmatprep.subr.bf16.mxu0 %v20856_v18  ;;  %v13683_v11 = vand.u32 4294901760, %v13682_v31  ;;  %v27722_v62 = vsub.f32 %v27632_v0, %v30963_v25  ;;  %30965 = vst [vmem:[#allocation16_spill] sm:$0xff] %v27727_v13  ;;  %v27737_v18 = vld [vmem:[%s29106_s7 + $0x238] sm:$0xff]  ;;  %v13692_v25 = vand.u32 4294901760, %v13691_v29 }
 0xd22   :  { %30953 = vst [vmem:[#allocation13_spill] sm:$0xff] %v27694_v59  ;;  %30960 = vst [vmem:[#allocation18_spill] sm:$0xff] %v27711_v5  ;;  %20897 = vmatprep.subr.bf16.mxu1 %v27436_v14  ;;  %v27717_v19 = vsub.f32 %v27627_v10, %v30961_v23  ;;  %v27732_v49 = vld [vmem:[%s29106_s7 + $0x230] sm:$0xff]  ;;  %13952 = vmatmul.mubr.f32.gmra.mrb[130].mxu1 %v27550_v3  ;;  %v13698_v31 = vand.u32 4294901760, %v27684_v48  ;;  %v30968_v23 = vand.u32 4294901760, %v27645_v57  ;;  %v30970_v10 = vand.u32 4294901760, %v27650_v44 }
 0xd23   :  { %30964 = vst [vmem:[#allocation15_spill] sm:$0xff] %v27722_v62  ;;  %30966 = vst [vmem:[#allocation21_spill] sm:$0xff] %v27732_v49  ;;  %13669 = vmatmul.mubr.f32.gmra.mrb[104].mxu0 %v13668_v16  ;;  %v27754_v14 = vld [vmem:[%s29106_s7 + $0x2c0] sm:$0xff]  ;;  %v27759_v29 = vld [vmem:[%s29106_s7 + $0x2c8] sm:$0xff]  ;;  %v30974_v48 = vand.u32 4294901760, %v27371_v21  ;;  %v30987_v16 = vand.u32 4294901760, %v27711_v5 }
 0xd24   :  { %30962 = vst [vmem:[#allocation20_spill] sm:$0xff] %v27717_v19  ;;  %30967 = vst [vmem:[#allocation22_spill] sm:$0xff] %v27737_v18  ;;  %v27744_v0 = vsub.f32 %v27645_v57, %v30968_v23  ;;  %v27749_v33 = vsub.f32 %v27650_v44, %v30970_v10  ;;  %13678 = vmatprep.mubr.f32.mxu0 %v13677_v27  ;;  %v30975_v10 = vand.u32 4294901760, %v27661_v39  ;;  %v27774_v57 = vld [vmem:[%s29106_s7 + $0x240] sm:$0xff]  ;;  %20859 = vmatpush3.bf16.msra.mxu0 %v20858_v58  ;;  %v27788_v44 = vld [vmem:[%s29106_s7 + $0x248] sm:$0xff] }
 0xd25   :  { %30972 = vst [vmem:[#allocation24_spill] sm:$0xff] %v27754_v14  ;;  %30973 = vst [vmem:[#allocation26_spill] sm:$0xff] %v27759_v29  ;;  %14221 = vmatprep.mubr.f32.mxu1 %v30974_v48  ;;  %20899 = vmatpush3.bf16.msra.mxu1 %v27468_v53  ;;  %v30978_v27 = vand.u32 4294901760, %v27675_v24  ;;  %v30981_v58 = vpack.c.bf16 %v30938_v52, %v30937_v17  ;;  %v30984_v23 = vand.u32 4294901760, %v27694_v59  ;;  %v30990_v52 = vand.u32 4294901760, %v27722_v62  ;;  %v31008_v62 = vld [vmem:[#allocation107_spill] sm:$0xff] }
 0xd26   :  { %30969 = vst [vmem:[#allocation17_spill] sm:$0xff] %v27744_v0  ;;  %30971 = vst [vmem:[#allocation19_spill] sm:$0xff] %v27749_v33  ;;  %v27768_v3 = vsub.f32 %v27661_v39, %v30975_v10  ;;  %20901 = vmatprep.subr.bf16.mxu1 %v27474_v1  ;;  %v27821_v53 = vsub.f32 %v27711_v5, %v30987_v16  ;;  %v30989_v1 = vand.u32 4294901760, %v27717_v19  ;;  %v30995_v39 = vand.u32 4294901760, %v27732_v49  ;;  %v31007_v5 = vld [vmem:[#allocation106_spill] sm:$0xff]  ;;  %v31009_v19 = vld [vmem:[#allocation113_spill] sm:$0xff] }
 0xd27   :  { %30977 = vst [vmem:[#allocation29_spill] sm:$0xff] %v27774_v57  ;;  %v27780_v48 = vsub.f32 %v27675_v24, %v30978_v27  ;;  %30980 = vst [vmem:[#allocation63_spill] sm:$0xff] %v27788_v44  ;;  %20861 = vmatprep.subr.bf16.mxu0 %v30981_v58  ;;  %13684 = vmatmul.mubr.f32.gmra.mrb[106].mxu0 %v13683_v11  ;;  %v27804_v58 = vld [vmem:[%s29106_s7 + $0x2d0] sm:$0xff]  ;;  %v27809_v24 = vld [vmem:[%s29106_s7 + $0x2d8] sm:$0xff]  ;;  %v30985_v11 = vand.u32 4294901760, %v27699_v45  ;;  %v20872_v45 = vpack.c.bf16 %v31009_v19, %v31008_v62 }
 0xd28   :  { %30976 = vst [vmem:[#allocation64_spill] sm:$0xff] %v27768_v3  ;;  %30982 = vst [vmem:[#allocation41_spill] sm:$0xff] %v27804_v58  ;;  %13693 = vmatprep.mubr.f32.mxu0 %v13692_v25  ;;  %v27828_v17 = vpack.c.bf16 %v30990_v52, %v30989_v1  ;;  %v27843_v27 = vsub.f32 %v27732_v49, %v30995_v39  ;;  %v30997_v1 = vand.u32 4294901760, %v27737_v18  ;;  %v31002_v39 = vand.u32 4294901760, %v27754_v14 }
 0xd29   :  { %30979 = vst [vmem:[#allocation44_spill] sm:$0xff] %v27780_v48  ;;  %30983 = vst [vmem:[#allocation36_spill] sm:$0xff] %v27809_v24  ;;  %v27815_v10 = vpack.c.bf16 %v30985_v11, %v30984_v23  ;;  %v30992_v23 = vpack.c.bf16 %v30943_v7, %v30942_v55  ;;  %20903 = vmatpush3.bf16.msra.mxu1 %v27496_v41  ;;  %v30993_v11 = vand.u32 4294901760, %v27727_v13  ;;  %v31010_v59 = vand.u32 4294901760, %v27774_v57 }
 0xd2a   :  { %30988 = vst [vmem:[#allocation50_spill] sm:$0xff] %v27821_v53  ;;  %30991 = vst [vmem:[#allocation43_spill] sm:$0xff] %v27828_v17  ;;  %v27848_v52 = vsub.f32 %v27737_v18, %v30997_v1  ;;  %v31001_v25 = vpack.c.bf16 %v30951_v12, %v30950_v35  ;;  %20905 = vmatprep.subr.bf16.mxu1 %v27509_v51  ;;  %v27867_v1 = vsub.f32 %v27754_v14, %v31002_v39 }
 0xd2b   :  { %30986 = vst [vmem:[#allocation75_spill] sm:$0xff] %v27815_v10  ;;  %20863 = vmatpush3.bf16.msra.mxu0 %v30992_v23  ;;  %v27838_v16 = vsub.f32 %v27727_v13, %v30993_v11  ;;  %30996 = vst [vmem:[#allocation73_spill] sm:$0xff] %v27843_v27  ;;  %v27853_v23 = vld [vmem:[%s29106_s7 + $0x250] sm:$0xff]  ;;  %v27858_v11 = vld [vmem:[%s29106_s7 + $0x258] sm:$0xff]  ;;  %v31004_v17 = vand.u32 4294901760, %v27759_v29  ;;  %v27883_v39 = vsub.f32 %v27774_v57, %v31010_v59  ;;  %v31012_v14 = vand.u32 4294901760, %v27744_v0 }
 0xd2c   :  { %30998 = vst [vmem:[#allocation74_spill] sm:$0xff] %v27848_v52  ;;  %30999 = vst [vmem:[#allocation125_spill] sm:$0xff] %v27853_v23  ;;  %20865 = vmatprep.subr.bf16.mxu0 %v31001_v25  ;;  %13699 = vmatmul.mubr.f32.gmra.mrb[108].mxu0 %v13698_v31  ;;  %v31006_v13 = vld [vmem:[#allocation119_spill] sm:$0xff]  ;;  %v31015_v31 = vand.u32 4294901760, %v27788_v44  ;;  %v27902_v59 = vld [vmem:[%s29106_s7 + $0x2e0] sm:$0xff]  ;;  %v31022_v18 = vpack.c.bf16 %v30957_v40, %v30956_v15 }
 0xd2d   :  { %30994 = vst [vmem:[#allocation76_spill] sm:$0xff] %v27838_v16  ;;  %31000 = vst [vmem:[#allocation126_spill] sm:$0xff] %v27858_v11  ;;  %v27872_v10 = vsub.f32 %v27759_v29, %v31004_v17  ;;  %v20870_v25 = vpack.c.bf16 %v31007_v5, %v31006_v13  ;;  %v31013_v17 = vand.u32 4294901760, %v27749_v33  ;;  %14087 = vmatprep.mubr.f32.mxu0 %v27371_v21  ;;  %v31019_v21 = vand.u32 4294901760, %v27768_v3  ;;  %v31041_v57 = vld [vmem:[#allocation55_spill] sm:$0xff] }
 0xd2e   :  { %31003 = vst [vmem:[#allocation56_spill] sm:$0xff] %v27867_v1  ;;  %31011 = vst [vmem:[#allocation83_spill] sm:$0xff] %v27883_v39  ;;  %v27895_v49 = vsub.f32 %v27788_v44, %v31015_v31  ;;  %20907 = vmatpush3.bf16.msra.mxu1 %v27522_v47  ;;  %v31023_v3 = vpack.c.bf16 %v30959_v4, %v30958_v54  ;;  %v31034_v33 = vand.u32 4294901760, %v27853_v23 }
 0xd2f   :  { %31005 = vst [vmem:[#allocation131_spill] sm:$0xff] %v27872_v10  ;;  %v27889_v29 = vpack.c.bf16 %v31013_v17, %v31012_v14  ;;  %31017 = vst [vmem:[#allocation86_spill] sm:$0xff] %v27902_v59  ;;  %v27907_v14 = vld [vmem:[%s29106_s7 + $0x2e8] sm:$0xff]  ;;  %v31020_v17 = vand.u32 4294901760, %v27780_v48  ;;  %20867 = vmatpush3.bf16.msra.mxu0 %v31022_v18  ;;  %20909 = vmatprep.subr.bf16.mxu1 %v27542_v2 }
 0xd30   :  { %31016 = vst [vmem:[#allocation134_spill] sm:$0xff] %v27895_v49  ;;  %31018 = vst [vmem:[#allocation30_spill] sm:$0xff] %v27907_v14  ;;  %20869 = vmatprep.subr.bf16.mxu0 %v31023_v3  ;;  %v27942_v3 = vld [vmem:[%s29106_s7 + $0x260] sm:$0xff]  ;;  %v27949_v18 = vld [vmem:[%s29106_s7 + $0x268] sm:$0xff]  ;;  %v27968_v0 = vsub.f32 %v27853_v23, %v31034_v33  ;;  %v31044_v23 = vand.u32 4294901760, %v27872_v10 }
 0xd31   :  { %31014 = vst [vmem:[#allocation132_spill] sm:$0xff] %v27889_v29  ;;  %v27913_v31 = vpack.c.bf16 %v31020_v17, %v31019_v21  ;;  %v31024_v17 = vand.u32 4294901760, %v27804_v58  ;;  %v31026_v29 = vand.u32 4294901760, %v27809_v24  ;;  %31027 = vst [vmem:[#allocation51_spill] sm:$0xff] %v27942_v3  ;;  %v31039_v33 = vld [vmem:[#allocation54_spill] sm:$0xff] }
 0xd32   :  { %31035 = vst [vmem:[#allocation123_spill] sm:$0xff] %v27968_v0  ;;  %20911 = vmatpush3.bf16.msra.mxu1 %v27557_v8  ;;  %v31046_v8 = vand.u32 4294901760, %v27883_v39 }
 0xd33   :  { %31021 = vst [vmem:[#allocation42_spill] sm:$0xff] %v27913_v31  ;;  %v27932_v19 = vsub.f32 %v27804_v58, %v31024_v17  ;;  %v27937_v44 = vsub.f32 %v27809_v24, %v31026_v29  ;;  %v31028_v17 = vand.u32 4294901760, %v27821_v53  ;;  %v31029_v31 = vand.u32 4294901760, %v27838_v16  ;;  %20871 = vmatpush3.bf16.msra.mxu0 %v20870_v25  ;;  %20913 = vmatprep.subr.bf16.mxu1 %v27569_v9  ;;  %v28022_v25 = vld [vmem:[%s29106_s7 + $0x270] sm:$0xff] }
 0xd34   :  { %v31031_v24 = vand.u32 4294901760, %v27843_v27  ;;  %v31032_v58 = vand.u32 4294901760, %v27848_v52  ;;  %v31036_v53 = vand.u32 4294901760, %v27858_v11  ;;  %20873 = vmatprep.subr.bf16.mxu0 %v20872_v45  ;;  %v31050_v45 = vand.u32 4294901760, %v27907_v14  ;;  %31052 = vst [vmem:[#allocation85_spill] sm:$0xff] %v28022_v25 }
 0xd35   :  { %31025 = vst [vmem:[#allocation110_spill] sm:$0xff] %v27932_v19  ;;  %v27955_v29 = vpack.c.bf16 %v31029_v31, %v31028_v17  ;;  %v27978_v17 = vld [vmem:[%s29106_s7 + $0x2f0] sm:$0xff]  ;;  %v20880_v16 = vpack.c.bf16 %v27383_v37, %v27378_v30  ;;  %v31054_v27 = vand.u32 4294901760, %v27942_v3 }
 0xd36   :  { %v27961_v48 = vpack.c.bf16 %v31032_v58, %v31031_v24  ;;  %v27973_v31 = vsub.f32 %v27858_v11, %v31036_v53  ;;  %v27983_v24 = vld [vmem:[%s29106_s7 + $0x2f8] sm:$0xff]  ;;  %v31040_v58 = vld [vmem:[#allocation38_spill] sm:$0xff]  ;;  %v31043_v11 = vand.u32 4294901760, %v27867_v1  ;;  %v31049_v1 = vand.u32 4294901760, %v27902_v59  ;;  %20915 = vmatpush3.bf16.msra.mxu1 %v27591_v20 }
 0xd37   :  { %31030 = vst [vmem:[#allocation49_spill] sm:$0xff] %v27955_v29  ;;  %31038 = vst [vmem:[#allocation104_spill] sm:$0xff] %v27983_v24  ;;  %v20874_v21 = vpack.c.bf16 %v31040_v58, %v31039_v33  ;;  %20949 = vmatprep.subr.bf16.mxu1 %v27161_v26  ;;  %v31062_v26 = vand.u32 4294901760, %v27978_v17 }
 0xd38   :  { %31033 = vst [vmem:[#allocation71_spill] sm:$0xff] %v27961_v48  ;;  %31037 = vst [vmem:[#allocation133_spill] sm:$0xff] %v27973_v31  ;;  %v31042_v48 = vld [vmem:[#allocation112_spill] sm:$0xff]  ;;  %v27995_v52 = vpack.c.bf16 %v31044_v23, %v31043_v11  ;;  %v28010_v23 = vsub.f32 %v27902_v59, %v31049_v1  ;;  %v28015_v11 = vsub.f32 %v27907_v14, %v31050_v45  ;;  %v31056_v14 = vand.u32 4294901760, %v27937_v44 }
 0xd39   :  { %v20876_v53 = vpack.c.bf16 %v31042_v48, %v31041_v57  ;;  %v31047_v48 = vand.u32 4294901760, %v27895_v49  ;;  %20875 = vmatpush3.bf16.msra.mxu0 %v20874_v21  ;;  %v31058_v21 = vand.u32 4294901760, %v27949_v18  ;;  %v31065_v49 = vand.u32 4294901760, %v27530_v60 }
 0xd3a   :  { %31045 = vst [vmem:[#allocation93_spill] sm:$0xff] %v27995_v52  ;;  %31051 = vst [vmem:[#allocation98_spill] sm:$0xff] %v28015_v11  ;;  %v31055_v52 = vand.u32 4294901760, %v27932_v19 }
 0xd3b   :  { %v28005_v29 = vpack.c.bf16 %v31047_v48, %v31046_v8  ;;  %v28027_v8 = vld [vmem:[%s29106_s7 + $0x278] sm:$0xff]  ;;  %v20878_v48 = vpack.c.bf16 %v27366_v22, %v27361_v34  ;;  %20877 = vmatprep.subr.bf16.mxu0 %v20876_v53  ;;  %v28051_v45 = vsub.f32 %v27949_v18, %v31058_v21  ;;  %v28066_v53 = vsub.f32 %v27978_v17, %v31062_v26 }
 0xd3c   :  { %31053 = vst [vmem:[#allocation32_spill] sm:$0xff] %v28027_v8  ;;  %v28045_v59 = vpack.c.bf16 %v31056_v14, %v31055_v52  ;;  %v31063_v21 = vand.u32 4294901760, %v27983_v24  ;;  %14225 = vmatmul.mubr.f32.vlgmr.msra.gmra.mrb[132].mxu1 %v31065_v49  ;;  %v31067_v14 = vand.u32 4294901760, %v26794_v36  ;;  %v31068_v26 = vand.u32 4294901760, %v26799_v32 }
 0xd3d   :  { %31048 = vst [vmem:[#allocation116_spill] sm:$0xff] %v28005_v29  ;;  %v28039_v29 = vsub.f32 %v27942_v3, %v31054_v27  ;;  %v31059_v27 = vand.u32 4294901760, %v27968_v0  ;;  %v31060_v3 = vand.u32 4294901760, %v27973_v31  ;;  %20879 = vmatpush3.bf16.msra.mxu0 %v20878_v48  ;;  %20951 = vmatpush3.bf16.msra.mxu1 %v27174_v6  ;;  %v29783_v48 = vand.u32 4294901760, %v28051_v45  ;;  %v28106_v6 = vld [vmem:[%s29106_s7 + $0x280] sm:$0xff] }
 0xd3e   :  { %31057 = vst [vmem:[#allocation52_spill] sm:$0xff] %v28045_v59  ;;  %v28071_v1 = vsub.f32 %v27983_v24, %v31063_v21  ;;  %v20916_v52 = vpack.c.bf16 %v31068_v26, %v31067_v14  ;;  %v31070_v21 = vand.u32 4294901760, %v28015_v11  ;;  %20881 = vmatprep.subr.bf16.mxu0 %v20880_v16  ;;  %v31073_v32 = vand.u32 4294901760, %v28027_v8  ;;  %20953 = vmatprep.subr.bf16.mxu1 %v30928_v43 }
 0xd3f   :  { %v28059_v19 = vpack.c.bf16 %v31060_v3, %v31059_v27  ;;  %v31066_v3 = vand.u32 4294901760, %v27533_v38  ;;  %v20882_v27 = vpack.c.bf16 %v27410_v50, %v27405_v61  ;;  %v29784_v49 = vand.u32 4294901760, %v28039_v29 }
 0xd40   :  { %31064 = vst [vmem:[#allocation60_spill] sm:$0xff] %v28071_v1  ;;  %v28100_v14 = vsub.f32 %v28027_v8, %v31073_v32  ;;  %v31077_v32 = vand.u32 4294901760, %v30929_v63  ;;  %v31079_v26 = vand.u32 4294901760, %v28066_v53  ;;  %v31080_v8 = vand.u32 4294901760, %v28071_v1 }
 0xd41   :  { %31061 = vst [vmem:[#allocation57_spill] sm:$0xff] %v28059_v19  ;;  %14232 = vmatprep.mubr.f32.mxu1 %v31066_v3  ;;  %v31069_v19 = vand.u32 4294901760, %v28010_v23  ;;  %v31072_v3 = vand.u32 4294901760, %v28022_v25  ;;  %v28121_v43 = vpack.c.bf16 %v29783_v48, %v29784_v49  ;;  %20883 = vmatpush3.bf16.msra.mxu0 %v20882_v27  ;;  %v29788_v48 = vand.u32 4294901760, %v28106_v6  ;;  %v31083_v49 = vld [vmem:[#allocation35_spill] sm:$0xff] }
 0xd42   :  { %20917 = vmatprep.subr.bf16.mxu0 %v20916_v52  ;;  %v29786_v63 = vand.u32 4294901760, %v28100_v14  ;;  %v28151_v52 = vld [vmem:[%s29106_s7 + $0x200] sm:$0xff] }
 0xd43   :  { %v28087_v59 = vpack.c.bf16 %v31070_v21, %v31069_v19  ;;  %v28095_v36 = vsub.f32 %v28022_v25, %v31072_v3  ;;  %v28111_v19 = vld [vmem:[%s29106_s7 + $0x288] sm:$0xff]  ;;  %v31074_v21 = vand.u32 4294901760, %v27561_v56  ;;  %31075 = vst [vmem:[#allocation88_spill] sm:$0xff] %v28121_v43  ;;  %v31076_v3 = vand.u32 4294901760, %v27573_v42 }
 0xd44   :  { %v31082_v25 = vld [vmem:[#allocation70_spill] sm:$0xff]  ;;  %14090 = vmatmul.mubr.f32.vlgmr.msra.gmra.mrb[110].mxu0 %v27530_v60  ;;  %v31091_v60 = vld [vmem:[#allocation5_spill] sm:$0xff] }
 0xd45   :  { %31071 = vst [vmem:[#allocation97_spill] sm:$0xff] %v28087_v59  ;;  %14236 = vmatmul.mubr.f32.gmra.mrb[134].mxu1 %v31074_v21  ;;  %v31078_v59 = vand.u32 4294901760, %v30930_v46  ;;  %v28133_v21 = vpack.c.bf16 %v31080_v8, %v31079_v26  ;;  %v31084_v46 = vld [vmem:[#allocation65_spill] sm:$0xff]  ;;  %v31088_v8 = vld [vmem:[#allocation12_spill] sm:$0xff]  ;;  %v28156_v26 = vld [vmem:[%s29106_s7 + $0x208] sm:$0xff]  ;;  %14096 = vmatprep.mubr.f32.mxu0 %v27533_v38 }
 0xd46   :  { %14243 = vmatprep.mubr.f32.mxu1 %v31076_v3  ;;  %20955 = vmatpush3.bf16.msra.mxu1 %v31082_v25  ;;  %v29787_v3 = vand.u32 4294901760, %v28095_v36  ;;  %v31089_v25 = vand.u32 4294901760, %v31088_v8 }
 0xd47   :  { %v20918_v16 = vpack.c.bf16 %v31078_v59, %v31077_v32  ;;  %31081 = vst [vmem:[#allocation34_spill] sm:$0xff] %v28133_v21  ;;  %20957 = vmatprep.subr.bf16.mxu1 %v31083_v49  ;;  %v31085_v59 = vand.u32 4294901760, %v31084_v46  ;;  %v31086_v32 = vld [vmem:[#allocation95_spill] sm:$0xff]  ;;  %v31093_v46 = vld [vmem:[#allocation94_spill] sm:$0xff]  ;;  %v28175_v21 = vsub.f32 %v28106_v6, %v29788_v48 }
 0xd48   :  { %v31087_v43 = vand.u32 4294901760, %v31086_v32  ;;  %v28162_v49 = vpack.c.bf16 %v29786_v63, %v29787_v3  ;;  %v31095_v32 = vld [vmem:[#allocation67_spill] sm:$0xff]  ;;  %v31097_v63 = vand.u32 4294901760, %v28111_v19  ;;  %v31101_v3 = vld [vmem:[#allocation82_spill] sm:$0xff]  ;;  %14099 = vmatmul.mubr.f32.gmra.mrb[112].mxu0 %v27561_v56  ;;  %v31109_v56 = vld [vmem:[#allocation37_spill] sm:$0xff] }
 0xd49   :  { %14247 = vmatmul.mubr.f32.gmra.mrb[136].mxu1 %v31089_v25  ;;  %20919 = vmatpush3.bf16.msra.mxu0 %v20918_v16  ;;  %v31096_v25 = vand.u32 4294901760, %v31095_v32  ;;  %v31099_v16 = vld [vmem:[#allocation124_spill] sm:$0xff] }
 0xd4a   :  { %v20920_v24 = vpack.c.bf16 %v31087_v43, %v31085_v59  ;;  %31090 = vst [vmem:[#allocation58_spill] sm:$0xff] %v28162_v49  ;;  %v31092_v43 = vand.u32 4294901760, %v31091_v60  ;;  %20959 = vmatpush3.bf16.msra.mxu1 %v27430_v28  ;;  %v31094_v59 = vand.u32 4294901760, %v31093_v46  ;;  %v28180_v38 = vsub.f32 %v28111_v19, %v31097_v63  ;;  %14105 = vmatprep.mubr.f32.mxu0 %v27573_v42  ;;  %v31105_v63 = vld [vmem:[#allocation135_spill] sm:$0xff] }
 0xd4b   :  { %v31100_v28 = vand.u32 4294901760, %v31099_v16  ;;  %v31102_v46 = vand.u32 4294901760, %v31101_v3  ;;  %v31108_v3 = vand.u32 4294901760, %v30943_v7  ;;  %v31111_v42 = vand.u32 4294901760, %v30951_v12 }
 0xd4c   :  { %14254 = vmatprep.mubr.f32.mxu1 %v31092_v43  ;;  %v20922_v27 = vpack.c.bf16 %v31096_v25, %v31094_v59  ;;  %20921 = vmatprep.subr.bf16.mxu0 %v20920_v24  ;;  %v31098_v43 = vld [vmem:[#allocation136_spill] sm:$0xff]  ;;  %v29793_v59 = vand.u32 4294901760, %v28151_v52  ;;  %v31106_v24 = vld [vmem:[#allocation87_spill] sm:$0xff]  ;;  %v31112_v7 = vand.u32 4294901760, %v28156_v26  ;;  %v31114_v12 = vand.u32 4294901760, %v30957_v40 }
 0xd4d   :  { %20961 = vmatprep.subr.bf16.mxu1 %v31098_v43  ;;  %v20924_v49 = vpack.c.bf16 %v31102_v46, %v31100_v28  ;;  %v31103_v25 = vld [vmem:[#allocation8_spill] sm:$0xff]  ;;  %v31107_v43 = vand.u32 4294901760, %v30942_v55  ;;  %v29792_v28 = vand.u32 4294901760, %v28175_v21  ;;  %v29791_v46 = vand.u32 4294901760, %v28180_v38  ;;  %14108 = vmatmul.mubr.f32.gmra.mrb[114].mxu0 %v31088_v8 }
 0xd4e   :  { %v31104_v48 = vand.u32 4294901760, %v31103_v25  ;;  %20923 = vmatpush3.bf16.msra.mxu0 %v20922_v27  ;;  %20963 = vmatpush3.bf16.msra.mxu1 %v31106_v24  ;;  %v28209_v27 = vsub.f32 %v28151_v52, %v29793_v59  ;;  %v28214_v55 = vsub.f32 %v28156_v26, %v31112_v7  ;;  %v31115_v8 = vand.u32 4294901760, %v30958_v54 }
 0xd4f   :  { %v20926_v16 = vpack.c.bf16 %v31108_v3, %v31107_v43  ;;  %20925 = vmatprep.subr.bf16.mxu0 %v20924_v49  ;;  %20965 = vmatprep.subr.bf16.mxu1 %v31109_v56  ;;  %v14850_v24 = vsub.f32 %v28175_v21, %v29792_v28  ;;  %v14857_v43 = vsub.f32 %v28180_v38, %v29791_v46  ;;  %v28236_v3 = vpop.permute.xlu1 %11753  ;;  %v31118_v54 = vand.u32 4294901760, %v31007_v5  ;;  %v31122_v5 = vld [vmem:[#allocation13_spill] sm:$0xff] }
 0xd50   :  { %14258 = vmatmul.mubr.f32.gmra.mrb[138].mxu1 %v31104_v48  ;;  %v31110_v48 = vand.u32 4294901760, %v30950_v35  ;;  %14114 = vmatprep.mubr.f32.mxu0 %v31091_v60  ;;  %v31113_v35 = vand.u32 4294901760, %v30956_v15  ;;  %v29790_v15 = vand.u32 4294901760, %v28209_v27  ;;  %v29789_v40 = vand.u32 4294901760, %v28214_v55 }
 0xd51   :  { %14549 = vmatprep.mubr.f32.mxu1 %v31105_v63  ;;  %14117 = vmatmul.mubr.f32.gmra.mrb[116].mxu0 %v31103_v25  ;;  %v31119_v56 = vand.u32 4294901760, %v31008_v62  ;;  %v11770_v62 = vpop.permute.xlu0 %11769 }
 0xd52   :  { %v20928_v32 = vpack.c.bf16 %v31111_v42, %v31110_v48  ;;  %20927 = vmatpush3.bf16.msra.mxu0 %v20926_v16  ;;  %20967 = vmatpush3.bf16.msra.mxu1 %v27496_v41  ;;  %v20930_v49 = vpack.c.bf16 %v31114_v12, %v31113_v35  ;;  %v31116_v41 = vand.u32 4294901760, %v30959_v4  ;;  %v14851_v4 = vand.u32 4294901760, %v14850_v24  ;;  %v31120_v48 = vld [vmem:[#allocation113_spill] sm:$0xff]  ;;  %v31124_v35 = vld [vmem:[#allocation14_spill] sm:$0xff] }
 0xd53   :  { %20969 = vmatprep.subr.bf16.mxu1 %v27509_v51  ;;  %14424 = vmatprep.mubr.f32.mxu0 %v31105_v63  ;;  %v31117_v51 = vand.u32 4294901760, %v31006_v13  ;;  %v14858_v16 = vand.u32 4294901760, %v14857_v43  ;;  %v31121_v42 = vand.u32 4294901760, %v31120_v48  ;;  %v14738_v63 = vsub.f32 %v28209_v27, %v29790_v15  ;;  %v31143_v15 = vld [vmem:[#allocation64_spill] sm:$0xff] }
 0xd54   :  { %20929 = vmatprep.subr.bf16.mxu0 %v20928_v32  ;;  %v20932_v60 = vpack.c.bf16 %v31116_v41, %v31115_v8  ;;  %v31123_v13 = vand.u32 4294901760, %v31122_v5  ;;  %v31125_v12 = vand.u32 4294901760, %v31124_v35  ;;  %v31127_v24 = vand.u32 4294901760, %v31040_v58  ;;  %v31129_v41 = vld [vmem:[#allocation112_spill] sm:$0xff] }
 0xd55   :  { %v20934_v32 = vpack.c.bf16 %v31118_v54, %v31117_v51  ;;  %v20936_v25 = vpack.c.bf16 %v31121_v42, %v31119_v56  ;;  %v31128_v8 = vand.u32 4294901760, %v31041_v57  ;;  %v28270_v54 = vpop.permute.xlu1 %11785  ;;  %v31132_v56 = vld [vmem:[#allocation11_spill] sm:$0xff]  ;;  %v21012_v48 = vpack.c.bf16 %v14858_v16, %v14851_v4  ;;  %v31133_v42 = vld [vmem:[#allocation20_spill] sm:$0xff] }
 0xd56   :  { %20931 = vmatpush3.bf16.msra.mxu0 %v20930_v49  ;;  %20971 = vmatpush3.bf16.msra.mxu1 %v27522_v47  ;;  %v14745_v47 = vsub.f32 %v28214_v55, %v29789_v40  ;;  %v14864_v7 = vsub.f32 %v31122_v5, %v31123_v13  ;;  %v31126_v49 = vand.u32 4294901760, %v31039_v33  ;;  %31131 = vst [vmem:[#allocation68_spill] sm:$0xff] %v28270_v54  ;;  %v31134_v13 = vand.u32 4294901760, %v31133_v42  ;;  %v31135_v40 = vld [vmem:[#allocation15_spill] sm:$0xff] }
 0xd57   :  { %20933 = vmatprep.subr.bf16.mxu0 %v20932_v60  ;;  %20973 = vmatprep.subr.bf16.mxu1 %v27542_v2  ;;  %v14871_v2 = vsub.f32 %v31124_v35, %v31125_v12  ;;  %v31130_v60 = vand.u32 4294901760, %v31129_v41  ;;  %v31136_v33 = vand.u32 4294901760, %v31135_v40  ;;  %v14739_v57 = vand.u32 4294901760, %v14738_v63  ;;  %v31139_v41 = vld [vmem:[#allocation19_spill] sm:$0xff] }
 0xd58   :  { %v20938_v43 = vpack.c.bf16 %v31127_v24, %v31126_v49  ;;  %v14752_v12 = vsub.f32 %v31133_v42, %v31134_v13  ;;  %v14746_v49 = vand.u32 4294901760, %v14745_v47  ;;  %v31137_v24 = vld [vmem:[#allocation17_spill] sm:$0xff]  ;;  %v11817_v16 = vsel %vm4710_vm3, %v28236_v3, %v11770_v62  ;;  %v31145_v62 = vld [vmem:[#allocation44_spill] sm:$0xff] }
 0xd59   :  { %v20940_v51 = vpack.c.bf16 %v31130_v60, %v31128_v8  ;;  %v14759_v58 = vsub.f32 %v31135_v40, %v31136_v33  ;;  %v31138_v8 = vand.u32 4294901760, %v31137_v24  ;;  %v31140_v60 = vand.u32 4294901760, %v31139_v41 }
 0xd5a   :  { %20935 = vmatpush3.bf16.msra.mxu0 %v20934_v32  ;;  %20975 = vmatpush3.bf16.msra.mxu1 %v31132_v56  ;;  %v14865_v56 = vand.u32 4294901760, %v14864_v7  ;;  %v14872_v13 = vand.u32 4294901760, %v14871_v2  ;;  %v31142_v63 = vand.u32 4294901760, %v27366_v22  ;;  %v14753_v33 = vand.u32 4294901760, %v14752_v12 }
 0xd5b   :  { %20937 = vmatprep.subr.bf16.mxu0 %v20936_v25  ;;  %20977 = vmatprep.subr.bf16.mxu1 %v27569_v9  ;;  %v14878_v32 = vsub.f32 %v31137_v24, %v31138_v8  ;;  %v14885_v4 = vsub.f32 %v31139_v41, %v31140_v60  ;;  %v11821_v25 = vsel %vm5035_vm13, %v11817_v16, %v28270_v54  ;;  %v31141_v9 = vand.u32 4294901760, %v27361_v34 }
 0xd5c   :  { %v14760_v8 = vand.u32 4294901760, %v14759_v58  ;;  %v31144_v60 = vand.u32 4294901760, %v31143_v15  ;;  %v31146_v7 = vand.u32 4294901760, %v31145_v62  ;;  %v21014_v16 = vpack.c.bf16 %v14746_v49, %v14739_v57  ;;  %v31149_v58 = vld [vmem:[#allocation50_spill] sm:$0xff]  ;;  %v31157_v57 = vld [vmem:[#allocation77_spill] sm:$0xff] }
 0xd5d   :  { %v20942_v47 = vpack.c.bf16 %v31142_v63, %v31141_v9  ;;  %v31147_v34 = vand.u32 4294901760, %v27378_v30  ;;  %v31148_v22 = vand.u32 4294901760, %v27383_v37  ;;  %v14879_v9 = vand.u32 4294901760, %v14878_v32 }
 0xd5e   :  { %20939 = vmatpush3.bf16.msra.mxu0 %v20938_v43  ;;  %20979 = vmatpush3.bf16.msra.mxu1 %v27591_v20  ;;  %v14766_v46 = vsub.f32 %v31143_v15, %v31144_v60  ;;  %v14773_v2 = vsub.f32 %v31145_v62, %v31146_v7  ;;  %v14886_v20 = vand.u32 4294901760, %v14885_v4  ;;  %v21016_v12 = vpack.c.bf16 %v14872_v13, %v14865_v56  ;;  %v31151_v60 = vld [vmem:[#allocation76_spill] sm:$0xff] }
 0xd5f   :  { %20941 = vmatprep.subr.bf16.mxu0 %v20940_v51  ;;  %21013 = vmatprep.subr.bf16.mxu1 %v21012_v48  ;;  %v20944_v43 = vpack.c.bf16 %v31148_v22, %v31147_v34  ;;  %v31150_v63 = vand.u32 4294901760, %v31149_v58  ;;  %v31152_v59 = vand.u32 4294901760, %v31151_v60  ;;  %v28311_v7 = vand.u32 4294901760, %v11821_v25  ;;  %v31154_v51 = vld [vmem:[#allocation91_spill] sm:$0xff]  ;;  %v28325_v34 = vpop.permute.xlu0 %11755  ;;  %v31160_v22 = vld [vmem:[#allocation73_spill] sm:$0xff] }
 0xd60   :  { %v31155_v30 = vand.u32 4294901760, %v27405_v61  ;;  %v31156_v37 = vand.u32 4294901760, %v27410_v50  ;;  %v21018_v49 = vpack.c.bf16 %v14760_v8, %v14753_v33  ;;  %v31158_v32 = vand.u32 4294901760, %v28106_v6  ;;  %v31164_v8 = vld [vmem:[#allocation56_spill] sm:$0xff] }
 0xd61   :  { %v14892_v28 = vsub.f32 %v31149_v58, %v31150_v63  ;;  %v14899_v54 = vsub.f32 %v31151_v60, %v31152_v59  ;;  %31153 = vst [vmem:[#allocation96_spill] sm:$0xff] %v28311_v7  ;;  %14551 = vmatmul.mubr.f32.vlgmr.msra.gmra.mrb[140].mxu1 %v31154_v51  ;;  %v31159_v4 = vand.u32 4294901760, %v28111_v19  ;;  %v14767_v59 = vand.u32 4294901760, %v14766_v46  ;;  %v31162_v63 = vld [vmem:[#allocation74_spill] sm:$0xff] }
 0xd62   :  { %v20946_v48 = vpack.c.bf16 %v31156_v37, %v31155_v30  ;;  %20943 = vmatpush3.bf16.msra.mxu0 %v20942_v47  ;;  %14556 = vmatprep.mubr.f32.mxu1 %v31157_v57  ;;  %v14774_v13 = vand.u32 4294901760, %v14773_v2  ;;  %v21020_v61 = vpack.c.bf16 %v14886_v20, %v14879_v9  ;;  %v31161_v50 = vand.u32 4294901760, %v31160_v22  ;;  %v31167_v9 = vld [vmem:[#allocation89_spill] sm:$0xff] }
 0xd63   :  { %v28323_v56 = vpack.c.bf16 %v31159_v4, %v31158_v32  ;;  %21015 = vmatpush3.bf16.msra.mxu1 %v21014_v16  ;;  %20945 = vmatprep.subr.bf16.mxu0 %v20944_v43  ;;  %v31163_v30 = vand.u32 4294901760, %v31162_v63  ;;  %v14893_v6 = vand.u32 4294901760, %v14892_v28  ;;  %v14900_v19 = vand.u32 4294901760, %v14899_v54  ;;  %v28349_v28 = vpop.permute.xlu1 %11771  ;;  %v31170_v54 = vld [vmem:[#allocation59_spill] sm:$0xff] }
 0xd64   :  { %v14780_v47 = vsub.f32 %v31160_v22, %v31161_v50  ;;  %21017 = vmatprep.subr.bf16.mxu1 %v21016_v12  ;;  %v31165_v37 = vand.u32 4294901760, %v31164_v8  ;;  %v31166_v2 = vand.u32 4294901760, %v27872_v10  ;;  %v28340_v43 = vsub.f32 %v11821_v25, %v28311_v7  ;;  %v31172_v25 = vld [vmem:[#allocation134_spill] sm:$0xff] }
 0xd65   :  { %v14787_v33 = vsub.f32 %v31162_v63, %v31163_v30  ;;  %14558 = vmatmul.mubr.f32.gmra.mrb[142].mxu1 %v31167_v9  ;;  %v31168_v20 = vand.u32 4294901760, %v28151_v52  ;;  %v31169_v32 = vand.u32 4294901760, %v28156_v26  ;;  %v21022_v4 = vpack.c.bf16 %v14774_v13, %v14767_v59  ;;  %v31177_v13 = vld [vmem:[#allocation6_spill] sm:$0xff] }
 0xd66   :  { %v14906_v46 = vsub.f32 %v31164_v8, %v31165_v37  ;;  %v14913_v16 = vsub.f32 %v27872_v10, %v31166_v2  ;;  %20947 = vmatpush3.bf16.msra.mxu0 %v20946_v48  ;;  %14563 = vmatprep.mubr.f32.mxu1 %v31170_v54  ;;  %v31171_v50 = vand.u32 4294901760, %v27883_v39  ;;  %v31173_v37 = vand.u32 4294901760, %v31172_v25  ;;  %v31185_v22 = vld [vmem:[#allocation10_spill] sm:$0xff] }
 0xd67   :  { %v28347_v12 = vpack.c.bf16 %v31169_v32, %v31168_v20  ;;  %21019 = vmatpush3.bf16.msra.mxu1 %v21018_v49  ;;  %20981 = vmatprep.subr.bf16.mxu0 %v28323_v56  ;;  %v14781_v52 = vand.u32 4294901760, %v14780_v47  ;;  %v14788_v26 = vand.u32 4294901760, %v14787_v33  ;;  %v31174_v20 = vld [vmem:[#allocation110_spill] sm:$0xff]  ;;  %v31176_v10 = vand.u32 4294901760, %v27937_v44  ;;  %v28371_v47 = vpop.permute.xlu0 %11787  ;;  %v31182_v33 = vld [vmem:[#allocation80_spill] sm:$0xff] }
 0xd68   :  { %v14794_v30 = vsub.f32 %v27883_v39, %v31171_v50  ;;  %v14801_v2 = vsub.f32 %v31172_v25, %v31173_v37  ;;  %v31175_v32 = vand.u32 4294901760, %v31174_v20  ;;  %21021 = vmatprep.subr.bf16.mxu1 %v21020_v61  ;;  %v31178_v50 = vand.u32 4294901760, %v31177_v13  ;;  %v31179_v39 = vld [vmem:[#allocation9_spill] sm:$0xff]  ;;  %31181 = vst [vmem:[#allocation66_spill] sm:$0xff] %v28371_v47  ;;  %v28397_v13 = vpop.permute.xlu1 %11757 }
 0xd69   :  { %v14927_v59 = vsub.f32 %v27937_v44, %v31176_v10  ;;  %v31180_v8 = vand.u32 4294901760, %v31179_v39  ;;  %v21024_v49 = vpack.c.bf16 %v14900_v19, %v14893_v6  ;;  %v14907_v37 = vand.u32 4294901760, %v14906_v46  ;;  %14426 = vmatmul.mubr.f32.vlgmr.msra.gmra.mrb[118].mxu0 %v31154_v51  ;;  %14565 = vmatmul.mubr.f32.gmra.mrb[144].mxu1 %v31182_v33  ;;  %v31187_v39 = vld [vmem:[#allocation122_spill] sm:$0xff] }
 0xd6a   :  { %v14920_v48 = vsub.f32 %v31174_v20, %v31175_v32  ;;  %v14914_v25 = vand.u32 4294901760, %v14913_v16  ;;  %v31183_v32 = vld [vmem:[#allocation7_spill] sm:$0xff]  ;;  %v31186_v10 = vand.u32 4294901760, %v31185_v22  ;;  %14431 = vmatprep.mubr.f32.mxu0 %v31157_v57  ;;  %14570 = vmatprep.mubr.f32.mxu1 %v31187_v39  ;;  %v14795_v6 = vand.u32 4294901760, %v14794_v30 }
 0xd6b   :  { %v28369_v63 = vpack.c.bf16 %v31180_v8, %v31178_v50  ;;  %v31184_v20 = vand.u32 4294901760, %v31183_v32  ;;  %v14802_v19 = vand.u32 4294901760, %v14801_v2  ;;  %v31188_v8 = vand.u32 4294901760, %v27968_v0  ;;  %20983 = vmatpush3.bf16.msra.mxu0 %v28347_v12  ;;  %21023 = vmatpush3.bf16.msra.mxu1 %v21022_v4  ;;  %v31192_v32 = vld [vmem:[#allocation25_spill] sm:$0xff] }
 0xd6c   :  { %v31189_v46 = vand.u32 4294901760, %v27973_v31  ;;  %v21026_v22 = vpack.c.bf16 %v14788_v26, %v14781_v52  ;;  %v31193_v57 = vand.u32 4294901760, %v31192_v32  ;;  %v14921_v30 = vand.u32 4294901760, %v14920_v48  ;;  %21025 = vmatprep.subr.bf16.mxu1 %v21024_v49  ;;  %v31196_v26 = vld [vmem:[#allocation92_spill] sm:$0xff]  ;;  %v31197_v48 = vld [vmem:[#allocation27_spill] sm:$0xff]  ;;  %v31201_v49 = vld [vmem:[#allocation18_spill] sm:$0xff] }
 0xd6d   :  { %v28379_v61 = vpack.c.bf16 %v31186_v10, %v31184_v20  ;;  %v14808_v51 = vsub.f32 %v27968_v0, %v31188_v8  ;;  %v31190_v20 = vld [vmem:[#allocation23_spill] sm:$0xff]  ;;  %v14928_v2 = vand.u32 4294901760, %v14927_v59  ;;  %20985 = vmatprep.subr.bf16.mxu0 %v28369_v63  ;;  %v21028_v8 = vpack.c.bf16 %v14914_v25, %v14907_v37  ;;  %14433 = vmatmul.mubr.f32.gmra.mrb[120].mxu0 %v31167_v9  ;;  %v31203_v37 = vld [vmem:[#allocation16_spill] sm:$0xff] }
 0xd6e   :  { %v14815_v16 = vsub.f32 %v27973_v31, %v31189_v46  ;;  %v31191_v50 = vand.u32 4294901760, %v31190_v20  ;;  %v31194_v46 = vand.u32 4294901760, %v28010_v23  ;;  %v31195_v4 = vand.u32 4294901760, %v28015_v11  ;;  %14572 = vmatmul.mubr.f32.gmra.mrb[146].mxu1 %v31196_v26  ;;  %v31199_v20 = vld [vmem:[#allocation28_spill] sm:$0xff]  ;;  %14438 = vmatprep.mubr.f32.mxu0 %v31170_v54 }
 0xd6f   :  { %v31198_v59 = vand.u32 4294901760, %v31197_v48  ;;  %v31202_v25 = vand.u32 4294901760, %v31201_v49  ;;  %14959 = vmatprep.mubr.f32.mxu1 %v28311_v7  ;;  %v31205_v9 = vand.u32 4294901760, %v28340_v43  ;;  %v14809_v48 = vand.u32 4294901760, %v14808_v51  ;;  %20987 = vmatpush3.bf16.msra.mxu0 %v28379_v61 }
 0xd70   :  { %v28395_v10 = vpack.c.bf16 %v31193_v57, %v31191_v50  ;;  %v14934_v31 = vsub.f32 %v28010_v23, %v31194_v46  ;;  %v14941_v52 = vsub.f32 %v28015_v11, %v31195_v4  ;;  %v31200_v50 = vand.u32 4294901760, %v31199_v20  ;;  %v11774_v20 = vpop.permute.xlu0 %11773  ;;  %21027 = vmatpush3.bf16.msra.mxu1 %v21026_v22 }
 0xd71   :  { %v31204_v57 = vand.u32 4294901760, %v31203_v37  ;;  %v21030_v46 = vpack.c.bf16 %v14802_v19, %v14795_v6  ;;  %v14676_v4 = vsub.f32 %v28340_v43, %v31205_v9  ;;  %v14816_v11 = vand.u32 4294901760, %v14815_v16  ;;  %21029 = vmatprep.subr.bf16.mxu1 %v21028_v8  ;;  %14440 = vmatmul.mubr.f32.gmra.mrb[122].mxu0 %v31182_v33  ;;  %v31214_v9 = vld [vmem:[#allocation22_spill] sm:$0xff] }
 0xd72   :  { %v28412_v32 = vpack.c.bf16 %v31200_v50, %v31198_v59  ;;  %v21032_v59 = vpack.c.bf16 %v14928_v2, %v14921_v30  ;;  %v31206_v50 = vand.u32 4294901760, %v28039_v29  ;;  %v31207_v54 = vand.u32 4294901760, %v28051_v45  ;;  %20989 = vmatprep.subr.bf16.mxu0 %v28395_v10  ;;  %v31210_v2 = vld [vmem:[#allocation109_spill] sm:$0xff]  ;;  %14445 = vmatprep.mubr.f32.mxu0 %v31187_v39 }
 0xd73   :  { %v28418_v0 = vpack.c.bf16 %v31204_v57, %v31202_v25  ;;  %v14935_v6 = vand.u32 4294901760, %v14934_v31  ;;  %v14942_v19 = vand.u32 4294901760, %v14941_v52  ;;  %v31208_v51 = vand.u32 4294901760, %v28066_v53  ;;  %v28446_v31 = vpop.permute.xlu1 %11789  ;;  %v31212_v52 = vld [vmem:[#allocation21_spill] sm:$0xff] }
 0xd74   :  { %v14822_v49 = vsub.f32 %v28039_v29, %v31206_v50  ;;  %v14829_v25 = vsub.f32 %v28051_v45, %v31207_v54  ;;  %v31209_v22 = vand.u32 4294901760, %v28071_v1  ;;  %v11813_v37 = vsel %vm5026_vm12, %v31210_v2, %v28236_v3  ;;  %31211 = vst [vmem:[#allocation48_spill] sm:$0xff] %v28446_v31  ;;  %v31218_v3 = vld [vmem:[#allocation26_spill] sm:$0xff]  ;;  %20991 = vmatpush3.bf16.msra.mxu0 %v28412_v32 }
 0xd75   :  { %v14948_v16 = vsub.f32 %v28066_v53, %v31208_v51  ;;  %v11818_v8 = vsel %vm4710_vm3, %v28325_v34, %v28349_v28  ;;  %v31213_v57 = vand.u32 4294901760, %v31212_v52  ;;  %v31215_v50 = vand.u32 4294901760, %v31214_v9  ;;  %21031 = vmatpush3.bf16.msra.mxu1 %v21030_v46  ;;  %20993 = vmatprep.subr.bf16.mxu0 %v28418_v0 }
 0xd76   :  { %v14955_v30 = vsub.f32 %v28071_v1, %v31209_v22  ;;  %v21034_v51 = vpack.c.bf16 %v14816_v11, %v14809_v48  ;;  %v31216_v22 = vld [vmem:[#allocation24_spill] sm:$0xff]  ;;  %v31219_v2 = vand.u32 4294901760, %v31218_v3  ;;  %v14823_v28 = vand.u32 4294901760, %v14822_v49  ;;  %21033 = vmatprep.subr.bf16.mxu1 %v21032_v59  ;;  %14447 = vmatmul.mubr.f32.gmra.mrb[124].mxu0 %v31196_v26  ;;  %v31227_v26 = vld [vmem:[#allocation41_spill] sm:$0xff] }
 0xd77   :  { %v28453_v54 = vpack.c.bf16 %v31215_v50, %v31213_v57  ;;  %v31217_v7 = vand.u32 4294901760, %v31216_v22  ;;  %v14830_v1 = vand.u32 4294901760, %v14829_v25  ;;  %v31220_v39 = vand.u32 4294901760, %v28095_v36  ;;  %v11760_v22 = vpop.permute.xlu0 %11759  ;;  %v31223_v25 = vld [vmem:[#allocation29_spill] sm:$0xff] }
 0xd78   :  { %v31221_v9 = vand.u32 4294901760, %v28100_v14  ;;  %v14677_v11 = vand.u32 4294901760, %v14676_v4  ;;  %v21036_v48 = vpack.c.bf16 %v14942_v19, %v14935_v6  ;;  %v14956_v50 = vand.u32 4294901760, %v14955_v30  ;;  %v11776_v30 = vpop.permute.xlu1 %11775 }
 0xd79   :  { %v28459_v33 = vpack.c.bf16 %v31219_v2, %v31217_v7  ;;  %v14836_v52 = vsub.f32 %v28095_v36, %v31220_v39  ;;  %v14949_v7 = vand.u32 4294901760, %v14948_v16  ;;  %v28470_v46 = vand.u32 4294901760, %v11813_v37  ;;  %20995 = vmatpush3.bf16.msra.mxu0 %v28453_v54  ;;  %21035 = vmatpush3.bf16.msra.mxu1 %v21034_v51  ;;  %v31225_v2 = vld [vmem:[#allocation63_spill] sm:$0xff] }
 0xd7a   :  { %v14843_v57 = vsub.f32 %v28100_v14, %v31221_v9  ;;  %v11822_v49 = vsel %vm5035_vm13, %v11818_v8, %v28371_v47  ;;  %14678 = vmatprep.mubr.f32.mxu0 %v14677_v11  ;;  %v31224_v3 = vand.u32 4294901760, %v31223_v25  ;;  %v31226_v59 = vand.u32 4294901760, %v31225_v2  ;;  %21037 = vmatprep.subr.bf16.mxu1 %v21036_v48  ;;  %v31229_v8 = vld [vmem:[#allocation36_spill] sm:$0xff]  ;;  %v31231_v25 = vld [vmem:[#allocation121_spill] sm:$0xff] }
 0xd7b   :  { %31222 = vst [vmem:[#allocation69_spill] sm:$0xff] %v28470_v46  ;;  %v21038_v6 = vpack.c.bf16 %v14830_v1, %v14823_v28  ;;  %v14837_v19 = vand.u32 4294901760, %v14836_v52  ;;  %20997 = vmatprep.subr.bf16.mxu0 %v28459_v33  ;;  %v31228_v39 = vand.u32 4294901760, %v31227_v26  ;;  %v31230_v9 = vand.u32 4294901760, %v31229_v8  ;;  %v31238_v8 = vld [vmem:[#allocation86_spill] sm:$0xff] }
 0xd7c   :  { %v28479_v4 = vpack.c.bf16 %v31226_v59, %v31224_v3  ;;  %v14844_v16 = vand.u32 4294901760, %v14843_v57  ;;  %v21040_v51 = vpack.c.bf16 %v14956_v50, %v14949_v7  ;;  %v11814_v2 = vsel %vm5026_vm12, %v31231_v25, %v28325_v34  ;;  %v28500_v57 = vpop.permute.xlu0 %11791  ;;  %v31234_v7 = vld [vmem:[#allocation125_spill] sm:$0xff]  ;;  %v31236_v50 = vld [vmem:[#allocation126_spill] sm:$0xff] }
 0xd7d   :  { %v28486_v11 = vpack.c.bf16 %v31230_v9, %v31228_v39  ;;  %v28491_v3 = vand.u32 4294901760, %v11822_v49  ;;  %v11819_v1 = vsel %vm4710_vm3, %v28397_v13, %v11774_v20  ;;  %v28496_v28 = vsub.f32 %v11813_v37, %v28470_v46  ;;  %31233 = vst [vmem:[#allocation79_spill] sm:$0xff] %v28500_v57  ;;  %21039 = vmatpush3.bf16.msra.mxu1 %v21038_v6  ;;  %v17750_v37 = vpop.f32.mrb[100].mxu1  ;;  %v31240_v25 = vld [vmem:[#allocation30_spill] sm:$0xff] }
 0xd7e   :  { %v11823_v52 = vsel %vm5035_vm13, %v11819_v1, %v28446_v31  ;;  %v11820_v48 = vsel %vm4710_vm3, %v11760_v22, %v11776_v30  ;;  %20999 = vmatpush3.bf16.msra.mxu0 %v28479_v4  ;;  %v31235_v34 = vand.u32 4294901760, %v31234_v7  ;;  %v31237_v59 = vand.u32 4294901760, %v31236_v50  ;;  %21041 = vmatprep.subr.bf16.mxu1 %v21040_v51  ;;  %v31242_v7 = vld [vmem:[#allocation137_spill] sm:$0xff] }
 0xd7f   :  { %31232 = vst [vmem:[#allocation47_spill] sm:$0xff] %v28491_v3  ;;  %v21042_v20 = vpack.c.bf16 %v14844_v16, %v14837_v19  ;;  %v28510_v39 = vand.u32 4294901760, %v11814_v2  ;;  %21001 = vmatprep.subr.bf16.mxu0 %v28486_v11  ;;  %v31239_v9 = vand.u32 4294901760, %v31238_v8  ;;  %v31241_v30 = vand.u32 4294901760, %v31240_v25  ;;  %v17751_v16 = vpop.f32.mrb[101].mxu1  ;;  %v31244_v8 = vld [vmem:[#allocation51_spill] sm:$0xff] }
 0xd80   :  { %v28508_v26 = vpack.c.bf16 %v31237_v59, %v31235_v34  ;;  %v28520_v6 = vsub.f32 %v11822_v49, %v28491_v3  ;;  %v11815_v34 = vsel %vm5026_vm12, %v31242_v7, %v28397_v13  ;;  %v28525_v19 = vand.u32 4294901760, %v11823_v52  ;;  %v31247_v7 = vld [vmem:[#allocation90_spill] sm:$0xff] }
 0xd81   :  { %v28517_v1 = vpack.c.bf16 %v31241_v30, %v31239_v9  ;;  %v11824_v51 = vsel %vm5035_vm13, %v11820_v48, %v28500_v57  ;;  %v17752_v50 = vadd.f32 %v17751_v16, %v17750_v37  ;;  %v29810_v59 = vand.u32 4294901760, %v28496_v28  ;;  %21043 = vmatpush3.bf16.msra.mxu1 %v21042_v20  ;;  %v31249_v37 = vld [vmem:[#allocation104_spill] sm:$0xff] }
 0xd82   :  { %31243 = vst [vmem:[#allocation120_spill] sm:$0xff] %v28525_v19  ;;  %21003 = vmatpush3.bf16.msra.mxu0 %v28508_v26  ;;  %v31245_v9 = vand.u32 4294901760, %v31244_v8  ;;  %v31246_v49 = vand.u32 4294901760, %v27949_v18  ;;  %v28538_v13 = vsub.f32 %v11814_v2, %v28510_v39  ;;  %v28540_v30 = vand.u32 4294901760, %v11815_v34  ;;  %21077 = vmatprep.subr.bf16.mxu1 %v28323_v56 }
 0xd83   :  { %v11816_v48 = vsel %vm5026_vm12, %v31247_v7, %v11760_v22  ;;  %21005 = vmatprep.subr.bf16.mxu0 %v28517_v1  ;;  %v31248_v20 = vand.u32 4294901760, %v27978_v17  ;;  %v31250_v16 = vand.u32 4294901760, %v31249_v37  ;;  %v28553_v18 = vsub.f32 %v11823_v52, %v28525_v19 }
 0xd84   :  { %v28535_v25 = vpack.c.bf16 %v31246_v49, %v31245_v9  ;;  %v28555_v2 = vand.u32 4294901760, %v11824_v51  ;;  %v17753_v9 = vpop.f32.mrb[102].mxu1  ;;  %14961 = vmatmul.mubr.f32.vlgmr.msra.gmra.mrb[148].mxu1 %v28470_v46  ;;  %v14682_v7 = vsub.f32 %v28496_v28, %v29810_v59  ;;  %v28562_v17 = vand.u32 4294901760, %v11816_v48  ;;  %v17706_v59 = vpop.f32.mrb[78].mxu0 }
 0xd85   :  { %v28550_v8 = vpack.c.bf16 %v31250_v16, %v31248_v20  ;;  %v17754_v22 = vpop.f32.mrb[103].mxu1  ;;  %14966 = vmatprep.mubr.f32.mxu1 %v28491_v3  ;;  %v31251_v20 = vld [vmem:[#allocation85_spill] sm:$0xff]  ;;  %v31253_v16 = vld [vmem:[#allocation32_spill] sm:$0xff]  ;;  %v28573_v49 = vsub.f32 %v11815_v34, %v28540_v30  ;;  %21079 = vmatpush3.bf16.msra.mxu1 %v28347_v12  ;;  %v21044_v47 = vpack.c.bf16 %v28180_v38, %v28175_v21  ;;  %v29818_v3 = vand.u32 4294901760, %v28538_v13 }
 0xd86   :  { %21007 = vmatpush3.bf16.msra.mxu0 %v28535_v25  ;;  %v17755_v52 = vadd.f32 %v17754_v22, %v17753_v9  ;;  %v31252_v37 = vand.u32 4294901760, %v31251_v20  ;;  %v31254_v57 = vand.u32 4294901760, %v31253_v16  ;;  %v28581_v9 = vsub.f32 %v11824_v51, %v28555_v2  ;;  %21081 = vmatprep.subr.bf16.mxu1 %v28369_v63 }
 0xd87   :  { %21009 = vmatprep.subr.bf16.mxu0 %v28550_v8  ;;  %v31255_v22 = vand.u32 4294901760, %v28520_v6  ;;  %v14683_v16 = vand.u32 4294901760, %v14682_v7  ;;  %v28590_v46 = vsub.f32 %v11816_v48, %v28562_v17  ;;  %v14711_v7 = vand.u32 4294901760, %v28573_v49 }
 0xd88   :  { %v28570_v31 = vpack.c.bf16 %v31254_v57, %v31252_v37  ;;  %v17707_v57 = vpop.f32.mrb[79].mxu0  ;;  %14968 = vmatmul.mubr.f32.gmra.mrb[150].mxu1 %v28510_v39  ;;  %v21048_v20 = vpack.c.bf16 %v31124_v35, %v31122_v5  ;;  %v21050_v5 = vpack.c.bf16 %v31135_v40, %v31133_v42  ;;  %v31257_v40 = vand.u32 4294901760, %v28340_v43 }
 0xd89   :  { %v14691_v34 = vsub.f32 %v28520_v6, %v31255_v22  ;;  %v17708_v37 = vadd.f32 %v17707_v57, %v17706_v59  ;;  %14973 = vmatprep.mubr.f32.mxu1 %v28525_v19  ;;  %21083 = vmatpush3.bf16.msra.mxu1 %v28379_v61  ;;  %v21046_v22 = vpack.c.bf16 %v28214_v55, %v28209_v27  ;;  %v17709_v57 = vpop.f32.mrb[80].mxu0 }
 0xd8a   :  { %21011 = vmatpush3.bf16.msra.mxu0 %v28570_v31  ;;  %v14697_v59 = vsub.f32 %v28538_v13, %v29818_v3  ;;  %21085 = vmatprep.subr.bf16.mxu1 %v28395_v10  ;;  %v17710_v19 = vpop.f32.mrb[81].mxu0  ;;  %v14712_v35 = vsub.f32 %v28573_v49, %v14711_v7 }
 0xd8b   :  { %v28595_v51 = vadd.f32 %v17752_v50, %v17708_v37  ;;  %21045 = vmatprep.subr.bf16.mxu0 %v21044_v47  ;;  %v14692_v48 = vand.u32 4294901760, %v14691_v34  ;;  %v31256_v50 = vand.u32 4294901760, %v28553_v18  ;;  %v14720_v37 = vand.u32 4294901760, %v28581_v9 }
 0xd8c   :  { %14975 = vmatmul.mubr.f32.gmra.mrb[152].mxu1 %v28540_v30  ;;  %v17711_v3 = vadd.f32 %v17710_v19, %v17709_v57  ;;  %v14698_v34 = vand.u32 4294901760, %v14697_v59  ;;  %v21052_v19 = vpack.c.bf16 %v31139_v41, %v31137_v24  ;;  %v14713_v42 = vand.u32 4294901760, %v14712_v35  ;;  %v31258_v59 = vld [vmem:[#allocation73_spill] sm:$0xff]  ;;  %v31259_v57 = vld [vmem:[#allocation74_spill] sm:$0xff] }
 0xd8d   :  { %v14706_v47 = vsub.f32 %v28553_v18, %v31256_v50  ;;  %14684 = vmatmul.mubr.f32.vlgmr.msra.gmra.mrb[126].mxu0 %v14683_v16  ;;  %14980 = vmatprep.mubr.f32.mxu1 %v28555_v2  ;;  %v14726_v16 = vand.u32 4294901760, %v28590_v46  ;;  %v31264_v35 = vld [vmem:[#allocation110_spill] sm:$0xff] }
 0xd8e   :  { %14693 = vmatprep.mubr.f32.mxu0 %v14692_v48  ;;  %21047 = vmatpush3.bf16.msra.mxu0 %v21046_v22  ;;  %v28620_v48 = vadd.f32 %v17755_v52, %v17711_v3  ;;  %v14721_v22 = vsub.f32 %v28581_v9, %v14720_v37  ;;  %v21054_v3 = vpack.c.bf16 %v31145_v62, %v31143_v15  ;;  %v31260_v62 = vld [vmem:[#allocation56_spill] sm:$0xff] }
 0xd8f   :  { %21087 = vmatpush3.bf16.msra.mxu1 %v28412_v32  ;;  %21049 = vmatprep.subr.bf16.mxu0 %v21048_v20  ;;  %v14707_v50 = vand.u32 4294901760, %v14706_v47  ;;  %v14727_v24 = vsub.f32 %v28590_v46, %v14726_v16  ;;  %v21056_v52 = vpack.c.bf16 %v31151_v60, %v31149_v58  ;;  %v21058_v15 = vpack.c.bf16 %v31259_v57, %v31258_v59  ;;  %v31261_v47 = vld [vmem:[#allocation131_spill] sm:$0xff]  ;;  %v31263_v60 = vld [vmem:[#allocation134_spill] sm:$0xff] }
 0xd90   :  { %21089 = vmatprep.subr.bf16.mxu1 %v28418_v0  ;;  %14982 = vmatmul.mubr.f32.gmra.mrb[154].mxu1 %v28562_v17  ;;  %v14722_v41 = vand.u32 4294901760, %v14721_v22  ;;  %v31262_v58 = vld [vmem:[#allocation83_spill] sm:$0xff]  ;;  %v31266_v22 = vld [vmem:[#allocation133_spill] sm:$0xff]  ;;  %v31281_v57 = vld [vmem:[#allocation42_spill] sm:$0xff] }
 0xd91   :  { %14699 = vmatmul.mubr.f32.gmra.mrb[128].mxu0 %v14698_v34  ;;  %15251 = vmatprep.mubr.f32.mxu1 %v31257_v40  ;;  %v14728_v20 = vand.u32 4294901760, %v14727_v24  ;;  %v21060_v34 = vpack.c.bf16 %v31261_v47, %v31260_v62  ;;  %v31282_v62 = vld [vmem:[#allocation49_spill] sm:$0xff] }
 0xd92   :  { %14708 = vmatprep.mubr.f32.mxu0 %v14707_v50  ;;  %21051 = vmatpush3.bf16.msra.mxu0 %v21050_v5  ;;  %v21062_v5 = vpack.c.bf16 %v31263_v60, %v31262_v58  ;;  %v21064_v50 = vpack.c.bf16 %v27937_v44, %v31264_v35  ;;  %v31268_v44 = vld [vmem:[#allocation60_spill] sm:$0xff] }
 0xd93   :  { %21091 = vmatpush3.bf16.msra.mxu1 %v28453_v54  ;;  %21053 = vmatprep.subr.bf16.mxu0 %v21052_v19  ;;  %v31265_v19 = vld [vmem:[#allocation123_spill] sm:$0xff]  ;;  %v21072_v24 = vpack.c.bf16 %v31268_v44, %v28066_v53  ;;  %v31273_v53 = vand.u32 4294901760, %v28538_v13 }
 0xd94   :  { %21093 = vmatprep.subr.bf16.mxu1 %v28459_v33  ;;  %v21066_v40 = vpack.c.bf16 %v31266_v22, %v31265_v19 }
 0xd95   :  { %14714 = vmatmul.mubr.f32.gmra.mrb[130].mxu0 %v14713_v42 }
 0xd96   :  { %14723 = vmatprep.mubr.f32.mxu0 %v14722_v41  ;;  %21055 = vmatpush3.bf16.msra.mxu0 %v21054_v3  ;;  %v21070_v3 = vpack.c.bf16 %v28051_v45, %v28039_v29  ;;  %v31269_v41 = vand.u32 4294901760, %v28496_v28  ;;  %v31271_v29 = vand.u32 4294901760, %v28175_v21  ;;  %v31272_v45 = vand.u32 4294901760, %v28180_v38 }
 0xd97   :  { %21095 = vmatpush3.bf16.msra.mxu1 %v28479_v4  ;;  %21057 = vmatprep.subr.bf16.mxu0 %v21056_v52  ;;  %v31270_v52 = vand.u32 4294901760, %v28520_v6  ;;  %v17756_v59 = vpop.f32.mrb[104].mxu1 }
 0xd98   :  { %21097 = vmatprep.subr.bf16.mxu1 %v28486_v11  ;;  %v17757_v38 = vpop.f32.mrb[105].mxu1 }
 0xd99   :  { %14729 = vmatmul.mubr.f32.gmra.mrb[132].mxu0 %v14728_v20  ;;  %v31274_v20 = vand.u32 4294901760, %v28553_v18 }
 0xd9a   :  { %15117 = vmatprep.mubr.f32.mxu0 %v28340_v43  ;;  %21059 = vmatpush3.bf16.msra.mxu0 %v21058_v15  ;;  %v31267_v43 = vld [vmem:[#allocation98_spill] sm:$0xff] }
 0xd9b   :  { %21099 = vmatpush3.bf16.msra.mxu1 %v28508_v26  ;;  %21061 = vmatprep.subr.bf16.mxu0 %v21060_v34  ;;  %v21068_v42 = vpack.c.bf16 %v31267_v43, %v28010_v23  ;;  %v21074_v23 = vpack.c.bf16 %v28100_v14, %v28095_v36  ;;  %v31275_v36 = vand.u32 4294901760, %v28209_v27  ;;  %v31276_v14 = vand.u32 4294901760, %v28214_v55  ;;  %v31277_v55 = vld [vmem:[#allocation75_spill] sm:$0xff] }
 0xd9c   :  { %21101 = vmatprep.subr.bf16.mxu1 %v28517_v1  ;;  %v17759_v27 = vpop.f32.mrb[106].mxu1 }
 0xd9d   :  { %v21110_v21 = vpack.c.bf16 %v31276_v14, %v31275_v36  ;;  %v31290_v14 = vld [vmem:[#allocation69_spill] sm:$0xff] }
 0xd9e   :  { %21063 = vmatpush3.bf16.msra.mxu0 %v21062_v5  ;;  %v31284_v5 = vld [vmem:[#allocation93_spill] sm:$0xff] }
 0xd9f   :  { %21103 = vmatpush3.bf16.msra.mxu1 %v28535_v25  ;;  %21065 = vmatprep.subr.bf16.mxu0 %v21064_v50 }
 0xda0   :  { %21105 = vmatprep.subr.bf16.mxu1 %v28550_v8 }
 0xda2   :  { %21067 = vmatpush3.bf16.msra.mxu0 %v21066_v40 }
 0xda3   :  { %21107 = vmatpush3.bf16.msra.mxu1 %v28570_v31  ;;  %21069 = vmatprep.subr.bf16.mxu0 %v21068_v42 }
 0xda4   :  { %21141 = vmatprep.subr.bf16.mxu1 %v28323_v56  ;;  %v21108_v56 = vpack.c.bf16 %v31272_v45, %v31271_v29 }
 0xda6   :  { %15255 = vmatmul.mubr.f32.vlgmr.msra.gmra.mrb[156].mxu1 %v31269_v41  ;;  %21071 = vmatpush3.bf16.msra.mxu0 %v21070_v3 }
 0xda7   :  { %15262 = vmatprep.mubr.f32.mxu1 %v31270_v52  ;;  %21143 = vmatpush3.bf16.msra.mxu1 %v28347_v12  ;;  %v17760_v12 = vpop.f32.mrb[107].mxu1 }
 0xda8   :  { %21073 = vmatprep.subr.bf16.mxu0 %v21072_v24  ;;  %21145 = vmatprep.subr.bf16.mxu1 %v28369_v63  ;;  %v17758_v63 = vadd.f32 %v17757_v38, %v17756_v59  ;;  %v11921_v24 = vld [vmem:[%s29106_s7 + $0x300] sm:$0xff]  ;;  %v31292_v38 = vld [vmem:[#allocation47_spill] sm:$0xff] }
 0xda9   :  { %v15608_v45 = vand.u32 4294901760, %v11921_v24 }
 0xdaa   :  { %15266 = vmatmul.mubr.f32.gmra.mrb[158].mxu1 %v31273_v53  ;;  %21075 = vmatpush3.bf16.msra.mxu0 %v21074_v23  ;;  %v31288_v23 = vld [vmem:[#allocation97_spill] sm:$0xff]  ;;  %v31289_v53 = vld [vmem:[#allocation68_spill] sm:$0xff] }
 0xdab   :  { %15273 = vmatprep.mubr.f32.mxu1 %v31274_v20  ;;  %21147 = vmatpush3.bf16.msra.mxu1 %v28379_v61  ;;  %v17761_v61 = vadd.f32 %v17760_v12, %v17759_v27  ;;  %v12509_v20 = vsel %vm5732_vm14, %v31289_v53, 0  ;;  %v31293_v12 = vld [vmem:[#allocation34_spill] sm:$0xff] }
 0xdac   :  { %21109 = vmatprep.subr.bf16.mxu0 %v21108_v56  ;;  %21149 = vmatprep.subr.bf16.mxu1 %v28395_v10  ;;  %v31278_v10 = vld [vmem:[#allocation96_spill] sm:$0xff] }
 0xdad   :  { %15120 = vmatmul.mubr.f32.vlgmr.msra.gmra.mrb[134].mxu0 %v28496_v28  ;;  %v17712_v28 = vpop.f32.mrb[82].mxu0 }
 0xdae   :  { %15277 = vmatmul.mubr.f32.gmra.mrb[160].mxu1 %v14711_v7  ;;  %15126 = vmatprep.mubr.f32.mxu0 %v28520_v6  ;;  %v31279_v6 = vld [vmem:[#allocation43_spill] sm:$0xff]  ;;  %v17838_v7 = vpop.f32.mrb[108].mxu1 }
 0xdaf   :  { %15284 = vmatprep.mubr.f32.mxu1 %v14720_v37  ;;  %21111 = vmatpush3.bf16.msra.mxu0 %v21110_v21  ;;  %v31280_v37 = vld [vmem:[#allocation132_spill] sm:$0xff] }
 0xdb0   :  { %21151 = vmatpush3.bf16.msra.mxu1 %v28412_v32  ;;  %21113 = vmatprep.subr.bf16.mxu0 %v31277_v55  ;;  %v17713_v32 = vpop.f32.mrb[83].mxu0  ;;  %v31291_v21 = vld [vmem:[#allocation88_spill] sm:$0xff]  ;;  %v28746_v55 = vand.u32 4294901760, %v12509_v20 }
 0xdb1   :  { %21153 = vmatprep.subr.bf16.mxu1 %v28418_v0  ;;  %15129 = vmatmul.mubr.f32.gmra.mrb[136].mxu0 %v28538_v13  ;;  %v17714_v0 = vadd.f32 %v17713_v32, %v17712_v28  ;;  %v17839_v13 = vpop.f32.mrb[109].mxu1  ;;  %v17715_v15 = vpop.f32.mrb[84].mxu0 }
 0xdb2   :  { %15288 = vmatmul.mubr.f32.gmra.mrb[162].mxu1 %v14726_v16  ;;  %15135 = vmatprep.mubr.f32.mxu0 %v28553_v18  ;;  %v17840_v16 = vadd.f32 %v17839_v13, %v17838_v7  ;;  %v17716_v47 = vpop.f32.mrb[85].mxu0  ;;  %v31294_v13 = vld [vmem:[#allocation58_spill] sm:$0xff] }
 0xdb3   :  { %15579 = vmatprep.mubr.f32.mxu1 %v31278_v10  ;;  %21115 = vmatpush3.bf16.msra.mxu0 %v31279_v6  ;;  %v21442_v18 = vadd.f32 %v17758_v63, %v17714_v0  ;;  %v17717_v34 = vadd.f32 %v17716_v47, %v17715_v15  ;;  %v11926_v0 = vld [vmem:[%s29106_s7 + $0x328] sm:$0xff]  ;;  %v28771_v47 = vld [vmem:[%s29106_s7 + $0x330] sm:$0xff] }
 0xdb4   :  { %21155 = vmatpush3.bf16.msra.mxu1 %v28453_v54  ;;  %21117 = vmatprep.subr.bf16.mxu0 %v31280_v37  ;;  %v17841_v54 = vpop.f32.mrb[110].mxu1  ;;  %v11925_v37 = vld [vmem:[%s29106_s7 + $0x320] sm:$0xff] }
 0xdb5   :  { %21157 = vmatprep.subr.bf16.mxu1 %v28459_v33  ;;  %15138 = vmatmul.mubr.f32.gmra.mrb[138].mxu0 %v28573_v49  ;;  %v17842_v33 = vpop.f32.mrb[111].mxu1  ;;  %v21424_v58 = vadd.f32 %v17761_v61, %v17717_v34 }
 0xdb6   :  { %15144 = vmatprep.mubr.f32.mxu0 %v28581_v9  ;;  %v17843_v49 = vadd.f32 %v17842_v33, %v17841_v54  ;;  %v31283_v9 = vld [vmem:[#allocation71_spill] sm:$0xff]  ;;  %v17844_v60 = vpop.f32.mrb[112].mxu1  ;;  %v15620_v54 = vand.u32 4294901760, %v11925_v37  ;;  %v28776_v33 = vld [vmem:[%s29106_s7 + $0x338] sm:$0xff] }
 0xdb7   :  { %21119 = vmatpush3.bf16.msra.mxu0 %v31281_v57  ;;  %v17845_v35 = vpop.f32.mrb[113].mxu1  ;;  %v28763_v57 = vsub.f32 %v12509_v20, %v28746_v55 }
 0xdb8   :  { %21159 = vmatpush3.bf16.msra.mxu1 %v28479_v4  ;;  %21121 = vmatprep.subr.bf16.mxu0 %v31282_v62  ;;  %v17794_v4 = vpop.f32.mrb[86].mxu0  ;;  %v17846_v19 = vadd.f32 %v17845_v35, %v17844_v60  ;;  %v17847_v43 = vpop.f32.mrb[114].mxu1  ;;  %v15623_v62 = vand.u32 4294901760, %v11926_v0  ;;  %v28798_v35 = vsub.f32 %v11921_v24, %v15608_v45 }
 0xdb9   :  { %21161 = vmatprep.subr.bf16.mxu1 %v28486_v11  ;;  %15147 = vmatmul.mubr.f32.gmra.mrb[140].mxu0 %v28590_v46  ;;  %v17795_v11 = vpop.f32.mrb[87].mxu0  ;;  %v31285_v46 = vld [vmem:[#allocation116_spill] sm:$0xff]  ;;  %v17848_v3 = vpop.f32.mrb[115].mxu1  ;;  %v15686_v60 = vand.u32 4294901760, %v28763_v57 }
 0xdba   :  { %15454 = vmatprep.mubr.f32.mxu0 %v31278_v10  ;;  %v17796_v50 = vadd.f32 %v17795_v11, %v17794_v4  ;;  %v17797_v40 = vpop.f32.mrb[88].mxu0  ;;  %v15629_v4 = vand.u32 4294901760, %v28776_v33  ;;  %v28796_v11 = vld [vmem:[%s29106_s7 + $0x340] sm:$0xff] }
 0xdbb   :  { %21123 = vmatpush3.bf16.msra.mxu0 %v31283_v9  ;;  %v17798_v42 = vpop.f32.mrb[89].mxu0  ;;  %v15687_v24 = vsub.f32 %v28763_v57, %v15686_v60 }
 0xdbc   :  { %21163 = vmatpush3.bf16.msra.mxu1 %v28508_v26  ;;  %21125 = vmatprep.subr.bf16.mxu0 %v31284_v5  ;;  %v21407_v22 = vadd.f32 %v28595_v51, %v17796_v50  ;;  %v31286_v26 = vld [vmem:[#allocation52_spill] sm:$0xff]  ;;  %v17799_v44 = vadd.f32 %v17798_v42, %v17797_v40  ;;  %v31287_v51 = vld [vmem:[#allocation57_spill] sm:$0xff]  ;;  %v17800_v52 = vpop.f32.mrb[90].mxu0  ;;  %v28791_v5 = vpack.c.bf16 %v15623_v62, %v15620_v54 }
 0xdbd   :  { %21165 = vmatprep.subr.bf16.mxu1 %v28517_v1  ;;  %v17849_v1 = vadd.f32 %v17848_v3, %v17847_v43  ;;  %v17801_v29 = vpop.f32.mrb[91].mxu0  ;;  %v31298_v43 = vld [vmem:[#allocation79_spill] sm:$0xff] }
 0xdbe   :  { %v28727_v41 = vadd.f32 %v21407_v22, %v17840_v16  ;;  %v17802_v59 = vadd.f32 %v17801_v29, %v17800_v52  ;;  %v17803_v27 = vpop.f32.mrb[92].mxu0  ;;  %v31295_v16 = vld [vmem:[#allocation120_spill] sm:$0xff]  ;;  %v28838_v52 = vld [vmem:[%s29106_s7 + $0x350] sm:$0xff]  ;;  %v15727_v29 = vand.u32 4294901760, %v28798_v35 }
 0xdbf   :  { %21127 = vmatpush3.bf16.msra.mxu0 %v31285_v46  ;;  %v17804_v10 = vpop.f32.mrb[93].mxu0  ;;  %v28809_v46 = vld [vmem:[%s29106_s7 + $0x348] sm:$0xff]  ;;  %v31297_v22 = vld [vmem:[#allocation48_spill] sm:$0xff] }
 0xdc0   :  { %21167 = vmatpush3.bf16.msra.mxu1 %v28535_v25  ;;  %21129 = vmatprep.subr.bf16.mxu0 %v31286_v26  ;;  %v11922_v25 = vld [vmem:[%s29106_s7 + $0x308] sm:$0xff]  ;;  %v21443_v63 = vadd.f32 %v21442_v18, %v17802_v59  ;;  %v17805_v28 = vadd.f32 %v17804_v10, %v17803_v27  ;;  %v12513_v40 = vsel %vm5732_vm14, %v31297_v22, 0  ;;  %v12515_v26 = vsel %vm5732_vm14, %v31298_v43, 0 }
 0xdc1   :  { %21169 = vmatprep.subr.bf16.mxu1 %v28550_v8  ;;  %v21389_v8 = vadd.f32 %v28620_v48, %v17799_v44  ;;  %v15611_v56 = vand.u32 4294901760, %v11922_v25  ;;  %v11924_v48 = vld [vmem:[%s29106_s7 + $0x318] sm:$0xff]  ;;  %v28850_v53 = vand.u32 4294901760, %v12513_v40  ;;  %v28852_v20 = vand.u32 4294901760, %v12515_v26 }
 0xdc2   :  { %v15617_v32 = vand.u32 4294901760, %v11924_v48  ;;  %v28751_v7 = vadd.f32 %v21443_v63, %v17846_v19  ;;  %v21425_v18 = vadd.f32 %v21424_v58, %v17805_v28  ;;  %v15626_v58 = vand.u32 4294901760, %v28771_v47 }
 0xdc3   :  { %21131 = vmatpush3.bf16.msra.mxu0 %v31287_v51  ;;  %v28735_v36 = vadd.f32 %v21389_v8, %v17843_v49  ;;  %v28749_v61 = vpack.c.bf16 %v15611_v56, %v15608_v45  ;;  %v31296_v49 = vld [vmem:[#allocation66_spill] sm:$0xff]  ;;  %v28800_v50 = vsub.f32 %v11922_v25, %v15611_v56  ;;  %v15632_v25 = vand.u32 4294901760, %v28796_v11 }
 0xdc4   :  { %21171 = vmatpush3.bf16.msra.mxu1 %v28570_v31  ;;  %21133 = vmatprep.subr.bf16.mxu0 %v31288_v23  ;;  %v11923_v31 = vld [vmem:[%s29106_s7 + $0x310] sm:$0xff]  ;;  %v28778_v34 = vadd.f32 %v21425_v18, %v17849_v1  ;;  %v12511_v9 = vsel %vm5732_vm14, %v31296_v49, 0  ;;  %v28818_v44 = vsub.f32 %v11924_v48, %v15617_v32  ;;  %v28825_v1 = vpack.c.bf16 %v15629_v4, %v15626_v58  ;;  %v28843_v23 = vld [vmem:[%s29106_s7 + $0x358] sm:$0xff]  ;;  %s21819_s7 = smov 96  }
 0xdc5   :  { %v15614_v6 = vand.u32 4294901760, %v11923_v31  ;;  %v28802_v19 = vand.u32 4294901760, %v12511_v9  ;;  %v15635_v8 = vand.u32 4294901760, %v28809_v46  ;;  %v15734_v45 = vand.u32 4294901760, %v28800_v50 }
 0xdc6   :  { %v28855_v59 = vsub.f32 %v11925_v37, %v15620_v54  ;;  %v29822_v48 = vand.u32 4294901760, %v28818_v44  ;;  %v15638_v27 = vand.u32 4294901760, %v28838_v52  ;;  %v15728_v10 = vsub.f32 %v28798_v35, %v15727_v29 }
 0xdc7   :  { %15581 = vmatmul.mubr.f32.vlgmr.msra.gmra.mrb[164].mxu1 %v31290_v14  ;;  %21135 = vmatpush3.bf16.msra.mxu0 %v31291_v21  ;;  %v28766_v15 = vpack.c.bf16 %v15617_v32, %v15614_v6  ;;  %v28816_v3 = vsub.f32 %v11923_v31, %v15614_v6  ;;  %v28848_v56 = vsub.f32 %v12511_v9, %v28802_v19 }
 0xdc8   :  { %15586 = vmatprep.mubr.f32.mxu1 %v31292_v38  ;;  %21137 = vmatprep.subr.bf16.mxu0 %v31293_v12  ;;  %v17926_v42 = vpop.f32.mrb[116].mxu1  ;;  %v28860_v21 = vsub.f32 %v11926_v0, %v15623_v62  ;;  %v15641_v12 = vand.u32 4294901760, %v28843_v23  ;;  %v15735_v28 = vsub.f32 %v28800_v50, %v15734_v45  ;;  %v28882_v32 = vsub.f32 %v12513_v40, %v28850_v53 }
 0xdc9   :  { %v29823_v31 = vand.u32 4294901760, %v28816_v3  ;;  %v29821_v6 = vand.u32 4294901760, %v28848_v56  ;;  %v28885_v37 = vsub.f32 %v12515_v26, %v28852_v20  ;;  %v29820_v0 = vand.u32 4294901760, %v28855_v59 }
 0xdca   :  { %v15749_v54 = vsub.f32 %v28818_v44, %v29822_v48  ;;  %v29819_v62 = vand.u32 4294901760, %v28860_v21  ;;  %v28906_v22 = vsub.f32 %v28771_v47, %v15626_v58  ;;  %v28911_v40 = vsub.f32 %v28776_v33, %v15629_v4 }
 0xdcb   :  { %15588 = vmatmul.mubr.f32.gmra.mrb[166].mxu1 %v28510_v39  ;;  %21139 = vmatpush3.bf16.msra.mxu0 %v31294_v13  ;;  %v17882_v13 = vpop.f32.mrb[94].mxu0  ;;  %v15742_v18 = vsub.f32 %v28816_v3, %v29823_v31  ;;  %v15716_v47 = vand.u32 4294901760, %v28885_v37  ;;  %v15756_v58 = vsub.f32 %v28855_v59, %v29820_v0 }
 0xdcc   :  { %15593 = vmatprep.mubr.f32.mxu1 %v31295_v16  ;;  %21173 = vmatprep.subr.bf16.mxu0 %v28749_v61  ;;  %v17883_v49 = vpop.f32.mrb[95].mxu0 }
 0xdcd   :  { %v17884_v43 = vadd.f32 %v17883_v49, %v17882_v13  ;;  %v15750_v13 = vand.u32 4294901760, %v15749_v54  ;;  %v15769_v49 = vand.u32 4294901760, %v28906_v22  ;;  %v15757_v31 = vand.u32 4294901760, %v15756_v58 }
 0xdce   :  { %15456 = vmatmul.mubr.f32.vlgmr.msra.gmra.mrb[142].mxu0 %v31290_v14  ;;  %v28962_v58 = vsub.f32 %v28838_v52, %v15638_v27 }
 0xdcf   :  { %15595 = vmatmul.mubr.f32.gmra.mrb[168].mxu1 %v28540_v30  ;;  %15461 = vmatprep.mubr.f32.mxu0 %v31292_v38  ;;  %v15688_v38 = vand.u32 4294901760, %v15687_v24  ;;  %v15697_v24 = vsub.f32 %v28848_v56, %v29821_v6  ;;  %v21409_v33 = vadd.f32 %v28727_v41, %v17884_v43  ;;  %v28932_v41 = vsub.f32 %v28796_v11, %v15632_v25 }
 0xdd0   :  { %15600 = vmatprep.mubr.f32.mxu1 %v28555_v2  ;;  %21175 = vmatpush3.bf16.msra.mxu0 %v28749_v61  ;;  %v15717_v11 = vsub.f32 %v28885_v37, %v15716_v47 }
 0xdd1   :  { %21177 = vmatprep.subr.bf16.mxu0 %v28766_v15  ;;  %v15698_v6 = vand.u32 4294901760, %v15697_v24  ;;  %v15783_v24 = vand.u32 4294901760, %v28932_v41 }
 0xdd2   :  { %15463 = vmatmul.mubr.f32.gmra.mrb[144].mxu0 %v28510_v39  ;;  %v17927_v39 = vpop.f32.mrb[117].mxu1  ;;  %v17885_v4 = vpop.f32.mrb[96].mxu0 }
 0xdd3   :  { %15602 = vmatmul.mubr.f32.gmra.mrb[170].mxu1 %v28562_v17  ;;  %15468 = vmatprep.mubr.f32.mxu0 %v31295_v16  ;;  %v28832_v51 = vadd.f32 %v17927_v39, %v17926_v42  ;;  %v17929_v14 = vpop.f32.mrb[118].mxu1  ;;  %v15729_v42 = vand.u32 4294901760, %v15728_v10  ;;  %v15736_v39 = vand.u32 4294901760, %v15735_v28  ;;  %v15763_v10 = vsub.f32 %v28860_v21, %v29819_v62  ;;  %v17886_v28 = vpop.f32.mrb[97].mxu0 }
 0xdd4   :  { %21179 = vmatpush3.bf16.msra.mxu0 %v28766_v15  ;;  %v17930_v63 = vpop.f32.mrb[119].mxu1  ;;  %v17887_v54 = vadd.f32 %v17886_v28, %v17885_v4  ;;  %v15718_v28 = vand.u32 4294901760, %v15717_v11 }
 0xdd5   :  { %21181 = vmatprep.subr.bf16.mxu0 %v28791_v5  ;;  %v17932_v16 = vpop.f32.mrb[120].mxu1  ;;  %v21196_v62 = vpack.c.bf16 %v15736_v39, %v15729_v42  ;;  %v28941_v0 = vadd.f32 %v21409_v33, %v28832_v51  ;;  %v15764_v4 = vand.u32 4294901760, %v15763_v10  ;;  %v15770_v51 = vsub.f32 %v28906_v22, %v15769_v49 }
 0xdd6   :  { %15470 = vmatmul.mubr.f32.gmra.mrb[146].mxu0 %v28540_v30  ;;  %v28866_v30 = vadd.f32 %v17930_v63, %v17929_v14  ;;  %v17933_v9 = vpop.f32.mrb[121].mxu1  ;;  %v15706_v14 = vand.u32 4294901760, %v28882_v32  ;;  %v15743_v63 = vand.u32 4294901760, %v15742_v18  ;;  %v28937_v18 = vsub.f32 %v28809_v46, %v15635_v8 }
 0xdd7   :  { %15475 = vmatprep.mubr.f32.mxu0 %v28555_v2  ;;  %v28872_v2 = vpack.c.bf16 %v15635_v8, %v15632_v25  ;;  %v17934_v26 = vadd.f32 %v17933_v9, %v17932_v16  ;;  %v15776_v9 = vand.u32 4294901760, %v28911_v40  ;;  %v21391_v46 = vadd.f32 %v28735_v36, %v17887_v54  ;;  %v17888_v25 = vpop.f32.mrb[98].mxu0 }
 0xdd8   :  { %21183 = vmatpush3.bf16.msra.mxu0 %v28791_v5  ;;  %v15707_v48 = vsub.f32 %v28882_v32, %v15706_v14  ;;  %v21200_v8 = vpack.c.bf16 %v15750_v13, %v15743_v63  ;;  %v17889_v42 = vpop.f32.mrb[99].mxu0  ;;  %v15790_v33 = vand.u32 4294901760, %v28937_v18  ;;  %v21204_v54 = vpack.c.bf16 %v15764_v4, %v15757_v31 }
 0xdd9   :  { %21185 = vmatprep.subr.bf16.mxu0 %v28825_v1  ;;  %v15777_v39 = vsub.f32 %v28911_v40, %v15776_v9  ;;  %v17890_v36 = vadd.f32 %v17889_v42, %v17888_v25  ;;  %v28970_v63 = vadd.f32 %v21391_v46, %v28866_v30  ;;  %v15771_v52 = vand.u32 4294901760, %v15770_v51 }
 0xdda   :  { %15477 = vmatmul.mubr.f32.gmra.mrb[148].mxu0 %v28562_v17  ;;  %v28901_v17 = vpack.c.bf16 %v15641_v12, %v15638_v27  ;;  %v15708_v13 = vand.u32 4294901760, %v15707_v48 }
 0xddb   :  { %19408 = vmatprep.mubr.f32.mxu0 %v15688_v38  ;;  %v17935_v38 = vpop.f32.mrb[122].mxu1  ;;  %v21445_v10 = vadd.f32 %v28751_v7, %v17890_v36  ;;  %v15778_v27 = vand.u32 4294901760, %v15777_v39  ;;  %v15797_v7 = vand.u32 4294901760, %v28962_v58 }
 0xddc   :  { %21187 = vmatpush3.bf16.msra.mxu0 %v28825_v1  ;;  %v17936_v16 = vpop.f32.mrb[123].mxu1 }
 0xddd   :  { %21189 = vmatprep.subr.bf16.mxu0 %v28872_v2  ;;  %v17937_v43 = vadd.f32 %v17936_v16, %v17935_v38  ;;  %v28967_v38 = vsub.f32 %v28843_v23, %v15641_v12  ;;  %v17891_v16 = vpop.f32.mrb[100].mxu0  ;;  %v15784_v23 = vsub.f32 %v28932_v41, %v15783_v24  ;;  %v15791_v12 = vsub.f32 %v28937_v18, %v15790_v33 }
 0xdde   :  { %v17892_v25 = vpop.f32.mrb[101].mxu0  ;;  %v21446_v31 = vadd.f32 %v21445_v10, %v17934_v26  ;;  %v15798_v4 = vsub.f32 %v28962_v58, %v15797_v7 }
 0xddf   :  { %v17893_v48 = vadd.f32 %v17892_v25, %v17891_v16  ;;  %v15804_v30 = vand.u32 4294901760, %v28967_v38  ;;  %v15785_v11 = vand.u32 4294901760, %v15784_v23  ;;  %v15792_v46 = vand.u32 4294901760, %v15791_v12 }
 0xde0   :  { %21191 = vmatpush3.bf16.msra.mxu0 %v28872_v2  ;;  %v21220_v25 = vpack.c.bf16 %v28800_v50, %v28798_v35  ;;  %v21224_v12 = vpack.c.bf16 %v28818_v44, %v28816_v3  ;;  %v31302_v35 = vand.u32 4294901760, %v28855_v59  ;;  %v31303_v50 = vand.u32 4294901760, %v28860_v21 }
 0xde1   :  { %21193 = vmatprep.subr.bf16.mxu0 %v28901_v17  ;;  %v15805_v42 = vsub.f32 %v28967_v38, %v15804_v30  ;;  %v21212_v26 = vpack.c.bf16 %v15792_v46, %v15785_v11 }
 0xde4   :  { %21195 = vmatpush3.bf16.msra.mxu0 %v28901_v17 }
 0xde5   :  { %21197 = vmatprep.subr.bf16.mxu0 %v21196_v62 }
 0xde7   :  { %19409 = vmatmul.mubr.f32.vlgmr.msra.gmra.mrb[74].mxu0 %v15698_v6  ;;  %v21427_v6 = vadd.f32 %v28778_v34, %v17893_v48  ;;  %v15799_v34 = vand.u32 4294901760, %v15798_v4 }
 0xde8   :  { %19411 = vmatprep.mubr.f32.mxu0 %v15708_v13  ;;  %21199 = vmatpush3.bf16.msra.mxu0 %v21196_v62  ;;  %v21208_v62 = vpack.c.bf16 %v15778_v27, %v15771_v52 }
 0xde9   :  { %21201 = vmatprep.subr.bf16.mxu0 %v21200_v8  ;;  %v21428_v51 = vadd.f32 %v21427_v6, %v17937_v43  ;;  %v18014_v39 = vpop.f32.mrb[124].mxu1 }
 0xdea   :  { %v18015_v36 = vpop.f32.mrb[125].mxu1 }
 0xdeb   :  { %19412 = vmatmul.mubr.f32.gmra.mrb[76].mxu0 %v15718_v28  ;;  %v18016_v10 = vadd.f32 %v18015_v36, %v18014_v39 }
 0xdec   :  { %21203 = vmatpush3.bf16.msra.mxu0 %v21200_v8  ;;  %19438 = vmatprep.mubr.f32.mxu0 %v28746_v55  ;;  %v15806_v8 = vand.u32 4294901760, %v15805_v42 }
 0xded   :  { %21205 = vmatprep.subr.bf16.mxu0 %v21204_v54  ;;  %v18017_v28 = vpop.f32.mrb[126].mxu1 }
 0xdee   :  { %v21216_v13 = vpack.c.bf16 %v15806_v8, %v15799_v34  ;;  %v18018_v16 = vpop.f32.mrb[127].mxu1 }
 0xdef   :  { %v18019_v52 = vadd.f32 %v18018_v16, %v18017_v28  ;;  %v21232_v28 = vpack.c.bf16 %v28911_v40, %v28906_v22  ;;  %v21288_v22 = vpack.c.bf16 %v15804_v30, %v15797_v7 }
 0xdf0   :  { %21207 = vmatpush3.bf16.msra.mxu0 %v21204_v54 }
 0xdf1   :  { %21209 = vmatprep.subr.bf16.mxu0 %v21208_v62  ;;  %v18020_v54 = vpop.f32.mrb[128].mxu1 }
 0xdf2   :  { %v17970_v43 = vpop.f32.mrb[102].mxu0  ;;  %v18021_v23 = vpop.f32.mrb[129].mxu1 }
 0xdf3   :  { %v17971_v27 = vpop.f32.mrb[103].mxu0  ;;  %v18022_v6 = vadd.f32 %v18021_v23, %v18020_v54 }
 0xdf4   :  { %21211 = vmatpush3.bf16.msra.mxu0 %v21208_v62  ;;  %v17972_v48 = vadd.f32 %v17971_v27, %v17970_v43  ;;  %v21236_v27 = vpack.c.bf16 %v28937_v18, %v28932_v41 }
 0xdf5   :  { %21213 = vmatprep.subr.bf16.mxu0 %v21212_v26  ;;  %v18023_v46 = vpop.f32.mrb[130].mxu1 }
 0xdf6   :  { %v21411_v62 = vadd.f32 %v28941_v0, %v17972_v48  ;;  %v17973_v11 = vpop.f32.mrb[104].mxu0  ;;  %v18024_v42 = vpop.f32.mrb[131].mxu1  ;;  %v21240_v48 = vpack.c.bf16 %v28967_v38, %v28962_v58 }
 0xdf7   :  { %v17974_v4 = vpop.f32.mrb[105].mxu0  ;;  %v18025_v8 = vadd.f32 %v18024_v42, %v18023_v46 }
 0xdf8   :  { %21215 = vmatpush3.bf16.msra.mxu0 %v21212_v26  ;;  %v21228_v26 = vpack.c.bf16 %v28860_v21, %v28855_v59  ;;  %v17975_v34 = vadd.f32 %v17974_v4, %v17973_v11  ;;  %v21412_v39 = vadd.f32 %v21411_v62, %v18016_v10  ;;  %v21284_v59 = vpack.c.bf16 %v15790_v33, %v15783_v24 }
 0xdf9   :  { %21217 = vmatprep.subr.bf16.mxu0 %v21216_v13 }
 0xdfa   :  { %v21393_v36 = vadd.f32 %v28970_v63, %v17975_v34 }
 0xdfc   :  { %21219 = vmatpush3.bf16.msra.mxu0 %v21216_v13  ;;  %v17976_v13 = vpop.f32.mrb[106].mxu0 }
 0xdfd   :  { %21221 = vmatprep.subr.bf16.mxu0 %v21220_v25  ;;  %v17977_v0 = vpop.f32.mrb[107].mxu0 }
 0xdfe   :  { %v17978_v16 = vadd.f32 %v17977_v0, %v17976_v13 }
 0xdff   :  { %19439 = vmatmul.mubr.f32.vlgmr.msra.gmra.mrb[74].mxu0 %v28802_v19  ;;  %v17979_v54 = vpop.f32.mrb[108].mxu0 }
 0xe00   :  { %19441 = vmatprep.mubr.f32.mxu0 %v28850_v53  ;;  %21223 = vmatpush3.bf16.msra.mxu0 %v21220_v25  ;;  %v21394_v25 = vadd.f32 %v21393_v36, %v18019_v52  ;;  %v21447_v43 = vadd.f32 %v21446_v31, %v17978_v16  ;;  %v17980_v10 = vpop.f32.mrb[109].mxu0 }
 0xe01   :  { %21225 = vmatprep.subr.bf16.mxu0 %v21224_v12  ;;  %v17981_v23 = vadd.f32 %v17980_v10, %v17979_v54 }
 0xe03   :  { %19442 = vmatmul.mubr.f32.gmra.mrb[76].mxu0 %v28852_v20  ;;  %v21429_v63 = vadd.f32 %v21428_v51, %v17981_v23 }
 0xe04   :  { %21227 = vmatpush3.bf16.msra.mxu0 %v21224_v12  ;;  %19468 = vmatprep.mubr.f32.mxu0 %v28763_v57  ;;  %v21448_v12 = vadd.f32 %v21447_v43, %v18022_v6 }
 0xe05   :  { %21229 = vmatprep.subr.bf16.mxu0 %v21228_v26  ;;  %v21430_v62 = vadd.f32 %v21429_v63, %v18025_v8 }
 0xe08   :  { %21231 = vmatpush3.bf16.msra.mxu0 %v21228_v26 }
 0xe09   :  { %21233 = vmatprep.subr.bf16.mxu0 %v21232_v28 }
 0xe0c   :  { %21235 = vmatpush3.bf16.msra.mxu0 %v21232_v28 }
 0xe0d   :  { %21237 = vmatprep.subr.bf16.mxu0 %v21236_v27 }
 0xe0f   :  { %v18102_v31 = vpop.f32.mrb[132].mxu1 }
 0xe10   :  { %21239 = vmatpush3.bf16.msra.mxu0 %v21236_v27  ;;  %v18103_v52 = vpop.f32.mrb[133].mxu1 }
 0xe11   :  { %21241 = vmatprep.subr.bf16.mxu0 %v21240_v48  ;;  %v18104_v11 = vadd.f32 %v18103_v52, %v18102_v31  ;;  %v21268_v52 = vpack.c.bf16 %v15734_v45, %v15727_v29  ;;  %v21276_v29 = vpack.c.bf16 %v31303_v50, %v31302_v35 }
 0xe14   :  { %21243 = vmatpush3.bf16.msra.mxu0 %v21240_v48 }
 0xe15   :  { %21245 = vmatprep.subr.bf16.mxu0 %v28749_v61 }
 0xe17   :  { %19469 = vmatmul.mubr.f32.vlgmr.msra.gmra.mrb[74].mxu0 %v28848_v56  ;;  %v18058_v4 = vpop.f32.mrb[110].mxu0 }
 0xe18   :  { %19471 = vmatprep.mubr.f32.mxu0 %v28882_v32  ;;  %21247 = vmatpush3.bf16.msra.mxu0 %v28749_v61  ;;  %v18105_v51 = vpop.f32.mrb[134].mxu1  ;;  %v18059_v26 = vpop.f32.mrb[111].mxu0 }
 0xe19   :  { %21249 = vmatprep.subr.bf16.mxu0 %v28766_v15  ;;  %v18106_v6 = vpop.f32.mrb[135].mxu1  ;;  %v18060_v8 = vadd.f32 %v18059_v26, %v18058_v4  ;;  %v31300_v4 = vand.u32 4294901760, %v28818_v44 }
 0xe1a   :  { %v18107_v46 = vadd.f32 %v18106_v6, %v18105_v51 }
 0xe1b   :  { %19472 = vmatmul.mubr.f32.gmra.mrb[76].mxu0 %v28885_v37  ;;  %v21413_v13 = vadd.f32 %v21412_v39, %v18060_v8  ;;  %v18061_v0 = vpop.f32.mrb[112].mxu0 }
 0xe1c   :  { %21251 = vmatpush3.bf16.msra.mxu0 %v28766_v15  ;;  %19498 = vmatprep.mubr.f32.mxu0 %v15686_v60  ;;  %v18108_v42 = vpop.f32.mrb[136].mxu1  ;;  %v18062_v16 = vpop.f32.mrb[113].mxu0 }
 0xe1d   :  { %21253 = vmatprep.subr.bf16.mxu0 %v28791_v5  ;;  %v18109_v34 = vpop.f32.mrb[137].mxu1  ;;  %v18063_v54 = vadd.f32 %v18062_v16, %v18061_v0  ;;  %v21414_v60 = vadd.f32 %v21413_v13, %v18104_v11 }
 0xe1e   :  { %v18110_v36 = vadd.f32 %v18109_v34, %v18108_v42  ;;  %v31301_v42 = vand.u32 4294901760, %v28848_v56 }
 0xe1f   :  { %v21395_v10 = vadd.f32 %v21394_v25, %v18063_v54 }
 0xe20   :  { %21255 = vmatpush3.bf16.msra.mxu0 %v28791_v5  ;;  %v18064_v27 = vpop.f32.mrb[114].mxu0 }
 0xe21   :  { %21257 = vmatprep.subr.bf16.mxu0 %v28825_v1  ;;  %v18065_v23 = vpop.f32.mrb[115].mxu0  ;;  %v21396_v48 = vadd.f32 %v21395_v10, %v18107_v46  ;;  %v31299_v46 = vand.u32 4294901760, %v28816_v3  ;;  %v21280_v3 = vpack.c.bf16 %v15776_v9, %v15769_v49 }
 0xe22   :  { %v18066_v63 = vadd.f32 %v18065_v23, %v18064_v27 }
 0xe23   :  { %v18111_v28 = vpop.f32.mrb[138].mxu1 }
 0xe24   :  { %v18112_v43 = vpop.f32.mrb[139].mxu1  ;;  %21259 = vmatpush3.bf16.msra.mxu0 %v28825_v1  ;;  %v21449_v39 = vadd.f32 %v21448_v12, %v18066_v63  ;;  %v18067_v31 = vpop.f32.mrb[116].mxu0  ;;  %v21272_v12 = vpack.c.bf16 %v31300_v4, %v31299_v46 }
 0xe25   :  { %v18113_v57 = vadd.f32 %v18112_v43, %v18111_v28  ;;  %21261 = vmatprep.subr.bf16.mxu0 %v28872_v2  ;;  %v18068_v11 = vpop.f32.mrb[117].mxu0 }
 0xe26   :  { %v18069_v51 = vadd.f32 %v18068_v11, %v18067_v31  ;;  %v21450_v25 = vadd.f32 %v21449_v39, %v18110_v36 }
 0xe28   :  { %21263 = vmatpush3.bf16.msra.mxu0 %v28872_v2  ;;  %v21431_v6 = vadd.f32 %v21430_v62, %v18069_v51 }
 0xe29   :  { %21265 = vmatprep.subr.bf16.mxu0 %v28901_v17 }
 0xe2a   :  { %v21432_v26 = vadd.f32 %v21431_v6, %v18113_v57 }
 0xe2c   :  { %21267 = vmatpush3.bf16.msra.mxu0 %v28901_v17 }
 0xe2d   :  { %21269 = vmatprep.subr.bf16.mxu0 %v21268_v52 }
 0xe2f   :  { %19499 = vmatmul.mubr.f32.vlgmr.msra.gmra.mrb[74].mxu0 %v31301_v42 }
 0xe30   :  { %19501 = vmatprep.mubr.f32.mxu0 %v15706_v14  ;;  %21271 = vmatpush3.bf16.msra.mxu0 %v21268_v52 }
 0xe31   :  { %21273 = vmatprep.subr.bf16.mxu0 %v21272_v12 }
 0xe33   :  { %19502 = vmatmul.mubr.f32.gmra.mrb[76].mxu0 %v15716_v47 }
 0xe34   :  { %21275 = vmatpush3.bf16.msra.mxu0 %v21272_v12  ;;  %19528 = vmatprep.mubr.f32.mxu0 %v28746_v55  ;;  %v18190_v44 = vpop.f32.mrb[140].mxu1 }
 0xe35   :  { %21277 = vmatprep.subr.bf16.mxu0 %v21276_v29  ;;  %v18191_v45 = vpop.f32.mrb[141].mxu1 }
 0xe36   :  { %v18192_v56 = vadd.f32 %v18191_v45, %v18190_v44 }
 0xe38   :  { %21279 = vmatpush3.bf16.msra.mxu0 %v21276_v29  ;;  %v18193_v21 = vpop.f32.mrb[142].mxu1 }
 0xe39   :  { %21281 = vmatprep.subr.bf16.mxu0 %v21280_v3  ;;  %v18194_v32 = vpop.f32.mrb[143].mxu1 }
 0xe3a   :  { %v18195_v37 = vadd.f32 %v18194_v32, %v18193_v21 }
 0xe3c   :  { %21283 = vmatpush3.bf16.msra.mxu0 %v21280_v3  ;;  %v18146_v40 = vpop.f32.mrb[118].mxu0  ;;  %v18196_v14 = vpop.f32.mrb[144].mxu1 }
 0xe3d   :  { %21285 = vmatprep.subr.bf16.mxu0 %v21284_v59  ;;  %v18147_v47 = vpop.f32.mrb[119].mxu0  ;;  %v18197_v49 = vpop.f32.mrb[145].mxu1 }
 0xe3e   :  { %v18148_v9 = vadd.f32 %v18147_v47, %v18146_v40  ;;  %v18198_v41 = vadd.f32 %v18197_v49, %v18196_v14 }
 0xe40   :  { %21287 = vmatpush3.bf16.msra.mxu0 %v21284_v59  ;;  %v21415_v18 = vadd.f32 %v21414_v60, %v18148_v9  ;;  %v18149_v24 = vpop.f32.mrb[120].mxu0 }
 0xe41   :  { %21289 = vmatprep.subr.bf16.mxu0 %v21288_v22  ;;  %v18199_v33 = vpop.f32.mrb[146].mxu1  ;;  %v18150_v62 = vpop.f32.mrb[121].mxu0 }
 0xe42   :  { %v18200_v34 = vpop.f32.mrb[147].mxu1  ;;  %v18151_v8 = vadd.f32 %v18150_v62, %v18149_v24  ;;  %v21416_v58 = vadd.f32 %v21415_v18, %v18192_v56 }
 0xe43   :  { %v18201_v36 = vadd.f32 %v18200_v34, %v18199_v33 }
 0xe44   :  { %21291 = vmatpush3.bf16.msra.mxu0 %v21288_v22  ;;  %v21397_v38 = vadd.f32 %v21396_v48, %v18151_v8  ;;  %v18152_v7 = vpop.f32.mrb[122].mxu0 }
 0xe45   :  { %21293 = vmatprep.subr.bf16.mxu0 %v28749_v61  ;;  %v18153_v30 = vpop.f32.mrb[123].mxu0 }
 0xe46   :  { %v18154_v13 = vadd.f32 %v18153_v30, %v18152_v7  ;;  %v21398_v0 = vadd.f32 %v21397_v38, %v18195_v37 }
 0xe47   :  { %19529 = vmatmul.mubr.f32.vlgmr.msra.gmra.mrb[74].mxu0 %v28802_v19 }
 0xe48   :  { %19531 = vmatprep.mubr.f32.mxu0 %v28850_v53  ;;  %21295 = vmatpush3.bf16.msra.mxu0 %v28749_v61  ;;  %v21451_v28 = vadd.f32 %v21450_v25, %v18154_v13 }
 0xe49   :  { %21297 = vmatprep.subr.bf16.mxu0 %v28766_v15  ;;  %v18155_v16 = vpop.f32.mrb[124].mxu0 }
 0xe4a   :  { %v18156_v43 = vpop.f32.mrb[125].mxu0  ;;  %v21452_v57 = vadd.f32 %v21451_v28, %v18198_v41 }
 0xe4b   :  { %19532 = vmatmul.mubr.f32.gmra.mrb[76].mxu0 %v28852_v20  ;;  %v18157_v54 = vadd.f32 %v18156_v43, %v18155_v16 }
 0xe4c   :  { %21299 = vmatpush3.bf16.msra.mxu0 %v28766_v15  ;;  %19558 = vmatprep.mubr.f32.mxu0 %v28746_v55 }
 0xe4d   :  { %21301 = vmatprep.subr.bf16.mxu0 %v28791_v5  ;;  %v21433_v60 = vadd.f32 %v21432_v26, %v18157_v54 }
 0xe4f   :  { %v21434_v61 = vadd.f32 %v21433_v60, %v18201_v36 }
 0xe50   :  { %21303 = vmatpush3.bf16.msra.mxu0 %v28791_v5 }
 0xe51   :  { %21305 = vmatprep.subr.bf16.mxu0 %v28825_v1 }
 0xe54   :  { %21307 = vmatpush3.bf16.msra.mxu0 %v28825_v1 }
 0xe55   :  { %21309 = vmatprep.subr.bf16.mxu0 %v28872_v2 }
 0xe57   :  { %v18278_v10 = vpop.f32.mrb[148].mxu1 }
 0xe58   :  { %21311 = vmatpush3.bf16.msra.mxu0 %v28872_v2  ;;  %v18279_v15 = vpop.f32.mrb[149].mxu1 }
 0xe59   :  { %v18280_v27 = vadd.f32 %v18279_v15, %v18278_v10  ;;  %21313 = vmatprep.subr.bf16.mxu0 %v28901_v17 }
 0xe5b   :  { %v18281_v55 = vpop.f32.mrb[150].mxu1 }
 0xe5c   :  { %21315 = vmatpush3.bf16.msra.mxu0 %v28901_v17  ;;  %v18282_v23 = vpop.f32.mrb[151].mxu1 }
 0xe5d   :  { %v18283_v63 = vadd.f32 %v18282_v23, %v18281_v55 }
 0xe5f   :  { %19559 = vmatmul.mubr.f32.vlgmr.msra.gmra.mrb[74].mxu0 %v28802_v19  ;;  %v18284_v48 = vpop.f32.mrb[152].mxu1 }
 0xe60   :  { %v18234_v5 = vpop.f32.mrb[126].mxu0  ;;  %19561 = vmatprep.mubr.f32.mxu0 %v28850_v53  ;;  %v18285_v39 = vpop.f32.mrb[153].mxu1 }
 0xe61   :  { %v18235_v1 = vpop.f32.mrb[127].mxu0  ;;  %v18286_v52 = vadd.f32 %v18285_v39, %v18284_v48 }
 0xe62   :  { %v18236_v31 = vadd.f32 %v18235_v1, %v18234_v5 }
 0xe63   :  { %19562 = vmatmul.mubr.f32.gmra.mrb[76].mxu0 %v28852_v20  ;;  %v18287_v51 = vpop.f32.mrb[154].mxu1 }
 0xe64   :  { %v21417_v2 = vadd.f32 %v21416_v58, %v18236_v31  ;;  %v18237_v11 = vpop.f32.mrb[128].mxu0  ;;  %v18288_v6 = vpop.f32.mrb[155].mxu1 }
 0xe65   :  { %v18238_v25 = vpop.f32.mrb[129].mxu0  ;;  %v18289_v46 = vadd.f32 %v18288_v6, %v18287_v51 }
 0xe66   :  { %v18239_v17 = vadd.f32 %v18238_v25, %v18237_v11  ;;  %v21418_v4 = vadd.f32 %v21417_v2, %v18280_v27 }
 0xe68   :  { %v21399_v12 = vadd.f32 %v21398_v0, %v18239_v17  ;;  %v18240_v19 = vpop.f32.mrb[130].mxu0 }
 0xe69   :  { %v18241_v42 = vpop.f32.mrb[131].mxu0 }
 0xe6a   :  { %v18242_v26 = vadd.f32 %v18241_v42, %v18240_v19  ;;  %v21400_v35 = vadd.f32 %v21399_v12, %v18283_v63 }
 0xe6c   :  { %v21453_v53 = vadd.f32 %v21452_v57, %v18242_v26  ;;  %v18243_v50 = vpop.f32.mrb[132].mxu0 }
 0xe6d   :  { %v18244_v29 = vpop.f32.mrb[133].mxu0 }
 0xe6e   :  { %v18245_v3 = vadd.f32 %v18244_v29, %v18243_v50  ;;  %v21454_v44 = vadd.f32 %v21453_v53, %v18286_v52 }
 0xe70   :  { %v21435_v45 = vadd.f32 %v21434_v61, %v18245_v3 }
 0xe72   :  { %v21436_v56 = vadd.f32 %v21435_v45, %v18289_v46 }
 0xe79   :  { %v18366_v20 = vpop.f32.mrb[156].mxu1 }
 0xe7a   :  { %v18367_v59 = vpop.f32.mrb[157].mxu1 }
 0xe7b   :  { %v18368_v21 = vadd.f32 %v18367_v59, %v18366_v20 }
 0xe7d   :  { %v18369_v32 = vpop.f32.mrb[158].mxu1 }
 0xe7e   :  { %v18370_v37 = vpop.f32.mrb[159].mxu1 }
 0xe7f   :  { %v18371_v22 = vadd.f32 %v18370_v37, %v18369_v32 }
 0xe80   :  { %v18322_v40 = vpop.f32.mrb[134].mxu0 }
 0xe81   :  { %v18372_v14 = vpop.f32.mrb[160].mxu1  ;;  %v18323_v47 = vpop.f32.mrb[135].mxu0 }
 0xe82   :  { %v18373_v49 = vpop.f32.mrb[161].mxu1  ;;  %v18324_v9 = vadd.f32 %v18323_v47, %v18322_v40 }
 0xe83   :  { %v18374_v41 = vadd.f32 %v18373_v49, %v18372_v14 }
 0xe84   :  { %v21419_v18 = vadd.f32 %v21418_v4, %v18324_v9  ;;  %v18325_v24 = vpop.f32.mrb[136].mxu0 }
 0xe85   :  { %v18375_v33 = vpop.f32.mrb[162].mxu1  ;;  %v18326_v62 = vpop.f32.mrb[137].mxu0 }
 0xe86   :  { %v18376_v34 = vpop.f32.mrb[163].mxu1  ;;  %v18327_v8 = vadd.f32 %v18326_v62, %v18325_v24  ;;  %v21420_v58 = vadd.f32 %v21419_v18, %v18368_v21  ;;  %v16332_v18 = vpop.permute.xlu0 %16331 }
 0xe87   :  { %v18377_v36 = vadd.f32 %v18376_v34, %v18375_v33  ;;  %v16330_v24 = vpop.permute.xlu1 %16329  ;;  %v31304_v34 = vld [vmem:[#allocation40_spill] sm:$0xff] }
 0xe88   :  { %v21401_v38 = vadd.f32 %v21400_v35, %v18327_v8  ;;  %v18328_v7 = vpop.f32.mrb[138].mxu0  ;;  %v16346_v8 = vsub.f32 1.0, %v31304_v34 }
 0xe89   :  { %v18329_v30 = vpop.f32.mrb[139].mxu0 }
 0xe8a   :  { %v18330_v13 = vadd.f32 %v18329_v30, %v18328_v7  ;;  %v21402_v0 = vadd.f32 %v21401_v38, %v18371_v22  ;;  %v16336_v33 = vpop.permute.xlu0 %16335  ;;  %v16342_v7 = vmul.f32 %v31304_v34, %v16332_v18 }
 0xe8b   :  { %v16334_v62 = vpop.permute.xlu1 %16333 }
 0xe8c   :  { %v21455_v28 = vadd.f32 %v21454_v44, %v18330_v13  ;;  %v18331_v16 = vpop.f32.mrb[140].mxu0 }
 0xe8d   :  { %v18332_v43 = vpop.f32.mrb[141].mxu0 }
 0xe8e   :  { %v18333_v54 = vadd.f32 %v18332_v43, %v18331_v16  ;;  %v21456_v57 = vadd.f32 %v21455_v28, %v18374_v41  ;;  %v31306_v43 = vld [vmem:[#allocation61_spill] sm:$0xff] }
 0xe90   :  { %v21437_v60 = vadd.f32 %v21436_v56, %v18333_v54  ;;  %v16348_v54 = vsub.f32 1.0, %v31306_v43 }
 0xe92   :  { %v21438_v61 = vadd.f32 %v21437_v60, %v18377_v36 }
 0xe9a   :  { %v18454_v10 = vpop.f32.mrb[164].mxu1 }
 0xe9b   :  { %v18455_v15 = vpop.f32.mrb[165].mxu1 }
 0xe9c   :  { %v18456_v27 = vadd.f32 %v18455_v15, %v18454_v10  ;;  %v16344_v15 = vmul.f32 %v31306_v43, %v16336_v33 }
 0xe9e   :  { %v18457_v55 = vpop.f32.mrb[166].mxu1 }
 0xe9f   :  { %v18458_v23 = vpop.f32.mrb[167].mxu1 }
 0xea0   :  { %v18459_v63 = vadd.f32 %v18458_v23, %v18457_v55 }
 0xea1   :  { %v18410_v5 = vpop.f32.mrb[142].mxu0 }
 0xea2   :  { %v18460_v48 = vpop.f32.mrb[168].mxu1  ;;  %v18411_v1 = vpop.f32.mrb[143].mxu0 }
 0xea3   :  { %v18461_v39 = vpop.f32.mrb[169].mxu1  ;;  %v18412_v31 = vadd.f32 %v18411_v1, %v18410_v5 }
 0xea4   :  { %v18462_v52 = vadd.f32 %v18461_v39, %v18460_v48 }
 0xea5   :  { %v21421_v2 = vadd.f32 %v21420_v58, %v18412_v31  ;;  %v18413_v11 = vpop.f32.mrb[144].mxu0  ;;  %v31305_v58 = vld [vmem:[#allocation39_spill] sm:$0xff] }
 0xea6   :  { %v18463_v51 = vpop.f32.mrb[170].mxu1  ;;  %v18414_v25 = vpop.f32.mrb[145].mxu0  ;;  %v16345_v38 = vsub.f32 1.0, %v31305_v58 }
 0xea7   :  { %v18464_v6 = vpop.f32.mrb[171].mxu1  ;;  %v18415_v17 = vadd.f32 %v18414_v25, %v18413_v11  ;;  %v21422_v4 = vadd.f32 %v21421_v2, %v18456_v27 }
 0xea8   :  { %v18465_v46 = vadd.f32 %v18464_v6, %v18463_v51 }
 0xea9   :  { %v21403_v12 = vadd.f32 %v21402_v0, %v18415_v17  ;;  %v18416_v19 = vpop.f32.mrb[146].mxu0  ;;  %v16341_v0 = vmul.f32 %v31305_v58, %v16330_v24 }
 0xeaa   :  { %v18417_v42 = vpop.f32.mrb[147].mxu0 }
 0xeab   :  { %v18418_v26 = vadd.f32 %v18417_v42, %v18416_v19  ;;  %v21404_v35 = vadd.f32 %v21403_v12, %v18459_v63 }
 0xead   :  { %v21457_v53 = vadd.f32 %v21456_v57, %v18418_v26  ;;  %v18419_v50 = vpop.f32.mrb[148].mxu0 }
 0xeae   :  { %v18420_v29 = vpop.f32.mrb[149].mxu0 }
 0xeaf   :  { %v18421_v3 = vadd.f32 %v18420_v29, %v18419_v50  ;;  %v21458_v44 = vadd.f32 %v21457_v53, %v18462_v52 }
 0xeb1   :  { %v21439_v45 = vadd.f32 %v21438_v61, %v18421_v3  ;;  %v31307_v61 = vld [vmem:[#allocation115_spill] sm:$0xff] }
 0xeb2   :  { %v16347_v10 = vsub.f32 1.0, %v31307_v61  ;;  %v16343_v23 = vmul.f32 %v31307_v61, %v16334_v62 }
 0xeb3   :  { %v21440_v56 = vadd.f32 %v21439_v45, %v18465_v46 }
 0xf32   :  { %v19560_v20 = vpop.f32.mrb[74].mxu0 }
 0xf33   :  { %v21405_v59 = vadd.f32 %v21404_v35, %v19560_v20  ;;  %v16303_v21 = vpop.f32.mrb[75].mxu0 }
 0xf34   :  { %v21423_v32 = vadd.f32 %v21422_v4, %v16303_v21 }
 0xf35   :  { %21750 = vtanh.f32 %v21405_v59 }
 0xf36   :  { %21752 = vtanh.f32 %v21423_v32  ;;  %v19563_v37 = vpop.f32.mrb[76].mxu0 }
 0xf37   :  { %v21441_v22 = vadd.f32 %v21440_v56, %v19563_v37  ;;  %v16315_v40 = vpop.f32.mrb[77].mxu0 }
 0xf38   :  { %v21459_v14 = vadd.f32 %v21458_v44, %v16315_v40 }
 0xf39   :  { %21754 = vtanh.f32 %v21441_v22 }
 0xf3a   :  { %21756 = vtanh.f32 %v21459_v14 }
 0xf3f   :  { %v21751_v47 = vpop.eup %21750 }
 0xf40   :  { %v21753_v49 = vpop.eup %21752  ;;  %16355 = vrot.lane.b32.xlu0 %v21751_v47, %s21818_s19 }
 0xf41   :  { %16353 = vrot.lane.b32.xlu1 %v21753_v49, %s21818_s19 }
 0xf43   :  { %v21755_v9 = vpop.eup %21754 }
 0xf44   :  { %v21757_v41 = vpop.eup %21756  ;;  %16359 = vrot.lane.b32.xlu0 %v21755_v9, %s21818_s19 }
 0xf45   :  { %16357 = vrot.lane.b32.xlu1 %v21757_v41, %s21818_s19  ;;  %s21820_s19 = smov [#allocation2]  }
 0xf46   :  { %s16399_s16 = sshll.u32 %s21820_s19, 4  ;;  %s16400_s16 = int_to_ptr.vmem [resolvable:$true] %s16399_s16 }
 0xf47   :  { %s21775_s8 = scalar_lea.vmem %s16400_s16, 512  ;;  %p21780_p1 = scmp.lt.s32.totalorder %s16400_s16, %s16400_s16 }
 0xf48   :  { %p21776_p0 = scmp.ne.s32.totalorder %s16400_s16, %s21775_s8  ;;  %p21781_p2 = scmp.lt.s32.totalorder %s21775_s8, %s21775_s8 }
 0xf4a   :  { %p21782_p3 = por %p21781_p2, %p21780_p1 }
 0xf4c   :  { %p21783_p4 = pnand %p21782_p3, %p21776_p0 }
 0xfb2   :  { %v16356_v36 = vpop.permute.xlu0 %16355 }
 0xfb3   :  { %v16366_v30 = vmul.f32 %v16356_v36, %v16346_v8  ;;  %v16354_v13 = vpop.permute.xlu1 %16353 }
 0xfb4   :  { %v16365_v28 = vmul.f32 %v16354_v13, %v16345_v38 }
 0xfb5   :  { %v16370_v16 = vadd.f32 %v16366_v30, %v16342_v7 }
 0xfb6   :  { %v16369_v57 = vadd.f32 %v16365_v28, %v16341_v0  ;;  %v16360_v60 = vpop.permute.xlu0 %16359 }
 0xfb7   :  { %v16368_v27 = vmul.f32 %v16360_v60, %v16348_v54  ;;  %16379 = vrot.lane.b32.xlu0 %v16370_v16, %s21819_s7  ;;  %v16358_v55 = vpop.permute.xlu1 %16357 }
 0xfb8   :  { %v16367_v63 = vmul.f32 %v16358_v55, %v16347_v10  ;;  %16377 = vrot.lane.b32.xlu1 %v16369_v57, %s21819_s7 }
 0xfb9   :  { %v16372_v5 = vadd.f32 %v16368_v27, %v16344_v15 }
 0xfba   :  { %v16371_v48 = vadd.f32 %v16367_v63, %v16343_v23 }
 0xfbb   :  { %16383 = vrot.lane.b32.xlu0 %v16372_v5, %s21819_s7 }
 0xfbc   :  { %16381 = vrot.lane.b32.xlu1 %v16371_v48, %s21819_s7 }
0x1029   :  { %v16380_v1 = vpop.permute.xlu0 %16379 }
0x102a   :  { %16391 = vst.msk [vmem:[#allocation2 + $0x8] sm:$0xff] %vm16389_vm15, %v16380_v1  ;;  %v16378_v39 = vpop.permute.xlu1 %16377 }
0x102b   :  { %16390 = vst.msk [vmem:[#allocation2] sm:$0xff] %vm16389_vm15, %v16378_v39 }
0x102d   :  { %v16384_v31 = vpop.permute.xlu0 %16383 }
0x102e   :  { %16393 = vst.msk [vmem:[#allocation2 + $0x18] sm:$0xff] %vm16389_vm15, %v16384_v31  ;;  %v16382_v52 = vpop.permute.xlu1 %16381 }
0x102f   :  { %16392 = vst.msk [vmem:[#allocation2 + $0x10] sm:$0xff] %vm16389_vm15, %v16382_v52 }
0x1030   :  { %21786 = shalt.err (!%p21783_p4)
}
0x1031   :  { %s21787_s23 = scalar_lea.hbm %s29108_s9, 512 }
0x1032   :  { %p21788_p5 = scmp.ne.s32.totalorder %s29108_s9, %s21787_s23  ;;  %p21791_p6 = scmp.lt.u32.totalorder %s21787_s23, %s29108_s9 }
0x1034   :  { %p21793_p7 = pnand %p21791_p6, %p21788_p5 }
0x1036   :  { %21796 = shalt.err (!%p21793_p7)
}
0x1037   :  { %s21821_s18 = smov 128  }
0x1038   :  { %16405 = dma.vmem_to_hbm [thread:$0]  %s16400_s16, 512, %s29108_s9, [#allocation3], %s21821_s18, %s21821_s18, %s21803_s4  }
0x1039   :  { %21797 = dma.done.wait [#allocation3], 512  }
0x103a   :  { %21798 = vsyncadd [#allocation3], 4294966784 }
0x103b   :  { %16409 = vsyncpa [#allocation3], 1 }

</bundles_post_ra>
